<compile_context>
chip_gen: v5e
topology: v5e:2x2
jax: 0.10.0
libtpu: 0.0.40
codegen_flags: <defaults>
</compile_context>

<pallas_src>
import functools

import jax
import jax.numpy as jnp
from jax.experimental import pallas as pl
from jax.experimental.pallas import tpu as pltpu


def _round_up(x, m):
    return (x + m - 1) // m * m


def _pick_tile(dim, prefs):
    for p in prefs:
        if dim % p == 0:
            return p
    return dim


def _select_tiles(M, Kp, Np):
    """Tile sizes for the (M,K) @ (K,N) conv-GEMM.

    * tn = full Np (capped at 512): the (possibly huge) im2col A matrix is
      read from HBM exactly once; lane-dense multiple of 128.
    * tm up to 512 rows, tk up to 2048: amortizes per-grid-step overhead on
      the K-heavy tail layers while keeping VMEM ~10 MiB double-buffered.
    * keep >= 2 blocks along a parallel grid axis when possible (v7x: 2 TCs).
    """
    tn = Np if Np <= 512 else _pick_tile(Np, (512, 256, 128))
    tm = min(512, _round_up(M, 16))
    n_i = _round_up(M, tm) // tm
    n_j = Np // tn
    if n_i * n_j < 2:
        if tn >= 256:
            tn //= 2                      # split output channels
        elif M > 16:
            tm = _round_up((M + 1) // 2, 16)   # split rows
    tk = _pick_tile(Kp, (2048, 1024, 512, 256, 128))
    return tm, tk, tn


# ----------------------------------------------------------------------------
# Pallas kernels
# ----------------------------------------------------------------------------
def _conv_gemm_kernel(*refs, add_bias, apply_act, emit_stats, slope):
    """out = act(A @ B + bias), accumulated in a f32 VMEM scratch across the
    K grid axis, emitted as bf16/f32 in the k==last epilogue.

    If emit_stats: also writes per-column sum (row 0) and sum-of-squares
    (row 1) of the raw f32 accumulator into a packed (8, tn) stats block, so
    BatchNorm batch statistics need no extra HBM pass over the raw output.
    """
    i = 0
    a_ref = refs[i]; i += 1
    b_ref = refs[i]; i += 1
    bias_ref = None
    if add_bias:
        bias_ref = refs[i]; i += 1
    o_ref = refs[i]; i += 1
    stats_ref = None
    if emit_stats:
        stats_ref = refs[i]; i += 1
    acc_ref = refs[i]

    k = pl.program_id(2)

    @pl.when(k == 0)
    def _():
        acc_ref[...] = jnp.zeros_like(acc_ref)

    acc_ref[...] += jnp.dot(a_ref[...], b_ref[...],
                            preferred_element_type=jnp.float32)

    @pl.when(k == pl.num_programs(2) - 1)
    def _():
        raw = acc_ref[...]                                      # (tm, tn) f32
        if emit_stats:
            col_sum = jnp.sum(raw, axis=0, keepdims=True)       # (1, tn)
            col_sq = jnp.sum(raw * raw, axis=0, keepdims=True)  # (1, tn)
            row = jax.lax.broadcasted_iota(jnp.int32, stats_ref.shape, 0)
            stats_ref[...] = jnp.where(row == 0, col_sum,
                                       jnp.where(row == 1, col_sq, 0.0))
        out = raw
        if add_bias:
            out = out + bias_ref[...]
        if apply_act:
            out = jnp.where(out > 0, out, slope * out)
        o_ref[...] = out.astype(o_ref.dtype)


def conv_gemm(a, b, *, bias=None, apply_act=False, emit_stats=False,
              slope=0.2, out_dtype=jnp.bfloat16):
    """a:(M,K) @ b:(K,N) with optional fused bias / LeakyReLU epilogue.

    Returns (out_padded (Mp,Np) out_dtype, col_sum (N,) f32 | None,
             col_sumsq (N,) f32 | None).  Zero padding keeps the column sums
    exact over the real M rows.
    """
    M, K = a.shape
    K2, N = b.shape
    assert K == K2

    Kp = _round_up(K, 128)
    Np = _round_up(N, 128)
    tm, tk, tn = _select_tiles(M, Kp, Np)
    Mp = _round_up(M, tm)
    n_i, n_j, n_k = Mp // tm, Np // tn, Kp // tk

    a = a.astype(jnp.bfloat16)
    if (Mp, Kp) != (M, K):
        a = jnp.pad(a, ((0, Mp - M), (0, Kp - K)))
    b_p = jnp.pad(b.astype(jnp.bfloat16), ((0, Kp - K), (0, Np - N)))

    inputs = [a, b_p]
    in_specs = [pl.BlockSpec((tm, tk), lambda i, j, k: (i, k)),
                pl.BlockSpec((tk, tn), lambda i, j, k: (k, j))]
    if bias is not None:
        bias_p = jnp.pad(bias.astype(jnp.float32).reshape(1, -1),
                         ((0, 0), (0, Np - N)))
        inputs.append(bias_p)
        in_specs.append(pl.BlockSpec((1, tn), lambda i, j, k: (0, j)))

    out_shape = [jax.ShapeDtypeStruct((Mp, Np), out_dtype)]
    out_specs = [pl.BlockSpec((tm, tn), lambda i, j, k: (i, j))]
    if emit_stats:
        out_shape.append(jax.ShapeDtypeStruct((n_i * 8, Np), jnp.float32))
        out_specs.append(pl.BlockSpec((8, tn), lambda i, j, k: (i, j)))

    kernel = functools.partial(_conv_gemm_kernel, add_bias=bias is not None,
                               apply_act=apply_act, emit_stats=emit_stats,
                               slope=slope)
    results = pl.pallas_call(
        kernel,
        out_shape=tuple(out_shape),
        grid_spec=pltpu.PrefetchScalarGridSpec(
            num_scalar_prefetch=0,
            grid=(n_i, n_j, n_k),
            in_specs=in_specs,
            out_specs=tuple(out_specs),
            scratch_shapes=[pltpu.VMEM((tm, tn), jnp.float32)]),
        compiler_params=pltpu.CompilerParams(
            dimension_semantics=("parallel", "parallel", "arbitrary"),
            vmem_limit_bytes=48 * 1024 * 1024),
    )(*inputs)

    out = results[0]
    if not emit_stats:
        return out, None, None
    stats = results[1].reshape(n_i, 8, Np)
    col_sum = stats[:, 0, :].sum(axis=0)[:N]
    col_sq = stats[:, 1, :].sum(axis=0)[:N]
    return out, col_sum, col_sq


def _affine_leaky_kernel(x_ref, scale_ref, shift_ref, o_ref, *, slope):
    v = x_ref[...].astype(jnp.float32) * scale_ref[...] + shift_ref[...]
    o_ref[...] = jnp.where(v > 0, v, slope * v).astype(o_ref.dtype)


def affine_leaky(x_padded, scale, shift, *, slope=0.2, out_dtype=jnp.bfloat16):
    """Per-channel affine (BatchNorm) + LeakyReLU on a padded (Mp, Np) bf16
    matrix.  Pure HBM stream: large row tiles, full lane-dense Np width."""
    Mp, Np = x_padded.shape
    C = scale.shape[0]
    scale_p = jnp.pad(scale.astype(jnp.float32).reshape(1, -1),
                      ((0, 0), (0, Np - C)))
    shift_p = jnp.pad(shift.astype(jnp.float32).reshape(1, -1),
                      ((0, 0), (0, Np - C)))
    tr = _pick_tile(Mp, (2048, 1024, 512, 256, 128, 64, 32, 16, 8))
    if Mp // tr < 2 and tr >= 16:
        tr //= 2      # keep both v7x TensorCores busy on the parallel axis

    return pl.pallas_call(
        functools.partial(_affine_leaky_kernel, slope=slope),
        out_shape=jax.ShapeDtypeStruct((Mp, Np), out_dtype),
        grid=(Mp // tr,),
        in_specs=[
            pl.BlockSpec((tr, Np), lambda i: (i, 0)),
            pl.BlockSpec((1, Np), lambda i: (0, 0)),
            pl.BlockSpec((1, Np), lambda i: (0, 0)),
        ],
        out_specs=pl.BlockSpec((tr, Np), lambda i: (i, 0)),
        compiler_params=pltpu.CompilerParams(dimension_semantics=("parallel",)),
    )(x_padded, scale_p, shift_p)


# ----------------------------------------------------------------------------
# JAX glue: reflect padding + im2col + weight reshapes (layout plumbing only)
# ----------------------------------------------------------------------------
def _im2col_reflect(x_nhwc, stride):
    """Reflect-pad by 1, extract 4x4 patches.  Returns ((M, 16*C), (N,OH,OW))."""
    xp = jnp.pad(x_nhwc, ((0, 0), (1, 1), (1, 1), (0, 0)), mode="reflect")
    N, Hp, Wp, C = xp.shape
    OH = (Hp - 4) // stride + 1
    OW = (Wp - 4) // stride + 1
    cols = []
    for kh in range(4):
        for kw in range(4):
            cols.append(xp[:, kh:kh + stride * (OH - 1) + 1:stride,
                            kw:kw + stride * (OW - 1) + 1:stride, :])
    patches = jnp.stack(cols, axis=3)                 # (N, OH, OW, 16, C)
    return patches.reshape(N * OH * OW, 16 * C), (N, OH, OW)


def _conv_im2col(h_nhwc, w_oihw, stride):
    cout = w_oihw.shape[0]
    a, (n, oh, ow) = _im2col_reflect(h_nhwc, stride)
    b = jnp.transpose(w_oihw, (2, 3, 1, 0)).reshape(-1, cout)  # (kh,kw,cin) rows
    return a, b, (n, oh, ow, cout)


# ----------------------------------------------------------------------------
# Discriminator forward
# ----------------------------------------------------------------------------
def discriminator_forward(params, x, y, *, eps=1e-5):
    """x, y: (N, 3, H, W) float32.  Returns (N, 1, H_out, W_out) float32."""
    h = jnp.concatenate([x, y], axis=1)                       # (N, 6, H, W)
    h = jnp.transpose(h, (0, 2, 3, 1)).astype(jnp.bfloat16)   # NHWC, bf16

    # initial: Conv(6->64, s=2) + bias + LeakyReLU(0.2) fused in the epilogue
    p = params["initial"]
    a, b, (n, oh, ow, c) = _conv_im2col(h, p["w"], 2)
    out_p, _, _ = conv_gemm(a, b, bias=p["b"], apply_act=True,
                            out_dtype=jnp.bfloat16)
    h = out_p[:n * oh * ow, :c].reshape(n, oh, ow, c)

    # CNN blocks: Conv(no bias) -> BatchNorm(batch stats) -> LeakyReLU(0.2)
    nblocks = len(params["blocks"])
    for idx, p in enumerate(params["blocks"]):
        stride = 1 if idx == nblocks - 1 else 2
        a, b, (n, oh, ow, c) = _conv_im2col(h, p["w"], stride)
        raw_p, col_sum, col_sq = conv_gemm(a, b, emit_stats=True,
                                           out_dtype=jnp.bfloat16)
        m = n * oh * ow
        mean = col_sum / m
        var = col_sq / m - mean * mean                        # biased, as BN fwd
        scale = p["gamma"] * jax.lax.rsqrt(var + eps)
        shift = p["beta"] - mean * scale
        act_p = affine_leaky(raw_p, scale, shift)             # bf16, padded
        h = act_p[:m, :c].reshape(n, oh, ow, c)

    # final: Conv(512->1, s=1) + bias (no activation)
    p = params["final"]
    a, b, (n, oh, ow, c) = _conv_im2col(h, p["w"], 1)
    out_p, _, _ = conv_gemm(a, b, bias=p["b"], apply_act=False,
                            out_dtype=jnp.float32)
    h = out_p[:n * oh * ow, :c].reshape(n, oh, ow, c)
    return jnp.transpose(h, (0, 3, 1, 2))


# ----------------------------------------------------------------------------
# Pure-JAX reference (bf16 convs, f32 accumulation / BN, batch statistics)
# ----------------------------------------------------------------------------
def _ref_conv(x_nhwc, w_oihw, stride, bias=None):
    xp = jnp.pad(x_nhwc.astype(jnp.bfloat16),
                 ((0, 0), (1, 1), (1, 1), (0, 0)), mode="reflect")
    w = jnp.transpose(w_oihw, (2, 3, 1, 0)).astype(jnp.bfloat16)   # HWIO
    out = jax.lax.conv_general_dilated(
        xp, w, window_strides=(stride, stride), padding="VALID",
        dimension_numbers=("NHWC", "HWIO", "NHWC"),
        preferred_element_type=jnp.float32)
    if bias is not None:
        out = out + bias
    return out


def reference_forward(params, x, y, *, eps=1e-5):
    h = jnp.transpose(jnp.concatenate([x, y], axis=1), (0, 2, 3, 1))
    h = _ref_conv(h, params["initial"]["w"], 2, params["initial"]["b"])
    h = jnp.where(h > 0, h, 0.2 * h)
    nblocks = len(params["blocks"])
    for idx, p in enumerate(params["blocks"]):
        stride = 1 if idx == nblocks - 1 else 2
        h = _ref_conv(h, p["w"], stride)
        mean = jnp.mean(h, axis=(0, 1, 2))
        var = jnp.var(h, axis=(0, 1, 2))
        h = (h - mean) * jax.lax.rsqrt(var + eps) * p["gamma"] + p["beta"]
        h = jnp.where(h > 0, h, 0.2 * h)
    h = _ref_conv(h, params["final"]["w"], 1, params["final"]["b"])
    return jnp.transpose(h, (0, 3, 1, 2))


# ----------------------------------------------------------------------------
# Deterministic parameter construction (shapes match the PyTorch module)
# ----------------------------------------------------------------------------
def make_params(key, in_channels=3, features=(64, 128, 256, 512)):
    keys = iter(jax.random.split(key, 32))
    params = {}
    params["initial"] = {
        "w": 0.05 * jax.random.normal(next(keys), (features[0], in_channels * 2, 4, 4), jnp.float32),
        "b": 0.05 * jax.random.normal(next(keys), (features[0],), jnp.float32),
    }
    blocks = []
    cin = features[0]
    for feat in features[1:]:
        blocks.append({
            "w": 0.05 * jax.random.normal(next(keys), (feat, cin, 4, 4), jnp.float32),
            "gamma": 1.0 + 0.1 * jax.random.normal(next(keys), (feat,), jnp.float32),
            "beta": 0.1 * jax.random.normal(next(keys), (feat,), jnp.float32),
        })
        cin = feat
    params["blocks"] = blocks
    params["final"] = {
        "w": 0.05 * jax.random.normal(next(keys), (1, cin, 4, 4), jnp.float32),
        "b": 0.05 * jax.random.normal(next(keys), (1,), jnp.float32),
    }
    return params


if __name__ == "__main__":
    key = jax.random.PRNGKey(0)
    kx, ky, kp = jax.random.split(key, 3)

    # Smallest spatial size for which all five 4x4 convs (reflect pad=1) keep a
    # positive spatial extent: 32 -> output 2x2.
    B, C, H, W = 2, 3, 32, 32
    x = jax.random.normal(kx, (B, C, H, W), jnp.float32)
    y = jax.random.normal(ky, (B, C, H, W), jnp.float32)
    params = make_params(kp, in_channels=C)

    out = jax.block_until_ready(jax.jit(discriminator_forward)(params, x, y))
    ref = jax.block_until_ready(jax.jit(reference_forward)(params, x, y))

    assert out.shape == ref.shape == (B, 1, 2, 2), out.shape
    err = float(jnp.max(jnp.abs(out - ref)))
    scale = float(jnp.max(jnp.abs(ref)))
    # bf16 A/B tiles, bf16 inter-layer activations and bf16 raw conv slabs:
    # use a scale-aware tolerance.
    assert err <= 5e-2 + 5e-2 * scale, (err, scale)

    print("KERNEL_OK")
</pallas_src>

<mosaic_0001>
module attributes {stable_mosaic.version = 11 : i64} {
  func.func @_conv_gemm_kernel(%arg0: i32, %arg1: i32, %arg2: i32, %arg3: memref<256x128xbf16, #tpu.memory_space<vmem>>, %arg4: memref<128x128xbf16, #tpu.memory_space<vmem>>, %arg5: memref<1x128xf32, #tpu.memory_space<vmem>>, %arg6: memref<256x128xbf16, #tpu.memory_space<vmem>>, %arg7: memref<256x128xf32, #tpu.memory_space<vmem>>) attributes {dimension_semantics = [#tpu.dimension_semantics<parallel>, #tpu.dimension_semantics<parallel>, #tpu.dimension_semantics<arbitrary>], iteration_bounds = array<i64: 2, 1, 1>, scalar_prefetch = 0 : i64, scratch_operands = 1 : i64, tpu.core_type = #tpu.core_type<tc>, window_params = [{transform_indices = @transform_0, window_bounds = array<i64: 256, 128>}, {transform_indices = @transform_1, window_bounds = array<i64: 128, 128>}, {transform_indices = @transform_2, window_bounds = array<i64: 1, 128>}, {transform_indices = @transform_3, window_bounds = array<i64: 256, 128>}]} {
    %c0_i32 = arith.constant 0 : i32
    %0 = arith.cmpi eq, %arg2, %c0_i32 : i32
    %1 = arith.extui %0 : i1 to i32
    %c0_i32_0 = arith.constant 0 : i32
    %2 = arith.cmpi ne, %1, %c0_i32_0 : i32
    scf.if %2 {
      %cst_10 = arith.constant 0.000000e+00 : f32
      %12 = vector.broadcast %cst_10 : f32 to vector<256x128xf32>
      %c0_11 = arith.constant 0 : index
      %c0_12 = arith.constant 0 : index
      %13 = vector.load %arg7[%c0_11, %c0_12] : memref<256x128xf32, #tpu.memory_space<vmem>>, vector<256x128xf32>
      tpu.vector_store %arg7[%c0_11, %c0_12], %12 {strides = array<i32>} : memref<256x128xf32, #tpu.memory_space<vmem>>, vector<256x128xf32>,
    } else {
    }
    %c0 = arith.constant 0 : index
    %c0_1 = arith.constant 0 : index
    %3 = vector.load %arg7[%c0, %c0_1] : memref<256x128xf32, #tpu.memory_space<vmem>>, vector<256x128xf32>
    %c0_2 = arith.constant 0 : index
    %c0_3 = arith.constant 0 : index
    %4 = vector.load %arg3[%c0_2, %c0_3] : memref<256x128xbf16, #tpu.memory_space<vmem>>, vector<256x128xbf16>
    %c0_4 = arith.constant 0 : index
    %c0_5 = arith.constant 0 : index
    %5 = vector.load %arg4[%c0_4, %c0_5] : memref<128x128xbf16, #tpu.memory_space<vmem>>, vector<128x128xbf16>
    %cst = arith.constant dense<0.000000e+00> : vector<256x128xf32>
    %6 = tpu.matmul %4, %5, %cst {dimension_numbers = #tpu.dot_dimension_numbers<[1], [0], [0], [1], [0, 0, 1, 1], [], []>} : vector<256x128xbf16>, vector<128x128xbf16>, vector<256x128xf32> -> vector<256x128xf32>
    %7 = arith.addf %3, %6 : vector<256x128xf32>
    %c0_6 = arith.constant 0 : index
    %c0_7 = arith.constant 0 : index
    %8 = vector.load %arg7[%c0_6, %c0_7] : memref<256x128xf32, #tpu.memory_space<vmem>>, vector<256x128xf32>
    tpu.vector_store %arg7[%c0_6, %c0_7], %7 {strides = array<i32>} : memref<256x128xf32, #tpu.memory_space<vmem>>, vector<256x128xf32>,
    %c0_i32_8 = arith.constant 0 : i32
    %9 = arith.cmpi eq, %arg2, %c0_i32_8 : i32
    %10 = arith.extui %9 : i1 to i32
    %c0_i32_9 = arith.constant 0 : i32
    %11 = arith.cmpi ne, %10, %c0_i32_9 : i32
    scf.if %11 {
      %c0_10 = arith.constant 0 : index
      %c0_11 = arith.constant 0 : index
      %12 = vector.load %arg7[%c0_10, %c0_11] : memref<256x128xf32, #tpu.memory_space<vmem>>, vector<256x128xf32>
      %c0_12 = arith.constant 0 : index
      %c0_13 = arith.constant 0 : index
      %13 = vector.load %arg5[%c0_12, %c0_13] : memref<1x128xf32, #tpu.memory_space<vmem>>, vector<1x128xf32>
      %14 = vector.broadcast %13 : vector<1x128xf32> to vector<256x128xf32>
      %15 = arith.addf %12, %14 : vector<256x128xf32>
      %cst_14 = arith.constant 0.000000e+00 : f32
      %16 = vector.broadcast %cst_14 : f32 to vector<256x128xf32>
      %17 = arith.cmpf ogt, %15, %16 : vector<256x128xf32>
      %cst_15 = arith.constant 2.000000e-01 : f32
      %18 = vector.broadcast %cst_15 : f32 to vector<256x128xf32>
      %19 = arith.mulf %18, %15 : vector<256x128xf32>
      %20 = arith.select %17, %15, %19 : vector<256x128xi1>, vector<256x128xf32>
      %21 = arith.truncf %20 : vector<256x128xf32> to vector<256x128xbf16>
      %c0_16 = arith.constant 0 : index
      %c0_17 = arith.constant 0 : index
      %22 = vector.load %arg6[%c0_16, %c0_17] : memref<256x128xbf16, #tpu.memory_space<vmem>>, vector<256x128xbf16>
      tpu.vector_store %arg6[%c0_16, %c0_17], %21 {strides = array<i32>} : memref<256x128xbf16, #tpu.memory_space<vmem>>, vector<256x128xbf16>,
    } else {
    }
    return
  }
  func.func @transform_0(%arg0: i32, %arg1: i32, %arg2: i32) -> (i32, i32) {
    %c0_i32 = arith.constant 0 : i32
    return %arg0, %arg2 : i32, i32
  }
  func.func @transform_1(%arg0: i32, %arg1: i32, %arg2: i32) -> (i32, i32) {
    %c0_i32 = arith.constant 0 : i32
    return %arg2, %arg1 : i32, i32
  }
  func.func @transform_2(%arg0: i32, %arg1: i32, %arg2: i32) -> (i32, i32) {
    %c0_i32 = arith.constant 0 : i32
    %c0_i32_0 = arith.constant 0 : i32
    return %c0_i32, %arg1 : i32, i32
  }
  func.func @transform_3(%arg0: i32, %arg1: i32, %arg2: i32) -> (i32, i32) {
    %c0_i32 = arith.constant 0 : i32
    return %arg0, %arg1 : i32, i32
  }
}

module attributes {stable_mosaic.version = 11 : i64} {
  func.func @_conv_gemm_kernel(%arg0: i32, %arg1: i32, %arg2: i32, %arg3: memref<64x1024xbf16, #tpu.memory_space<vmem>>, %arg4: memref<1024x128xbf16, #tpu.memory_space<vmem>>, %arg5: memref<64x128xbf16, #tpu.memory_space<vmem>>, %arg6: memref<8x128xf32, #tpu.memory_space<vmem>>, %arg7: memref<64x128xf32, #tpu.memory_space<vmem>>) attributes {dimension_semantics = [#tpu.dimension_semantics<parallel>, #tpu.dimension_semantics<parallel>, #tpu.dimension_semantics<arbitrary>], iteration_bounds = array<i64: 2, 1, 1>, scalar_prefetch = 0 : i64, scratch_operands = 1 : i64, tpu.core_type = #tpu.core_type<tc>, window_params = [{transform_indices = @transform_0, window_bounds = array<i64: 64, 1024>}, {transform_indices = @transform_1, window_bounds = array<i64: 1024, 128>}, {transform_indices = @transform_2, window_bounds = array<i64: 64, 128>}, {transform_indices = @transform_3, window_bounds = array<i64: 8, 128>}]} {
    %c0_i32 = arith.constant 0 : i32
    %0 = arith.cmpi eq, %arg2, %c0_i32 : i32
    %1 = arith.extui %0 : i1 to i32
    %c0_i32_0 = arith.constant 0 : i32
    %2 = arith.cmpi ne, %1, %c0_i32_0 : i32
    scf.if %2 {
      %cst_10 = arith.constant 0.000000e+00 : f32
      %12 = vector.broadcast %cst_10 : f32 to vector<64x128xf32>
      %c0_11 = arith.constant 0 : index
      %c0_12 = arith.constant 0 : index
      %13 = vector.load %arg7[%c0_11, %c0_12] : memref<64x128xf32, #tpu.memory_space<vmem>>, vector<64x128xf32>
      tpu.vector_store %arg7[%c0_11, %c0_12], %12 {strides = array<i32>} : memref<64x128xf32, #tpu.memory_space<vmem>>, vector<64x128xf32>,
    } else {
    }
    %c0 = arith.constant 0 : index
    %c0_1 = arith.constant 0 : index
    %3 = vector.load %arg7[%c0, %c0_1] : memref<64x128xf32, #tpu.memory_space<vmem>>, vector<64x128xf32>
    %c0_2 = arith.constant 0 : index
    %c0_3 = arith.constant 0 : index
    %4 = vector.load %arg3[%c0_2, %c0_3] : memref<64x1024xbf16, #tpu.memory_space<vmem>>, vector<64x1024xbf16>
    %c0_4 = arith.constant 0 : index
    %c0_5 = arith.constant 0 : index
    %5 = vector.load %arg4[%c0_4, %c0_5] : memref<1024x128xbf16, #tpu.memory_space<vmem>>, vector<1024x128xbf16>
    %cst = arith.constant dense<0.000000e+00> : vector<64x128xf32>
    %6 = tpu.matmul %4, %5, %cst {dimension_numbers = #tpu.dot_dimension_numbers<[1], [0], [0], [1], [0, 0, 1, 1], [], []>} : vector<64x1024xbf16>, vector<1024x128xbf16>, vector<64x128xf32> -> vector<64x128xf32>
    %7 = arith.addf %3, %6 : vector<64x128xf32>
    %c0_6 = arith.constant 0 : index
    %c0_7 = arith.constant 0 : index
    %8 = vector.load %arg7[%c0_6, %c0_7] : memref<64x128xf32, #tpu.memory_space<vmem>>, vector<64x128xf32>
    tpu.vector_store %arg7[%c0_6, %c0_7], %7 {strides = array<i32>} : memref<64x128xf32, #tpu.memory_space<vmem>>, vector<64x128xf32>,
    %c0_i32_8 = arith.constant 0 : i32
    %9 = arith.cmpi eq, %arg2, %c0_i32_8 : i32
    %10 = arith.extui %9 : i1 to i32
    %c0_i32_9 = arith.constant 0 : i32
    %11 = arith.cmpi ne, %10, %c0_i32_9 : i32
    scf.if %11 {
      %c0_10 = arith.constant 0 : index
      %c0_11 = arith.constant 0 : index
      %12 = vector.load %arg7[%c0_10, %c0_11] : memref<64x128xf32, #tpu.memory_space<vmem>>, vector<64x128xf32>
      %cst_12 = arith.constant dense<0.000000e+00> : vector<128xf32>
      %13 = vector.multi_reduction <add>, %12, %cst_12 [0] : vector<64x128xf32> to vector<128xf32>
      %14 = vector.shape_cast %13 : vector<128xf32> to vector<1x128xf32>
      %15 = arith.mulf %12, %12 : vector<64x128xf32>
      %cst_13 = arith.constant dense<0.000000e+00> : vector<128xf32>
      %16 = vector.multi_reduction <add>, %15, %cst_13 [0] : vector<64x128xf32> to vector<128xf32>
      %17 = vector.shape_cast %16 : vector<128xf32> to vector<1x128xf32>
      %18 = tpu.iota {dimensions = array<i32: 0>} : vector<8x128xi32>
      %c0_i32_14 = arith.constant 0 : i32
      %19 = vector.broadcast %c0_i32_14 : i32 to vector<8x128xi32>
      %20 = arith.cmpi eq, %18, %19 : vector<8x128xi32>
      %c1_i32 = arith.constant 1 : i32
      %21 = vector.broadcast %c1_i32 : i32 to vector<8x128xi32>
      %22 = arith.cmpi eq, %18, %21 : vector<8x128xi32>
      %cst_15 = arith.constant 0.000000e+00 : f32
      %23 = vector.shape_cast %17 : vector<1x128xf32> to vector<1x128xf32>
      %24 = vector.broadcast %23 : vector<1x128xf32> to vector<8x128xf32>
      %25 = vector.broadcast %cst_15 : f32 to vector<8x128xf32>
      %26 = arith.select %22, %24, %25 : vector<8x128xi1>, vector<8x128xf32>
      %27 = vector.shape_cast %14 : vector<1x128xf32> to vector<1x128xf32>
      %28 = vector.broadcast %27 : vector<1x128xf32> to vector<8x128xf32>
      %29 = arith.select %20, %28, %26 : vector<8x128xi1>, vector<8x128xf32>
      %c0_16 = arith.constant 0 : index
      %c0_17 = arith.constant 0 : index
      %30 = vector.load %arg6[%c0_16, %c0_17] : memref<8x128xf32, #tpu.memory_space<vmem>>, vector<8x128xf32>
      tpu.vector_store %arg6[%c0_16, %c0_17], %29 {strides = array<i32>} : memref<8x128xf32, #tpu.memory_space<vmem>>, vector<8x128xf32>,
      %31 = arith.truncf %12 : vector<64x128xf32> to vector<64x128xbf16>
      %c0_18 = arith.constant 0 : index
      %c0_19 = arith.constant 0 : index
      %32 = vector.load %arg5[%c0_18, %c0_19] : memref<64x128xbf16, #tpu.memory_space<vmem>>, vector<64x128xbf16>
      tpu.vector_store %arg5[%c0_18, %c0_19], %31 {strides = array<i32>} : memref<64x128xbf16, #tpu.memory_space<vmem>>, vector<64x128xbf16>,
    } else {
    }
    return
  }
  func.func @transform_0(%arg0: i32, %arg1: i32, %arg2: i32) -> (i32, i32) {
    %c0_i32 = arith.constant 0 : i32
    return %arg0, %arg2 : i32, i32
  }
  func.func @transform_1(%arg0: i32, %arg1: i32, %arg2: i32) -> (i32, i32) {
    %c0_i32 = arith.constant 0 : i32
    return %arg2, %arg1 : i32, i32
  }
  func.func @transform_2(%arg0: i32, %arg1: i32, %arg2: i32) -> (i32, i32) {
    %c0_i32 = arith.constant 0 : i32
    return %arg0, %arg1 : i32, i32
  }
  func.func @transform_3(%arg0: i32, %arg1: i32, %arg2: i32) -> (i32, i32) {
    %c0_i32 = arith.constant 0 : i32
    return %arg0, %arg1 : i32, i32
  }
}

module attributes {stable_mosaic.version = 11 : i64} {
  func.func @_affine_leaky_kernel(%arg0: i32, %arg1: memref<64x128xbf16, #tpu.memory_space<vmem>>, %arg2: memref<1x128xf32, #tpu.memory_space<vmem>>, %arg3: memref<1x128xf32, #tpu.memory_space<vmem>>, %arg4: memref<64x128xbf16, #tpu.memory_space<vmem>>) attributes {dimension_semantics = [#tpu.dimension_semantics<parallel>], iteration_bounds = array<i64: 2>, scalar_prefetch = 0 : i64, scratch_operands = 0 : i64, tpu.core_type = #tpu.core_type<tc>, window_params = [{transform_indices = @transform_0, window_bounds = array<i64: 64, 128>}, {pipeline_mode = #tpu.pipeline_mode<synchronous>, transform_indices = @transform_1, window_bounds = array<i64: 1, 128>}, {pipeline_mode = #tpu.pipeline_mode<synchronous>, transform_indices = @transform_2, window_bounds = array<i64: 1, 128>}, {transform_indices = @transform_3, window_bounds = array<i64: 64, 128>}]} {
    %c0 = arith.constant 0 : index
    %c0_0 = arith.constant 0 : index
    %0 = vector.load %arg1[%c0, %c0_0] : memref<64x128xbf16, #tpu.memory_space<vmem>>, vector<64x128xbf16>
    %1 = arith.extf %0 : vector<64x128xbf16> to vector<64x128xf32>
    %c0_1 = arith.constant 0 : index
    %c0_2 = arith.constant 0 : index
    %2 = vector.load %arg2[%c0_1, %c0_2] : memref<1x128xf32, #tpu.memory_space<vmem>>, vector<1x128xf32>
    %3 = vector.broadcast %2 : vector<1x128xf32> to vector<64x128xf32>
    %4 = arith.mulf %1, %3 : vector<64x128xf32>
    %c0_3 = arith.constant 0 : index
    %c0_4 = arith.constant 0 : index
    %5 = vector.load %arg3[%c0_3, %c0_4] : memref<1x128xf32, #tpu.memory_space<vmem>>, vector<1x128xf32>
    %6 = vector.broadcast %5 : vector<1x128xf32> to vector<64x128xf32>
    %7 = arith.addf %4, %6 : vector<64x128xf32>
    %cst = arith.constant 0.000000e+00 : f32
    %8 = vector.broadcast %cst : f32 to vector<64x128xf32>
    %9 = arith.cmpf ogt, %7, %8 : vector<64x128xf32>
    %cst_5 = arith.constant 2.000000e-01 : f32
    %10 = vector.broadcast %cst_5 : f32 to vector<64x128xf32>
    %11 = arith.mulf %10, %7 : vector<64x128xf32>
    %12 = arith.select %9, %7, %11 : vector<64x128xi1>, vector<64x128xf32>
    %13 = arith.truncf %12 : vector<64x128xf32> to vector<64x128xbf16>
    %c0_6 = arith.constant 0 : index
    %c0_7 = arith.constant 0 : index
    %14 = vector.load %arg4[%c0_6, %c0_7] : memref<64x128xbf16, #tpu.memory_space<vmem>>, vector<64x128xbf16>
    tpu.vector_store %arg4[%c0_6, %c0_7], %13 {strides = array<i32>} : memref<64x128xbf16, #tpu.memory_space<vmem>>, vector<64x128xbf16>,
    return
  }
  func.func @transform_0(%arg0: i32) -> (i32, i32) {
    %c0_i32 = arith.constant 0 : i32
    %c0_i32_0 = arith.constant 0 : i32
    return %arg0, %c0_i32 : i32, i32
  }
  func.func @transform_1(%arg0: i32) -> (i32, i32) {
    %c0_i32 = arith.constant 0 : i32
    %c0_i32_0 = arith.constant 0 : i32
    %c0_i32_1 = arith.constant 0 : i32
    return %c0_i32, %c0_i32_0 : i32, i32
  }
  func.func @transform_2(%arg0: i32) -> (i32, i32) {
    %c0_i32 = arith.constant 0 : i32
    %c0_i32_0 = arith.constant 0 : i32
    %c0_i32_1 = arith.constant 0 : i32
    return %c0_i32, %c0_i32_0 : i32, i32
  }
  func.func @transform_3(%arg0: i32) -> (i32, i32) {
    %c0_i32 = arith.constant 0 : i32
    %c0_i32_0 = arith.constant 0 : i32
    return %arg0, %c0_i32 : i32, i32
  }
}

module attributes {stable_mosaic.version = 11 : i64} {
  func.func @_conv_gemm_kernel(%arg0: i32, %arg1: i32, %arg2: i32, %arg3: memref<32x2048xbf16, #tpu.memory_space<vmem>>, %arg4: memref<2048x128xbf16, #tpu.memory_space<vmem>>, %arg5: memref<32x128xbf16, #tpu.memory_space<vmem>>, %arg6: memref<8x128xf32, #tpu.memory_space<vmem>>, %arg7: memref<32x128xf32, #tpu.memory_space<vmem>>) attributes {dimension_semantics = [#tpu.dimension_semantics<parallel>, #tpu.dimension_semantics<parallel>, #tpu.dimension_semantics<arbitrary>], iteration_bounds = array<i64: 1, 2, 1>, scalar_prefetch = 0 : i64, scratch_operands = 1 : i64, tpu.core_type = #tpu.core_type<tc>, window_params = [{transform_indices = @transform_0, window_bounds = array<i64: 32, 2048>}, {transform_indices = @transform_1, window_bounds = array<i64: 2048, 128>}, {transform_indices = @transform_2, window_bounds = array<i64: 32, 128>}, {transform_indices = @transform_3, window_bounds = array<i64: 8, 128>}]} {
    %c0_i32 = arith.constant 0 : i32
    %0 = arith.cmpi eq, %arg2, %c0_i32 : i32
    %1 = arith.extui %0 : i1 to i32
    %c0_i32_0 = arith.constant 0 : i32
    %2 = arith.cmpi ne, %1, %c0_i32_0 : i32
    scf.if %2 {
      %cst_10 = arith.constant 0.000000e+00 : f32
      %12 = vector.broadcast %cst_10 : f32 to vector<32x128xf32>
      %c0_11 = arith.constant 0 : index
      %c0_12 = arith.constant 0 : index
      %13 = vector.load %arg7[%c0_11, %c0_12] : memref<32x128xf32, #tpu.memory_space<vmem>>, vector<32x128xf32>
      tpu.vector_store %arg7[%c0_11, %c0_12], %12 {strides = array<i32>} : memref<32x128xf32, #tpu.memory_space<vmem>>, vector<32x128xf32>,
    } else {
    }
    %c0 = arith.constant 0 : index
    %c0_1 = arith.constant 0 : index
    %3 = vector.load %arg7[%c0, %c0_1] : memref<32x128xf32, #tpu.memory_space<vmem>>, vector<32x128xf32>
    %c0_2 = arith.constant 0 : index
    %c0_3 = arith.constant 0 : index
    %4 = vector.load %arg3[%c0_2, %c0_3] : memref<32x2048xbf16, #tpu.memory_space<vmem>>, vector<32x2048xbf16>
    %c0_4 = arith.constant 0 : index
    %c0_5 = arith.constant 0 : index
    %5 = vector.load %arg4[%c0_4, %c0_5] : memref<2048x128xbf16, #tpu.memory_space<vmem>>, vector<2048x128xbf16>
    %cst = arith.constant dense<0.000000e+00> : vector<32x128xf32>
    %6 = tpu.matmul %4, %5, %cst {dimension_numbers = #tpu.dot_dimension_numbers<[1], [0], [0], [1], [0, 0, 1, 1], [], []>} : vector<32x2048xbf16>, vector<2048x128xbf16>, vector<32x128xf32> -> vector<32x128xf32>
    %7 = arith.addf %3, %6 : vector<32x128xf32>
    %c0_6 = arith.constant 0 : index
    %c0_7 = arith.constant 0 : index
    %8 = vector.load %arg7[%c0_6, %c0_7] : memref<32x128xf32, #tpu.memory_space<vmem>>, vector<32x128xf32>
    tpu.vector_store %arg7[%c0_6, %c0_7], %7 {strides = array<i32>} : memref<32x128xf32, #tpu.memory_space<vmem>>, vector<32x128xf32>,
    %c0_i32_8 = arith.constant 0 : i32
    %9 = arith.cmpi eq, %arg2, %c0_i32_8 : i32
    %10 = arith.extui %9 : i1 to i32
    %c0_i32_9 = arith.constant 0 : i32
    %11 = arith.cmpi ne, %10, %c0_i32_9 : i32
    scf.if %11 {
      %c0_10 = arith.constant 0 : index
      %c0_11 = arith.constant 0 : index
      %12 = vector.load %arg7[%c0_10, %c0_11] : memref<32x128xf32, #tpu.memory_space<vmem>>, vector<32x128xf32>
      %cst_12 = arith.constant dense<0.000000e+00> : vector<128xf32>
      %13 = vector.multi_reduction <add>, %12, %cst_12 [0] : vector<32x128xf32> to vector<128xf32>
      %14 = vector.shape_cast %13 : vector<128xf32> to vector<1x128xf32>
      %15 = arith.mulf %12, %12 : vector<32x128xf32>
      %cst_13 = arith.constant dense<0.000000e+00> : vector<128xf32>
      %16 = vector.multi_reduction <add>, %15, %cst_13 [0] : vector<32x128xf32> to vector<128xf32>
      %17 = vector.shape_cast %16 : vector<128xf32> to vector<1x128xf32>
      %18 = tpu.iota {dimensions = array<i32: 0>} : vector<8x128xi32>
      %c0_i32_14 = arith.constant 0 : i32
      %19 = vector.broadcast %c0_i32_14 : i32 to vector<8x128xi32>
      %20 = arith.cmpi eq, %18, %19 : vector<8x128xi32>
      %c1_i32 = arith.constant 1 : i32
      %21 = vector.broadcast %c1_i32 : i32 to vector<8x128xi32>
      %22 = arith.cmpi eq, %18, %21 : vector<8x128xi32>
      %cst_15 = arith.constant 0.000000e+00 : f32
      %23 = vector.shape_cast %17 : vector<1x128xf32> to vector<1x128xf32>
      %24 = vector.broadcast %23 : vector<1x128xf32> to vector<8x128xf32>
      %25 = vector.broadcast %cst_15 : f32 to vector<8x128xf32>
      %26 = arith.select %22, %24, %25 : vector<8x128xi1>, vector<8x128xf32>
      %27 = vector.shape_cast %14 : vector<1x128xf32> to vector<1x128xf32>
      %28 = vector.broadcast %27 : vector<1x128xf32> to vector<8x128xf32>
      %29 = arith.select %20, %28, %26 : vector<8x128xi1>, vector<8x128xf32>
      %c0_16 = arith.constant 0 : index
      %c0_17 = arith.constant 0 : index
      %30 = vector.load %arg6[%c0_16, %c0_17] : memref<8x128xf32, #tpu.memory_space<vmem>>, vector<8x128xf32>
      tpu.vector_store %arg6[%c0_16, %c0_17], %29 {strides = array<i32>} : memref<8x128xf32, #tpu.memory_space<vmem>>, vector<8x128xf32>,
      %31 = arith.truncf %12 : vector<32x128xf32> to vector<32x128xbf16>
      %c0_18 = arith.constant 0 : index
      %c0_19 = arith.constant 0 : index
      %32 = vector.load %arg5[%c0_18, %c0_19] : memref<32x128xbf16, #tpu.memory_space<vmem>>, vector<32x128xbf16>
      tpu.vector_store %arg5[%c0_18, %c0_19], %31 {strides = array<i32>} : memref<32x128xbf16, #tpu.memory_space<vmem>>, vector<32x128xbf16>,
    } else {
    }
    return
  }
  func.func @transform_0(%arg0: i32, %arg1: i32, %arg2: i32) -> (i32, i32) {
    %c0_i32 = arith.constant 0 : i32
    return %arg0, %arg2 : i32, i32
  }
  func.func @transform_1(%arg0: i32, %arg1: i32, %arg2: i32) -> (i32, i32) {
    %c0_i32 = arith.constant 0 : i32
    return %arg2, %arg1 : i32, i32
  }
  func.func @transform_2(%arg0: i32, %arg1: i32, %arg2: i32) -> (i32, i32) {
    %c0_i32 = arith.constant 0 : i32
    return %arg0, %arg1 : i32, i32
  }
  func.func @transform_3(%arg0: i32, %arg1: i32, %arg2: i32) -> (i32, i32) {
    %c0_i32 = arith.constant 0 : i32
    return %arg0, %arg1 : i32, i32
  }
}

module attributes {stable_mosaic.version = 11 : i64} {
  func.func @_affine_leaky_kernel(%arg0: i32, %arg1: memref<16x256xbf16, #tpu.memory_space<vmem>>, %arg2: memref<1x256xf32, #tpu.memory_space<vmem>>, %arg3: memref<1x256xf32, #tpu.memory_space<vmem>>, %arg4: memref<16x256xbf16, #tpu.memory_space<vmem>>) attributes {dimension_semantics = [#tpu.dimension_semantics<parallel>], iteration_bounds = array<i64: 2>, scalar_prefetch = 0 : i64, scratch_operands = 0 : i64, tpu.core_type = #tpu.core_type<tc>, window_params = [{transform_indices = @transform_0, window_bounds = array<i64: 16, 256>}, {pipeline_mode = #tpu.pipeline_mode<synchronous>, transform_indices = @transform_1, window_bounds = array<i64: 1, 256>}, {pipeline_mode = #tpu.pipeline_mode<synchronous>, transform_indices = @transform_2, window_bounds = array<i64: 1, 256>}, {transform_indices = @transform_3, window_bounds = array<i64: 16, 256>}]} {
    %c0 = arith.constant 0 : index
    %c0_0 = arith.constant 0 : index
    %0 = vector.load %arg1[%c0, %c0_0] : memref<16x256xbf16, #tpu.memory_space<vmem>>, vector<16x256xbf16>
    %1 = arith.extf %0 : vector<16x256xbf16> to vector<16x256xf32>
    %c0_1 = arith.constant 0 : index
    %c0_2 = arith.constant 0 : index
    %2 = vector.load %arg2[%c0_1, %c0_2] : memref<1x256xf32, #tpu.memory_space<vmem>>, vector<1x256xf32>
    %3 = vector.broadcast %2 : vector<1x256xf32> to vector<16x256xf32>
    %4 = arith.mulf %1, %3 : vector<16x256xf32>
    %c0_3 = arith.constant 0 : index
    %c0_4 = arith.constant 0 : index
    %5 = vector.load %arg3[%c0_3, %c0_4] : memref<1x256xf32, #tpu.memory_space<vmem>>, vector<1x256xf32>
    %6 = vector.broadcast %5 : vector<1x256xf32> to vector<16x256xf32>
    %7 = arith.addf %4, %6 : vector<16x256xf32>
    %cst = arith.constant 0.000000e+00 : f32
    %8 = vector.broadcast %cst : f32 to vector<16x256xf32>
    %9 = arith.cmpf ogt, %7, %8 : vector<16x256xf32>
    %cst_5 = arith.constant 2.000000e-01 : f32
    %10 = vector.broadcast %cst_5 : f32 to vector<16x256xf32>
    %11 = arith.mulf %10, %7 : vector<16x256xf32>
    %12 = arith.select %9, %7, %11 : vector<16x256xi1>, vector<16x256xf32>
    %13 = arith.truncf %12 : vector<16x256xf32> to vector<16x256xbf16>
    %c0_6 = arith.constant 0 : index
    %c0_7 = arith.constant 0 : index
    %14 = vector.load %arg4[%c0_6, %c0_7] : memref<16x256xbf16, #tpu.memory_space<vmem>>, vector<16x256xbf16>
    tpu.vector_store %arg4[%c0_6, %c0_7], %13 {strides = array<i32>} : memref<16x256xbf16, #tpu.memory_space<vmem>>, vector<16x256xbf16>,
    return
  }
  func.func @transform_0(%arg0: i32) -> (i32, i32) {
    %c0_i32 = arith.constant 0 : i32
    %c0_i32_0 = arith.constant 0 : i32
    return %arg0, %c0_i32 : i32, i32
  }
  func.func @transform_1(%arg0: i32) -> (i32, i32) {
    %c0_i32 = arith.constant 0 : i32
    %c0_i32_0 = arith.constant 0 : i32
    %c0_i32_1 = arith.constant 0 : i32
    return %c0_i32, %c0_i32_0 : i32, i32
  }
  func.func @transform_2(%arg0: i32) -> (i32, i32) {
    %c0_i32 = arith.constant 0 : i32
    %c0_i32_0 = arith.constant 0 : i32
    %c0_i32_1 = arith.constant 0 : i32
    return %c0_i32, %c0_i32_0 : i32, i32
  }
  func.func @transform_3(%arg0: i32) -> (i32, i32) {
    %c0_i32 = arith.constant 0 : i32
    %c0_i32_0 = arith.constant 0 : i32
    return %arg0, %c0_i32 : i32, i32
  }
}

module attributes {stable_mosaic.version = 11 : i64} {
  func.func @_conv_gemm_kernel(%arg0: i32, %arg1: i32, %arg2: i32, %arg3: memref<32x2048xbf16, #tpu.memory_space<vmem>>, %arg4: memref<2048x256xbf16, #tpu.memory_space<vmem>>, %arg5: memref<32x256xbf16, #tpu.memory_space<vmem>>, %arg6: memref<8x256xf32, #tpu.memory_space<vmem>>, %arg7: memref<32x256xf32, #tpu.memory_space<vmem>>) attributes {dimension_semantics = [#tpu.dimension_semantics<parallel>, #tpu.dimension_semantics<parallel>, #tpu.dimension_semantics<arbitrary>], iteration_bounds = array<i64: 1, 2, 2>, scalar_prefetch = 0 : i64, scratch_operands = 1 : i64, tpu.core_type = #tpu.core_type<tc>, window_params = [{transform_indices = @transform_0, window_bounds = array<i64: 32, 2048>}, {transform_indices = @transform_1, window_bounds = array<i64: 2048, 256>}, {transform_indices = @transform_2, window_bounds = array<i64: 32, 256>}, {transform_indices = @transform_3, window_bounds = array<i64: 8, 256>}]} {
    %c0_i32 = arith.constant 0 : i32
    %0 = arith.cmpi eq, %arg2, %c0_i32 : i32
    %1 = arith.extui %0 : i1 to i32
    %c0_i32_0 = arith.constant 0 : i32
    %2 = arith.cmpi ne, %1, %c0_i32_0 : i32
    scf.if %2 {
      %cst_9 = arith.constant 0.000000e+00 : f32
      %12 = vector.broadcast %cst_9 : f32 to vector<32x256xf32>
      %c0_10 = arith.constant 0 : index
      %c0_11 = arith.constant 0 : index
      %13 = vector.load %arg7[%c0_10, %c0_11] : memref<32x256xf32, #tpu.memory_space<vmem>>, vector<32x256xf32>
      tpu.vector_store %arg7[%c0_10, %c0_11], %12 {strides = array<i32>} : memref<32x256xf32, #tpu.memory_space<vmem>>, vector<32x256xf32>,
    } else {
    }
    %c0 = arith.constant 0 : index
    %c0_1 = arith.constant 0 : index
    %3 = vector.load %arg7[%c0, %c0_1] : memref<32x256xf32, #tpu.memory_space<vmem>>, vector<32x256xf32>
    %c0_2 = arith.constant 0 : index
    %c0_3 = arith.constant 0 : index
    %4 = vector.load %arg3[%c0_2, %c0_3] : memref<32x2048xbf16, #tpu.memory_space<vmem>>, vector<32x2048xbf16>
    %c0_4 = arith.constant 0 : index
    %c0_5 = arith.constant 0 : index
    %5 = vector.load %arg4[%c0_4, %c0_5] : memref<2048x256xbf16, #tpu.memory_space<vmem>>, vector<2048x256xbf16>
    %cst = arith.constant dense<0.000000e+00> : vector<32x256xf32>
    %6 = tpu.matmul %4, %5, %cst {dimension_numbers = #tpu.dot_dimension_numbers<[1], [0], [0], [1], [0, 0, 1, 1], [], []>} : vector<32x2048xbf16>, vector<2048x256xbf16>, vector<32x256xf32> -> vector<32x256xf32>
    %7 = arith.addf %3, %6 : vector<32x256xf32>
    %c0_6 = arith.constant 0 : index
    %c0_7 = arith.constant 0 : index
    %8 = vector.load %arg7[%c0_6, %c0_7] : memref<32x256xf32, #tpu.memory_space<vmem>>, vector<32x256xf32>
    tpu.vector_store %arg7[%c0_6, %c0_7], %7 {strides = array<i32>} : memref<32x256xf32, #tpu.memory_space<vmem>>, vector<32x256xf32>,
    %c1_i32 = arith.constant 1 : i32
    %9 = arith.cmpi eq, %arg2, %c1_i32 : i32
    %10 = arith.extui %9 : i1 to i32
    %c0_i32_8 = arith.constant 0 : i32
    %11 = arith.cmpi ne, %10, %c0_i32_8 : i32
    scf.if %11 {
      %c0_9 = arith.constant 0 : index
      %c0_10 = arith.constant 0 : index
      %12 = vector.load %arg7[%c0_9, %c0_10] : memref<32x256xf32, #tpu.memory_space<vmem>>, vector<32x256xf32>
      %cst_11 = arith.constant dense<0.000000e+00> : vector<256xf32>
      %13 = vector.multi_reduction <add>, %12, %cst_11 [0] : vector<32x256xf32> to vector<256xf32>
      %14 = vector.shape_cast %13 : vector<256xf32> to vector<1x256xf32>
      %15 = arith.mulf %12, %12 : vector<32x256xf32>
      %cst_12 = arith.constant dense<0.000000e+00> : vector<256xf32>
      %16 = vector.multi_reduction <add>, %15, %cst_12 [0] : vector<32x256xf32> to vector<256xf32>
      %17 = vector.shape_cast %16 : vector<256xf32> to vector<1x256xf32>
      %18 = tpu.iota {dimensions = array<i32: 0>} : vector<8x256xi32>
      %c0_i32_13 = arith.constant 0 : i32
      %19 = vector.broadcast %c0_i32_13 : i32 to vector<8x256xi32>
      %20 = arith.cmpi eq, %18, %19 : vector<8x256xi32>
      %c1_i32_14 = arith.constant 1 : i32
      %21 = vector.broadcast %c1_i32_14 : i32 to vector<8x256xi32>
      %22 = arith.cmpi eq, %18, %21 : vector<8x256xi32>
      %cst_15 = arith.constant 0.000000e+00 : f32
      %23 = vector.shape_cast %17 : vector<1x256xf32> to vector<1x256xf32>
      %24 = vector.broadcast %23 : vector<1x256xf32> to vector<8x256xf32>
      %25 = vector.broadcast %cst_15 : f32 to vector<8x256xf32>
      %26 = arith.select %22, %24, %25 : vector<8x256xi1>, vector<8x256xf32>
      %27 = vector.shape_cast %14 : vector<1x256xf32> to vector<1x256xf32>
      %28 = vector.broadcast %27 : vector<1x256xf32> to vector<8x256xf32>
      %29 = arith.select %20, %28, %26 : vector<8x256xi1>, vector<8x256xf32>
      %c0_16 = arith.constant 0 : index
      %c0_17 = arith.constant 0 : index
      %30 = vector.load %arg6[%c0_16, %c0_17] : memref<8x256xf32, #tpu.memory_space<vmem>>, vector<8x256xf32>
      tpu.vector_store %arg6[%c0_16, %c0_17], %29 {strides = array<i32>} : memref<8x256xf32, #tpu.memory_space<vmem>>, vector<8x256xf32>,
      %31 = arith.truncf %12 : vector<32x256xf32> to vector<32x256xbf16>
      %c0_18 = arith.constant 0 : index
      %c0_19 = arith.constant 0 : index
      %32 = vector.load %arg5[%c0_18, %c0_19] : memref<32x256xbf16, #tpu.memory_space<vmem>>, vector<32x256xbf16>
      tpu.vector_store %arg5[%c0_18, %c0_19], %31 {strides = array<i32>} : memref<32x256xbf16, #tpu.memory_space<vmem>>, vector<32x256xbf16>,
    } else {
    }
    return
  }
  func.func @transform_0(%arg0: i32, %arg1: i32, %arg2: i32) -> (i32, i32) {
    %c0_i32 = arith.constant 0 : i32
    return %arg0, %arg2 : i32, i32
  }
  func.func @transform_1(%arg0: i32, %arg1: i32, %arg2: i32) -> (i32, i32) {
    %c0_i32 = arith.constant 0 : i32
    return %arg2, %arg1 : i32, i32
  }
  func.func @transform_2(%arg0: i32, %arg1: i32, %arg2: i32) -> (i32, i32) {
    %c0_i32 = arith.constant 0 : i32
    return %arg0, %arg1 : i32, i32
  }
  func.func @transform_3(%arg0: i32, %arg1: i32, %arg2: i32) -> (i32, i32) {
    %c0_i32 = arith.constant 0 : i32
    return %arg0, %arg1 : i32, i32
  }
}

module attributes {stable_mosaic.version = 11 : i64} {
  func.func @_affine_leaky_kernel(%arg0: i32, %arg1: memref<16x512xbf16, #tpu.memory_space<vmem>>, %arg2: memref<1x512xf32, #tpu.memory_space<vmem>>, %arg3: memref<1x512xf32, #tpu.memory_space<vmem>>, %arg4: memref<16x512xbf16, #tpu.memory_space<vmem>>) attributes {dimension_semantics = [#tpu.dimension_semantics<parallel>], iteration_bounds = array<i64: 2>, scalar_prefetch = 0 : i64, scratch_operands = 0 : i64, tpu.core_type = #tpu.core_type<tc>, window_params = [{transform_indices = @transform_0, window_bounds = array<i64: 16, 512>}, {pipeline_mode = #tpu.pipeline_mode<synchronous>, transform_indices = @transform_1, window_bounds = array<i64: 1, 512>}, {pipeline_mode = #tpu.pipeline_mode<synchronous>, transform_indices = @transform_2, window_bounds = array<i64: 1, 512>}, {transform_indices = @transform_3, window_bounds = array<i64: 16, 512>}]} {
    %c0 = arith.constant 0 : index
    %c0_0 = arith.constant 0 : index
    %0 = vector.load %arg1[%c0, %c0_0] : memref<16x512xbf16, #tpu.memory_space<vmem>>, vector<16x512xbf16>
    %1 = arith.extf %0 : vector<16x512xbf16> to vector<16x512xf32>
    %c0_1 = arith.constant 0 : index
    %c0_2 = arith.constant 0 : index
    %2 = vector.load %arg2[%c0_1, %c0_2] : memref<1x512xf32, #tpu.memory_space<vmem>>, vector<1x512xf32>
    %3 = vector.broadcast %2 : vector<1x512xf32> to vector<16x512xf32>
    %4 = arith.mulf %1, %3 : vector<16x512xf32>
    %c0_3 = arith.constant 0 : index
    %c0_4 = arith.constant 0 : index
    %5 = vector.load %arg3[%c0_3, %c0_4] : memref<1x512xf32, #tpu.memory_space<vmem>>, vector<1x512xf32>
    %6 = vector.broadcast %5 : vector<1x512xf32> to vector<16x512xf32>
    %7 = arith.addf %4, %6 : vector<16x512xf32>
    %cst = arith.constant 0.000000e+00 : f32
    %8 = vector.broadcast %cst : f32 to vector<16x512xf32>
    %9 = arith.cmpf ogt, %7, %8 : vector<16x512xf32>
    %cst_5 = arith.constant 2.000000e-01 : f32
    %10 = vector.broadcast %cst_5 : f32 to vector<16x512xf32>
    %11 = arith.mulf %10, %7 : vector<16x512xf32>
    %12 = arith.select %9, %7, %11 : vector<16x512xi1>, vector<16x512xf32>
    %13 = arith.truncf %12 : vector<16x512xf32> to vector<16x512xbf16>
    %c0_6 = arith.constant 0 : index
    %c0_7 = arith.constant 0 : index
    %14 = vector.load %arg4[%c0_6, %c0_7] : memref<16x512xbf16, #tpu.memory_space<vmem>>, vector<16x512xbf16>
    tpu.vector_store %arg4[%c0_6, %c0_7], %13 {strides = array<i32>} : memref<16x512xbf16, #tpu.memory_space<vmem>>, vector<16x512xbf16>,
    return
  }
  func.func @transform_0(%arg0: i32) -> (i32, i32) {
    %c0_i32 = arith.constant 0 : i32
    %c0_i32_0 = arith.constant 0 : i32
    return %arg0, %c0_i32 : i32, i32
  }
  func.func @transform_1(%arg0: i32) -> (i32, i32) {
    %c0_i32 = arith.constant 0 : i32
    %c0_i32_0 = arith.constant 0 : i32
    %c0_i32_1 = arith.constant 0 : i32
    return %c0_i32, %c0_i32_0 : i32, i32
  }
  func.func @transform_2(%arg0: i32) -> (i32, i32) {
    %c0_i32 = arith.constant 0 : i32
    %c0_i32_0 = arith.constant 0 : i32
    %c0_i32_1 = arith.constant 0 : i32
    return %c0_i32, %c0_i32_0 : i32, i32
  }
  func.func @transform_3(%arg0: i32) -> (i32, i32) {
    %c0_i32 = arith.constant 0 : i32
    %c0_i32_0 = arith.constant 0 : i32
    return %arg0, %c0_i32 : i32, i32
  }
}

module attributes {stable_mosaic.version = 11 : i64} {
  func.func @_conv_gemm_kernel(%arg0: i32, %arg1: i32, %arg2: i32, %arg3: memref<16x2048xbf16, #tpu.memory_space<vmem>>, %arg4: memref<2048x128xbf16, #tpu.memory_space<vmem>>, %arg5: memref<1x128xf32, #tpu.memory_space<vmem>>, %arg6: memref<16x128xf32, #tpu.memory_space<vmem>>, %arg7: memref<16x128xf32, #tpu.memory_space<vmem>>) attributes {dimension_semantics = [#tpu.dimension_semantics<parallel>, #tpu.dimension_semantics<parallel>, #tpu.dimension_semantics<arbitrary>], iteration_bounds = array<i64: 1, 1, 4>, scalar_prefetch = 0 : i64, scratch_operands = 1 : i64, tpu.core_type = #tpu.core_type<tc>, window_params = [{transform_indices = @transform_0, window_bounds = array<i64: 16, 2048>}, {transform_indices = @transform_1, window_bounds = array<i64: 2048, 128>}, {transform_indices = @transform_2, window_bounds = array<i64: 1, 128>}, {transform_indices = @transform_3, window_bounds = array<i64: 16, 128>}]} {
    %c0_i32 = arith.constant 0 : i32
    %0 = arith.cmpi eq, %arg2, %c0_i32 : i32
    %1 = arith.extui %0 : i1 to i32
    %c0_i32_0 = arith.constant 0 : i32
    %2 = arith.cmpi ne, %1, %c0_i32_0 : i32
    scf.if %2 {
      %cst_9 = arith.constant 0.000000e+00 : f32
      %12 = vector.broadcast %cst_9 : f32 to vector<16x128xf32>
      %c0_10 = arith.constant 0 : index
      %c0_11 = arith.constant 0 : index
      %13 = vector.load %arg7[%c0_10, %c0_11] : memref<16x128xf32, #tpu.memory_space<vmem>>, vector<16x128xf32>
      tpu.vector_store %arg7[%c0_10, %c0_11], %12 {strides = array<i32>} : memref<16x128xf32, #tpu.memory_space<vmem>>, vector<16x128xf32>,
    } else {
    }
    %c0 = arith.constant 0 : index
    %c0_1 = arith.constant 0 : index
    %3 = vector.load %arg7[%c0, %c0_1] : memref<16x128xf32, #tpu.memory_space<vmem>>, vector<16x128xf32>
    %c0_2 = arith.constant 0 : index
    %c0_3 = arith.constant 0 : index
    %4 = vector.load %arg3[%c0_2, %c0_3] : memref<16x2048xbf16, #tpu.memory_space<vmem>>, vector<16x2048xbf16>
    %c0_4 = arith.constant 0 : index
    %c0_5 = arith.constant 0 : index
    %5 = vector.load %arg4[%c0_4, %c0_5] : memref<2048x128xbf16, #tpu.memory_space<vmem>>, vector<2048x128xbf16>
    %cst = arith.constant dense<0.000000e+00> : vector<16x128xf32>
    %6 = tpu.matmul %4, %5, %cst {dimension_numbers = #tpu.dot_dimension_numbers<[1], [0], [0], [1], [0, 0, 1, 1], [], []>} : vector<16x2048xbf16>, vector<2048x128xbf16>, vector<16x128xf32> -> vector<16x128xf32>
    %7 = arith.addf %3, %6 : vector<16x128xf32>
    %c0_6 = arith.constant 0 : index
    %c0_7 = arith.constant 0 : index
    %8 = vector.load %arg7[%c0_6, %c0_7] : memref<16x128xf32, #tpu.memory_space<vmem>>, vector<16x128xf32>
    tpu.vector_store %arg7[%c0_6, %c0_7], %7 {strides = array<i32>} : memref<16x128xf32, #tpu.memory_space<vmem>>, vector<16x128xf32>,
    %c3_i32 = arith.constant 3 : i32
    %9 = arith.cmpi eq, %arg2, %c3_i32 : i32
    %10 = arith.extui %9 : i1 to i32
    %c0_i32_8 = arith.constant 0 : i32
    %11 = arith.cmpi ne, %10, %c0_i32_8 : i32
    scf.if %11 {
      %c0_9 = arith.constant 0 : index
      %c0_10 = arith.constant 0 : index
      %12 = vector.load %arg7[%c0_9, %c0_10] : memref<16x128xf32, #tpu.memory_space<vmem>>, vector<16x128xf32>
      %c0_11 = arith.constant 0 : index
      %c0_12 = arith.constant 0 : index
      %13 = vector.load %arg5[%c0_11, %c0_12] : memref<1x128xf32, #tpu.memory_space<vmem>>, vector<1x128xf32>
      %14 = vector.broadcast %13 : vector<1x128xf32> to vector<16x128xf32>
      %15 = arith.addf %12, %14 : vector<16x128xf32>
      %c0_13 = arith.constant 0 : index
      %c0_14 = arith.constant 0 : index
      %16 = vector.load %arg6[%c0_13, %c0_14] : memref<16x128xf32, #tpu.memory_space<vmem>>, vector<16x128xf32>
      tpu.vector_store %arg6[%c0_13, %c0_14], %15 {strides = array<i32>} : memref<16x128xf32, #tpu.memory_space<vmem>>, vector<16x128xf32>,
    } else {
    }
    return
  }
  func.func @transform_0(%arg0: i32, %arg1: i32, %arg2: i32) -> (i32, i32) {
    %c0_i32 = arith.constant 0 : i32
    return %arg0, %arg2 : i32, i32
  }
  func.func @transform_1(%arg0: i32, %arg1: i32, %arg2: i32) -> (i32, i32) {
    %c0_i32 = arith.constant 0 : i32
    return %arg2, %arg1 : i32, i32
  }
  func.func @transform_2(%arg0: i32, %arg1: i32, %arg2: i32) -> (i32, i32) {
    %c0_i32 = arith.constant 0 : i32
    %c0_i32_0 = arith.constant 0 : i32
    return %c0_i32, %arg1 : i32, i32
  }
  func.func @transform_3(%arg0: i32, %arg1: i32, %arg2: i32) -> (i32, i32) {
    %c0_i32 = arith.constant 0 : i32
    return %arg0, %arg1 : i32, i32
  }
}

</mosaic_0001>

<bundles_post_ra>
// kernel: discriminator_forward.8
= control target key start
LH: loop header
LB: loop body
LE: loop exit
PB: predicated region body
PF: predicated region fallthrough
CT: control target
= control target key end

     0   :  { %s1335_s12 = smov 0   ;;  %s1337_s13 = smov 0   ;;  %s1475_s0 = inlined_call_operand.vmem [shape: bf16[512,128], index: 0, kind: input, shape index: {}]   ;;  %s1476_s1 = inlined_call_operand.vmem [shape: bf16[128,128], index: 1, kind: input, shape index: {}]   ;;  %s1477_s2 = inlined_call_operand.vmem [shape: f32[1,128], index: 2, kind: input, shape index: {}]   ;;  %s1478_s3 = inlined_call_operand.vmem [shape: bf16[512,128], index: 3, kind: output, shape index: {}]  }
   0x1   :  { %s1339_s14 = smov 0  }
   0x2 LB: > { %s32_s15 = sadd.s32 1, %s1309_s13  ;;  %p1020_p0 = scmp.ge.s32.totalorder %s1313_s14, 1  ;;  %s1313_s14 = sphi %s1339_s14, %s13_s14   ;;  %s1309_s13 = sphi %s1337_s13, %s1480_s13   ;;  %s1305_s12 = sphi %s1335_s12, %s1479_s12  }
   0x3   : > { %p34_p1 = scmp.ge.s32.totalorder %s32_s15, 2  ;;  %p188_p2 = scmp.lt.s32.totalorder %s1313_s14, 3 }
   0x5   : > { %s1482_s15 = smov (%p34_p1, %s32_s15), 0  ;;  %p189_p3 = pnand %p1020_p0, %p188_p2 }
   0x6   : > { %s1021_s24 = sshll.u32 (!%p189_p3), %s1305_s12, 5 }
   0x7   : > { %192 = sbr.rel (%p189_p3) target bundleno = 242 (0xf2), region = 32  ;;  %p230_p4 = scmp.lt.s32.totalorder (!%p189_p3), %s1021_s24, 63 }
   0xc   : > { %v1146_v0 = vld [vmem:[%s1476_s1 + $0x38] sm:$0xff]  ;;  %v1145_v1 = vld [vmem:[%s1476_s1 + $0x30] sm:$0xff]  ;;  %v1144_v2 = vld [vmem:[%s1476_s1 + $0x28] sm:$0xff]  ;;  %s1484_s24 = smov (!%p230_p4, %s1021_s24), 63 }
   0xd   : > { %519 = vmatpush.bf16.msra.mxu0 %v1146_v0  ;;  %1242 = vmatpush.bf16.msra.mxu1 %v1146_v0  ;;  %v1143_v3 = vld [vmem:[%s1476_s1 + $0x20] sm:$0xff]  ;;  %v1142_v4 = vld [vmem:[%s1476_s1 + $0x18] sm:$0xff]  ;;  %v1141_v5 = vld [vmem:[%s1476_s1 + $0x10] sm:$0xff]  ;;  %s1022_s4 = sshll.u32 %s1484_s24, 2 }
   0xe   : > { %1243 = vmatpush.bf16.msra.mxu2 %v1146_v0  ;;  %1244 = vmatpush.bf16.msra.mxu3 %v1146_v0  ;;  %v1140_v6 = vld [vmem:[%s1476_s1 + $0x8] sm:$0xff]  ;;  %v1139_v7 = vld [vmem:[%s1476_s1] sm:$0xff]  ;;  %s1388_s9 = scalar_lea.vmem %s1475_s0, %s1022_s4  ;;  %s1422_s17 = scalar_lea.vmem %s1478_s3, %s1022_s4 }
   0xf   : > { %v1123_v8 = vld [vmem:[%s1388_s9] sm:$0xff]  ;;  %v1124_v12 = vld [vmem:[%s1388_s9 + $0x8] sm:$0xff]  ;;  %v1125_v16 = vld [vmem:[%s1388_s9 + $0x10] sm:$0xff] }
  0x10   : > { %v1127_v9 = vld [vmem:[%s1388_s9 + $0x20] sm:$0xff]  ;;  %v1128_v13 = vld [vmem:[%s1388_s9 + $0x28] sm:$0xff]  ;;  %v1129_v17 = vld [vmem:[%s1388_s9 + $0x30] sm:$0xff] }
  0x11   : > { %520 = vmatpush.bf16.msra.mxu0 %v1145_v1  ;;  %1245 = vmatpush.bf16.msra.mxu1 %v1145_v1  ;;  %v1131_v10 = vld [vmem:[%s1388_s9 + $0x40] sm:$0xff]  ;;  %v1132_v14 = vld [vmem:[%s1388_s9 + $0x48] sm:$0xff]  ;;  %v1133_v18 = vld [vmem:[%s1388_s9 + $0x50] sm:$0xff] }
  0x12   : > { %1246 = vmatpush.bf16.msra.mxu2 %v1145_v1  ;;  %1247 = vmatpush.bf16.msra.mxu3 %v1145_v1  ;;  %v1135_v11 = vld [vmem:[%s1388_s9 + $0x60] sm:$0xff]  ;;  %v1136_v15 = vld [vmem:[%s1388_s9 + $0x68] sm:$0xff]  ;;  %v1137_v19 = vld [vmem:[%s1388_s9 + $0x70] sm:$0xff] }
  0x13   : > { %v1126_v20 = vld [vmem:[%s1388_s9 + $0x18] sm:$0xff]  ;;  %v1409_v26 = vld [vmem:[%s1477_s2] ss:$0 sm:$0xff] }
  0x14   : > { %v1130_v21 = vld [vmem:[%s1388_s9 + $0x38] sm:$0xff] }
  0x15   : > { %521 = vmatpush.bf16.msra.mxu0 %v1144_v2  ;;  %1248 = vmatpush.bf16.msra.mxu1 %v1144_v2  ;;  %v1134_v22 = vld [vmem:[%s1388_s9 + $0x58] sm:$0xff] }
  0x16   : > { %1249 = vmatpush.bf16.msra.mxu2 %v1144_v2  ;;  %1250 = vmatpush.bf16.msra.mxu3 %v1144_v2  ;;  %v1138_v23 = vld [vmem:[%s1388_s9 + $0x78] sm:$0xff] }
  0x19   : > { %522 = vmatpush.bf16.msra.mxu0 %v1143_v3  ;;  %1251 = vmatpush.bf16.msra.mxu1 %v1143_v3 }
  0x1a   : > { %1252 = vmatpush.bf16.msra.mxu2 %v1143_v3  ;;  %1253 = vmatpush.bf16.msra.mxu3 %v1143_v3 }
  0x1d   : > { %523 = vmatpush.bf16.msra.mxu0 %v1142_v4  ;;  %1254 = vmatpush.bf16.msra.mxu1 %v1142_v4 }
  0x1e   : > { %1255 = vmatpush.bf16.msra.mxu2 %v1142_v4  ;;  %1256 = vmatpush.bf16.msra.mxu3 %v1142_v4 }
  0x21   : > { %524 = vmatpush.bf16.msra.mxu0 %v1141_v5  ;;  %1257 = vmatpush.bf16.msra.mxu1 %v1141_v5 }
  0x22   : > { %1258 = vmatpush.bf16.msra.mxu2 %v1141_v5  ;;  %1259 = vmatpush.bf16.msra.mxu3 %v1141_v5 }
  0x25   : > { %525 = vmatpush.bf16.msra.mxu0 %v1140_v6  ;;  %1260 = vmatpush.bf16.msra.mxu1 %v1140_v6 }
  0x26   : > { %1261 = vmatpush.bf16.msra.mxu2 %v1140_v6  ;;  %1262 = vmatpush.bf16.msra.mxu3 %v1140_v6 }
  0x29   : > { %526 = vmatpush.bf16.msra.mxu0 %v1139_v7  ;;  %1263 = vmatpush.bf16.msra.mxu1 %v1139_v7 }
  0x2a   : > { %1264 = vmatpush.bf16.msra.mxu2 %v1139_v7  ;;  %1265 = vmatpush.bf16.msra.mxu3 %v1139_v7 }
  0x2c   : > { %527 = vmatmul.bf16.vlgmr.msra.gmra.mxu0 %v1123_v8  ;;  %547 = vmatmul.bf16.vlgmr.msra.gmra.mxu1 %v1127_v9 }
  0x2d   : > { %567 = vmatmul.bf16.vlgmr.msra.gmra.mxu2 %v1131_v10  ;;  %587 = vmatmul.bf16.vlgmr.msra.gmra.mxu3 %v1135_v11 }
  0x3c   : > { %532 = vmatmul.bf16.gmra.mxu0 %v1124_v12  ;;  %552 = vmatmul.bf16.gmra.mxu1 %v1128_v13 }
  0x3d   : > { %572 = vmatmul.bf16.gmra.mxu2 %v1132_v14  ;;  %592 = vmatmul.bf16.gmra.mxu3 %v1136_v15 }
  0x4c   : > { %537 = vmatmul.bf16.gmra.mxu0 %v1125_v16  ;;  %557 = vmatmul.bf16.gmra.mxu1 %v1129_v17 }
  0x4d   : > { %577 = vmatmul.bf16.gmra.mxu2 %v1133_v18  ;;  %597 = vmatmul.bf16.gmra.mxu3 %v1137_v19 }
  0x5c   : > { %542 = vmatmul.bf16.gmra.mxu0 %v1126_v20  ;;  %562 = vmatmul.bf16.gmra.mxu1 %v1130_v21 }
  0x5d   : > { %582 = vmatmul.bf16.gmra.mxu2 %v1134_v22  ;;  %602 = vmatmul.bf16.gmra.mxu3 %v1138_v23 }
  0xa9   : > { %v528_v24 = vpop.f32.mrf.mxu0  ;;  %v548_v25 = vpop.f32.mrf.mxu1 }
  0xaa   : > { %v711_v27 = vadd.f32 %v1409_v26, %v528_v24  ;;  %v719_v28 = vadd.f32 %v1409_v26, %v548_v25 }
  0xac   : > { %v775_v33 = vmul.f32 0.2, %v711_v27  ;;  %v783_v34 = vmul.f32 0.2, %v719_v28  ;;  %vm743_vm0 = vcmp.gt.f32.partialorder %v711_v27, 0.0  ;;  %vm751_vm1 = vcmp.gt.f32.partialorder %v719_v28, 0.0 }
  0xae   : > { %v807_v41 = vsel %vm743_vm0, %v711_v27, %v775_v33  ;;  %v815_v42 = vsel %vm751_vm1, %v719_v28, %v783_v34 }
  0xb0   : > { %v568_v29 = vpop.f32.mrf.mxu2  ;;  %v588_v30 = vpop.f32.mrf.mxu3 }
  0xb1   : > { %v530_v31 = vpop.f32.mrf.mxu0  ;;  %v550_v32 = vpop.f32.mrf.mxu1  ;;  %v727_v39 = vadd.f32 %v1409_v26, %v568_v29  ;;  %v735_v40 = vadd.f32 %v1409_v26, %v588_v30 }
  0xb2   : > { %v712_v35 = vadd.f32 %v1409_v26, %v530_v31  ;;  %v720_v36 = vadd.f32 %v1409_v26, %v550_v32 }
  0xb3   : > { %v791_v49 = vmul.f32 0.2, %v727_v39  ;;  %v799_v50 = vmul.f32 0.2, %v735_v40  ;;  %vm759_vm4 = vcmp.gt.f32.partialorder %v727_v39, 0.0  ;;  %vm767_vm5 = vcmp.gt.f32.partialorder %v735_v40, 0.0 }
  0xb4   : > { %vm744_vm2 = vcmp.gt.f32.partialorder %v712_v35, 0.0  ;;  %v776_v37 = vmul.f32 0.2, %v712_v35  ;;  %vm752_vm3 = vcmp.gt.f32.partialorder %v720_v36, 0.0  ;;  %v784_v38 = vmul.f32 0.2, %v720_v36 }
  0xb5   : > { %v823_v57 = vsel %vm759_vm4, %v727_v39, %v791_v49  ;;  %v831_v58 = vsel %vm767_vm5, %v735_v40, %v799_v50 }
  0xb6   : > { %v808_v43 = vsel %vm744_vm2, %v712_v35, %v776_v37  ;;  %v816_v44 = vsel %vm752_vm3, %v720_v36, %v784_v38 }
  0xb7   : > { %v1150_v45 = vpack.c.bf16 %v808_v43, %v807_v41  ;;  %v1170_v46 = vpack.c.bf16 %v816_v44, %v815_v42 }
  0xb8   : > { %v570_v47 = vpop.f32.mrf.mxu2  ;;  %v590_v48 = vpop.f32.mrf.mxu3 }
  0xb9   : > { %1151 = vst [vmem:[%s1422_s17] sm:$0xff] %v1150_v45   ;;  %v728_v51 = vadd.f32 %v1409_v26, %v570_v47  ;;  %v736_v52 = vadd.f32 %v1409_v26, %v590_v48  ;;  %v533_v53 = vpop.f32.mrf.mxu0  ;;  %v553_v54 = vpop.f32.mrf.mxu1 }
  0xba   : > { %1230 = vst [vmem:[%s1422_s17 + $0x20] sm:$0xff] %v1170_v46   ;;  %v713_v63 = vadd.f32 %v1409_v26, %v533_v53  ;;  %v721_v0 = vadd.f32 %v1409_v26, %v553_v54 }
  0xbb   : > { %vm760_vm6 = vcmp.gt.f32.partialorder %v728_v51, 0.0  ;;  %v792_v55 = vmul.f32 0.2, %v728_v51  ;;  %vm768_vm7 = vcmp.gt.f32.partialorder %v736_v52, 0.0  ;;  %v800_v56 = vmul.f32 0.2, %v736_v52 }
  0xbc   : > { %v777_v5 = vmul.f32 0.2, %v713_v63  ;;  %v785_v6 = vmul.f32 0.2, %v721_v0  ;;  %vm745_vm8 = vcmp.gt.f32.partialorder %v713_v63, 0.0  ;;  %vm753_vm9 = vcmp.gt.f32.partialorder %v721_v0, 0.0 }
  0xbd   : > { %v824_v59 = vsel %vm760_vm6, %v728_v51, %v792_v55  ;;  %v832_v60 = vsel %vm768_vm7, %v736_v52, %v800_v56 }
  0xbe   : > { %v1190_v61 = vpack.c.bf16 %v824_v59, %v823_v57  ;;  %v1210_v62 = vpack.c.bf16 %v832_v60, %v831_v58  ;;  %v809_v13 = vsel %vm745_vm8, %v713_v63, %v777_v5  ;;  %v817_v14 = vsel %vm753_vm9, %v721_v0, %v785_v6 }
  0xc0   : > { %1234 = vst [vmem:[%s1422_s17 + $0x40] sm:$0xff] %v1190_v61   ;;  %v573_v1 = vpop.f32.mrf.mxu2  ;;  %v593_v2 = vpop.f32.mrf.mxu3 }
  0xc1   : > { %1238 = vst [vmem:[%s1422_s17 + $0x60] sm:$0xff] %v1210_v62   ;;  %v535_v3 = vpop.f32.mrf.mxu0  ;;  %v555_v4 = vpop.f32.mrf.mxu1  ;;  %v729_v11 = vadd.f32 %v1409_v26, %v573_v1  ;;  %v737_v12 = vadd.f32 %v1409_v26, %v593_v2 }
  0xc2   : > { %v714_v7 = vadd.f32 %v1409_v26, %v535_v3  ;;  %v722_v8 = vadd.f32 %v1409_v26, %v555_v4 }
  0xc3   : > { %v793_v21 = vmul.f32 0.2, %v729_v11  ;;  %v801_v22 = vmul.f32 0.2, %v737_v12  ;;  %vm761_vm12 = vcmp.gt.f32.partialorder %v729_v11, 0.0  ;;  %vm769_vm13 = vcmp.gt.f32.partialorder %v737_v12, 0.0 }
  0xc4   : > { %vm746_vm10 = vcmp.gt.f32.partialorder %v714_v7, 0.0  ;;  %v778_v9 = vmul.f32 0.2, %v714_v7  ;;  %vm754_vm11 = vcmp.gt.f32.partialorder %v722_v8, 0.0  ;;  %v786_v10 = vmul.f32 0.2, %v722_v8 }
  0xc5   : > { %v825_v30 = vsel %vm761_vm12, %v729_v11, %v793_v21  ;;  %v833_v31 = vsel %vm769_vm13, %v737_v12, %v801_v22 }
  0xc6   : > { %v810_v15 = vsel %vm746_vm10, %v714_v7, %v778_v9  ;;  %v818_v16 = vsel %vm754_vm11, %v722_v8, %v786_v10 }
  0xc7   : > { %v1155_v17 = vpack.c.bf16 %v810_v15, %v809_v13  ;;  %v1175_v18 = vpack.c.bf16 %v818_v16, %v817_v14 }
  0xc8   : > { %v575_v19 = vpop.f32.mrf.mxu2  ;;  %v595_v20 = vpop.f32.mrf.mxu3 }
  0xc9   : > { %1227 = vst [vmem:[%s1422_s17 + $0x8] sm:$0xff] %v1155_v17   ;;  %v730_v23 = vadd.f32 %v1409_v26, %v575_v19  ;;  %v738_v24 = vadd.f32 %v1409_v26, %v595_v20  ;;  %v538_v25 = vpop.f32.mrf.mxu0  ;;  %v558_v27 = vpop.f32.mrf.mxu1 }
  0xca   : > { %1231 = vst [vmem:[%s1422_s17 + $0x28] sm:$0xff] %v1175_v18   ;;  %v715_v36 = vadd.f32 %v1409_v26, %v538_v25  ;;  %v723_v37 = vadd.f32 %v1409_v26, %v558_v27 }
  0xcb   : > { %vm762_vm14 = vcmp.gt.f32.partialorder %v730_v23, 0.0  ;;  %v794_v28 = vmul.f32 0.2, %v730_v23  ;;  %vm770_vm15 = vcmp.gt.f32.partialorder %v738_v24, 0.0  ;;  %v802_v29 = vmul.f32 0.2, %v738_v24 }
  0xcc   : > { %v779_v42 = vmul.f32 0.2, %v715_v36  ;;  %v787_v43 = vmul.f32 0.2, %v723_v37  ;;  %vm747_vm0 = vcmp.gt.f32.partialorder %v715_v36, 0.0  ;;  %vm755_vm1 = vcmp.gt.f32.partialorder %v723_v37, 0.0 }
  0xcd   : > { %v826_v32 = vsel %vm762_vm14, %v730_v23, %v794_v28  ;;  %v834_v33 = vsel %vm770_vm15, %v738_v24, %v802_v29 }
  0xce   : > { %v1195_v34 = vpack.c.bf16 %v826_v32, %v825_v30  ;;  %v1215_v35 = vpack.c.bf16 %v834_v33, %v833_v31  ;;  %v811_v50 = vsel %vm747_vm0, %v715_v36, %v779_v42  ;;  %v819_v51 = vsel %vm755_vm1, %v723_v37, %v787_v43 }
  0xd0   : > { %1235 = vst [vmem:[%s1422_s17 + $0x48] sm:$0xff] %v1195_v34   ;;  %v578_v38 = vpop.f32.mrf.mxu2  ;;  %v598_v39 = vpop.f32.mrf.mxu3 }
  0xd1   : > { %1239 = vst [vmem:[%s1422_s17 + $0x68] sm:$0xff] %v1215_v35   ;;  %v540_v40 = vpop.f32.mrf.mxu0  ;;  %v560_v41 = vpop.f32.mrf.mxu1  ;;  %v731_v48 = vadd.f32 %v1409_v26, %v578_v38  ;;  %v739_v49 = vadd.f32 %v1409_v26, %v598_v39 }
  0xd2   : > { %v716_v44 = vadd.f32 %v1409_v26, %v540_v40  ;;  %v724_v45 = vadd.f32 %v1409_v26, %v560_v41 }
  0xd3   : > { %v795_v58 = vmul.f32 0.2, %v731_v48  ;;  %v803_v59 = vmul.f32 0.2, %v739_v49  ;;  %vm763_vm4 = vcmp.gt.f32.partialorder %v731_v48, 0.0  ;;  %vm771_vm5 = vcmp.gt.f32.partialorder %v739_v49, 0.0 }
  0xd4   : > { %vm748_vm2 = vcmp.gt.f32.partialorder %v716_v44, 0.0  ;;  %v780_v46 = vmul.f32 0.2, %v716_v44  ;;  %vm756_vm3 = vcmp.gt.f32.partialorder %v724_v45, 0.0  ;;  %v788_v47 = vmul.f32 0.2, %v724_v45 }
  0xd5   : > { %v827_v2 = vsel %vm763_vm4, %v731_v48, %v795_v58  ;;  %v835_v3 = vsel %vm771_vm5, %v739_v49, %v803_v59 }
  0xd6   : > { %v812_v52 = vsel %vm748_vm2, %v716_v44, %v780_v46  ;;  %v820_v53 = vsel %vm756_vm3, %v724_v45, %v788_v47 }
  0xd7   : > { %v1160_v54 = vpack.c.bf16 %v812_v52, %v811_v50  ;;  %v1180_v55 = vpack.c.bf16 %v820_v53, %v819_v51 }
  0xd8   : > { %v580_v56 = vpop.f32.mrf.mxu2  ;;  %v600_v57 = vpop.f32.mrf.mxu3 }
  0xd9   : > { %1228 = vst [vmem:[%s1422_s17 + $0x10] sm:$0xff] %v1160_v54   ;;  %v732_v60 = vadd.f32 %v1409_v26, %v580_v56  ;;  %v740_v61 = vadd.f32 %v1409_v26, %v600_v57  ;;  %v543_v62 = vpop.f32.mrf.mxu0  ;;  %v563_v63 = vpop.f32.mrf.mxu1 }
  0xda   : > { %1232 = vst [vmem:[%s1422_s17 + $0x30] sm:$0xff] %v1180_v55   ;;  %v717_v8 = vadd.f32 %v1409_v26, %v543_v62  ;;  %v725_v9 = vadd.f32 %v1409_v26, %v563_v63 }
  0xdb   : > { %vm764_vm6 = vcmp.gt.f32.partialorder %v732_v60, 0.0  ;;  %v796_v0 = vmul.f32 0.2, %v732_v60  ;;  %vm772_vm7 = vcmp.gt.f32.partialorder %v740_v61, 0.0  ;;  %v804_v1 = vmul.f32 0.2, %v740_v61 }
  0xdc   : > { %v781_v14 = vmul.f32 0.2, %v717_v8  ;;  %v789_v15 = vmul.f32 0.2, %v725_v9  ;;  %vm749_vm8 = vcmp.gt.f32.partialorder %v717_v8, 0.0  ;;  %vm757_vm9 = vcmp.gt.f32.partialorder %v725_v9, 0.0 }
  0xdd   : > { %v828_v4 = vsel %vm764_vm6, %v732_v60, %v796_v0  ;;  %v836_v5 = vsel %vm772_vm7, %v740_v61, %v804_v1 }
  0xde   : > { %v1200_v6 = vpack.c.bf16 %v828_v4, %v827_v2  ;;  %v1220_v7 = vpack.c.bf16 %v836_v5, %v835_v3  ;;  %v813_v22 = vsel %vm749_vm8, %v717_v8, %v781_v14  ;;  %v821_v23 = vsel %vm757_vm9, %v725_v9, %v789_v15 }
  0xe0   : > { %1236 = vst [vmem:[%s1422_s17 + $0x50] sm:$0xff] %v1200_v6   ;;  %v583_v10 = vpop.f32.mrf.mxu2  ;;  %v603_v11 = vpop.f32.mrf.mxu3 }
  0xe1   : > { %1240 = vst [vmem:[%s1422_s17 + $0x70] sm:$0xff] %v1220_v7   ;;  %v545_v12 = vpop.f32.mrf.mxu0  ;;  %v565_v13 = vpop.f32.mrf.mxu1  ;;  %v733_v20 = vadd.f32 %v1409_v26, %v583_v10  ;;  %v741_v21 = vadd.f32 %v1409_v26, %v603_v11 }
  0xe2   : > { %v718_v16 = vadd.f32 %v1409_v26, %v545_v12  ;;  %v726_v17 = vadd.f32 %v1409_v26, %v565_v13 }
  0xe3   : > { %v797_v31 = vmul.f32 0.2, %v733_v20  ;;  %v805_v32 = vmul.f32 0.2, %v741_v21  ;;  %vm765_vm12 = vcmp.gt.f32.partialorder %v733_v20, 0.0  ;;  %vm773_vm13 = vcmp.gt.f32.partialorder %v741_v21, 0.0 }
  0xe4   : > { %vm750_vm10 = vcmp.gt.f32.partialorder %v718_v16, 0.0  ;;  %v782_v18 = vmul.f32 0.2, %v718_v16  ;;  %vm758_vm11 = vcmp.gt.f32.partialorder %v726_v17, 0.0  ;;  %v790_v19 = vmul.f32 0.2, %v726_v17 }
  0xe5   : > { %v829_v37 = vsel %vm765_vm12, %v733_v20, %v797_v31  ;;  %v837_v38 = vsel %vm773_vm13, %v741_v21, %v805_v32 }
  0xe6   : > { %v814_v24 = vsel %vm750_vm10, %v718_v16, %v782_v18  ;;  %v822_v25 = vsel %vm758_vm11, %v726_v17, %v790_v19 }
  0xe7   : > { %v1165_v27 = vpack.c.bf16 %v814_v24, %v813_v22  ;;  %v1185_v28 = vpack.c.bf16 %v822_v25, %v821_v23 }
  0xe8   : > { %v585_v29 = vpop.f32.mrf.mxu2  ;;  %v605_v30 = vpop.f32.mrf.mxu3 }
  0xe9   : > { %1229 = vst [vmem:[%s1422_s17 + $0x18] sm:$0xff] %v1165_v27   ;;  %v734_v33 = vadd.f32 %v1409_v26, %v585_v29  ;;  %v742_v34 = vadd.f32 %v1409_v26, %v605_v30 }
  0xea   : > { %1233 = vst [vmem:[%s1422_s17 + $0x38] sm:$0xff] %v1185_v28  }
  0xeb   : > { %vm766_vm14 = vcmp.gt.f32.partialorder %v734_v33, 0.0  ;;  %v798_v35 = vmul.f32 0.2, %v734_v33  ;;  %vm774_vm15 = vcmp.gt.f32.partialorder %v742_v34, 0.0  ;;  %v806_v36 = vmul.f32 0.2, %v742_v34 }
  0xed   : > { %v830_v39 = vsel %vm766_vm14, %v734_v33, %v798_v35  ;;  %v838_v40 = vsel %vm774_vm15, %v742_v34, %v806_v36 }
  0xee   : > { %v1205_v41 = vpack.c.bf16 %v830_v39, %v829_v37  ;;  %v1225_v42 = vpack.c.bf16 %v838_v40, %v837_v38 }
  0xf0   : > { %1237 = vst [vmem:[%s1422_s17 + $0x58] sm:$0xff] %v1205_v41  }
  0xf1   : > { %1241 = vst [vmem:[%s1422_s17 + $0x78] sm:$0xff] %v1225_v42  }
  0xf2 PF: > { %s13_s14 = sadd.s32 1, %s1313_s14   ;;  %s1479_s12 = smov %s1309_s13 }
  0xf3   : > { %p10_p5 = scmp.ge.s32.totalorder %s13_s14, 4   ;;  %s1480_s13 = smov %s1482_s15 }
  0xf5   :  { %12 = sbr.rel (!%p10_p5) target bundleno = 2 (0x2), region = 76 }

// kernel: discriminator_forward.9
= control target key start
LH: loop header
LB: loop body
LE: loop exit
PB: predicated region body
PF: predicated region fallthrough
CT: control target
= control target key end

     0   :  { %s2041_s12 = smov 0   ;;  %s2043_s13 = smov 0   ;;  %s2386_s0 = inlined_call_operand.vmem [shape: bf16[128,1024], index: 0, kind: input, shape index: {}]   ;;  %s2387_s1 = inlined_call_operand.vmem [shape: bf16[1024,128], index: 1, kind: input, shape index: {}]   ;;  %s2388_s2 = inlined_call_operand.vmem [shape: bf16[128,128], index: 2, kind: output, shape index: {0}]   ;;  %s2389_s3 = inlined_call_operand.vmem [shape: f32[16,128], index: 3, kind: output, shape index: {1}]  }
   0x1   :  { %s2045_s14 = smov 0  }
   0x2 LB: > { %s33_s15 = sadd.s32 1, %s2015_s13  ;;  %p1460_p0 = scmp.ge.s32.totalorder %s2019_s14, 1  ;;  %s2019_s14 = sphi %s2045_s14, %s14_s14   ;;  %s2015_s13 = sphi %s2043_s13, %s2391_s13   ;;  %s2011_s12 = sphi %s2041_s12, %s2390_s12  }
   0x3   : > { %p35_p1 = scmp.ge.s32.totalorder %s33_s15, 2  ;;  %p188_p2 = scmp.lt.s32.totalorder %s2019_s14, 3 }
   0x5   : > { %s2393_s15 = smov (%p35_p1, %s33_s15), 0  ;;  %p189_p3 = pnand %p1460_p0, %p188_p2 }
   0x6   : > { %s1461_s17 = sshll.u32 (!%p189_p3), %s2011_s12, 3  ;;  %p265_p5 = scmp.lt.s32.totalorder (!%p189_p3), %s2011_s12, 1 }
   0x7   : > { %192 = sbr.rel (%p189_p3) target bundleno = 321 (0x141), region = 28  ;;  %p237_p4 = scmp.lt.s32.totalorder (!%p189_p3), %s1461_s17, 15 }
   0xc   : > { %v1893_v0 = vld [vmem:[%s2387_s1 + $0x38] sm:$0xff]  ;;  %v1892_v4 = vld [vmem:[%s2387_s1 + $0x30] sm:$0xff]  ;;  %v1891_v8 = vld [vmem:[%s2387_s1 + $0x28] sm:$0xff]  ;;  %s2395_s17 = smov (!%p237_p4, %s1461_s17), 15  ;;  %s2397_s12 = smov (!%p265_p5, %s2011_s12), 1 }
   0xd   : > { %v1901_v1 = vld [vmem:[%s2387_s1 + $0x78] sm:$0xff]  ;;  %996 = vmatpush.bf16.msra.mxu0 %v1893_v0  ;;  %v1900_v5 = vld [vmem:[%s2387_s1 + $0x70] sm:$0xff]  ;;  %v1899_v9 = vld [vmem:[%s2387_s1 + $0x68] sm:$0xff]  ;;  %s1853_s20 = sshll.u32 %s2395_s17, 5 }
   0xe   : > { %v1909_v2 = vld [vmem:[%s2387_s1 + $0xb8] sm:$0xff]  ;;  %1025 = vmatpush.bf16.msra.mxu1 %v1901_v1  ;;  %v1908_v6 = vld [vmem:[%s2387_s1 + $0xb0] sm:$0xff]  ;;  %v1907_v10 = vld [vmem:[%s2387_s1 + $0xa8] sm:$0xff]  ;;  %s2146_s27 = scalar_lea.vmem %s2386_s0, %s1853_s20 }
   0xf   : > { %v1917_v3 = vld [vmem:[%s2387_s1 + $0xf8] sm:$0xff]  ;;  %1054 = vmatpush.bf16.msra.mxu2 %v1909_v2  ;;  %v1916_v7 = vld [vmem:[%s2387_s1 + $0xf0] sm:$0xff]  ;;  %v1915_v11 = vld [vmem:[%s2387_s1 + $0xe8] sm:$0xff] }
  0x10   : > { %1083 = vmatpush.bf16.msra.mxu3 %v1917_v3  ;;  %v1890_v12 = vld [vmem:[%s2387_s1 + $0x20] sm:$0xff]  ;;  %v1889_v16 = vld [vmem:[%s2387_s1 + $0x18] sm:$0xff]  ;;  %v1888_v20 = vld [vmem:[%s2387_s1 + $0x10] sm:$0xff] }
  0x11   : > { %997 = vmatpush.bf16.msra.mxu0 %v1892_v4  ;;  %v1898_v13 = vld [vmem:[%s2387_s1 + $0x60] sm:$0xff]  ;;  %v1897_v17 = vld [vmem:[%s2387_s1 + $0x58] sm:$0xff]  ;;  %v1896_v21 = vld [vmem:[%s2387_s1 + $0x50] sm:$0xff] }
  0x12   : > { %1026 = vmatpush.bf16.msra.mxu1 %v1900_v5  ;;  %v1906_v14 = vld [vmem:[%s2387_s1 + $0xa0] sm:$0xff]  ;;  %v1905_v18 = vld [vmem:[%s2387_s1 + $0x98] sm:$0xff]  ;;  %v1904_v22 = vld [vmem:[%s2387_s1 + $0x90] sm:$0xff] }
  0x13   : > { %1055 = vmatpush.bf16.msra.mxu2 %v1908_v6  ;;  %v1914_v15 = vld [vmem:[%s2387_s1 + $0xe0] sm:$0xff]  ;;  %v1913_v19 = vld [vmem:[%s2387_s1 + $0xd8] sm:$0xff]  ;;  %v1912_v23 = vld [vmem:[%s2387_s1 + $0xd0] sm:$0xff] }
  0x14   : > { %1084 = vmatpush.bf16.msra.mxu3 %v1916_v7  ;;  %v1887_v24 = vld [vmem:[%s2387_s1 + $0x8] sm:$0xff]  ;;  %v1886_v28 = vld [vmem:[%s2387_s1] sm:$0xff]  ;;  %v1941_v40 = vld [vmem:[%s2387_s1 + $0x1b8] sm:$0xff] }
  0x15   : > { %998 = vmatpush.bf16.msra.mxu0 %v1891_v8  ;;  %v1895_v25 = vld [vmem:[%s2387_s1 + $0x48] sm:$0xff]  ;;  %v1894_v29 = vld [vmem:[%s2387_s1 + $0x40] sm:$0xff]  ;;  %v1925_v41 = vld [vmem:[%s2387_s1 + $0x138] sm:$0xff] }
  0x16   : > { %1027 = vmatpush.bf16.msra.mxu1 %v1899_v9  ;;  %v1903_v26 = vld [vmem:[%s2387_s1 + $0x88] sm:$0xff]  ;;  %v1902_v30 = vld [vmem:[%s2387_s1 + $0x80] sm:$0xff]  ;;  %v1949_v46 = vld [vmem:[%s2387_s1 + $0x1f8] sm:$0xff] }
  0x17   : > { %1056 = vmatpush.bf16.msra.mxu2 %v1907_v10  ;;  %v1911_v27 = vld [vmem:[%s2387_s1 + $0xc8] sm:$0xff]  ;;  %v1910_v31 = vld [vmem:[%s2387_s1 + $0xc0] sm:$0xff]  ;;  %v1933_v47 = vld [vmem:[%s2387_s1 + $0x178] sm:$0xff] }
  0x18   : > { %1085 = vmatpush.bf16.msra.mxu3 %v1915_v11  ;;  %v1469_v32 = vld [vmem:[%s2146_s27] sm:$0xf]  ;;  %v1854_v34 = vld [vmem:[%s2146_s27 + $0x4] sm:$0xf]  ;;  %v1477_v36 = vld [vmem:[%s2146_s27 + $0x8] sm:$0xf] }
  0x19   : > { %999 = vmatpush.bf16.msra.mxu0 %v1890_v12  ;;  %v1858_v33 = vld [vmem:[%s2146_s27 + $0x1c] sm:$0xf0]  ;;  %v1471_v35 = vld [vmem:[%s2146_s27 + $0x20] sm:$0xf0]  ;;  %v1859_v37 = vld [vmem:[%s2146_s27 + $0x24] sm:$0xf0] }
  0x1a   : > { %1028 = vmatpush.bf16.msra.mxu1 %v1898_v13  ;;  %v1855_v38 = vld [vmem:[%s2146_s27 + $0xc] sm:$0xf]  ;;  %v1470_v42 = vor.u32 %v1858_v33, %v1469_v32  ;;  %v1474_v43 = vor.u32 %v1854_v34, %v1471_v35  ;;  %v1478_v44 = vor.u32 %v1859_v37, %v1477_v36  ;;  %v1940_v48 = vld [vmem:[%s2387_s1 + $0x1b0] sm:$0xff]  ;;  %v1501_v56 = vld [vmem:[%s2146_s27 + $0x40] sm:$0xf] }
  0x1b   : > { %1057 = vmatpush.bf16.msra.mxu2 %v1906_v14  ;;  %v1479_v39 = vld [vmem:[%s2146_s27 + $0x28] sm:$0xf0]  ;;  %v1924_v49 = vld [vmem:[%s2387_s1 + $0x130] sm:$0xff]  ;;  %v1938_v57 = vld [vmem:[%s2387_s1 + $0x1a0] sm:$0xff] }
  0x1c   : > { %1086 = vmatpush.bf16.msra.mxu3 %v1914_v15  ;;  %v1482_v45 = vor.u32 %v1855_v38, %v1479_v39  ;;  %v1948_v50 = vld [vmem:[%s2387_s1 + $0x1f0] sm:$0xff]  ;;  %v1939_v52 = vld [vmem:[%s2387_s1 + $0x1a8] sm:$0xff]  ;;  %v1922_v58 = vld [vmem:[%s2387_s1 + $0x120] sm:$0xff] }
  0x1d   : > { %1000 = vmatpush.bf16.msra.mxu0 %v1889_v16  ;;  %v1932_v51 = vld [vmem:[%s2387_s1 + $0x170] sm:$0xff]  ;;  %v1923_v53 = vld [vmem:[%s2387_s1 + $0x128] sm:$0xff]  ;;  %v1866_v59 = vld [vmem:[%s2146_s27 + $0x5c] sm:$0xf0] }
  0x1e   : > { %1029 = vmatpush.bf16.msra.mxu1 %v1897_v17  ;;  %v1947_v54 = vld [vmem:[%s2387_s1 + $0x1e8] sm:$0xff]  ;;  %v1862_v60 = vld [vmem:[%s2146_s27 + $0x44] sm:$0xf]  ;;  %v1937_v4 = vld [vmem:[%s2387_s1 + $0x198] sm:$0xff]  ;;  %v1502_v6 = vor.u32 %v1866_v59, %v1501_v56 }
  0x1f   : > { %1058 = vmatpush.bf16.msra.mxu2 %v1905_v18  ;;  %v1931_v55 = vld [vmem:[%s2387_s1 + $0x168] sm:$0xff]  ;;  %v1503_v61 = vld [vmem:[%s2146_s27 + $0x60] sm:$0xf0]  ;;  %v1921_v5 = vld [vmem:[%s2387_s1 + $0x118] sm:$0xff] }
  0x20   : > { %1087 = vmatpush.bf16.msra.mxu3 %v1913_v19  ;;  %v1509_v62 = vld [vmem:[%s2146_s27 + $0x48] sm:$0xf]  ;;  %v1863_v0 = vld [vmem:[%s2146_s27 + $0x4c] sm:$0xf]  ;;  %v1946_v2 = vld [vmem:[%s2387_s1 + $0x1e0] sm:$0xff]  ;;  %v1506_v7 = vor.u32 %v1862_v60, %v1503_v61 }
  0x21   : > { %1001 = vmatpush.bf16.msra.mxu0 %v1888_v20  ;;  %v1867_v63 = vld [vmem:[%s2146_s27 + $0x64] sm:$0xf0]  ;;  %v1511_v1 = vld [vmem:[%s2146_s27 + $0x68] sm:$0xf0]  ;;  %v1930_v3 = vld [vmem:[%s2387_s1 + $0x160] sm:$0xff] }
  0x22   : > { %1030 = vmatpush.bf16.msra.mxu1 %v1896_v21  ;;  %v1510_v8 = vor.u32 %v1867_v63, %v1509_v62  ;;  %v1514_v9 = vor.u32 %v1863_v0, %v1511_v1  ;;  %v1945_v10 = vld [vmem:[%s2387_s1 + $0x1d8] sm:$0xff]  ;;  %v1936_v12 = vld [vmem:[%s2387_s1 + $0x190] sm:$0xff]  ;;  %v1935_v16 = vld [vmem:[%s2387_s1 + $0x188] sm:$0xff] }
  0x23   : > { %1059 = vmatpush.bf16.msra.mxu2 %v1904_v22  ;;  %v1929_v11 = vld [vmem:[%s2387_s1 + $0x158] sm:$0xff]  ;;  %v1920_v13 = vld [vmem:[%s2387_s1 + $0x110] sm:$0xff]  ;;  %v1919_v17 = vld [vmem:[%s2387_s1 + $0x108] sm:$0xff] }
  0x24   : > { %1088 = vmatpush.bf16.msra.mxu3 %v1912_v23  ;;  %v1944_v14 = vld [vmem:[%s2387_s1 + $0x1d0] sm:$0xff]  ;;  %v1943_v18 = vld [vmem:[%s2387_s1 + $0x1c8] sm:$0xff]  ;;  %v1533_v20 = vld [vmem:[%s2146_s27 + $0x80] sm:$0xf] }
  0x25   : > { %1002 = vmatpush.bf16.msra.mxu0 %v1887_v24  ;;  %v1928_v15 = vld [vmem:[%s2387_s1 + $0x150] sm:$0xff]  ;;  %v1927_v19 = vld [vmem:[%s2387_s1 + $0x148] sm:$0xff]  ;;  %v1934_v21 = vld [vmem:[%s2387_s1 + $0x180] sm:$0xff] }
  0x26   : > { %1031 = vmatpush.bf16.msra.mxu1 %v1895_v25  ;;  %v1918_v22 = vld [vmem:[%s2387_s1 + $0x100] sm:$0xff]  ;;  %v1517_v60 = vld [vmem:[%s2146_s27 + $0x50] sm:$0xf]  ;;  %v1864_v62 = vld [vmem:[%s2146_s27 + $0x54] sm:$0xf] }
  0x27   : > { %1060 = vmatpush.bf16.msra.mxu2 %v1903_v26  ;;  %v1874_v23 = vld [vmem:[%s2146_s27 + $0x9c] sm:$0xf0]  ;;  %v1870_v24 = vld [vmem:[%s2146_s27 + $0x84] sm:$0xf]  ;;  %v1541_v26 = vld [vmem:[%s2146_s27 + $0x88] sm:$0xf] }
  0x28   : > { %1089 = vmatpush.bf16.msra.mxu3 %v1911_v27  ;;  %v1535_v25 = vld [vmem:[%s2146_s27 + $0xa0] sm:$0xf0]  ;;  %v1875_v27 = vld [vmem:[%s2146_s27 + $0xa4] sm:$0xf0]  ;;  %v1534_v32 = vor.u32 %v1874_v23, %v1533_v20  ;;  %v1565_v36 = vld [vmem:[%s2146_s27 + $0xc0] sm:$0xf] }
  0x29   : > { %1003 = vmatpush.bf16.msra.mxu0 %v1886_v28  ;;  %v1871_v28 = vld [vmem:[%s2146_s27 + $0x8c] sm:$0xf]  ;;  %v1538_v33 = vor.u32 %v1870_v24, %v1535_v25  ;;  %v1542_v34 = vor.u32 %v1875_v27, %v1541_v26  ;;  %v1882_v37 = vld [vmem:[%s2146_s27 + $0xdc] sm:$0xf0]  ;;  %v1878_v38 = vld [vmem:[%s2146_s27 + $0xc4] sm:$0xf] }
  0x2a   : > { %1032 = vmatpush.bf16.msra.mxu1 %v1894_v29  ;;  %v1543_v29 = vld [vmem:[%s2146_s27 + $0xa8] sm:$0xf0]  ;;  %v1567_v39 = vld [vmem:[%s2146_s27 + $0xe0] sm:$0xf0]  ;;  %v1868_v61 = vld [vmem:[%s2146_s27 + $0x6c] sm:$0xf0] }
  0x2b   : > { %1061 = vmatpush.bf16.msra.mxu2 %v1902_v30  ;;  %v1942_v30 = vld [vmem:[%s2387_s1 + $0x1c0] sm:$0xff]  ;;  %v1546_v35 = vor.u32 %v1871_v28, %v1543_v29  ;;  %v1519_v63 = vld [vmem:[%s2146_s27 + $0x70] sm:$0xf0]  ;;  %v1525_v0 = vld [vmem:[%s2146_s27 + $0x58] sm:$0xf] }
  0x2c   : > { %1090 = vmatpush.bf16.msra.mxu3 %v1910_v31  ;;  %1004 = vmatmul.bf16.vlgmr.msra.gmra.mxu0 %v1470_v42  ;;  %v1926_v31 = vld [vmem:[%s2387_s1 + $0x140] sm:$0xff]  ;;  %v1879_v42 = vld [vmem:[%s2146_s27 + $0xcc] sm:$0xf]  ;;  %v1869_v1 = vld [vmem:[%s2146_s27 + $0x74] sm:$0xf0] }
  0x2d   : > { %1112 = vmatpush.bf16.msrb.mxu0 %v1925_v41  ;;  %1033 = vmatmul.bf16.vlgmr.msra.gmra.mxu1 %v1474_v43  ;;  %v1883_v41 = vld [vmem:[%s2146_s27 + $0xe4] sm:$0xf0]  ;;  %v1575_v43 = vld [vmem:[%s2146_s27 + $0xe8] sm:$0xf0]  ;;  %v1581_v20 = vld [vmem:[%s2146_s27 + $0xd0] sm:$0xf] }
  0x2e   : > { %1062 = vmatmul.bf16.vlgmr.msra.gmra.mxu2 %v1478_v44  ;;  %1141 = vmatpush.bf16.msrb.mxu1 %v1933_v47  ;;  %v1566_v44 = vor.u32 %v1882_v37, %v1565_v36  ;;  %v1578_v47 = vor.u32 %v1879_v42, %v1575_v43  ;;  %v1583_v23 = vld [vmem:[%s2146_s27 + $0xf0] sm:$0xf0]  ;;  %v1589_v24 = vld [vmem:[%s2146_s27 + $0xd8] sm:$0xf]  ;;  %v1881_v26 = vld [vmem:[%s2146_s27 + $0xdc] sm:$0xf] }
  0x2f   : > { %1170 = vmatpush.bf16.msrb.mxu2 %v1941_v40  ;;  %1091 = vmatmul.bf16.vlgmr.msra.gmra.mxu3 %v1482_v45  ;;  %v1573_v40 = vld [vmem:[%s2146_s27 + $0xc8] sm:$0xf]  ;;  %v1570_v45 = vor.u32 %v1878_v38, %v1567_v39  ;;  %v1885_v25 = vld [vmem:[%s2146_s27 + $0xf4] sm:$0xf0]  ;;  %v1591_v27 = vld [vmem:[%s2146_s27 + $0xf8] sm:$0xf0] }
  0x30   : > { %1199 = vmatpush.bf16.msrb.mxu3 %v1949_v46  ;;  %v1574_v46 = vor.u32 %v1883_v41, %v1573_v40 }
  0x31   : > { %1113 = vmatpush.bf16.msrb.mxu0 %v1924_v49  ;;  %v1860_v49 = vld [vmem:[%s2146_s27 + $0x2c] sm:$0xf0] }
  0x32   : > { %1142 = vmatpush.bf16.msrb.mxu1 %v1932_v51  ;;  %v1487_v51 = vld [vmem:[%s2146_s27 + $0x30] sm:$0xf0] }
  0x33   : > { %1171 = vmatpush.bf16.msrb.mxu2 %v1940_v48  ;;  %v1485_v48 = vld [vmem:[%s2146_s27 + $0x10] sm:$0xf] }
  0x34   : > { %1200 = vmatpush.bf16.msrb.mxu3 %v1948_v50  ;;  %v1856_v50 = vld [vmem:[%s2146_s27 + $0x14] sm:$0xf]  ;;  %v1486_v56 = vor.u32 %v1860_v49, %v1485_v48 }
  0x35   : > { %1114 = vmatpush.bf16.msrb.mxu0 %v1923_v53  ;;  %v1861_v53 = vld [vmem:[%s2146_s27 + $0x34] sm:$0xf0] }
  0x36   : > { %1143 = vmatpush.bf16.msrb.mxu1 %v1931_v55  ;;  %v1495_v55 = vld [vmem:[%s2146_s27 + $0x38] sm:$0xf0] }
  0x37   : > { %1172 = vmatpush.bf16.msrb.mxu2 %v1939_v52  ;;  %v1493_v52 = vld [vmem:[%s2146_s27 + $0x18] sm:$0xf] }
  0x38   : > { %1201 = vmatpush.bf16.msrb.mxu3 %v1947_v54  ;;  %v1857_v54 = vld [vmem:[%s2146_s27 + $0x1c] sm:$0xf] }
  0x39   : > { %1115 = vmatpush.bf16.msrb.mxu0 %v1922_v58  ;;  %v1494_v58 = vor.u32 %v1861_v53, %v1493_v52  ;;  %v1498_v59 = vor.u32 %v1857_v54, %v1495_v55 }
  0x3a   : > { %1144 = vmatpush.bf16.msrb.mxu1 %v1930_v3  ;;  %v1527_v3 = vld [vmem:[%s2146_s27 + $0x78] sm:$0xf0] }
  0x3b   : > { %1173 = vmatpush.bf16.msrb.mxu2 %v1938_v57  ;;  %v1490_v57 = vor.u32 %v1856_v50, %v1487_v51 }
  0x3c   : > { %1202 = vmatpush.bf16.msrb.mxu3 %v1946_v2  ;;  %1009 = vmatmul.bf16.gmra.mxu0 %v1502_v6  ;;  %v1865_v2 = vld [vmem:[%s2146_s27 + $0x5c] sm:$0xf]  ;;  %v1526_v6 = vor.u32 %v1869_v1, %v1525_v0 }
  0x3d   : > { %1116 = vmatpush.bf16.msrb.mxu0 %v1921_v5  ;;  %1038 = vmatmul.bf16.gmra.mxu1 %v1506_v7  ;;  %v1522_v5 = vor.u32 %v1864_v62, %v1519_v63  ;;  %v1530_v7 = vor.u32 %v1865_v2, %v1527_v3 }
  0x3e   : > { %1067 = vmatmul.bf16.gmra.mxu2 %v1510_v8  ;;  %1145 = vmatpush.bf16.msrb.mxu1 %v1929_v11  ;;  %v1549_v8 = vld [vmem:[%s2146_s27 + $0x90] sm:$0xf]  ;;  %v1551_v11 = vld [vmem:[%s2146_s27 + $0xb0] sm:$0xf0] }
  0x3f   : > { %1174 = vmatpush.bf16.msrb.mxu2 %v1937_v4  ;;  %1096 = vmatmul.bf16.gmra.mxu3 %v1514_v9  ;;  %v1518_v4 = vor.u32 %v1868_v61, %v1517_v60  ;;  %v1876_v9 = vld [vmem:[%s2146_s27 + $0xac] sm:$0xf0] }
  0x40   : > { %1203 = vmatpush.bf16.msrb.mxu3 %v1945_v10  ;;  %v1872_v10 = vld [vmem:[%s2146_s27 + $0x94] sm:$0xf] }
  0x41   : > { %1117 = vmatpush.bf16.msrb.mxu0 %v1920_v13  ;;  %v1877_v13 = vld [vmem:[%s2146_s27 + $0xb4] sm:$0xf0] }
  0x42   : > { %1146 = vmatpush.bf16.msrb.mxu1 %v1928_v15  ;;  %v1559_v15 = vld [vmem:[%s2146_s27 + $0xb8] sm:$0xf0] }
  0x43   : > { %1175 = vmatpush.bf16.msrb.mxu2 %v1936_v12  ;;  %v1557_v12 = vld [vmem:[%s2146_s27 + $0x98] sm:$0xf] }
  0x44   : > { %1204 = vmatpush.bf16.msrb.mxu3 %v1944_v14  ;;  %v1873_v14 = vld [vmem:[%s2146_s27 + $0x9c] sm:$0xf] }
  0x45   : > { %1118 = vmatpush.bf16.msrb.mxu0 %v1919_v17  ;;  %v1554_v17 = vor.u32 %v1872_v10, %v1551_v11 }
  0x46   : > { %1147 = vmatpush.bf16.msrb.mxu1 %v1927_v19  ;;  %v1562_v19 = vor.u32 %v1873_v14, %v1559_v15 }
  0x47   : > { %1176 = vmatpush.bf16.msrb.mxu2 %v1935_v16  ;;  %v1550_v16 = vor.u32 %v1876_v9, %v1549_v8 }
  0x48   : > { %1205 = vmatpush.bf16.msrb.mxu3 %v1943_v18  ;;  %v1558_v18 = vor.u32 %v1877_v13, %v1557_v12 }
  0x49   : > { %1119 = vmatpush.bf16.msrb.mxu0 %v1918_v22  ;;  %v1880_v22 = vld [vmem:[%s2146_s27 + $0xd4] sm:$0xf] }
  0x4a   : > { %1148 = vmatpush.bf16.msrb.mxu1 %v1926_v31  ;;  %v1586_v29 = vor.u32 %v1880_v22, %v1583_v23  ;;  %v1594_v31 = vor.u32 %v1881_v26, %v1591_v27 }
  0x4b   : > { %1177 = vmatpush.bf16.msrb.mxu2 %v1934_v21  ;;  %v1884_v21 = vld [vmem:[%s2146_s27 + $0xec] sm:$0xf0]  ;;  %s1465_s27 = sshll.u32 %s2395_s17, 2  ;;  %s1466_s17 = sshll.u32 %s2397_s12, 3 }
  0x4c   : > { %1206 = vmatpush.bf16.msrb.mxu3 %v1942_v30  ;;  %1014 = vmatmul.bf16.gmra.mxu0 %v1534_v32  ;;  %v1582_v28 = vor.u32 %v1884_v21, %v1581_v20  ;;  %v1590_v30 = vor.u32 %v1885_v25, %v1589_v24  ;;  %s2354_s21 = scalar_lea.vmem %s2388_s2, %s1465_s27  ;;  %s271_s24 = scalar_lea.vmem %s2389_s3, %s1466_s17 }
  0x4d   : > { %1043 = vmatmul.bf16.gmra.mxu1 %v1538_v33 }
  0x4e   : > { %1072 = vmatmul.bf16.gmra.mxu2 %v1542_v34 }
  0x4f   : > { %1101 = vmatmul.bf16.gmra.mxu3 %v1546_v35 }
  0x5c   : > { %1019 = vmatmul.bf16.gmra.mxu0 %v1566_v44 }
  0x5d   : > { %1048 = vmatmul.bf16.gmra.mxu1 %v1570_v45 }
  0x5e   : > { %1077 = vmatmul.bf16.gmra.mxu2 %v1574_v46 }
  0x5f   : > { %1106 = vmatmul.bf16.gmra.mxu3 %v1578_v47 }
  0x6c   : > { %1120 = vmatmul.bf16.vlgmr.msrb.gmra.mxu0 %v1486_v56 }
  0x6d   : > { %1149 = vmatmul.bf16.vlgmr.msrb.gmra.mxu1 %v1490_v57 }
  0x6e   : > { %1178 = vmatmul.bf16.vlgmr.msrb.gmra.mxu2 %v1494_v58 }
  0x6f   : > { %1207 = vmatmul.bf16.vlgmr.msrb.gmra.mxu3 %v1498_v59 }
  0x7c   : > { %1125 = vmatmul.bf16.gmra.mxu0 %v1518_v4 }
  0x7d   : > { %1154 = vmatmul.bf16.gmra.mxu1 %v1522_v5 }
  0x7e   : > { %1183 = vmatmul.bf16.gmra.mxu2 %v1526_v6 }
  0x7f   : > { %1212 = vmatmul.bf16.gmra.mxu3 %v1530_v7 }
  0x8c   : > { %1130 = vmatmul.bf16.gmra.mxu0 %v1550_v16 }
  0x8d   : > { %1159 = vmatmul.bf16.gmra.mxu1 %v1554_v17 }
  0x8e   : > { %1188 = vmatmul.bf16.gmra.mxu2 %v1558_v18 }
  0x8f   : > { %1217 = vmatmul.bf16.gmra.mxu3 %v1562_v19 }
  0x9c   : > { %1135 = vmatmul.bf16.gmra.mxu0 %v1582_v28 }
  0x9d   : > { %1164 = vmatmul.bf16.gmra.mxu1 %v1586_v29 }
  0x9e   : > { %1193 = vmatmul.bf16.gmra.mxu2 %v1590_v30 }
  0x9f   : > { %1222 = vmatmul.bf16.gmra.mxu3 %v1594_v31 }
  0xa9   : > { %v1005_v32 = vpop.f32.mrf.mxu0 }
  0xaa   : > { %v1034_v33 = vpop.f32.mrf.mxu1 }
  0xab   : > { %v1035_v34 = vadd.f32 %v1034_v33, %v1005_v32 }
  0xb1   : > { %v1063_v35 = vpop.f32.mrf.mxu2  ;;  %v1007_v38 = vpop.f32.mrf.mxu0 }
  0xb2   : > { %v1092_v36 = vpop.f32.mrf.mxu3  ;;  %v1064_v37 = vadd.f32 %v1063_v35, %v1035_v34  ;;  %v1036_v39 = vpop.f32.mrf.mxu1 }
  0xb3   : > { %v1037_v11 = vadd.f32 %v1036_v39, %v1007_v38 }
  0xb4   : > { %v1093_v40 = vadd.f32 %v1092_v36, %v1064_v37 }
  0xb9   : > { %v1065_v41 = vpop.f32.mrf.mxu2  ;;  %v1010_v43 = vpop.f32.mrf.mxu0 }
  0xba   : > { %v1094_v42 = vpop.f32.mrf.mxu3  ;;  %v1039_v44 = vpop.f32.mrf.mxu1  ;;  %v1066_v12 = vadd.f32 %v1065_v41, %v1037_v11 }
  0xbb   : > { %v1040_v45 = vadd.f32 %v1039_v44, %v1010_v43 }
  0xbc   : > { %v1095_v15 = vadd.f32 %v1094_v42, %v1066_v12 }
  0xc1   : > { %v1068_v46 = vpop.f32.mrf.mxu2  ;;  %v1012_v49 = vpop.f32.mrf.mxu0 }
  0xc2   : > { %v1097_v47 = vpop.f32.mrf.mxu3  ;;  %v1069_v48 = vadd.f32 %v1068_v46, %v1040_v45  ;;  %v1041_v50 = vpop.f32.mrf.mxu1 }
  0xc3   : > { %v1042_v28 = vadd.f32 %v1041_v50, %v1012_v49 }
  0xc4   : > { %v1098_v51 = vadd.f32 %v1097_v47, %v1069_v48 }
  0xc9   : > { %v1070_v52 = vpop.f32.mrf.mxu2  ;;  %v1015_v54 = vpop.f32.mrf.mxu0 }
  0xca   : > { %v1099_v53 = vpop.f32.mrf.mxu3  ;;  %v1044_v55 = vpop.f32.mrf.mxu1  ;;  %v1071_v32 = vadd.f32 %v1070_v52, %v1042_v28 }
  0xcb   : > { %v1045_v56 = vadd.f32 %v1044_v55, %v1015_v54 }
  0xcc   : > { %v1100_v37 = vadd.f32 %v1099_v53, %v1071_v32 }
  0xd1   : > { %v1073_v57 = vpop.f32.mrf.mxu2  ;;  %v2326_v60 = vpop.f32.mrf.mxu0 }
  0xd2   : > { %v1102_v58 = vpop.f32.mrf.mxu3  ;;  %v1074_v59 = vadd.f32 %v1073_v57, %v1045_v56  ;;  %v1046_v61 = vpop.f32.mrf.mxu1 }
  0xd3   : > { %v1047_v53 = vadd.f32 %v1046_v61, %v2326_v60 }
  0xd4   : > { %v2328_v62 = vadd.f32 %v1102_v58, %v1074_v59 }
  0xd9   : > { %v2330_v63 = vpop.f32.mrf.mxu2  ;;  %v2334_v1 = vpop.f32.mrf.mxu0 }
  0xda   : > { %v2332_v0 = vpop.f32.mrf.mxu3  ;;  %v2336_v2 = vpop.f32.mrf.mxu1  ;;  %v1076_v59 = vadd.f32 %v2330_v63, %v1047_v53 }
  0xe1   : > { %v2338_v3 = vpop.f32.mrf.mxu2  ;;  %v2342_v5 = vpop.f32.mrf.mxu0 }
  0xe2   : > { %v2340_v4 = vpop.f32.mrf.mxu3  ;;  %v2344_v6 = vpop.f32.mrf.mxu1 }
  0xe9   : > { %v2346_v7 = vpop.f32.mrf.mxu2  ;;  %v1121_v9 = vpop.f32.mrf.mxu0 }
  0xea   : > { %v2348_v8 = vpop.f32.mrf.mxu3  ;;  %v1150_v10 = vpop.f32.mrf.mxu1  ;;  %v1122_v16 = vadd.f32 %v1121_v9, %v1093_v40 }
  0xec   : > { %v1151_v20 = vadd.f32 %v1150_v10, %v1122_v16 }
  0xf1   : > { %v1179_v13 = vpop.f32.mrf.mxu2  ;;  %v1123_v17 = vpop.f32.mrf.mxu0 }
  0xf2   : > { %v1208_v14 = vpop.f32.mrf.mxu3  ;;  %v1152_v18 = vpop.f32.mrf.mxu1  ;;  %v1124_v19 = vadd.f32 %v1123_v17, %v1095_v15  ;;  %v1180_v21 = vadd.f32 %v1179_v13, %v1151_v20  ;;  %v1105_v13 = vadd.f32 %v2332_v0, %v1076_v59 }
  0xf4   : > { %v1153_v22 = vadd.f32 %v1152_v18, %v1124_v19  ;;  %v1209_v29 = vadd.f32 %v1208_v14, %v1180_v21  ;;  %v1050_v18 = vadd.f32 %v2336_v2, %v2334_v1  ;;  %v1052_v1 = vadd.f32 %v2344_v6, %v2342_v5 }
  0xf6   : > { %v1268_v42 = vmul.f32 %v1209_v29, %v1209_v29 }
  0xf9   : > { %v1181_v23 = vpop.f32.mrf.mxu2  ;;  %v1126_v26 = vpop.f32.mrf.mxu0 }
  0xfa   : > { %v1210_v24 = vpop.f32.mrf.mxu3  ;;  %v1182_v25 = vadd.f32 %v1181_v23, %v1153_v22  ;;  %v1155_v27 = vpop.f32.mrf.mxu1  ;;  %v1127_v31 = vadd.f32 %v1126_v26, %v1098_v51 }
  0xfc   : > { %v1211_v30 = vadd.f32 %v1210_v24, %v1182_v25  ;;  %v1156_v34 = vadd.f32 %v1155_v27, %v1127_v31 }
  0xfe   : > { %v1953_v33 = vpack.c.bf16 %v1211_v30, %v1209_v29  ;;  %v1269_v38 = vmul.f32 %v1211_v30, %v1211_v30  ;;  %v1255_v43 = vadd.f32 %v1211_v30, %v1209_v29 }
 0x100   : > { %1954 = vst [vmem:[%s2354_s21] sm:$0xff] %v1953_v33   ;;  %v1276_v46 = vadd.f32 %v1269_v38, %v1268_v42 }
 0x101   : > { %v1184_v35 = vpop.f32.mrf.mxu2  ;;  %v1128_v40 = vpop.f32.mrf.mxu0 }
 0x102   : > { %v1213_v36 = vpop.f32.mrf.mxu3  ;;  %v1185_v39 = vadd.f32 %v1184_v35, %v1156_v34  ;;  %v1157_v41 = vpop.f32.mrf.mxu1  ;;  %v1129_v45 = vadd.f32 %v1128_v40, %v1100_v37 }
 0x104   : > { %v1214_v44 = vadd.f32 %v1213_v36, %v1185_v39  ;;  %v1158_v50 = vadd.f32 %v1157_v41, %v1129_v45 }
 0x106   : > { %v1256_v47 = vadd.f32 %v1255_v43, %v1214_v44  ;;  %v1270_v48 = vmul.f32 %v1214_v44, %v1214_v44 }
 0x108   : > { %v1277_v49 = vadd.f32 %v1276_v46, %v1270_v48 }
 0x109   : > { %v1186_v51 = vpop.f32.mrf.mxu2  ;;  %v1131_v55 = vpop.f32.mrf.mxu0 }
 0x10a   : > { %v1215_v52 = vpop.f32.mrf.mxu3  ;;  %v1187_v54 = vadd.f32 %v1186_v51, %v1158_v50  ;;  %v1160_v56 = vpop.f32.mrf.mxu1  ;;  %v1132_v58 = vadd.f32 %v1131_v55, %v2328_v62  ;;  %v1079_v62 = vadd.f32 %v2338_v3, %v1050_v18  ;;  %v1081_v3 = vadd.f32 %v2346_v7, %v1052_v1 }
 0x10c   : > { %v1216_v57 = vadd.f32 %v1215_v52, %v1187_v54  ;;  %v1161_v10 = vadd.f32 %v1160_v56, %v1132_v58  ;;  %v1108_v25 = vadd.f32 %v2340_v4, %v1079_v62  ;;  %v1110_v34 = vadd.f32 %v2348_v8, %v1081_v3 }
 0x10d   : > { %v1289_v54 = vlaneseq }
 0x10e   : > { %v1958_v9 = vpack.c.bf16 %v1216_v57, %v1214_v44  ;;  %v1271_v14 = vmul.f32 %v1216_v57, %v1216_v57  ;;  %v1257_v60 = vadd.f32 %v1256_v47, %v1216_v57 }
 0x10f   : > { %v1290_v58 = vshrl.u32 %v1289_v54, 7 }
 0x110   : > { %1970 = vst [vmem:[%s2354_s21 + $0x8] sm:$0xff] %v1958_v9   ;;  %v1278_v63 = vadd.f32 %v1277_v49, %v1271_v14 }
 0x111   : > { %v1189_v11 = vpop.f32.mrf.mxu2  ;;  %v1133_v16 = vpop.f32.mrf.mxu0  ;;  %vm1292_vm0 = vcmp.eq.s32.totalorder %v1290_v58, 1  ;;  %vm1291_vm1 = vcmp.eq.s32.totalorder %v1290_v58, 0 }
 0x112   : > { %v1218_v12 = vpop.f32.mrf.mxu3  ;;  %v1190_v15 = vadd.f32 %v1189_v11, %v1161_v10  ;;  %v1162_v17 = vpop.f32.mrf.mxu1  ;;  %v1134_v19 = vadd.f32 %v1133_v16, %v1105_v13 }
 0x114   : > { %v1219_v61 = vadd.f32 %v1218_v12, %v1190_v15  ;;  %v1163_v23 = vadd.f32 %v1162_v17, %v1134_v19 }
 0x116   : > { %v1258_v20 = vadd.f32 %v1257_v60, %v1219_v61  ;;  %v1272_v21 = vmul.f32 %v1219_v61, %v1219_v61 }
 0x118   : > { %v1279_v22 = vadd.f32 %v1278_v63, %v1272_v21 }
 0x119   : > { %v1191_v24 = vpop.f32.mrf.mxu2  ;;  %v1136_v27 = vpop.f32.mrf.mxu0 }
 0x11a   : > { %v1220_v0 = vpop.f32.mrf.mxu3  ;;  %v1192_v26 = vadd.f32 %v1191_v24, %v1163_v23  ;;  %v1137_v28 = vadd.f32 %v1136_v27, %v1108_v25  ;;  %v1165_v29 = vpop.f32.mrf.mxu1 }
 0x11c   : > { %v1221_v2 = vadd.f32 %v1220_v0, %v1192_v26  ;;  %v1166_v31 = vadd.f32 %v1165_v29, %v1137_v28 }
 0x11e   : > { %v1963_v30 = vpack.c.bf16 %v1221_v2, %v1219_v61  ;;  %v1273_v35 = vmul.f32 %v1221_v2, %v1221_v2  ;;  %v1259_v37 = vadd.f32 %v1258_v20, %v1221_v2 }
 0x120   : > { %1971 = vst [vmem:[%s2354_s21 + $0x10] sm:$0xff] %v1963_v30   ;;  %v1280_v5 = vadd.f32 %v1279_v22, %v1273_v35 }
 0x121   : > { %v1194_v32 = vpop.f32.mrf.mxu2  ;;  %v1138_v4 = vpop.f32.mrf.mxu0 }
 0x122   : > { %v1223_v33 = vpop.f32.mrf.mxu3  ;;  %v1195_v36 = vadd.f32 %v1194_v32, %v1166_v31  ;;  %v1139_v39 = vadd.f32 %v1138_v4, %v1110_v34  ;;  %v1167_v41 = vpop.f32.mrf.mxu1 }
 0x124   : > { %v1224_v38 = vadd.f32 %v1223_v33, %v1195_v36  ;;  %v1168_v42 = vadd.f32 %v1167_v41, %v1139_v39 }
 0x126   : > { %v1260_v6 = vadd.f32 %v1259_v37, %v1224_v38  ;;  %v1274_v40 = vmul.f32 %v1224_v38, %v1224_v38 }
 0x128   : > { %v1281_v7 = vadd.f32 %v1280_v5, %v1274_v40 }
 0x129   : > { %v1196_v43 = vpop.f32.mrf.mxu2 }
 0x12a   : > { %v1197_v44 = vadd.f32 %v1196_v43, %v1168_v42  ;;  %v1225_v45 = vpop.f32.mrf.mxu3 }
 0x12c   : > { %v1226_v46 = vadd.f32 %v1225_v45, %v1197_v44 }
 0x12e   : > { %v1261_v8 = vadd.f32 %v1260_v6, %v1226_v46  ;;  %v1275_v47 = vmul.f32 %v1226_v46, %v1226_v46  ;;  %v1968_v48 = vpack.c.bf16 %v1226_v46, %v1224_v38 }
 0x130   : > { %v1262_v49 = vrot.slane %v1261_v8, 4  ;;  %v1282_v50 = vadd.f32 %v1281_v7, %v1275_v47  ;;  %1972 = vst [vmem:[%s2354_s21 + $0x18] sm:$0xff] %v1968_v48  }
 0x132   : > { %v1263_v51 = vadd.f32 %v1262_v49, %v1261_v8  ;;  %v1283_v52 = vrot.slane %v1282_v50, 4 }
 0x134   : > { %v1264_v55 = vrot.slane %v1263_v51, 2  ;;  %v1284_v56 = vadd.f32 %v1283_v52, %v1282_v50 }
 0x136   : > { %v1265_v53 = vadd.f32 %v1264_v55, %v1263_v51  ;;  %v1285_v57 = vrot.slane %v1284_v56, 2 }
 0x138   : > { %v1286_v59 = vadd.f32 %v1285_v57, %v1284_v56  ;;  %v1266_v9 = vrot.slane %v1265_v53, 1 }
 0x13a   : > { %v1287_v10 = vrot.slane %v1286_v59, 1  ;;  %v1267_v12 = vadd.f32 %v1266_v9, %v1265_v53 }
 0x13c   : > { %v1288_v11 = vadd.f32 %v1287_v10, %v1286_v59 }
 0x13e   : > { %v1293_v13 = vsel %vm1292_vm0, %v1288_v11, 0.0 }
 0x13f   : > { %v1294_v14 = vsel %vm1291_vm1, %v1267_v12, %v1293_v13 }
 0x140   : > { %1295 = vst [vmem:[%s271_s24] sm:$0xff] %v1294_v14 }
 0x141 PF: > { %s14_s14 = sadd.s32 1, %s2019_s14   ;;  %s2390_s12 = smov %s2015_s13 }
 0x142   : > { %p11_p6 = scmp.ge.s32.totalorder %s14_s14, 4   ;;  %s2391_s13 = smov %s2393_s15 }
 0x144   :  { %13 = sbr.rel (!%p11_p6) target bundleno = 2 (0x2), region = 81 }

// kernel: discriminator_forward.10
= control target key start
LH: loop header
LB: loop body
LE: loop exit
PB: predicated region body
PF: predicated region fallthrough
CT: control target
= control target key end

     0   :  { %s401_s12 = smov 0   ;;  %s431_s0 = inlined_call_operand.vmem [shape: bf16[128,128], index: 0, kind: input, shape index: {}]   ;;  %s432_s1 = inlined_call_operand.vmem [shape: f32[1,128], index: 1, kind: input, shape index: {}]   ;;  %s433_s2 = inlined_call_operand.vmem [shape: f32[1,128], index: 2, kind: input, shape index: {}]   ;;  %s434_s3 = inlined_call_operand.vmem [shape: bf16[128,128], index: 3, kind: output, shape index: {}]  }
   0x1 LB: > { %s310_s13 = sadd.s32 4294967295, %s379_s12   ;;  %p314_p0 = scmp.ge.s32.totalorder %s379_s12, 1  ;;  %s379_s12 = sphi %s401_s12, %s13_s12  }
   0x2   : > { %p138_p1 = scmp.lt.s32.totalorder %s379_s12, 3 }
   0x4   : > { %p139_p2 = pnand %p314_p0, %p138_p1 }
   0x5   : > { %s315_s14 = sshll.u32 (!%p139_p2), %s310_s13, 3 }
   0x6   : > { %142 = sbr.rel (%p139_p2) target bundleno = 32 (0x20), region = 32  ;;  %p163_p3 = scmp.lt.s32.totalorder (!%p139_p2), %s315_s14, 15 }
   0xb   : > { %s436_s14 = smov (!%p163_p3, %s315_s14), 15  ;;  %v371_v0 = vld [vmem:[%s432_s1] ss:$0 sm:$0xff] }
   0xc   : > { %s316_s15 = sshll.u32 %s436_s14, 2  ;;  %v372_v9 = vld [vmem:[%s433_s2] ss:$0 sm:$0xff] }
   0xd   : > { %s166_s18 = scalar_lea.vmem %s431_s0, %s316_s15  ;;  %s172_s25 = scalar_lea.vmem %s434_s3, %s316_s15 }
   0xe   : > { %v322_v1 = vld [vmem:[%s166_s18] sm:$0xff]   ;;  %v357_v2 = vld [vmem:[%s166_s18 + $0x8] sm:$0xff]   ;;  %v358_v3 = vld [vmem:[%s166_s18 + $0x10] sm:$0xff]  }
   0xf   : > { %v323_v4 = vunpack.c.l.bf16 %v322_v1  ;;  %v324_v5 = vunpack.c.h.bf16 %v322_v1  ;;  %v327_v6 = vunpack.c.l.bf16 %v357_v2  ;;  %v328_v7 = vunpack.c.h.bf16 %v357_v2  ;;  %v359_v8 = vld [vmem:[%s166_s18 + $0x18] sm:$0xff]  }
  0x10   : > { %v331_v10 = vunpack.c.l.bf16 %v358_v3  ;;  %v332_v11 = vunpack.c.h.bf16 %v358_v3  ;;  %v335_v12 = vunpack.c.l.bf16 %v359_v8  ;;  %v336_v13 = vunpack.c.h.bf16 %v359_v8 }
  0x11   : > { %v194_v14 = vmul.f32 %v371_v0, %v323_v4  ;;  %v195_v15 = vmul.f32 %v371_v0, %v324_v5  ;;  %v196_v16 = vmul.f32 %v371_v0, %v327_v6  ;;  %v197_v17 = vmul.f32 %v371_v0, %v328_v7 }
  0x12   : > { %v198_v18 = vmul.f32 %v371_v0, %v331_v10  ;;  %v199_v19 = vmul.f32 %v371_v0, %v332_v11  ;;  %v200_v20 = vmul.f32 %v371_v0, %v335_v12  ;;  %v201_v21 = vmul.f32 %v371_v0, %v336_v13 }
  0x13   : > { %v206_v22 = vadd.f32 %v372_v9, %v194_v14  ;;  %v207_v23 = vadd.f32 %v372_v9, %v195_v15  ;;  %v208_v24 = vadd.f32 %v372_v9, %v196_v16  ;;  %v209_v25 = vadd.f32 %v372_v9, %v197_v17 }
  0x14   : > { %v210_v26 = vadd.f32 %v372_v9, %v198_v18  ;;  %v211_v27 = vadd.f32 %v372_v9, %v199_v19  ;;  %v212_v28 = vadd.f32 %v372_v9, %v200_v20  ;;  %v213_v29 = vadd.f32 %v372_v9, %v201_v21 }
  0x15   : > { %vm214_vm0 = vcmp.gt.f32.partialorder %v206_v22, 0.0  ;;  %vm215_vm1 = vcmp.gt.f32.partialorder %v207_v23, 0.0  ;;  %v222_v30 = vmul.f32 0.2, %v206_v22  ;;  %v223_v31 = vmul.f32 0.2, %v207_v23 }
  0x16   : > { %vm216_vm2 = vcmp.gt.f32.partialorder %v208_v24, 0.0  ;;  %vm217_vm3 = vcmp.gt.f32.partialorder %v209_v25, 0.0  ;;  %v224_v32 = vmul.f32 0.2, %v208_v24  ;;  %v225_v33 = vmul.f32 0.2, %v209_v25 }
  0x17   : > { %v230_v34 = vsel %vm214_vm0, %v206_v22, %v222_v30  ;;  %v231_v35 = vsel %vm215_vm1, %v207_v23, %v223_v31  ;;  %vm218_vm4 = vcmp.gt.f32.partialorder %v210_v26, 0.0  ;;  %vm219_vm5 = vcmp.gt.f32.partialorder %v211_v27, 0.0 }
  0x18   : > { %v340_v36 = vpack.c.bf16 %v231_v35, %v230_v34  ;;  %v232_v37 = vsel %vm216_vm2, %v208_v24, %v224_v32  ;;  %v233_v38 = vsel %vm217_vm3, %v209_v25, %v225_v33  ;;  %v226_v39 = vmul.f32 0.2, %v210_v26 }
  0x19   : > { %v345_v40 = vpack.c.bf16 %v233_v38, %v232_v37  ;;  %v227_v41 = vmul.f32 0.2, %v211_v27  ;;  %vm220_vm6 = vcmp.gt.f32.partialorder %v212_v28, 0.0  ;;  %vm221_vm7 = vcmp.gt.f32.partialorder %v213_v29, 0.0 }
  0x1a   : > { %341 = vst [vmem:[%s172_s25] sm:$0xff] %v340_v36   ;;  %v234_v42 = vsel %vm218_vm4, %v210_v26, %v226_v39  ;;  %v228_v43 = vmul.f32 0.2, %v212_v28  ;;  %v229_v44 = vmul.f32 0.2, %v213_v29 }
  0x1b   : > { %360 = vst [vmem:[%s172_s25 + $0x8] sm:$0xff] %v345_v40   ;;  %v235_v45 = vsel %vm219_vm5, %v211_v27, %v227_v41 }
  0x1c   : > { %v350_v46 = vpack.c.bf16 %v235_v45, %v234_v42  ;;  %v236_v47 = vsel %vm220_vm6, %v212_v28, %v228_v43  ;;  %v237_v48 = vsel %vm221_vm7, %v213_v29, %v229_v44 }
  0x1d   : > { %v355_v49 = vpack.c.bf16 %v237_v48, %v236_v47 }
  0x1e   : > { %361 = vst [vmem:[%s172_s25 + $0x10] sm:$0xff] %v350_v46  }
  0x1f   : > { %362 = vst [vmem:[%s172_s25 + $0x18] sm:$0xff] %v355_v49  }
  0x20 PF: > { %s13_s12 = sadd.s32 1, %s379_s12  }
  0x21   : > { %p10_p4 = scmp.ge.s32.totalorder %s13_s12, 4  }
  0x23   :  { %12 = sbr.rel (!%p10_p4) target bundleno = 1 (0x1), region = 62 }

// kernel: discriminator_forward.11
= control target key start
LH: loop header
LB: loop body
LE: loop exit
PB: predicated region body
PF: predicated region fallthrough
CT: control target
= control target key end

     0   :  { %s5091_s12 = smov 0   ;;  %s5093_s13 = smov 0   ;;  %s6018_s0 = inlined_call_operand.vmem [shape: bf16[32,2048], index: 0, kind: input, shape index: {}]   ;;  %s6019_s1 = inlined_call_operand.vmem [shape: bf16[2048,256], index: 1, kind: input, shape index: {}]   ;;  %s6020_s2 = inlined_call_operand.vmem [shape: bf16[32,256], index: 2, kind: output, shape index: {0}]   ;;  %s6021_s3 = inlined_call_operand.vmem [shape: f32[8,256], index: 3, kind: output, shape index: {1}]  }
   0x1   :  { %s5095_s14 = smov 0   ;;  %s5097_s15 = smov 0  }
   0x2   :  { %s5099_s16 = smov 0  }
   0x3 LB: > { %s29_s17 = sadd.s32 1, %s5065_s15  ;;  %s4165_s18 = sadd.s32 4294967295, %s5069_s16   ;;  %s5069_s16 = sphi %s5099_s16, %s14_s16   ;;  %s5065_s15 = sphi %s5097_s15, %s6026_s15   ;;  %s5061_s14 = sphi %s5095_s14, %s6025_s14   ;;  %s5057_s13 = sphi %s5093_s13, %s6024_s13   ;;  %s5053_s12 = sphi %s5091_s12, %s6023_s12  }
   0x4   : > { %p31_p0 = scmp.ge.s32.totalorder %s29_s17, 2  ;;  %p77_p1 = scmp.ne.s32.totalorder %s5057_s13, %s5053_s12 }
   0x5   : > { %p78_p2 = scmp.eq.s32.totalorder %s5069_s16, 0  ;;  %p109_p4 = scmp.eq.s32.totalorder %s4165_s18, 1 }
   0x6   : > { %s6028_s17 = smov (%p31_p0, %s29_s17), 0  ;;  %s70_s20 = sadd.s32 1, %s5057_s13 }
   0x7   : > { %p79_p3 = por %p78_p2, %p77_p1  ;;  %s66_s19 = ssub.s32 %s5065_s15, %s6028_s17 }
   0x8   : > { %p68_p5 = scmp.eq.s32.totalorder %s66_s19, 0  ;;  %p5126_p6 = por %p109_p4, %p77_p1 }
   0x9   : > { %p4169_p7 = scmp.ge.s32.totalorder %s5069_s16, 2 }
   0xa   : > { %s5131_s22 = scalar_select %p68_p5, %s5057_s13, %s70_s20  }
   0xb   : > { %174 = sbr.rel (%p4169_p7) target bundleno = 276 (0x114), region = 20 }
  0x10   : > { %177 = sbr.rel (!%p79_p3) target bundleno = 276 (0x114), region = 24  ;;  %s179_s23 = sand.u32 (%p79_p3), 1, %s5057_s13  }
  0x11   : > { %s4171_s24 = sshll.u32 (%p79_p3), %s5065_s15, 2  ;;  %s4170_s25 = sshll.u32 (%p79_p3), %s179_s23, 10 }
  0x12   : > { %s5139_s28 = scalar_lea.vmem (%p79_p3), %s6019_s1, %s4171_s24  ;;  %s5143_s29 = scalar_lea.vmem (%p79_p3), [#allocation3], %s4170_s25 }
  0x13   : > { %v203_v0 = vld [vmem:[%s5139_s28] sm:$0xf] (%p79_p3)  ;;  %v205_v1 = vld [vmem:[%s5139_s28 + $0x8] sm:$0xf] (%p79_p3)  ;;  %v207_v2 = vld [vmem:[%s5139_s28 + $0x10] sm:$0xf] (%p79_p3) }
  0x14   : > { %204 = vst [vmem:[%s5143_s29] sm:$0xf] (%p79_p3), %v203_v0  ;;  %v209_v3 = vld [vmem:[%s5139_s28 + $0x18] sm:$0xf] (%p79_p3)  ;;  %v211_v4 = vld [vmem:[%s5139_s28 + $0x20] sm:$0xf] (%p79_p3) }
  0x15   : > { %206 = vst [vmem:[%s5143_s29 + $0x4] sm:$0xf] %v205_v1  ;;  %v213_v5 = vld [vmem:[%s5139_s28 + $0x28] sm:$0xf]  ;;  %v215_v6 = vld [vmem:[%s5139_s28 + $0x30] sm:$0xf] }
  0x16   : > { %208 = vst [vmem:[%s5143_s29 + $0x8] sm:$0xf] %v207_v2  ;;  %v217_v7 = vld [vmem:[%s5139_s28 + $0x38] sm:$0xf]  ;;  %v219_v8 = vld [vmem:[%s5139_s28 + $0x40] sm:$0xf] }
  0x17   : > { %210 = vst [vmem:[%s5143_s29 + $0xc] sm:$0xf] %v209_v3  ;;  %v221_v9 = vld [vmem:[%s5139_s28 + $0x48] sm:$0xf]  ;;  %v223_v10 = vld [vmem:[%s5139_s28 + $0x50] sm:$0xf] }
  0x18   : > { %212 = vst [vmem:[%s5143_s29 + $0x10] sm:$0xf] %v211_v4  ;;  %v225_v11 = vld [vmem:[%s5139_s28 + $0x58] sm:$0xf]  ;;  %v227_v12 = vld [vmem:[%s5139_s28 + $0x60] sm:$0xf] }
  0x19   : > { %214 = vst [vmem:[%s5143_s29 + $0x14] sm:$0xf] %v213_v5  ;;  %v229_v13 = vld [vmem:[%s5139_s28 + $0x68] sm:$0xf]  ;;  %v231_v14 = vld [vmem:[%s5139_s28 + $0x70] sm:$0xf] }
  0x1a   : > { %216 = vst [vmem:[%s5143_s29 + $0x18] sm:$0xf] %v215_v6  ;;  %v233_v15 = vld [vmem:[%s5139_s28 + $0x78] sm:$0xf]  ;;  %v235_v16 = vld [vmem:[%s5139_s28 + $0x80] sm:$0xf] }
  0x1b   : > { %218 = vst [vmem:[%s5143_s29 + $0x1c] sm:$0xf] %v217_v7  ;;  %v237_v17 = vld [vmem:[%s5139_s28 + $0x88] sm:$0xf]  ;;  %v239_v18 = vld [vmem:[%s5139_s28 + $0x90] sm:$0xf] }
  0x1c   : > { %220 = vst [vmem:[%s5143_s29 + $0x20] sm:$0xf] %v219_v8  ;;  %v241_v19 = vld [vmem:[%s5139_s28 + $0x98] sm:$0xf]  ;;  %v243_v20 = vld [vmem:[%s5139_s28 + $0xa0] sm:$0xf] }
  0x1d   : > { %222 = vst [vmem:[%s5143_s29 + $0x24] sm:$0xf] %v221_v9  ;;  %v245_v21 = vld [vmem:[%s5139_s28 + $0xa8] sm:$0xf]  ;;  %v247_v22 = vld [vmem:[%s5139_s28 + $0xb0] sm:$0xf] }
  0x1e   : > { %224 = vst [vmem:[%s5143_s29 + $0x28] sm:$0xf] %v223_v10  ;;  %v249_v23 = vld [vmem:[%s5139_s28 + $0xb8] sm:$0xf]  ;;  %v251_v24 = vld [vmem:[%s5139_s28 + $0xc0] sm:$0xf] }
  0x1f   : > { %226 = vst [vmem:[%s5143_s29 + $0x2c] sm:$0xf] %v225_v11  ;;  %v253_v25 = vld [vmem:[%s5139_s28 + $0xc8] sm:$0xf]  ;;  %v255_v26 = vld [vmem:[%s5139_s28 + $0xd0] sm:$0xf] }
  0x20   : > { %228 = vst [vmem:[%s5143_s29 + $0x30] sm:$0xf] %v227_v12  ;;  %v257_v27 = vld [vmem:[%s5139_s28 + $0xd8] sm:$0xf]  ;;  %v259_v28 = vld [vmem:[%s5139_s28 + $0xe0] sm:$0xf] }
  0x21   : > { %230 = vst [vmem:[%s5143_s29 + $0x34] sm:$0xf] %v229_v13  ;;  %v261_v29 = vld [vmem:[%s5139_s28 + $0xe8] sm:$0xf]  ;;  %v263_v30 = vld [vmem:[%s5139_s28 + $0xf0] sm:$0xf] }
  0x22   : > { %232 = vst [vmem:[%s5143_s29 + $0x38] sm:$0xf] %v231_v14  ;;  %v265_v31 = vld [vmem:[%s5139_s28 + $0xf8] sm:$0xf]  ;;  %v267_v32 = vld [vmem:[%s5139_s28 + $0x100] sm:$0xf] }
  0x23   : > { %234 = vst [vmem:[%s5143_s29 + $0x3c] sm:$0xf] %v233_v15  ;;  %v269_v33 = vld [vmem:[%s5139_s28 + $0x108] sm:$0xf]  ;;  %v271_v34 = vld [vmem:[%s5139_s28 + $0x110] sm:$0xf] }
  0x24   : > { %236 = vst [vmem:[%s5143_s29 + $0x40] sm:$0xf] %v235_v16  ;;  %v273_v35 = vld [vmem:[%s5139_s28 + $0x118] sm:$0xf]  ;;  %v275_v36 = vld [vmem:[%s5139_s28 + $0x120] sm:$0xf] }
  0x25   : > { %238 = vst [vmem:[%s5143_s29 + $0x44] sm:$0xf] %v237_v17  ;;  %v277_v37 = vld [vmem:[%s5139_s28 + $0x128] sm:$0xf]  ;;  %v279_v38 = vld [vmem:[%s5139_s28 + $0x130] sm:$0xf] }
  0x26   : > { %240 = vst [vmem:[%s5143_s29 + $0x48] sm:$0xf] %v239_v18  ;;  %v281_v39 = vld [vmem:[%s5139_s28 + $0x138] sm:$0xf]  ;;  %v283_v40 = vld [vmem:[%s5139_s28 + $0x140] sm:$0xf] }
  0x27   : > { %242 = vst [vmem:[%s5143_s29 + $0x4c] sm:$0xf] %v241_v19  ;;  %v285_v41 = vld [vmem:[%s5139_s28 + $0x148] sm:$0xf]  ;;  %v287_v42 = vld [vmem:[%s5139_s28 + $0x150] sm:$0xf] }
  0x28   : > { %244 = vst [vmem:[%s5143_s29 + $0x50] sm:$0xf] %v243_v20  ;;  %v289_v43 = vld [vmem:[%s5139_s28 + $0x158] sm:$0xf]  ;;  %v291_v44 = vld [vmem:[%s5139_s28 + $0x160] sm:$0xf] }
  0x29   : > { %246 = vst [vmem:[%s5143_s29 + $0x54] sm:$0xf] %v245_v21  ;;  %v293_v45 = vld [vmem:[%s5139_s28 + $0x168] sm:$0xf]  ;;  %v295_v46 = vld [vmem:[%s5139_s28 + $0x170] sm:$0xf] }
  0x2a   : > { %248 = vst [vmem:[%s5143_s29 + $0x58] sm:$0xf] %v247_v22  ;;  %v297_v47 = vld [vmem:[%s5139_s28 + $0x178] sm:$0xf]  ;;  %v299_v48 = vld [vmem:[%s5139_s28 + $0x180] sm:$0xf] }
  0x2b   : > { %250 = vst [vmem:[%s5143_s29 + $0x5c] sm:$0xf] %v249_v23  ;;  %v301_v49 = vld [vmem:[%s5139_s28 + $0x188] sm:$0xf]  ;;  %v303_v50 = vld [vmem:[%s5139_s28 + $0x190] sm:$0xf] }
  0x2c   : > { %252 = vst [vmem:[%s5143_s29 + $0x60] sm:$0xf] %v251_v24  ;;  %v305_v51 = vld [vmem:[%s5139_s28 + $0x198] sm:$0xf]  ;;  %v307_v52 = vld [vmem:[%s5139_s28 + $0x1a0] sm:$0xf] }
  0x2d   : > { %254 = vst [vmem:[%s5143_s29 + $0x64] sm:$0xf] %v253_v25  ;;  %v309_v53 = vld [vmem:[%s5139_s28 + $0x1a8] sm:$0xf]  ;;  %v311_v54 = vld [vmem:[%s5139_s28 + $0x1b0] sm:$0xf] }
  0x2e   : > { %256 = vst [vmem:[%s5143_s29 + $0x68] sm:$0xf] %v255_v26  ;;  %v313_v55 = vld [vmem:[%s5139_s28 + $0x1b8] sm:$0xf]  ;;  %v315_v56 = vld [vmem:[%s5139_s28 + $0x1c0] sm:$0xf] }
  0x2f   : > { %258 = vst [vmem:[%s5143_s29 + $0x6c] sm:$0xf] %v257_v27  ;;  %v317_v57 = vld [vmem:[%s5139_s28 + $0x1c8] sm:$0xf]  ;;  %v319_v58 = vld [vmem:[%s5139_s28 + $0x1d0] sm:$0xf] }
  0x30   : > { %260 = vst [vmem:[%s5143_s29 + $0x70] sm:$0xf] %v259_v28  ;;  %v321_v59 = vld [vmem:[%s5139_s28 + $0x1d8] sm:$0xf]  ;;  %v323_v60 = vld [vmem:[%s5139_s28 + $0x1e0] sm:$0xf] }
  0x31   : > { %262 = vst [vmem:[%s5143_s29 + $0x74] sm:$0xf] %v261_v29  ;;  %v325_v61 = vld [vmem:[%s5139_s28 + $0x1e8] sm:$0xf]  ;;  %v327_v62 = vld [vmem:[%s5139_s28 + $0x1f0] sm:$0xf] }
  0x32   : > { %264 = vst [vmem:[%s5143_s29 + $0x78] sm:$0xf] %v263_v30  ;;  %v329_v63 = vld [vmem:[%s5139_s28 + $0x1f8] sm:$0xf]  ;;  %v331_v0 = vld [vmem:[%s5139_s28 + $0x200] sm:$0xf] }
  0x33   : > { %266 = vst [vmem:[%s5143_s29 + $0x7c] sm:$0xf] %v265_v31  ;;  %v333_v1 = vld [vmem:[%s5139_s28 + $0x208] sm:$0xf]  ;;  %v335_v2 = vld [vmem:[%s5139_s28 + $0x210] sm:$0xf] }
  0x34   : > { %268 = vst [vmem:[%s5143_s29 + $0x80] sm:$0xf] %v267_v32  ;;  %v337_v3 = vld [vmem:[%s5139_s28 + $0x218] sm:$0xf]  ;;  %v339_v4 = vld [vmem:[%s5139_s28 + $0x220] sm:$0xf] }
  0x35   : > { %270 = vst [vmem:[%s5143_s29 + $0x84] sm:$0xf] %v269_v33  ;;  %v341_v5 = vld [vmem:[%s5139_s28 + $0x228] sm:$0xf]  ;;  %v343_v6 = vld [vmem:[%s5139_s28 + $0x230] sm:$0xf] }
  0x36   : > { %272 = vst [vmem:[%s5143_s29 + $0x88] sm:$0xf] %v271_v34  ;;  %v345_v7 = vld [vmem:[%s5139_s28 + $0x238] sm:$0xf]  ;;  %v347_v8 = vld [vmem:[%s5139_s28 + $0x240] sm:$0xf] }
  0x37   : > { %274 = vst [vmem:[%s5143_s29 + $0x8c] sm:$0xf] %v273_v35  ;;  %v349_v9 = vld [vmem:[%s5139_s28 + $0x248] sm:$0xf]  ;;  %v351_v10 = vld [vmem:[%s5139_s28 + $0x250] sm:$0xf] }
  0x38   : > { %276 = vst [vmem:[%s5143_s29 + $0x90] sm:$0xf] %v275_v36  ;;  %v353_v11 = vld [vmem:[%s5139_s28 + $0x258] sm:$0xf]  ;;  %v355_v12 = vld [vmem:[%s5139_s28 + $0x260] sm:$0xf] }
  0x39   : > { %278 = vst [vmem:[%s5143_s29 + $0x94] sm:$0xf] %v277_v37  ;;  %v357_v13 = vld [vmem:[%s5139_s28 + $0x268] sm:$0xf]  ;;  %v359_v14 = vld [vmem:[%s5139_s28 + $0x270] sm:$0xf] }
  0x3a   : > { %280 = vst [vmem:[%s5143_s29 + $0x98] sm:$0xf] %v279_v38  ;;  %v361_v15 = vld [vmem:[%s5139_s28 + $0x278] sm:$0xf]  ;;  %v363_v16 = vld [vmem:[%s5139_s28 + $0x280] sm:$0xf] }
  0x3b   : > { %282 = vst [vmem:[%s5143_s29 + $0x9c] sm:$0xf] %v281_v39  ;;  %v365_v17 = vld [vmem:[%s5139_s28 + $0x288] sm:$0xf]  ;;  %v367_v18 = vld [vmem:[%s5139_s28 + $0x290] sm:$0xf] }
  0x3c   : > { %284 = vst [vmem:[%s5143_s29 + $0xa0] sm:$0xf] %v283_v40  ;;  %v369_v19 = vld [vmem:[%s5139_s28 + $0x298] sm:$0xf]  ;;  %v371_v20 = vld [vmem:[%s5139_s28 + $0x2a0] sm:$0xf] }
  0x3d   : > { %286 = vst [vmem:[%s5143_s29 + $0xa4] sm:$0xf] %v285_v41  ;;  %v373_v21 = vld [vmem:[%s5139_s28 + $0x2a8] sm:$0xf]  ;;  %v375_v22 = vld [vmem:[%s5139_s28 + $0x2b0] sm:$0xf] }
  0x3e   : > { %288 = vst [vmem:[%s5143_s29 + $0xa8] sm:$0xf] %v287_v42  ;;  %v377_v23 = vld [vmem:[%s5139_s28 + $0x2b8] sm:$0xf]  ;;  %v379_v24 = vld [vmem:[%s5139_s28 + $0x2c0] sm:$0xf] }
  0x3f   : > { %290 = vst [vmem:[%s5143_s29 + $0xac] sm:$0xf] %v289_v43  ;;  %v381_v25 = vld [vmem:[%s5139_s28 + $0x2c8] sm:$0xf]  ;;  %v383_v26 = vld [vmem:[%s5139_s28 + $0x2d0] sm:$0xf] }
  0x40   : > { %292 = vst [vmem:[%s5143_s29 + $0xb0] sm:$0xf] %v291_v44  ;;  %v385_v27 = vld [vmem:[%s5139_s28 + $0x2d8] sm:$0xf]  ;;  %v387_v28 = vld [vmem:[%s5139_s28 + $0x2e0] sm:$0xf] }
  0x41   : > { %294 = vst [vmem:[%s5143_s29 + $0xb4] sm:$0xf] %v293_v45  ;;  %v389_v29 = vld [vmem:[%s5139_s28 + $0x2e8] sm:$0xf]  ;;  %v391_v30 = vld [vmem:[%s5139_s28 + $0x2f0] sm:$0xf] }
  0x42   : > { %296 = vst [vmem:[%s5143_s29 + $0xb8] sm:$0xf] %v295_v46  ;;  %v393_v31 = vld [vmem:[%s5139_s28 + $0x2f8] sm:$0xf]  ;;  %v395_v32 = vld [vmem:[%s5139_s28 + $0x300] sm:$0xf] }
  0x43   : > { %298 = vst [vmem:[%s5143_s29 + $0xbc] sm:$0xf] %v297_v47  ;;  %v397_v33 = vld [vmem:[%s5139_s28 + $0x308] sm:$0xf]  ;;  %v399_v34 = vld [vmem:[%s5139_s28 + $0x310] sm:$0xf] }
  0x44   : > { %300 = vst [vmem:[%s5143_s29 + $0xc0] sm:$0xf] %v299_v48  ;;  %v401_v35 = vld [vmem:[%s5139_s28 + $0x318] sm:$0xf]  ;;  %v403_v36 = vld [vmem:[%s5139_s28 + $0x320] sm:$0xf] }
  0x45   : > { %302 = vst [vmem:[%s5143_s29 + $0xc4] sm:$0xf] %v301_v49  ;;  %v405_v37 = vld [vmem:[%s5139_s28 + $0x328] sm:$0xf]  ;;  %v407_v38 = vld [vmem:[%s5139_s28 + $0x330] sm:$0xf] }
  0x46   : > { %304 = vst [vmem:[%s5143_s29 + $0xc8] sm:$0xf] %v303_v50  ;;  %v409_v39 = vld [vmem:[%s5139_s28 + $0x338] sm:$0xf]  ;;  %v411_v40 = vld [vmem:[%s5139_s28 + $0x340] sm:$0xf] }
  0x47   : > { %306 = vst [vmem:[%s5143_s29 + $0xcc] sm:$0xf] %v305_v51  ;;  %v413_v41 = vld [vmem:[%s5139_s28 + $0x348] sm:$0xf]  ;;  %v415_v42 = vld [vmem:[%s5139_s28 + $0x350] sm:$0xf] }
  0x48   : > { %308 = vst [vmem:[%s5143_s29 + $0xd0] sm:$0xf] %v307_v52  ;;  %v417_v43 = vld [vmem:[%s5139_s28 + $0x358] sm:$0xf]  ;;  %v419_v44 = vld [vmem:[%s5139_s28 + $0x360] sm:$0xf] }
  0x49   : > { %310 = vst [vmem:[%s5143_s29 + $0xd4] sm:$0xf] %v309_v53  ;;  %v421_v45 = vld [vmem:[%s5139_s28 + $0x368] sm:$0xf]  ;;  %v423_v46 = vld [vmem:[%s5139_s28 + $0x370] sm:$0xf] }
  0x4a   : > { %312 = vst [vmem:[%s5143_s29 + $0xd8] sm:$0xf] %v311_v54  ;;  %v425_v47 = vld [vmem:[%s5139_s28 + $0x378] sm:$0xf]  ;;  %v427_v48 = vld [vmem:[%s5139_s28 + $0x380] sm:$0xf] }
  0x4b   : > { %314 = vst [vmem:[%s5143_s29 + $0xdc] sm:$0xf] %v313_v55  ;;  %v429_v49 = vld [vmem:[%s5139_s28 + $0x388] sm:$0xf]  ;;  %v431_v50 = vld [vmem:[%s5139_s28 + $0x390] sm:$0xf] }
  0x4c   : > { %316 = vst [vmem:[%s5143_s29 + $0xe0] sm:$0xf] %v315_v56  ;;  %v433_v51 = vld [vmem:[%s5139_s28 + $0x398] sm:$0xf]  ;;  %v435_v52 = vld [vmem:[%s5139_s28 + $0x3a0] sm:$0xf] }
  0x4d   : > { %318 = vst [vmem:[%s5143_s29 + $0xe4] sm:$0xf] %v317_v57  ;;  %v437_v53 = vld [vmem:[%s5139_s28 + $0x3a8] sm:$0xf]  ;;  %v439_v54 = vld [vmem:[%s5139_s28 + $0x3b0] sm:$0xf] }
  0x4e   : > { %320 = vst [vmem:[%s5143_s29 + $0xe8] sm:$0xf] %v319_v58  ;;  %v441_v55 = vld [vmem:[%s5139_s28 + $0x3b8] sm:$0xf]  ;;  %v443_v56 = vld [vmem:[%s5139_s28 + $0x3c0] sm:$0xf] }
  0x4f   : > { %322 = vst [vmem:[%s5143_s29 + $0xec] sm:$0xf] %v321_v59  ;;  %v445_v57 = vld [vmem:[%s5139_s28 + $0x3c8] sm:$0xf]  ;;  %v447_v58 = vld [vmem:[%s5139_s28 + $0x3d0] sm:$0xf] }
  0x50   : > { %324 = vst [vmem:[%s5143_s29 + $0xf0] sm:$0xf] %v323_v60  ;;  %v449_v59 = vld [vmem:[%s5139_s28 + $0x3d8] sm:$0xf]  ;;  %v451_v60 = vld [vmem:[%s5139_s28 + $0x3e0] sm:$0xf] }
  0x51   : > { %326 = vst [vmem:[%s5143_s29 + $0xf4] sm:$0xf] %v325_v61  ;;  %v453_v61 = vld [vmem:[%s5139_s28 + $0x3e8] sm:$0xf] }
  0x52   : > { %328 = vst [vmem:[%s5143_s29 + $0xf8] sm:$0xf] %v327_v62  ;;  %v455_v62 = vld [vmem:[%s5139_s28 + $0x3f0] sm:$0xf] }
  0x53   : > { %330 = vst [vmem:[%s5143_s29 + $0xfc] sm:$0xf] %v329_v63  ;;  %v457_v63 = vld [vmem:[%s5139_s28 + $0x3f8] sm:$0xf] }
  0x54   : > { %332 = vst [vmem:[%s5143_s29 + $0x100] sm:$0xf] %v331_v0  ;;  %v459_v0 = vld [vmem:[%s5139_s28 + $0x400] sm:$0xf] }
  0x55   : > { %334 = vst [vmem:[%s5143_s29 + $0x104] sm:$0xf] %v333_v1  ;;  %v461_v1 = vld [vmem:[%s5139_s28 + $0x408] sm:$0xf] }
  0x56   : > { %336 = vst [vmem:[%s5143_s29 + $0x108] sm:$0xf] %v335_v2  ;;  %v463_v2 = vld [vmem:[%s5139_s28 + $0x410] sm:$0xf] }
  0x57   : > { %338 = vst [vmem:[%s5143_s29 + $0x10c] sm:$0xf] %v337_v3  ;;  %v465_v3 = vld [vmem:[%s5139_s28 + $0x418] sm:$0xf] }
  0x58   : > { %340 = vst [vmem:[%s5143_s29 + $0x110] sm:$0xf] %v339_v4  ;;  %v467_v4 = vld [vmem:[%s5139_s28 + $0x420] sm:$0xf] }
  0x59   : > { %342 = vst [vmem:[%s5143_s29 + $0x114] sm:$0xf] %v341_v5  ;;  %v469_v5 = vld [vmem:[%s5139_s28 + $0x428] sm:$0xf] }
  0x5a   : > { %344 = vst [vmem:[%s5143_s29 + $0x118] sm:$0xf] %v343_v6  ;;  %v471_v6 = vld [vmem:[%s5139_s28 + $0x430] sm:$0xf] }
  0x5b   : > { %346 = vst [vmem:[%s5143_s29 + $0x11c] sm:$0xf] %v345_v7  ;;  %v473_v7 = vld [vmem:[%s5139_s28 + $0x438] sm:$0xf] }
  0x5c   : > { %348 = vst [vmem:[%s5143_s29 + $0x120] sm:$0xf] %v347_v8  ;;  %v475_v8 = vld [vmem:[%s5139_s28 + $0x440] sm:$0xf] }
  0x5d   : > { %350 = vst [vmem:[%s5143_s29 + $0x124] sm:$0xf] %v349_v9  ;;  %v477_v9 = vld [vmem:[%s5139_s28 + $0x448] sm:$0xf] }
  0x5e   : > { %352 = vst [vmem:[%s5143_s29 + $0x128] sm:$0xf] %v351_v10  ;;  %v479_v10 = vld [vmem:[%s5139_s28 + $0x450] sm:$0xf] }
  0x5f   : > { %354 = vst [vmem:[%s5143_s29 + $0x12c] sm:$0xf] %v353_v11  ;;  %v481_v11 = vld [vmem:[%s5139_s28 + $0x458] sm:$0xf] }
  0x60   : > { %356 = vst [vmem:[%s5143_s29 + $0x130] sm:$0xf] %v355_v12  ;;  %v483_v12 = vld [vmem:[%s5139_s28 + $0x460] sm:$0xf] }
  0x61   : > { %358 = vst [vmem:[%s5143_s29 + $0x134] sm:$0xf] %v357_v13  ;;  %v485_v13 = vld [vmem:[%s5139_s28 + $0x468] sm:$0xf] }
  0x62   : > { %360 = vst [vmem:[%s5143_s29 + $0x138] sm:$0xf] %v359_v14  ;;  %v487_v14 = vld [vmem:[%s5139_s28 + $0x470] sm:$0xf] }
  0x63   : > { %362 = vst [vmem:[%s5143_s29 + $0x13c] sm:$0xf] %v361_v15  ;;  %v489_v15 = vld [vmem:[%s5139_s28 + $0x478] sm:$0xf] }
  0x64   : > { %364 = vst [vmem:[%s5143_s29 + $0x140] sm:$0xf] %v363_v16  ;;  %v491_v16 = vld [vmem:[%s5139_s28 + $0x480] sm:$0xf] }
  0x65   : > { %366 = vst [vmem:[%s5143_s29 + $0x144] sm:$0xf] %v365_v17  ;;  %v493_v17 = vld [vmem:[%s5139_s28 + $0x488] sm:$0xf] }
  0x66   : > { %368 = vst [vmem:[%s5143_s29 + $0x148] sm:$0xf] %v367_v18  ;;  %v495_v18 = vld [vmem:[%s5139_s28 + $0x490] sm:$0xf] }
  0x67   : > { %370 = vst [vmem:[%s5143_s29 + $0x14c] sm:$0xf] %v369_v19  ;;  %v497_v19 = vld [vmem:[%s5139_s28 + $0x498] sm:$0xf] }
  0x68   : > { %372 = vst [vmem:[%s5143_s29 + $0x150] sm:$0xf] %v371_v20  ;;  %v499_v20 = vld [vmem:[%s5139_s28 + $0x4a0] sm:$0xf] }
  0x69   : > { %374 = vst [vmem:[%s5143_s29 + $0x154] sm:$0xf] %v373_v21  ;;  %v501_v21 = vld [vmem:[%s5139_s28 + $0x4a8] sm:$0xf] }
  0x6a   : > { %376 = vst [vmem:[%s5143_s29 + $0x158] sm:$0xf] %v375_v22  ;;  %v503_v22 = vld [vmem:[%s5139_s28 + $0x4b0] sm:$0xf] }
  0x6b   : > { %378 = vst [vmem:[%s5143_s29 + $0x15c] sm:$0xf] %v377_v23  ;;  %v505_v23 = vld [vmem:[%s5139_s28 + $0x4b8] sm:$0xf] }
  0x6c   : > { %380 = vst [vmem:[%s5143_s29 + $0x160] sm:$0xf] %v379_v24  ;;  %v507_v24 = vld [vmem:[%s5139_s28 + $0x4c0] sm:$0xf] }
  0x6d   : > { %382 = vst [vmem:[%s5143_s29 + $0x164] sm:$0xf] %v381_v25  ;;  %v509_v25 = vld [vmem:[%s5139_s28 + $0x4c8] sm:$0xf] }
  0x6e   : > { %384 = vst [vmem:[%s5143_s29 + $0x168] sm:$0xf] %v383_v26  ;;  %v511_v26 = vld [vmem:[%s5139_s28 + $0x4d0] sm:$0xf] }
  0x6f   : > { %386 = vst [vmem:[%s5143_s29 + $0x16c] sm:$0xf] %v385_v27  ;;  %v513_v27 = vld [vmem:[%s5139_s28 + $0x4d8] sm:$0xf] }
  0x70   : > { %388 = vst [vmem:[%s5143_s29 + $0x170] sm:$0xf] %v387_v28  ;;  %v515_v28 = vld [vmem:[%s5139_s28 + $0x4e0] sm:$0xf] }
  0x71   : > { %390 = vst [vmem:[%s5143_s29 + $0x174] sm:$0xf] %v389_v29  ;;  %v517_v29 = vld [vmem:[%s5139_s28 + $0x4e8] sm:$0xf] }
  0x72   : > { %392 = vst [vmem:[%s5143_s29 + $0x178] sm:$0xf] %v391_v30  ;;  %v519_v30 = vld [vmem:[%s5139_s28 + $0x4f0] sm:$0xf] }
  0x73   : > { %394 = vst [vmem:[%s5143_s29 + $0x17c] sm:$0xf] %v393_v31  ;;  %v521_v31 = vld [vmem:[%s5139_s28 + $0x4f8] sm:$0xf] }
  0x74   : > { %396 = vst [vmem:[%s5143_s29 + $0x180] sm:$0xf] %v395_v32  ;;  %v523_v32 = vld [vmem:[%s5139_s28 + $0x500] sm:$0xf] }
  0x75   : > { %398 = vst [vmem:[%s5143_s29 + $0x184] sm:$0xf] %v397_v33  ;;  %v525_v33 = vld [vmem:[%s5139_s28 + $0x508] sm:$0xf] }
  0x76   : > { %400 = vst [vmem:[%s5143_s29 + $0x188] sm:$0xf] %v399_v34  ;;  %v527_v34 = vld [vmem:[%s5139_s28 + $0x510] sm:$0xf] }
  0x77   : > { %402 = vst [vmem:[%s5143_s29 + $0x18c] sm:$0xf] %v401_v35  ;;  %v529_v35 = vld [vmem:[%s5139_s28 + $0x518] sm:$0xf] }
  0x78   : > { %404 = vst [vmem:[%s5143_s29 + $0x190] sm:$0xf] %v403_v36  ;;  %v531_v36 = vld [vmem:[%s5139_s28 + $0x520] sm:$0xf] }
  0x79   : > { %406 = vst [vmem:[%s5143_s29 + $0x194] sm:$0xf] %v405_v37  ;;  %v533_v37 = vld [vmem:[%s5139_s28 + $0x528] sm:$0xf] }
  0x7a   : > { %408 = vst [vmem:[%s5143_s29 + $0x198] sm:$0xf] %v407_v38  ;;  %v535_v38 = vld [vmem:[%s5139_s28 + $0x530] sm:$0xf] }
  0x7b   : > { %410 = vst [vmem:[%s5143_s29 + $0x19c] sm:$0xf] %v409_v39  ;;  %v537_v39 = vld [vmem:[%s5139_s28 + $0x538] sm:$0xf] }
  0x7c   : > { %412 = vst [vmem:[%s5143_s29 + $0x1a0] sm:$0xf] %v411_v40  ;;  %v539_v40 = vld [vmem:[%s5139_s28 + $0x540] sm:$0xf] }
  0x7d   : > { %414 = vst [vmem:[%s5143_s29 + $0x1a4] sm:$0xf] %v413_v41  ;;  %v541_v41 = vld [vmem:[%s5139_s28 + $0x548] sm:$0xf] }
  0x7e   : > { %416 = vst [vmem:[%s5143_s29 + $0x1a8] sm:$0xf] %v415_v42  ;;  %v543_v42 = vld [vmem:[%s5139_s28 + $0x550] sm:$0xf] }
  0x7f   : > { %418 = vst [vmem:[%s5143_s29 + $0x1ac] sm:$0xf] %v417_v43  ;;  %v545_v43 = vld [vmem:[%s5139_s28 + $0x558] sm:$0xf] }
  0x80   : > { %420 = vst [vmem:[%s5143_s29 + $0x1b0] sm:$0xf] %v419_v44  ;;  %v547_v44 = vld [vmem:[%s5139_s28 + $0x560] sm:$0xf] }
  0x81   : > { %422 = vst [vmem:[%s5143_s29 + $0x1b4] sm:$0xf] %v421_v45  ;;  %v549_v45 = vld [vmem:[%s5139_s28 + $0x568] sm:$0xf] }
  0x82   : > { %424 = vst [vmem:[%s5143_s29 + $0x1b8] sm:$0xf] %v423_v46  ;;  %v551_v46 = vld [vmem:[%s5139_s28 + $0x570] sm:$0xf] }
  0x83   : > { %426 = vst [vmem:[%s5143_s29 + $0x1bc] sm:$0xf] %v425_v47  ;;  %v553_v47 = vld [vmem:[%s5139_s28 + $0x578] sm:$0xf] }
  0x84   : > { %428 = vst [vmem:[%s5143_s29 + $0x1c0] sm:$0xf] %v427_v48  ;;  %v555_v48 = vld [vmem:[%s5139_s28 + $0x580] sm:$0xf] }
  0x85   : > { %430 = vst [vmem:[%s5143_s29 + $0x1c4] sm:$0xf] %v429_v49  ;;  %v557_v49 = vld [vmem:[%s5139_s28 + $0x588] sm:$0xf] }
  0x86   : > { %432 = vst [vmem:[%s5143_s29 + $0x1c8] sm:$0xf] %v431_v50  ;;  %v559_v50 = vld [vmem:[%s5139_s28 + $0x590] sm:$0xf] }
  0x87   : > { %434 = vst [vmem:[%s5143_s29 + $0x1cc] sm:$0xf] %v433_v51  ;;  %v561_v51 = vld [vmem:[%s5139_s28 + $0x598] sm:$0xf] }
  0x88   : > { %436 = vst [vmem:[%s5143_s29 + $0x1d0] sm:$0xf] %v435_v52  ;;  %v563_v52 = vld [vmem:[%s5139_s28 + $0x5a0] sm:$0xf] }
  0x89   : > { %438 = vst [vmem:[%s5143_s29 + $0x1d4] sm:$0xf] %v437_v53  ;;  %v565_v53 = vld [vmem:[%s5139_s28 + $0x5a8] sm:$0xf] }
  0x8a   : > { %440 = vst [vmem:[%s5143_s29 + $0x1d8] sm:$0xf] %v439_v54  ;;  %v567_v54 = vld [vmem:[%s5139_s28 + $0x5b0] sm:$0xf] }
  0x8b   : > { %442 = vst [vmem:[%s5143_s29 + $0x1dc] sm:$0xf] %v441_v55  ;;  %v569_v55 = vld [vmem:[%s5139_s28 + $0x5b8] sm:$0xf] }
  0x8c   : > { %444 = vst [vmem:[%s5143_s29 + $0x1e0] sm:$0xf] %v443_v56  ;;  %v571_v56 = vld [vmem:[%s5139_s28 + $0x5c0] sm:$0xf] }
  0x8d   : > { %446 = vst [vmem:[%s5143_s29 + $0x1e4] sm:$0xf] %v445_v57  ;;  %v573_v57 = vld [vmem:[%s5139_s28 + $0x5c8] sm:$0xf] }
  0x8e   : > { %448 = vst [vmem:[%s5143_s29 + $0x1e8] sm:$0xf] %v447_v58  ;;  %v575_v58 = vld [vmem:[%s5139_s28 + $0x5d0] sm:$0xf] }
  0x8f   : > { %450 = vst [vmem:[%s5143_s29 + $0x1ec] sm:$0xf] %v449_v59  ;;  %v577_v59 = vld [vmem:[%s5139_s28 + $0x5d8] sm:$0xf] }
  0x90   : > { %452 = vst [vmem:[%s5143_s29 + $0x1f0] sm:$0xf] %v451_v60  ;;  %v579_v60 = vld [vmem:[%s5139_s28 + $0x5e0] sm:$0xf] }
  0x91   : > { %454 = vst [vmem:[%s5143_s29 + $0x1f4] sm:$0xf] %v453_v61  ;;  %v581_v61 = vld [vmem:[%s5139_s28 + $0x5e8] sm:$0xf] }
  0x92   : > { %456 = vst [vmem:[%s5143_s29 + $0x1f8] sm:$0xf] %v455_v62  ;;  %v583_v62 = vld [vmem:[%s5139_s28 + $0x5f0] sm:$0xf] }
  0x93   : > { %458 = vst [vmem:[%s5143_s29 + $0x1fc] sm:$0xf] %v457_v63  ;;  %v585_v63 = vld [vmem:[%s5139_s28 + $0x5f8] sm:$0xf] }
  0x94   : > { %460 = vst [vmem:[%s5143_s29 + $0x200] sm:$0xf] %v459_v0  ;;  %v587_v0 = vld [vmem:[%s5139_s28 + $0x600] sm:$0xf] }
  0x95   : > { %462 = vst [vmem:[%s5143_s29 + $0x204] sm:$0xf] %v461_v1  ;;  %v589_v1 = vld [vmem:[%s5139_s28 + $0x608] sm:$0xf] }
  0x96   : > { %464 = vst [vmem:[%s5143_s29 + $0x208] sm:$0xf] %v463_v2  ;;  %v591_v2 = vld [vmem:[%s5139_s28 + $0x610] sm:$0xf] }
  0x97   : > { %466 = vst [vmem:[%s5143_s29 + $0x20c] sm:$0xf] %v465_v3  ;;  %v593_v3 = vld [vmem:[%s5139_s28 + $0x618] sm:$0xf] }
  0x98   : > { %468 = vst [vmem:[%s5143_s29 + $0x210] sm:$0xf] %v467_v4  ;;  %v595_v4 = vld [vmem:[%s5139_s28 + $0x620] sm:$0xf] }
  0x99   : > { %470 = vst [vmem:[%s5143_s29 + $0x214] sm:$0xf] %v469_v5  ;;  %v597_v5 = vld [vmem:[%s5139_s28 + $0x628] sm:$0xf] }
  0x9a   : > { %472 = vst [vmem:[%s5143_s29 + $0x218] sm:$0xf] %v471_v6  ;;  %v599_v6 = vld [vmem:[%s5139_s28 + $0x630] sm:$0xf] }
  0x9b   : > { %474 = vst [vmem:[%s5143_s29 + $0x21c] sm:$0xf] %v473_v7  ;;  %v601_v7 = vld [vmem:[%s5139_s28 + $0x638] sm:$0xf] }
  0x9c   : > { %476 = vst [vmem:[%s5143_s29 + $0x220] sm:$0xf] %v475_v8  ;;  %v603_v8 = vld [vmem:[%s5139_s28 + $0x640] sm:$0xf] }
  0x9d   : > { %478 = vst [vmem:[%s5143_s29 + $0x224] sm:$0xf] %v477_v9  ;;  %v605_v9 = vld [vmem:[%s5139_s28 + $0x648] sm:$0xf] }
  0x9e   : > { %480 = vst [vmem:[%s5143_s29 + $0x228] sm:$0xf] %v479_v10  ;;  %v607_v10 = vld [vmem:[%s5139_s28 + $0x650] sm:$0xf] }
  0x9f   : > { %482 = vst [vmem:[%s5143_s29 + $0x22c] sm:$0xf] %v481_v11  ;;  %v609_v11 = vld [vmem:[%s5139_s28 + $0x658] sm:$0xf] }
  0xa0   : > { %484 = vst [vmem:[%s5143_s29 + $0x230] sm:$0xf] %v483_v12  ;;  %v611_v12 = vld [vmem:[%s5139_s28 + $0x660] sm:$0xf] }
  0xa1   : > { %486 = vst [vmem:[%s5143_s29 + $0x234] sm:$0xf] %v485_v13  ;;  %v613_v13 = vld [vmem:[%s5139_s28 + $0x668] sm:$0xf] }
  0xa2   : > { %488 = vst [vmem:[%s5143_s29 + $0x238] sm:$0xf] %v487_v14  ;;  %v615_v14 = vld [vmem:[%s5139_s28 + $0x670] sm:$0xf] }
  0xa3   : > { %490 = vst [vmem:[%s5143_s29 + $0x23c] sm:$0xf] %v489_v15  ;;  %v617_v15 = vld [vmem:[%s5139_s28 + $0x678] sm:$0xf] }
  0xa4   : > { %492 = vst [vmem:[%s5143_s29 + $0x240] sm:$0xf] %v491_v16  ;;  %v619_v16 = vld [vmem:[%s5139_s28 + $0x680] sm:$0xf] }
  0xa5   : > { %494 = vst [vmem:[%s5143_s29 + $0x244] sm:$0xf] %v493_v17  ;;  %v621_v17 = vld [vmem:[%s5139_s28 + $0x688] sm:$0xf] }
  0xa6   : > { %496 = vst [vmem:[%s5143_s29 + $0x248] sm:$0xf] %v495_v18  ;;  %v623_v18 = vld [vmem:[%s5139_s28 + $0x690] sm:$0xf] }
  0xa7   : > { %498 = vst [vmem:[%s5143_s29 + $0x24c] sm:$0xf] %v497_v19  ;;  %v625_v19 = vld [vmem:[%s5139_s28 + $0x698] sm:$0xf] }
  0xa8   : > { %500 = vst [vmem:[%s5143_s29 + $0x250] sm:$0xf] %v499_v20  ;;  %v627_v20 = vld [vmem:[%s5139_s28 + $0x6a0] sm:$0xf] }
  0xa9   : > { %502 = vst [vmem:[%s5143_s29 + $0x254] sm:$0xf] %v501_v21  ;;  %v629_v21 = vld [vmem:[%s5139_s28 + $0x6a8] sm:$0xf] }
  0xaa   : > { %504 = vst [vmem:[%s5143_s29 + $0x258] sm:$0xf] %v503_v22  ;;  %v631_v22 = vld [vmem:[%s5139_s28 + $0x6b0] sm:$0xf] }
  0xab   : > { %506 = vst [vmem:[%s5143_s29 + $0x25c] sm:$0xf] %v505_v23  ;;  %v633_v23 = vld [vmem:[%s5139_s28 + $0x6b8] sm:$0xf] }
  0xac   : > { %508 = vst [vmem:[%s5143_s29 + $0x260] sm:$0xf] %v507_v24  ;;  %v635_v24 = vld [vmem:[%s5139_s28 + $0x6c0] sm:$0xf] }
  0xad   : > { %510 = vst [vmem:[%s5143_s29 + $0x264] sm:$0xf] %v509_v25  ;;  %v637_v25 = vld [vmem:[%s5139_s28 + $0x6c8] sm:$0xf] }
  0xae   : > { %512 = vst [vmem:[%s5143_s29 + $0x268] sm:$0xf] %v511_v26  ;;  %v639_v26 = vld [vmem:[%s5139_s28 + $0x6d0] sm:$0xf] }
  0xaf   : > { %514 = vst [vmem:[%s5143_s29 + $0x26c] sm:$0xf] %v513_v27  ;;  %v641_v27 = vld [vmem:[%s5139_s28 + $0x6d8] sm:$0xf] }
  0xb0   : > { %516 = vst [vmem:[%s5143_s29 + $0x270] sm:$0xf] %v515_v28  ;;  %v643_v28 = vld [vmem:[%s5139_s28 + $0x6e0] sm:$0xf] }
  0xb1   : > { %518 = vst [vmem:[%s5143_s29 + $0x274] sm:$0xf] %v517_v29  ;;  %v645_v29 = vld [vmem:[%s5139_s28 + $0x6e8] sm:$0xf] }
  0xb2   : > { %520 = vst [vmem:[%s5143_s29 + $0x278] sm:$0xf] %v519_v30  ;;  %v647_v30 = vld [vmem:[%s5139_s28 + $0x6f0] sm:$0xf] }
  0xb3   : > { %522 = vst [vmem:[%s5143_s29 + $0x27c] sm:$0xf] %v521_v31  ;;  %v649_v31 = vld [vmem:[%s5139_s28 + $0x6f8] sm:$0xf] }
  0xb4   : > { %524 = vst [vmem:[%s5143_s29 + $0x280] sm:$0xf] %v523_v32  ;;  %v651_v32 = vld [vmem:[%s5139_s28 + $0x700] sm:$0xf] }
  0xb5   : > { %526 = vst [vmem:[%s5143_s29 + $0x284] sm:$0xf] %v525_v33  ;;  %v653_v33 = vld [vmem:[%s5139_s28 + $0x708] sm:$0xf] }
  0xb6   : > { %528 = vst [vmem:[%s5143_s29 + $0x288] sm:$0xf] %v527_v34  ;;  %v655_v34 = vld [vmem:[%s5139_s28 + $0x710] sm:$0xf] }
  0xb7   : > { %530 = vst [vmem:[%s5143_s29 + $0x28c] sm:$0xf] %v529_v35  ;;  %v657_v35 = vld [vmem:[%s5139_s28 + $0x718] sm:$0xf] }
  0xb8   : > { %532 = vst [vmem:[%s5143_s29 + $0x290] sm:$0xf] %v531_v36  ;;  %v659_v36 = vld [vmem:[%s5139_s28 + $0x720] sm:$0xf] }
  0xb9   : > { %534 = vst [vmem:[%s5143_s29 + $0x294] sm:$0xf] %v533_v37  ;;  %v661_v37 = vld [vmem:[%s5139_s28 + $0x728] sm:$0xf] }
  0xba   : > { %536 = vst [vmem:[%s5143_s29 + $0x298] sm:$0xf] %v535_v38  ;;  %v663_v38 = vld [vmem:[%s5139_s28 + $0x730] sm:$0xf] }
  0xbb   : > { %538 = vst [vmem:[%s5143_s29 + $0x29c] sm:$0xf] %v537_v39  ;;  %v665_v39 = vld [vmem:[%s5139_s28 + $0x738] sm:$0xf] }
  0xbc   : > { %540 = vst [vmem:[%s5143_s29 + $0x2a0] sm:$0xf] %v539_v40  ;;  %v667_v40 = vld [vmem:[%s5139_s28 + $0x740] sm:$0xf] }
  0xbd   : > { %542 = vst [vmem:[%s5143_s29 + $0x2a4] sm:$0xf] %v541_v41  ;;  %v669_v41 = vld [vmem:[%s5139_s28 + $0x748] sm:$0xf] }
  0xbe   : > { %544 = vst [vmem:[%s5143_s29 + $0x2a8] sm:$0xf] %v543_v42  ;;  %v671_v42 = vld [vmem:[%s5139_s28 + $0x750] sm:$0xf] }
  0xbf   : > { %546 = vst [vmem:[%s5143_s29 + $0x2ac] sm:$0xf] %v545_v43  ;;  %v673_v43 = vld [vmem:[%s5139_s28 + $0x758] sm:$0xf] }
  0xc0   : > { %548 = vst [vmem:[%s5143_s29 + $0x2b0] sm:$0xf] %v547_v44  ;;  %v675_v44 = vld [vmem:[%s5139_s28 + $0x760] sm:$0xf] }
  0xc1   : > { %550 = vst [vmem:[%s5143_s29 + $0x2b4] sm:$0xf] %v549_v45  ;;  %v677_v45 = vld [vmem:[%s5139_s28 + $0x768] sm:$0xf] }
  0xc2   : > { %552 = vst [vmem:[%s5143_s29 + $0x2b8] sm:$0xf] %v551_v46  ;;  %v679_v46 = vld [vmem:[%s5139_s28 + $0x770] sm:$0xf] }
  0xc3   : > { %554 = vst [vmem:[%s5143_s29 + $0x2bc] sm:$0xf] %v553_v47  ;;  %v681_v47 = vld [vmem:[%s5139_s28 + $0x778] sm:$0xf] }
  0xc4   : > { %556 = vst [vmem:[%s5143_s29 + $0x2c0] sm:$0xf] %v555_v48  ;;  %v683_v48 = vld [vmem:[%s5139_s28 + $0x780] sm:$0xf] }
  0xc5   : > { %558 = vst [vmem:[%s5143_s29 + $0x2c4] sm:$0xf] %v557_v49  ;;  %v685_v49 = vld [vmem:[%s5139_s28 + $0x788] sm:$0xf] }
  0xc6   : > { %560 = vst [vmem:[%s5143_s29 + $0x2c8] sm:$0xf] %v559_v50  ;;  %v687_v50 = vld [vmem:[%s5139_s28 + $0x790] sm:$0xf] }
  0xc7   : > { %562 = vst [vmem:[%s5143_s29 + $0x2cc] sm:$0xf] %v561_v51  ;;  %v689_v51 = vld [vmem:[%s5139_s28 + $0x798] sm:$0xf] }
  0xc8   : > { %564 = vst [vmem:[%s5143_s29 + $0x2d0] sm:$0xf] %v563_v52  ;;  %v691_v52 = vld [vmem:[%s5139_s28 + $0x7a0] sm:$0xf] }
  0xc9   : > { %566 = vst [vmem:[%s5143_s29 + $0x2d4] sm:$0xf] %v565_v53  ;;  %v693_v53 = vld [vmem:[%s5139_s28 + $0x7a8] sm:$0xf] }
  0xca   : > { %568 = vst [vmem:[%s5143_s29 + $0x2d8] sm:$0xf] %v567_v54  ;;  %v695_v54 = vld [vmem:[%s5139_s28 + $0x7b0] sm:$0xf] }
  0xcb   : > { %570 = vst [vmem:[%s5143_s29 + $0x2dc] sm:$0xf] %v569_v55  ;;  %v697_v55 = vld [vmem:[%s5139_s28 + $0x7b8] sm:$0xf] }
  0xcc   : > { %572 = vst [vmem:[%s5143_s29 + $0x2e0] sm:$0xf] %v571_v56  ;;  %v699_v56 = vld [vmem:[%s5139_s28 + $0x7c0] sm:$0xf] }
  0xcd   : > { %574 = vst [vmem:[%s5143_s29 + $0x2e4] sm:$0xf] %v573_v57  ;;  %v701_v57 = vld [vmem:[%s5139_s28 + $0x7c8] sm:$0xf] }
  0xce   : > { %576 = vst [vmem:[%s5143_s29 + $0x2e8] sm:$0xf] %v575_v58  ;;  %v703_v58 = vld [vmem:[%s5139_s28 + $0x7d0] sm:$0xf] }
  0xcf   : > { %578 = vst [vmem:[%s5143_s29 + $0x2ec] sm:$0xf] %v577_v59  ;;  %v705_v59 = vld [vmem:[%s5139_s28 + $0x7d8] sm:$0xf] }
  0xd0   : > { %580 = vst [vmem:[%s5143_s29 + $0x2f0] sm:$0xf] %v579_v60  ;;  %v707_v60 = vld [vmem:[%s5139_s28 + $0x7e0] sm:$0xf] }
  0xd1   : > { %582 = vst [vmem:[%s5143_s29 + $0x2f4] sm:$0xf] %v581_v61  ;;  %v709_v61 = vld [vmem:[%s5139_s28 + $0x7e8] sm:$0xf] }
  0xd2   : > { %584 = vst [vmem:[%s5143_s29 + $0x2f8] sm:$0xf] %v583_v62  ;;  %v711_v62 = vld [vmem:[%s5139_s28 + $0x7f0] sm:$0xf] }
  0xd3   : > { %586 = vst [vmem:[%s5143_s29 + $0x2fc] sm:$0xf] %v585_v63  ;;  %v713_v63 = vld [vmem:[%s5139_s28 + $0x7f8] sm:$0xf] }
  0xd4   : > { %588 = vst [vmem:[%s5143_s29 + $0x300] sm:$0xf] %v587_v0 }
  0xd5   : > { %590 = vst [vmem:[%s5143_s29 + $0x304] sm:$0xf] %v589_v1 }
  0xd6   : > { %592 = vst [vmem:[%s5143_s29 + $0x308] sm:$0xf] %v591_v2 }
  0xd7   : > { %594 = vst [vmem:[%s5143_s29 + $0x30c] sm:$0xf] %v593_v3 }
  0xd8   : > { %596 = vst [vmem:[%s5143_s29 + $0x310] sm:$0xf] %v595_v4 }
  0xd9   : > { %598 = vst [vmem:[%s5143_s29 + $0x314] sm:$0xf] %v597_v5 }
  0xda   : > { %600 = vst [vmem:[%s5143_s29 + $0x318] sm:$0xf] %v599_v6 }
  0xdb   : > { %602 = vst [vmem:[%s5143_s29 + $0x31c] sm:$0xf] %v601_v7 }
  0xdc   : > { %604 = vst [vmem:[%s5143_s29 + $0x320] sm:$0xf] %v603_v8 }
  0xdd   : > { %606 = vst [vmem:[%s5143_s29 + $0x324] sm:$0xf] %v605_v9 }
  0xde   : > { %608 = vst [vmem:[%s5143_s29 + $0x328] sm:$0xf] %v607_v10 }
  0xdf   : > { %610 = vst [vmem:[%s5143_s29 + $0x32c] sm:$0xf] %v609_v11 }
  0xe0   : > { %612 = vst [vmem:[%s5143_s29 + $0x330] sm:$0xf] %v611_v12 }
  0xe1   : > { %614 = vst [vmem:[%s5143_s29 + $0x334] sm:$0xf] %v613_v13 }
  0xe2   : > { %616 = vst [vmem:[%s5143_s29 + $0x338] sm:$0xf] %v615_v14 }
  0xe3   : > { %618 = vst [vmem:[%s5143_s29 + $0x33c] sm:$0xf] %v617_v15 }
  0xe4   : > { %620 = vst [vmem:[%s5143_s29 + $0x340] sm:$0xf] %v619_v16 }
  0xe5   : > { %622 = vst [vmem:[%s5143_s29 + $0x344] sm:$0xf] %v621_v17 }
  0xe6   : > { %624 = vst [vmem:[%s5143_s29 + $0x348] sm:$0xf] %v623_v18 }
  0xe7   : > { %626 = vst [vmem:[%s5143_s29 + $0x34c] sm:$0xf] %v625_v19 }
  0xe8   : > { %628 = vst [vmem:[%s5143_s29 + $0x350] sm:$0xf] %v627_v20 }
  0xe9   : > { %630 = vst [vmem:[%s5143_s29 + $0x354] sm:$0xf] %v629_v21 }
  0xea   : > { %632 = vst [vmem:[%s5143_s29 + $0x358] sm:$0xf] %v631_v22 }
  0xeb   : > { %634 = vst [vmem:[%s5143_s29 + $0x35c] sm:$0xf] %v633_v23 }
  0xec   : > { %636 = vst [vmem:[%s5143_s29 + $0x360] sm:$0xf] %v635_v24 }
  0xed   : > { %638 = vst [vmem:[%s5143_s29 + $0x364] sm:$0xf] %v637_v25 }
  0xee   : > { %640 = vst [vmem:[%s5143_s29 + $0x368] sm:$0xf] %v639_v26 }
  0xef   : > { %642 = vst [vmem:[%s5143_s29 + $0x36c] sm:$0xf] %v641_v27 }
  0xf0   : > { %644 = vst [vmem:[%s5143_s29 + $0x370] sm:$0xf] %v643_v28 }
  0xf1   : > { %646 = vst [vmem:[%s5143_s29 + $0x374] sm:$0xf] %v645_v29 }
  0xf2   : > { %648 = vst [vmem:[%s5143_s29 + $0x378] sm:$0xf] %v647_v30 }
  0xf3   : > { %650 = vst [vmem:[%s5143_s29 + $0x37c] sm:$0xf] %v649_v31 }
  0xf4   : > { %652 = vst [vmem:[%s5143_s29 + $0x380] sm:$0xf] %v651_v32 }
  0xf5   : > { %654 = vst [vmem:[%s5143_s29 + $0x384] sm:$0xf] %v653_v33 }
  0xf6   : > { %656 = vst [vmem:[%s5143_s29 + $0x388] sm:$0xf] %v655_v34 }
  0xf7   : > { %658 = vst [vmem:[%s5143_s29 + $0x38c] sm:$0xf] %v657_v35 }
  0xf8   : > { %660 = vst [vmem:[%s5143_s29 + $0x390] sm:$0xf] %v659_v36 }
  0xf9   : > { %662 = vst [vmem:[%s5143_s29 + $0x394] sm:$0xf] %v661_v37 }
  0xfa   : > { %664 = vst [vmem:[%s5143_s29 + $0x398] sm:$0xf] %v663_v38 }
  0xfb   : > { %666 = vst [vmem:[%s5143_s29 + $0x39c] sm:$0xf] %v665_v39 }
  0xfc   : > { %668 = vst [vmem:[%s5143_s29 + $0x3a0] sm:$0xf] %v667_v40 }
  0xfd   : > { %670 = vst [vmem:[%s5143_s29 + $0x3a4] sm:$0xf] %v669_v41 }
  0xfe   : > { %672 = vst [vmem:[%s5143_s29 + $0x3a8] sm:$0xf] %v671_v42 }
  0xff   : > { %674 = vst [vmem:[%s5143_s29 + $0x3ac] sm:$0xf] %v673_v43 }
 0x100   : > { %676 = vst [vmem:[%s5143_s29 + $0x3b0] sm:$0xf] %v675_v44 }
 0x101   : > { %678 = vst [vmem:[%s5143_s29 + $0x3b4] sm:$0xf] %v677_v45 }
 0x102   : > { %680 = vst [vmem:[%s5143_s29 + $0x3b8] sm:$0xf] %v679_v46 }
 0x103   : > { %682 = vst [vmem:[%s5143_s29 + $0x3bc] sm:$0xf] %v681_v47 }
 0x104   : > { %684 = vst [vmem:[%s5143_s29 + $0x3c0] sm:$0xf] %v683_v48 }
 0x105   : > { %686 = vst [vmem:[%s5143_s29 + $0x3c4] sm:$0xf] %v685_v49 }
 0x106   : > { %688 = vst [vmem:[%s5143_s29 + $0x3c8] sm:$0xf] %v687_v50 }
 0x107   : > { %690 = vst [vmem:[%s5143_s29 + $0x3cc] sm:$0xf] %v689_v51 }
 0x108   : > { %692 = vst [vmem:[%s5143_s29 + $0x3d0] sm:$0xf] %v691_v52 }
 0x109   : > { %694 = vst [vmem:[%s5143_s29 + $0x3d4] sm:$0xf] %v693_v53 }
 0x10a   : > { %696 = vst [vmem:[%s5143_s29 + $0x3d8] sm:$0xf] %v695_v54 }
 0x10b   : > { %698 = vst [vmem:[%s5143_s29 + $0x3dc] sm:$0xf] %v697_v55 }
 0x10c   : > { %700 = vst [vmem:[%s5143_s29 + $0x3e0] sm:$0xf] %v699_v56 }
 0x10d   : > { %702 = vst [vmem:[%s5143_s29 + $0x3e4] sm:$0xf] %v701_v57 }
 0x10e   : > { %704 = vst [vmem:[%s5143_s29 + $0x3e8] sm:$0xf] %v703_v58 }
 0x10f   : > { %706 = vst [vmem:[%s5143_s29 + $0x3ec] sm:$0xf] %v705_v59 }
 0x110   : > { %708 = vst [vmem:[%s5143_s29 + $0x3f0] sm:$0xf] %v707_v60 }
 0x111   : > { %710 = vst [vmem:[%s5143_s29 + $0x3f4] sm:$0xf] %v709_v61 }
 0x112   : > { %712 = vst [vmem:[%s5143_s29 + $0x3f8] sm:$0xf] %v711_v62 }
 0x113   : > { %714 = vst [vmem:[%s5143_s29 + $0x3fc] sm:$0xf] %v713_v63 }
 0x114 PF: > { %p4172_p8 = scmp.ge.s32.totalorder %s5069_s16, 1  ;;  %p2299_p9 = scmp.lt.s32.totalorder %s5069_s16, 3 }
 0x116   : > { %p2300_p10 = pnand %p4172_p8, %p2299_p9 }
 0x117   : > { %s2306_s30 = sand.u32 (!%p2300_p10), 1, %s5053_s12   ;;  %p2362_p11 = scmp.lt.s32.totalorder (!%p2300_p10), %s5061_s14, 1 }
 0x118   : > { %2303 = sbr.rel (%p2300_p10) target bundleno = 594 (0x252), region = 76  ;;  %s4173_s4 = sshll.u32 (!%p2300_p10), %s2306_s30, 10 }
 0x119   : > { %s5660_s5 = scalar_lea.vmem (!%p2300_p10), [#allocation3], %s4173_s4  ;;  %s4174_s19 = sshll.u32 (!%p2300_p10), %s2306_s30, 4 }
 0x11a   : > { %s5984_s20 = scalar_lea.vmem (!%p2300_p10), [#allocation4], %s4174_s19 }
 0x11d   : > { %v4859_v0 = vld [vmem:[%s5660_s5 + $0x38] sm:$0xff]  ;;  %v4858_v4 = vld [vmem:[%s5660_s5 + $0x30] sm:$0xff]  ;;  %v4857_v8 = vld [vmem:[%s5660_s5 + $0x28] sm:$0xff]  ;;  %s2363_s12 = scalar_select %p2362_p11, %s5061_s14, 1 }
 0x11e   : > { %v4867_v1 = vld [vmem:[%s5660_s5 + $0x78] sm:$0xff]  ;;  %3596 = vmatpush.bf16.msra.mxu0 %v4859_v0  ;;  %v4866_v5 = vld [vmem:[%s5660_s5 + $0x70] sm:$0xff]  ;;  %v4865_v9 = vld [vmem:[%s5660_s5 + $0x68] sm:$0xff]  ;;  %s4817_s26 = sshll.u32 (%p5126_p6), %s5061_s14, 2 }
 0x11f   : > { %v4875_v2 = vld [vmem:[%s5660_s5 + $0xb8] sm:$0xff]  ;;  %3615 = vmatpush.bf16.msra.mxu1 %v4867_v1  ;;  %v4874_v6 = vld [vmem:[%s5660_s5 + $0xb0] sm:$0xff]  ;;  %v4873_v10 = vld [vmem:[%s5660_s5 + $0xa8] sm:$0xff]  ;;  %s4175_s30 = sshll.u32 %s2363_s12, 3  ;;  %s3971_s29 = scalar_lea.vmem (%p5126_p6), %s6020_s2, %s4817_s26 }
 0x120   : > { %v4883_v3 = vld [vmem:[%s5660_s5 + $0xf8] sm:$0xff]  ;;  %3634 = vmatpush.bf16.msra.mxu2 %v4875_v2  ;;  %v4882_v7 = vld [vmem:[%s5660_s5 + $0xf0] sm:$0xff]  ;;  %v4881_v11 = vld [vmem:[%s5660_s5 + $0xe8] sm:$0xff]  ;;  %s2367_s25 = scalar_lea.vmem %s6021_s3, %s4175_s30 }
 0x121   : > { %3653 = vmatpush.bf16.msra.mxu3 %v4883_v3  ;;  %v4856_v12 = vld [vmem:[%s5660_s5 + $0x20] sm:$0xff]  ;;  %v4855_v16 = vld [vmem:[%s5660_s5 + $0x18] sm:$0xff]  ;;  %v4854_v20 = vld [vmem:[%s5660_s5 + $0x10] sm:$0xff] }
 0x122   : > { %3597 = vmatpush.bf16.msra.mxu0 %v4858_v4  ;;  %v4864_v13 = vld [vmem:[%s5660_s5 + $0x60] sm:$0xff]  ;;  %v4863_v17 = vld [vmem:[%s5660_s5 + $0x58] sm:$0xff]  ;;  %v4862_v21 = vld [vmem:[%s5660_s5 + $0x50] sm:$0xff] }
 0x123   : > { %3616 = vmatpush.bf16.msra.mxu1 %v4866_v5  ;;  %v4872_v14 = vld [vmem:[%s5660_s5 + $0xa0] sm:$0xff]  ;;  %v4871_v18 = vld [vmem:[%s5660_s5 + $0x98] sm:$0xff]  ;;  %v4870_v22 = vld [vmem:[%s5660_s5 + $0x90] sm:$0xff] }
 0x124   : > { %3635 = vmatpush.bf16.msra.mxu2 %v4874_v6  ;;  %v4880_v15 = vld [vmem:[%s5660_s5 + $0xe0] sm:$0xff]  ;;  %v4879_v19 = vld [vmem:[%s5660_s5 + $0xd8] sm:$0xff]  ;;  %v4878_v23 = vld [vmem:[%s5660_s5 + $0xd0] sm:$0xff] }
 0x125   : > { %3654 = vmatpush.bf16.msra.mxu3 %v4882_v7  ;;  %v4853_v24 = vld [vmem:[%s5660_s5 + $0x8] sm:$0xff]  ;;  %v4852_v28 = vld [vmem:[%s5660_s5] sm:$0xff]  ;;  %v4907_v40 = vld [vmem:[%s5660_s5 + $0x1b8] sm:$0xff] }
 0x126   : > { %3598 = vmatpush.bf16.msra.mxu0 %v4857_v8  ;;  %v4861_v25 = vld [vmem:[%s5660_s5 + $0x48] sm:$0xff]  ;;  %v4178_v29 = vld [vmem:[%s6018_s0] sm:$0xf]  ;;  %v4820_v34 = vld [vmem:[%s6018_s0 + $0x4] sm:$0xf] }
 0x127   : > { %3617 = vmatpush.bf16.msra.mxu1 %v4865_v9  ;;  %v4869_v26 = vld [vmem:[%s5660_s5 + $0x88] sm:$0xff]  ;;  %v4828_v30 = vld [vmem:[%s6018_s0 + $0x3c] sm:$0xf0]  ;;  %v4180_v35 = vld [vmem:[%s6018_s0 + $0x40] sm:$0xf0] }
 0x128   : > { %3636 = vmatpush.bf16.msra.mxu2 %v4873_v10  ;;  %v4877_v27 = vld [vmem:[%s5660_s5 + $0xc8] sm:$0xff]  ;;  %v4860_v31 = vld [vmem:[%s5660_s5 + $0x40] sm:$0xff]  ;;  %v4891_v41 = vld [vmem:[%s5660_s5 + $0x138] sm:$0xff]  ;;  %v4179_v42 = vor.u32 %v4828_v30, %v4178_v29  ;;  %v4183_v43 = vor.u32 %v4820_v34, %v4180_v35 }
 0x129   : > { %3655 = vmatpush.bf16.msra.mxu3 %v4881_v11  ;;  %v4868_v32 = vld [vmem:[%s5660_s5 + $0x80] sm:$0xff]  ;;  %v4186_v36 = vld [vmem:[%s6018_s0 + $0x8] sm:$0xf]  ;;  %v4821_v38 = vld [vmem:[%s6018_s0 + $0xc] sm:$0xf] }
 0x12a   : > { %3599 = vmatpush.bf16.msra.mxu0 %v4856_v12  ;;  %v4876_v33 = vld [vmem:[%s5660_s5 + $0xc0] sm:$0xff]  ;;  %v4829_v37 = vld [vmem:[%s6018_s0 + $0x44] sm:$0xf0]  ;;  %v4188_v39 = vld [vmem:[%s6018_s0 + $0x48] sm:$0xf0] }
 0x12b   : > { %3618 = vmatpush.bf16.msra.mxu1 %v4864_v13  ;;  %v4187_v44 = vor.u32 %v4829_v37, %v4186_v36  ;;  %v4191_v45 = vor.u32 %v4821_v38, %v4188_v39  ;;  %v4899_v46 = vld [vmem:[%s5660_s5 + $0x178] sm:$0xff]  ;;  %v4906_v48 = vld [vmem:[%s5660_s5 + $0x1b0] sm:$0xff]  ;;  %v4905_v52 = vld [vmem:[%s5660_s5 + $0x1a8] sm:$0xff] }
 0x12c   : > { %3637 = vmatpush.bf16.msra.mxu2 %v4872_v14  ;;  %v4915_v47 = vld [vmem:[%s5660_s5 + $0x1f8] sm:$0xff]  ;;  %v4890_v49 = vld [vmem:[%s5660_s5 + $0x130] sm:$0xff]  ;;  %v4889_v53 = vld [vmem:[%s5660_s5 + $0x128] sm:$0xff] }
 0x12d   : > { %3656 = vmatpush.bf16.msra.mxu3 %v4880_v15  ;;  %v4898_v50 = vld [vmem:[%s5660_s5 + $0x170] sm:$0xff]  ;;  %v4897_v54 = vld [vmem:[%s5660_s5 + $0x168] sm:$0xff]  ;;  %v4904_v56 = vld [vmem:[%s5660_s5 + $0x1a0] sm:$0xff] }
 0x12e   : > { %3600 = vmatpush.bf16.msra.mxu0 %v4855_v16  ;;  %v4914_v51 = vld [vmem:[%s5660_s5 + $0x1f0] sm:$0xff]  ;;  %v4913_v55 = vld [vmem:[%s5660_s5 + $0x1e8] sm:$0xff]  ;;  %v4888_v57 = vld [vmem:[%s5660_s5 + $0x120] sm:$0xff] }
 0x12f   : > { %3619 = vmatpush.bf16.msra.mxu1 %v4863_v17  ;;  %v4896_v58 = vld [vmem:[%s5660_s5 + $0x160] sm:$0xff]  ;;  %v4250_v0 = vld [vmem:[%s6018_s0 + $0x88] sm:$0xf]  ;;  %v4837_v2 = vld [vmem:[%s6018_s0 + $0x8c] sm:$0xf] }
 0x130   : > { %3638 = vmatpush.bf16.msra.mxu2 %v4871_v18  ;;  %v4912_v59 = vld [vmem:[%s5660_s5 + $0x1e0] sm:$0xff]  ;;  %v4845_v1 = vld [vmem:[%s6018_s0 + $0xc4] sm:$0xf0]  ;;  %v4252_v3 = vld [vmem:[%s6018_s0 + $0xc8] sm:$0xf0] }
 0x131   : > { %3657 = vmatpush.bf16.msra.mxu3 %v4879_v19  ;;  %v4242_v60 = vld [vmem:[%s6018_s0 + $0x80] sm:$0xf]  ;;  %v4836_v62 = vld [vmem:[%s6018_s0 + $0x84] sm:$0xf]  ;;  %v4903_v4 = vld [vmem:[%s5660_s5 + $0x198] sm:$0xff]  ;;  %v4251_v8 = vor.u32 %v4845_v1, %v4250_v0  ;;  %v4255_v9 = vor.u32 %v4837_v2, %v4252_v3 }
 0x132   : > { %3601 = vmatpush.bf16.msra.mxu0 %v4854_v20  ;;  %v4844_v61 = vld [vmem:[%s6018_s0 + $0xbc] sm:$0xf0]  ;;  %v4244_v63 = vld [vmem:[%s6018_s0 + $0xc0] sm:$0xf0]  ;;  %v4887_v5 = vld [vmem:[%s5660_s5 + $0x118] sm:$0xff] }
 0x133   : > { %3620 = vmatpush.bf16.msra.mxu1 %v4862_v21  ;;  %v4243_v6 = vor.u32 %v4844_v61, %v4242_v60  ;;  %v4247_v7 = vor.u32 %v4836_v62, %v4244_v63  ;;  %v4895_v10 = vld [vmem:[%s5660_s5 + $0x158] sm:$0xff]  ;;  %v4902_v12 = vld [vmem:[%s5660_s5 + $0x190] sm:$0xff]  ;;  %v4901_v16 = vld [vmem:[%s5660_s5 + $0x188] sm:$0xff] }
 0x134   : > { %3639 = vmatpush.bf16.msra.mxu2 %v4870_v22  ;;  %v4911_v11 = vld [vmem:[%s5660_s5 + $0x1d8] sm:$0xff]  ;;  %v4886_v13 = vld [vmem:[%s5660_s5 + $0x110] sm:$0xff]  ;;  %v4885_v17 = vld [vmem:[%s5660_s5 + $0x108] sm:$0xff] }
 0x135   : > { %3658 = vmatpush.bf16.msra.mxu3 %v4878_v23  ;;  %v4894_v14 = vld [vmem:[%s5660_s5 + $0x150] sm:$0xff]  ;;  %v4893_v18 = vld [vmem:[%s5660_s5 + $0x148] sm:$0xff]  ;;  %v4900_v20 = vld [vmem:[%s5660_s5 + $0x180] sm:$0xff] }
 0x136   : > { %3602 = vmatpush.bf16.msra.mxu0 %v4853_v24  ;;  %v4910_v15 = vld [vmem:[%s5660_s5 + $0x1d0] sm:$0xff]  ;;  %v4909_v19 = vld [vmem:[%s5660_s5 + $0x1c8] sm:$0xff]  ;;  %v4884_v21 = vld [vmem:[%s5660_s5 + $0x100] sm:$0xff] }
 0x137   : > { %3621 = vmatpush.bf16.msra.mxu1 %v4861_v25  ;;  %v4892_v22 = vld [vmem:[%s5660_s5 + $0x140] sm:$0xff]  ;;  %v4194_v24 = vld [vmem:[%s6018_s0 + $0x10] sm:$0xf]  ;;  %v4939_v25 = vld [vmem:[%s5660_s5 + $0x2b8] sm:$0xff] }
 0x138   : > { %3640 = vmatpush.bf16.msra.mxu2 %v4869_v26  ;;  %v4908_v23 = vld [vmem:[%s5660_s5 + $0x1c0] sm:$0xff]  ;;  %v4923_v26 = vld [vmem:[%s5660_s5 + $0x238] sm:$0xff]  ;;  %v4196_v29 = vld [vmem:[%s6018_s0 + $0x50] sm:$0xf0] }
 0x139   : > { %3659 = vmatpush.bf16.msra.mxu3 %v4877_v27  ;;  %v4830_v27 = vld [vmem:[%s6018_s0 + $0x4c] sm:$0xf0]  ;;  %v4202_v30 = vld [vmem:[%s6018_s0 + $0x18] sm:$0xf]  ;;  %v4268_v61 = vld [vmem:[%s6018_s0 + $0xd8] sm:$0xf0] }
 0x13a   : > { %3603 = vmatpush.bf16.msra.mxu0 %v4852_v28  ;;  %v4822_v28 = vld [vmem:[%s6018_s0 + $0x14] sm:$0xf]  ;;  %v4931_v34 = vld [vmem:[%s5660_s5 + $0x278] sm:$0xff]  ;;  %v4195_v36 = vor.u32 %v4830_v27, %v4194_v24  ;;  %v4212_v24 = vld [vmem:[%s6018_s0 + $0x60] sm:$0xf0] }
 0x13b   : > { %3622 = vmatpush.bf16.msra.mxu1 %v4860_v31  ;;  %v4831_v31 = vld [vmem:[%s6018_s0 + $0x54] sm:$0xf0]  ;;  %v4938_v37 = vld [vmem:[%s5660_s5 + $0x2b0] sm:$0xff]  ;;  %v4199_v38 = vor.u32 %v4822_v28, %v4196_v29  ;;  %v4825_v27 = vld [vmem:[%s6018_s0 + $0x2c] sm:$0xf] }
 0x13c   : > { %3641 = vmatpush.bf16.msra.mxu2 %v4868_v32  ;;  %v4823_v32 = vld [vmem:[%s6018_s0 + $0x1c] sm:$0xf]  ;;  %v4203_v39 = vor.u32 %v4831_v31, %v4202_v30  ;;  %v4934_v1 = vld [vmem:[%s5660_s5 + $0x290] sm:$0xff]  ;;  %v4220_v28 = vld [vmem:[%s6018_s0 + $0x68] sm:$0xf0] }
 0x13d   : > { %3660 = vmatpush.bf16.msra.mxu3 %v4876_v33  ;;  %3604 = vmatmul.bf16.vlgmr.msra.gmra.mxu0 %v4179_v42  ;;  %v4204_v33 = vld [vmem:[%s6018_s0 + $0x58] sm:$0xf0]  ;;  %v4930_v42 = vld [vmem:[%s5660_s5 + $0x270] sm:$0xff] }
 0x13e   : > { %3672 = vmatpush.bf16.msrb.mxu0 %v4891_v41  ;;  %3623 = vmatmul.bf16.vlgmr.msra.gmra.mxu1 %v4183_v43  ;;  %v4947_v35 = vld [vmem:[%s5660_s5 + $0x2f8] sm:$0xff]  ;;  %v4922_v41 = vld [vmem:[%s5660_s5 + $0x230] sm:$0xff] }
 0x13f   : > { %3642 = vmatmul.bf16.vlgmr.msra.gmra.mxu2 %v4187_v44  ;;  %3691 = vmatpush.bf16.msrb.mxu1 %v4899_v46  ;;  %v4946_v43 = vld [vmem:[%s5660_s5 + $0x2f0] sm:$0xff]  ;;  %v4937_v44 = vld [vmem:[%s5660_s5 + $0x2a8] sm:$0xff]  ;;  %v4919_v60 = vld [vmem:[%s5660_s5 + $0x218] sm:$0xff] }
 0x140   : > { %3710 = vmatpush.bf16.msrb.mxu2 %v4907_v40  ;;  %3661 = vmatmul.bf16.vlgmr.msra.gmra.mxu3 %v4191_v45  ;;  %v4207_v40 = vor.u32 %v4823_v32, %v4204_v33  ;;  %v4921_v45 = vld [vmem:[%s5660_s5 + $0x228] sm:$0xff]  ;;  %v4927_v62 = vld [vmem:[%s5660_s5 + $0x258] sm:$0xff]  ;;  %v4962_v30 = vld [vmem:[%s5660_s5 + $0x370] sm:$0xff]  ;;  %v4223_v33 = vor.u32 %v4825_v27, %v4220_v28 }
 0x141   : > { %3729 = vmatpush.bf16.msrb.mxu3 %v4915_v47  ;;  %v4929_v46 = vld [vmem:[%s5660_s5 + $0x268] sm:$0xff]  ;;  %v4943_v63 = vld [vmem:[%s5660_s5 + $0x2d8] sm:$0xff] }
 0x142   : > { %3673 = vmatpush.bf16.msrb.mxu0 %v4890_v49  ;;  %v4945_v47 = vld [vmem:[%s5660_s5 + $0x2e8] sm:$0xff]  ;;  %v4920_v49 = vld [vmem:[%s5660_s5 + $0x220] sm:$0xff]  ;;  %v4300_v27 = vld [vmem:[%s6018_s0 + $0xf8] sm:$0xf0] }
 0x143   : > { %3692 = vmatpush.bf16.msrb.mxu1 %v4898_v50  ;;  %v4928_v50 = vld [vmem:[%s5660_s5 + $0x260] sm:$0xff] }
 0x144   : > { %3711 = vmatpush.bf16.msrb.mxu2 %v4906_v48  ;;  %v4936_v48 = vld [vmem:[%s5660_s5 + $0x2a0] sm:$0xff] }
 0x145   : > { %3730 = vmatpush.bf16.msrb.mxu3 %v4914_v51  ;;  %v4944_v51 = vld [vmem:[%s5660_s5 + $0x2e0] sm:$0xff] }
 0x146   : > { %3674 = vmatpush.bf16.msrb.mxu0 %v4889_v53  ;;  %v4846_v53 = vld [vmem:[%s6018_s0 + $0xcc] sm:$0xf0] }
 0x147   : > { %3693 = vmatpush.bf16.msrb.mxu1 %v4897_v54  ;;  %v4935_v54 = vld [vmem:[%s5660_s5 + $0x298] sm:$0xff] }
 0x148   : > { %3712 = vmatpush.bf16.msrb.mxu2 %v4905_v52  ;;  %v4258_v52 = vld [vmem:[%s6018_s0 + $0x90] sm:$0xf] }
 0x149   : > { %3731 = vmatpush.bf16.msrb.mxu3 %v4913_v55  ;;  %v4838_v55 = vld [vmem:[%s6018_s0 + $0x94] sm:$0xf]  ;;  %v4259_v0 = vor.u32 %v4846_v53, %v4258_v52  ;;  %v4841_v52 = vld [vmem:[%s6018_s0 + $0xac] sm:$0xf]  ;;  %v4951_v53 = vld [vmem:[%s5660_s5 + $0x318] sm:$0xff] }
 0x14a   : > { %3675 = vmatpush.bf16.msrb.mxu0 %v4888_v57  ;;  %v4266_v57 = vld [vmem:[%s6018_s0 + $0x98] sm:$0xf] }
 0x14b   : > { %3694 = vmatpush.bf16.msrb.mxu1 %v4896_v58  ;;  %v4847_v58 = vld [vmem:[%s6018_s0 + $0xd4] sm:$0xf0] }
 0x14c   : > { %3713 = vmatpush.bf16.msrb.mxu2 %v4904_v56  ;;  %v4260_v56 = vld [vmem:[%s6018_s0 + $0xd0] sm:$0xf0]  ;;  %v4267_v3 = vor.u32 %v4847_v58, %v4266_v57 }
 0x14d   : > { %3732 = vmatpush.bf16.msrb.mxu3 %v4912_v59  ;;  %3609 = vmatmul.bf16.gmra.mxu0 %v4243_v6  ;;  %v4839_v59 = vld [vmem:[%s6018_s0 + $0x9c] sm:$0xf]  ;;  %v4263_v2 = vor.u32 %v4838_v55, %v4260_v56  ;;  %v4926_v6 = vld [vmem:[%s5660_s5 + $0x250] sm:$0xff] }
 0x14e   : > { %3676 = vmatpush.bf16.msrb.mxu0 %v4887_v5  ;;  %3628 = vmatmul.bf16.gmra.mxu1 %v4247_v7  ;;  %v4918_v5 = vld [vmem:[%s5660_s5 + $0x210] sm:$0xff]  ;;  %v4975_v55 = vld [vmem:[%s5660_s5 + $0x3d8] sm:$0xff] }
 0x14f   : > { %3647 = vmatmul.bf16.gmra.mxu2 %v4251_v8  ;;  %3695 = vmatpush.bf16.msrb.mxu1 %v4895_v10  ;;  %v4942_v7 = vld [vmem:[%s5660_s5 + $0x2d0] sm:$0xff]  ;;  %v4933_v8 = vld [vmem:[%s5660_s5 + $0x288] sm:$0xff] }
 0x150   : > { %3714 = vmatpush.bf16.msrb.mxu2 %v4903_v4  ;;  %3666 = vmatmul.bf16.gmra.mxu3 %v4255_v9  ;;  %v4271_v4 = vor.u32 %v4839_v59, %v4268_v61  ;;  %v4917_v9 = vld [vmem:[%s5660_s5 + $0x208] sm:$0xff]  ;;  %v4966_v56 = vld [vmem:[%s5660_s5 + $0x390] sm:$0xff] }
 0x151   : > { %3733 = vmatpush.bf16.msrb.mxu3 %v4911_v11  ;;  %v4925_v10 = vld [vmem:[%s5660_s5 + $0x248] sm:$0xff]  ;;  %v4958_v58 = vld [vmem:[%s5660_s5 + $0x350] sm:$0xff] }
 0x152   : > { %3677 = vmatpush.bf16.msrb.mxu0 %v4886_v13  ;;  %v4941_v11 = vld [vmem:[%s5660_s5 + $0x2c8] sm:$0xff]  ;;  %v4971_v13 = vld [vmem:[%s5660_s5 + $0x3b8] sm:$0xff] }
 0x153   : > { %3696 = vmatpush.bf16.msrb.mxu1 %v4894_v14  ;;  %v4916_v14 = vld [vmem:[%s5660_s5 + $0x200] sm:$0xff] }
 0x154   : > { %3715 = vmatpush.bf16.msrb.mxu2 %v4902_v12  ;;  %v4932_v12 = vld [vmem:[%s5660_s5 + $0x280] sm:$0xff] }
 0x155   : > { %3734 = vmatpush.bf16.msrb.mxu3 %v4910_v15  ;;  %v4924_v15 = vld [vmem:[%s5660_s5 + $0x240] sm:$0xff] }
 0x156   : > { %3678 = vmatpush.bf16.msrb.mxu0 %v4885_v17  ;;  %v4210_v17 = vld [vmem:[%s6018_s0 + $0x20] sm:$0xf] }
 0x157   : > { %3697 = vmatpush.bf16.msrb.mxu1 %v4893_v18  ;;  %v4832_v18 = vld [vmem:[%s6018_s0 + $0x5c] sm:$0xf0] }
 0x158   : > { %3716 = vmatpush.bf16.msrb.mxu2 %v4901_v16  ;;  %v4940_v16 = vld [vmem:[%s5660_s5 + $0x2c0] sm:$0xff]  ;;  %v4211_v29 = vor.u32 %v4832_v18, %v4210_v17 }
 0x159   : > { %3735 = vmatpush.bf16.msrb.mxu3 %v4909_v19  ;;  %v4955_v19 = vld [vmem:[%s5660_s5 + $0x338] sm:$0xff] }
 0x15a   : > { %3679 = vmatpush.bf16.msrb.mxu0 %v4884_v21  ;;  %v4824_v21 = vld [vmem:[%s6018_s0 + $0x24] sm:$0xf] }
 0x15b   : > { %3698 = vmatpush.bf16.msrb.mxu1 %v4892_v22  ;;  %v4979_v22 = vld [vmem:[%s5660_s5 + $0x3f8] sm:$0xff]  ;;  %v4215_v31 = vor.u32 %v4824_v21, %v4212_v24  ;;  %v4850_v21 = vld [vmem:[%s6018_s0 + $0xec] sm:$0xf0] }
 0x15c   : > { %3717 = vmatpush.bf16.msrb.mxu2 %v4900_v20  ;;  %v4963_v20 = vld [vmem:[%s5660_s5 + $0x378] sm:$0xff] }
 0x15d   : > { %3736 = vmatpush.bf16.msrb.mxu3 %v4908_v23  ;;  %3680 = vmatmul.bf16.vlgmr.msrb.gmra.mxu0 %v4195_v36  ;;  %v4970_v23 = vld [vmem:[%s5660_s5 + $0x3b0] sm:$0xff]  ;;  %v4969_v36 = vld [vmem:[%s5660_s5 + $0x3a8] sm:$0xff]  ;;  %v4298_v24 = vld [vmem:[%s6018_s0 + $0xb8] sm:$0xf] }
 0x15e   : > { %3748 = vmatpush.bf16.msra.mxu0 %v4923_v26  ;;  %3699 = vmatmul.bf16.vlgmr.msrb.gmra.mxu1 %v4199_v38  ;;  %v4833_v26 = vld [vmem:[%s6018_s0 + $0x64] sm:$0xf0] }
 0x15f   : > { %3767 = vmatpush.bf16.msra.mxu1 %v4931_v34  ;;  %3718 = vmatmul.bf16.vlgmr.msrb.gmra.mxu2 %v4203_v39  ;;  %v4954_v34 = vld [vmem:[%s5660_s5 + $0x330] sm:$0xff]  ;;  %v4953_v38 = vld [vmem:[%s5660_s5 + $0x328] sm:$0xff] }
 0x160   : > { %3786 = vmatpush.bf16.msra.mxu2 %v4939_v25  ;;  %3737 = vmatmul.bf16.vlgmr.msrb.gmra.mxu3 %v4207_v40  ;;  %v4218_v25 = vld [vmem:[%s6018_s0 + $0x28] sm:$0xf]  ;;  %v4968_v40 = vld [vmem:[%s5660_s5 + $0x3a0] sm:$0xff] }
 0x161   : > { %3805 = vmatpush.bf16.msra.mxu3 %v4947_v35  ;;  %v4219_v32 = vor.u32 %v4833_v26, %v4218_v25  ;;  %v4978_v35 = vld [vmem:[%s5660_s5 + $0x3f0] sm:$0xff]  ;;  %v4977_v39 = vld [vmem:[%s5660_s5 + $0x3e8] sm:$0xff]  ;;  %v4851_v25 = vld [vmem:[%s6018_s0 + $0xf4] sm:$0xf0] }
 0x162   : > { %3749 = vmatpush.bf16.msra.mxu0 %v4922_v41  ;;  %v4960_v41 = vld [vmem:[%s5660_s5 + $0x360] sm:$0xff]  ;;  %v4843_v26 = vld [vmem:[%s6018_s0 + $0xbc] sm:$0xf] }
 0x163   : > { %3768 = vmatpush.bf16.msra.mxu1 %v4930_v42  ;;  %v4952_v42 = vld [vmem:[%s5660_s5 + $0x320] sm:$0xff] }
 0x164   : > { %3787 = vmatpush.bf16.msra.mxu2 %v4938_v37  ;;  %v4961_v37 = vld [vmem:[%s5660_s5 + $0x368] sm:$0xff] }
 0x165   : > { %3806 = vmatpush.bf16.msra.mxu3 %v4946_v43  ;;  %v4976_v43 = vld [vmem:[%s5660_s5 + $0x3e0] sm:$0xff] }
 0x166   : > { %3750 = vmatpush.bf16.msra.mxu0 %v4921_v45  ;;  %v4274_v45 = vld [vmem:[%s6018_s0 + $0xa0] sm:$0xf] }
 0x167   : > { %3769 = vmatpush.bf16.msra.mxu1 %v4929_v46  ;;  %v4848_v46 = vld [vmem:[%s6018_s0 + $0xdc] sm:$0xf0] }
 0x168   : > { %3788 = vmatpush.bf16.msra.mxu2 %v4937_v44  ;;  %v4967_v44 = vld [vmem:[%s5660_s5 + $0x398] sm:$0xff]  ;;  %v4275_v57 = vor.u32 %v4848_v46, %v4274_v45 }
 0x169   : > { %3807 = vmatpush.bf16.msra.mxu3 %v4945_v47  ;;  %v4959_v47 = vld [vmem:[%s5660_s5 + $0x358] sm:$0xff] }
 0x16a   : > { %3751 = vmatpush.bf16.msra.mxu0 %v4920_v49  ;;  %v4276_v49 = vld [vmem:[%s6018_s0 + $0xe0] sm:$0xf0] }
 0x16b   : > { %3770 = vmatpush.bf16.msra.mxu1 %v4928_v50  ;;  %v4282_v50 = vld [vmem:[%s6018_s0 + $0xa8] sm:$0xf] }
 0x16c   : > { %3789 = vmatpush.bf16.msra.mxu2 %v4936_v48  ;;  %v4840_v48 = vld [vmem:[%s6018_s0 + $0xa4] sm:$0xf] }
 0x16d   : > { %3808 = vmatpush.bf16.msra.mxu3 %v4944_v51  ;;  %3685 = vmatmul.bf16.gmra.mxu0 %v4259_v0  ;;  %v4849_v51 = vld [vmem:[%s6018_s0 + $0xe4] sm:$0xf0]  ;;  %v4279_v59 = vor.u32 %v4840_v48, %v4276_v49 }
 0x16e   : > { %3752 = vmatpush.bf16.msra.mxu0 %v4919_v60  ;;  %3704 = vmatmul.bf16.gmra.mxu1 %v4263_v2  ;;  %v4283_v60 = vor.u32 %v4849_v51, %v4282_v50  ;;  %v4965_v0 = vld [vmem:[%s5660_s5 + $0x388] sm:$0xff] }
 0x16f   : > { %3771 = vmatpush.bf16.msra.mxu1 %v4927_v62  ;;  %3723 = vmatmul.bf16.gmra.mxu2 %v4267_v3  ;;  %v4950_v62 = vld [vmem:[%s5660_s5 + $0x310] sm:$0xff]  ;;  %v4949_v2 = vld [vmem:[%s5660_s5 + $0x308] sm:$0xff] }
 0x170   : > { %3790 = vmatpush.bf16.msra.mxu2 %v4935_v54  ;;  %3742 = vmatmul.bf16.gmra.mxu3 %v4271_v4  ;;  %v4284_v54 = vld [vmem:[%s6018_s0 + $0xe8] sm:$0xf0]  ;;  %v4964_v4 = vld [vmem:[%s5660_s5 + $0x380] sm:$0xff] }
 0x171   : > { %3809 = vmatpush.bf16.msra.mxu3 %v4943_v63  ;;  %v4287_v61 = vor.u32 %v4841_v52, %v4284_v54  ;;  %v4974_v63 = vld [vmem:[%s5660_s5 + $0x3d0] sm:$0xff]  ;;  %v4973_v3 = vld [vmem:[%s5660_s5 + $0x3c8] sm:$0xff] }
 0x172   : > { %3753 = vmatpush.bf16.msra.mxu0 %v4918_v5  ;;  %v4956_v5 = vld [vmem:[%s5660_s5 + $0x340] sm:$0xff] }
 0x173   : > { %3772 = vmatpush.bf16.msra.mxu1 %v4926_v6  ;;  %v4948_v6 = vld [vmem:[%s5660_s5 + $0x300] sm:$0xff] }
 0x174   : > { %3791 = vmatpush.bf16.msra.mxu2 %v4934_v1  ;;  %v4957_v1 = vld [vmem:[%s5660_s5 + $0x348] sm:$0xff] }
 0x175   : > { %3810 = vmatpush.bf16.msra.mxu3 %v4942_v7  ;;  %v4972_v7 = vld [vmem:[%s5660_s5 + $0x3c0] sm:$0xff] }
 0x176   : > { %3754 = vmatpush.bf16.msra.mxu0 %v4917_v9  ;;  %v4834_v9 = vld [vmem:[%s6018_s0 + $0x6c] sm:$0xf0] }
 0x177   : > { %3773 = vmatpush.bf16.msra.mxu1 %v4925_v10  ;;  %v4826_v10 = vld [vmem:[%s6018_s0 + $0x34] sm:$0xf] }
 0x178   : > { %3792 = vmatpush.bf16.msra.mxu2 %v4933_v8  ;;  %v4226_v8 = vld [vmem:[%s6018_s0 + $0x30] sm:$0xf] }
 0x179   : > { %3811 = vmatpush.bf16.msra.mxu3 %v4941_v11  ;;  %v4228_v11 = vld [vmem:[%s6018_s0 + $0x70] sm:$0xf0] }
 0x17a   : > { %3755 = vmatpush.bf16.msra.mxu0 %v4916_v14  ;;  %v4827_v14 = vld [vmem:[%s6018_s0 + $0x3c] sm:$0xf]  ;;  %v4231_v17 = vor.u32 %v4826_v10, %v4228_v11 }
 0x17b   : > { %3774 = vmatpush.bf16.msra.mxu1 %v4924_v15  ;;  %v4236_v15 = vld [vmem:[%s6018_s0 + $0x78] sm:$0xf0] }
 0x17c   : > { %3793 = vmatpush.bf16.msra.mxu2 %v4932_v12  ;;  %v4234_v12 = vld [vmem:[%s6018_s0 + $0x38] sm:$0xf] }
 0x17d   : > { %3812 = vmatpush.bf16.msra.mxu3 %v4940_v16  ;;  %3756 = vmatmul.bf16.vlgmr.msra.gmra.mxu0 %v4211_v29  ;;  %v4227_v16 = vor.u32 %v4834_v9, %v4226_v8 }
 0x17e   : > { %3824 = vmatpush.bf16.msrb.mxu0 %v4955_v19  ;;  %3775 = vmatmul.bf16.vlgmr.msra.gmra.mxu1 %v4215_v31  ;;  %v4239_v19 = vor.u32 %v4827_v14, %v4236_v15  ;;  %v4303_v31 = vor.u32 %v4843_v26, %v4300_v27 }
 0x17f   : > { %3843 = vmatpush.bf16.msrb.mxu1 %v4963_v20  ;;  %3794 = vmatmul.bf16.vlgmr.msra.gmra.mxu2 %v4219_v32  ;;  %v4290_v20 = vld [vmem:[%s6018_s0 + $0xb0] sm:$0xf] }
 0x180   : > { %3862 = vmatpush.bf16.msrb.mxu2 %v4971_v13  ;;  %3813 = vmatmul.bf16.vlgmr.msra.gmra.mxu3 %v4223_v33  ;;  %v4835_v13 = vld [vmem:[%s6018_s0 + $0x74] sm:$0xf0]  ;;  %v4291_v28 = vor.u32 %v4850_v21, %v4290_v20 }
 0x181   : > { %3881 = vmatpush.bf16.msrb.mxu3 %v4979_v22  ;;  %v4235_v18 = vor.u32 %v4835_v13, %v4234_v12  ;;  %v4842_v22 = vld [vmem:[%s6018_s0 + $0xb4] sm:$0xf] }
 0x182   : > { %3825 = vmatpush.bf16.msrb.mxu0 %v4954_v34 }
 0x183   : > { %3844 = vmatpush.bf16.msrb.mxu1 %v4962_v30  ;;  %v4299_v30 = vor.u32 %v4851_v25, %v4298_v24 }
 0x184   : > { %3863 = vmatpush.bf16.msrb.mxu2 %v4970_v23  ;;  %v4292_v23 = vld [vmem:[%s6018_s0 + $0xf0] sm:$0xf0] }
 0x185   : > { %3882 = vmatpush.bf16.msrb.mxu3 %v4978_v35  ;;  %v4295_v29 = vor.u32 %v4842_v22, %v4292_v23 }
 0x186   : > { %3826 = vmatpush.bf16.msrb.mxu0 %v4953_v38 }
 0x187   : > { %3845 = vmatpush.bf16.msrb.mxu1 %v4961_v37 }
 0x188   : > { %3864 = vmatpush.bf16.msrb.mxu2 %v4969_v36 }
 0x189   : > { %3883 = vmatpush.bf16.msrb.mxu3 %v4977_v39 }
 0x18a   : > { %3827 = vmatpush.bf16.msrb.mxu0 %v4952_v42 }
 0x18b   : > { %3846 = vmatpush.bf16.msrb.mxu1 %v4960_v41 }
 0x18c   : > { %3865 = vmatpush.bf16.msrb.mxu2 %v4968_v40 }
 0x18d   : > { %3884 = vmatpush.bf16.msrb.mxu3 %v4976_v43  ;;  %3761 = vmatmul.bf16.gmra.mxu0 %v4275_v57 }
 0x18e   : > { %3828 = vmatpush.bf16.msrb.mxu0 %v4951_v53  ;;  %3780 = vmatmul.bf16.gmra.mxu1 %v4279_v59 }
 0x18f   : > { %3847 = vmatpush.bf16.msrb.mxu1 %v4959_v47  ;;  %3799 = vmatmul.bf16.gmra.mxu2 %v4283_v60 }
 0x190   : > { %3866 = vmatpush.bf16.msrb.mxu2 %v4967_v44  ;;  %3818 = vmatmul.bf16.gmra.mxu3 %v4287_v61 }
 0x191   : > { %3885 = vmatpush.bf16.msrb.mxu3 %v4975_v55 }
 0x192   : > { %3829 = vmatpush.bf16.msrb.mxu0 %v4950_v62 }
 0x193   : > { %3848 = vmatpush.bf16.msrb.mxu1 %v4958_v58 }
 0x194   : > { %3867 = vmatpush.bf16.msrb.mxu2 %v4966_v56 }
 0x195   : > { %3886 = vmatpush.bf16.msrb.mxu3 %v4974_v63 }
 0x196   : > { %3830 = vmatpush.bf16.msrb.mxu0 %v4949_v2 }
 0x197   : > { %3849 = vmatpush.bf16.msrb.mxu1 %v4957_v1 }
 0x198   : > { %3868 = vmatpush.bf16.msrb.mxu2 %v4965_v0 }
 0x199   : > { %3887 = vmatpush.bf16.msrb.mxu3 %v4973_v3 }
 0x19a   : > { %3831 = vmatpush.bf16.msrb.mxu0 %v4948_v6 }
 0x19b   : > { %3850 = vmatpush.bf16.msrb.mxu1 %v4956_v5 }
 0x19c   : > { %3869 = vmatpush.bf16.msrb.mxu2 %v4964_v4 }
 0x19d   : > { %3888 = vmatpush.bf16.msrb.mxu3 %v4972_v7  ;;  %3832 = vmatmul.bf16.vlgmr.msrb.gmra.mxu0 %v4227_v16 }
 0x19e   : > { %3851 = vmatmul.bf16.vlgmr.msrb.gmra.mxu1 %v4231_v17 }
 0x19f   : > { %3870 = vmatmul.bf16.vlgmr.msrb.gmra.mxu2 %v4235_v18 }
 0x1a0   : > { %3889 = vmatmul.bf16.vlgmr.msrb.gmra.mxu3 %v4239_v19 }
 0x1ad   : > { %3837 = vmatmul.bf16.gmra.mxu0 %v4291_v28 }
 0x1ae   : > { %3856 = vmatmul.bf16.gmra.mxu1 %v4295_v29 }
 0x1af   : > { %3875 = vmatmul.bf16.gmra.mxu2 %v4299_v30 }
 0x1b0   : > { %3894 = vmatmul.bf16.gmra.mxu3 %v4303_v31 }
 0x1ba   : > { %v3605_v32 = vpop.f32.mrf.mxu0 }
 0x1bb   : > { %v3624_v33 = vpop.f32.mrf.mxu1 }
 0x1bc   : > { %v3625_v34 = vadd.f32 %v3624_v33, %v3605_v32 }
 0x1c2   : > { %v3643_v35 = vpop.f32.mrf.mxu2  ;;  %v3607_v38 = vpop.f32.mrf.mxu0 }
 0x1c3   : > { %v3662_v36 = vpop.f32.mrf.mxu3  ;;  %v3644_v37 = vadd.f32 %v3643_v35, %v3625_v34  ;;  %v3626_v39 = vpop.f32.mrf.mxu1 }
 0x1c4   : > { %v3627_v40 = vadd.f32 %v3626_v39, %v3607_v38 }
 0x1c5   : > { %v3663_v41 = vadd.f32 %v3662_v36, %v3644_v37 }
 0x1ca   : > { %v3645_v42 = vpop.f32.mrf.mxu2  ;;  %v3610_v45 = vpop.f32.mrf.mxu0 }
 0x1cb   : > { %v3664_v43 = vpop.f32.mrf.mxu3  ;;  %v3646_v44 = vadd.f32 %v3645_v42, %v3627_v40  ;;  %v3629_v46 = vpop.f32.mrf.mxu1 }
 0x1cc   : > { %v3630_v47 = vadd.f32 %v3629_v46, %v3610_v45 }
 0x1cd   : > { %v3665_v48 = vadd.f32 %v3664_v43, %v3646_v44 }
 0x1d2   : > { %v3648_v49 = vpop.f32.mrf.mxu2  ;;  %v3612_v52 = vpop.f32.mrf.mxu0 }
 0x1d3   : > { %v3667_v50 = vpop.f32.mrf.mxu3  ;;  %v3649_v51 = vadd.f32 %v3648_v49, %v3630_v47  ;;  %v3631_v53 = vpop.f32.mrf.mxu1 }
 0x1d4   : > { %v3632_v54 = vadd.f32 %v3631_v53, %v3612_v52 }
 0x1d5   : > { %v3668_v55 = vadd.f32 %v3667_v50, %v3649_v51 }
 0x1da   : > { %v3650_v56 = vpop.f32.mrf.mxu2  ;;  %v3681_v59 = vpop.f32.mrf.mxu0 }
 0x1db   : > { %v3669_v57 = vpop.f32.mrf.mxu3  ;;  %v3651_v58 = vadd.f32 %v3650_v56, %v3632_v54  ;;  %v3700_v60 = vpop.f32.mrf.mxu1  ;;  %v3682_v18 = vadd.f32 %v3681_v59, %v3663_v41 }
 0x1dd   : > { %v3670_v61 = vadd.f32 %v3669_v57, %v3651_v58  ;;  %v3701_v23 = vadd.f32 %v3700_v60, %v3682_v18 }
 0x1e2   : > { %v3719_v62 = vpop.f32.mrf.mxu2  ;;  %v3683_v0 = vpop.f32.mrf.mxu0 }
 0x1e3   : > { %v3738_v63 = vpop.f32.mrf.mxu3  ;;  %v3702_v1 = vpop.f32.mrf.mxu1  ;;  %v3684_v24 = vadd.f32 %v3683_v0, %v3665_v48  ;;  %v3720_v25 = vadd.f32 %v3719_v62, %v3701_v23 }
 0x1e5   : > { %v3703_v26 = vadd.f32 %v3702_v1, %v3684_v24  ;;  %v3739_v28 = vadd.f32 %v3738_v63, %v3720_v25 }
 0x1ea   : > { %v3721_v2 = vpop.f32.mrf.mxu2  ;;  %v3686_v4 = vpop.f32.mrf.mxu0 }
 0x1eb   : > { %v3740_v3 = vpop.f32.mrf.mxu3  ;;  %v3705_v5 = vpop.f32.mrf.mxu1  ;;  %v3722_v29 = vadd.f32 %v3721_v2, %v3703_v26  ;;  %v3687_v33 = vadd.f32 %v3686_v4, %v3668_v55 }
 0x1ed   : > { %v3741_v35 = vadd.f32 %v3740_v3, %v3722_v29  ;;  %v3706_v36 = vadd.f32 %v3705_v5, %v3687_v33 }
 0x1f2   : > { %v3724_v6 = vpop.f32.mrf.mxu2  ;;  %v3688_v8 = vpop.f32.mrf.mxu0 }
 0x1f3   : > { %v3743_v7 = vpop.f32.mrf.mxu3  ;;  %v3707_v9 = vpop.f32.mrf.mxu1  ;;  %v3725_v40 = vadd.f32 %v3724_v6, %v3706_v36  ;;  %v3689_v44 = vadd.f32 %v3688_v8, %v3670_v61 }
 0x1f5   : > { %v3744_v47 = vadd.f32 %v3743_v7, %v3725_v40  ;;  %v3708_v50 = vadd.f32 %v3707_v9, %v3689_v44 }
 0x1fa   : > { %v3726_v10 = vpop.f32.mrf.mxu2  ;;  %v3757_v12 = vpop.f32.mrf.mxu0 }
 0x1fb   : > { %v3745_v11 = vpop.f32.mrf.mxu3  ;;  %v3776_v13 = vpop.f32.mrf.mxu1  ;;  %v3758_v34 = vadd.f32 %v3757_v12, %v3739_v28  ;;  %v3727_v53 = vadd.f32 %v3726_v10, %v3708_v50 }
 0x1fd   : > { %v3777_v37 = vadd.f32 %v3776_v13, %v3758_v34  ;;  %v3746_v63 = vadd.f32 %v3745_v11, %v3727_v53 }
 0x202   : > { %v3795_v14 = vpop.f32.mrf.mxu2  ;;  %v3759_v16 = vpop.f32.mrf.mxu0 }
 0x203   : > { %v3814_v15 = vpop.f32.mrf.mxu3  ;;  %v3778_v17 = vpop.f32.mrf.mxu1  ;;  %v3760_v38 = vadd.f32 %v3759_v16, %v3741_v35  ;;  %v3796_v41 = vadd.f32 %v3795_v14, %v3777_v37 }
 0x205   : > { %v3779_v46 = vadd.f32 %v3778_v17, %v3760_v38  ;;  %v3815_v48 = vadd.f32 %v3814_v15, %v3796_v41 }
 0x20a   : > { %v3797_v19 = vpop.f32.mrf.mxu2  ;;  %v3762_v21 = vpop.f32.mrf.mxu0 }
 0x20b   : > { %v3816_v20 = vpop.f32.mrf.mxu3  ;;  %v3781_v22 = vpop.f32.mrf.mxu1  ;;  %v3798_v49 = vadd.f32 %v3797_v19, %v3779_v46  ;;  %v3763_v51 = vadd.f32 %v3762_v21, %v3744_v47 }
 0x20d   : > { %v3817_v55 = vadd.f32 %v3816_v20, %v3798_v49  ;;  %v3782_v59 = vadd.f32 %v3781_v22, %v3763_v51 }
 0x212   : > { %v3800_v27 = vpop.f32.mrf.mxu2  ;;  %v3764_v31 = vpop.f32.mrf.mxu0 }
 0x213   : > { %v3819_v30 = vpop.f32.mrf.mxu3  ;;  %v3783_v32 = vpop.f32.mrf.mxu1  ;;  %v3801_v61 = vadd.f32 %v3800_v27, %v3782_v59  ;;  %v3765_v1 = vadd.f32 %v3764_v31, %v3746_v63 }
 0x215   : > { %v3820_v4 = vadd.f32 %v3819_v30, %v3801_v61  ;;  %v3784_v9 = vadd.f32 %v3783_v32, %v3765_v1 }
 0x21a   : > { %v3802_v39 = vpop.f32.mrf.mxu2  ;;  %v3833_v43 = vpop.f32.mrf.mxu0 }
 0x21b   : > { %v3821_v42 = vpop.f32.mrf.mxu3  ;;  %v3852_v45 = vpop.f32.mrf.mxu1  ;;  %v3834_v52 = vadd.f32 %v3833_v43, %v3815_v48  ;;  %v3803_v13 = vadd.f32 %v3802_v39, %v3784_v9  ;;  %v3937_v43 = vlaneseq }
 0x21d   : > { %v3853_v60 = vadd.f32 %v3852_v45, %v3834_v52  ;;  %v3822_v21 = vadd.f32 %v3821_v42, %v3803_v13  ;;  %v3938_v48 = vshrl.u32 %v3937_v43, 7 }
 0x21f   : > { %vm3940_vm0 = vcmp.eq.s32.totalorder %v3938_v48, 1  ;;  %vm3939_vm1 = vcmp.eq.s32.totalorder %v3938_v48, 0 }
 0x222   : > { %v3871_v54 = vpop.f32.mrf.mxu2  ;;  %v3835_v57 = vpop.f32.mrf.mxu0 }
 0x223   : > { %v3890_v56 = vpop.f32.mrf.mxu3  ;;  %v3854_v58 = vpop.f32.mrf.mxu1  ;;  %v3836_v62 = vadd.f32 %v3835_v57, %v3817_v55  ;;  %v3872_v0 = vadd.f32 %v3871_v54, %v3853_v60 }
 0x225   : > { %v3855_v2 = vadd.f32 %v3854_v58, %v3836_v62  ;;  %v3891_v5 = vadd.f32 %v3890_v56, %v3872_v0 }
 0x227   : > { %v3924_v15 = vmul.f32 %v3891_v5, %v3891_v5 }
 0x22a   : > { %v3873_v3 = vpop.f32.mrf.mxu2  ;;  %v3838_v8 = vpop.f32.mrf.mxu0 }
 0x22b   : > { %v3874_v6 = vadd.f32 %v3873_v3, %v3855_v2  ;;  %v3892_v7 = vpop.f32.mrf.mxu3  ;;  %v3839_v12 = vadd.f32 %v3838_v8, %v3820_v4  ;;  %v3857_v14 = vpop.f32.mrf.mxu1 }
 0x22d   : > { %v3893_v10 = vadd.f32 %v3892_v7, %v3874_v6  ;;  %v3858_v19 = vadd.f32 %v3857_v14, %v3839_v12 }
 0x22f   : > { %v3915_v16 = vadd.f32 %v3893_v10, %v3891_v5  ;;  %v3925_v11 = vmul.f32 %v3893_v10, %v3893_v10  ;;  %v4983_v17 = vpack.c.bf16 %v3893_v10, %v3891_v5 }
 0x231   : > { %v3928_v18 = vadd.f32 %v3925_v11, %v3924_v15  ;;  %4984 = vst [vmem:[%s5984_s20] sm:$0xff] %v4983_v17  }
 0x232   : > { %v3876_v20 = vpop.f32.mrf.mxu2  ;;  %v3840_v24 = vpop.f32.mrf.mxu0 }
 0x233   : > { %v3877_v22 = vadd.f32 %v3876_v20, %v3858_v19  ;;  %v3895_v23 = vpop.f32.mrf.mxu3  ;;  %v3841_v26 = vadd.f32 %v3840_v24, %v3822_v21  ;;  %v3859_v29 = vpop.f32.mrf.mxu1 }
 0x235   : > { %v3896_v25 = vadd.f32 %v3895_v23, %v3877_v22  ;;  %v3860_v31 = vadd.f32 %v3859_v29, %v3841_v26 }
 0x237   : > { %v3916_v27 = vadd.f32 %v3915_v16, %v3896_v25  ;;  %v3926_v28 = vmul.f32 %v3896_v25, %v3896_v25 }
 0x238   : > { %v3988_v56 = vld [vmem:[%s5984_s20] sm:$0xf] (%p5126_p6)  ;;  %v3990_v57 = vld [vmem:[%s5984_s20 + $0x4] sm:$0xf] (%p5126_p6) }
 0x239   : > { %v3929_v30 = vadd.f32 %v3928_v18, %v3926_v28  ;;  %3989 = vst [vmem:[%s3971_s29] sm:$0xf] (%p5126_p6), %v3988_v56 }
 0x23a   : > { %v3878_v32 = vpop.f32.mrf.mxu2  ;;  %3991 = vst [vmem:[%s3971_s29 + $0x8] sm:$0xf] (%p5126_p6), %v3990_v57 }
 0x23b   : > { %v3879_v33 = vadd.f32 %v3878_v32, %v3860_v31  ;;  %v3897_v34 = vpop.f32.mrf.mxu3 }
 0x23d   : > { %v3898_v35 = vadd.f32 %v3897_v34, %v3879_v33 }
 0x23f   : > { %v3917_v36 = vadd.f32 %v3916_v27, %v3898_v35  ;;  %v3927_v37 = vmul.f32 %v3898_v35, %v3898_v35  ;;  %v4988_v38 = vpack.c.bf16 %v3898_v35, %v3896_v25 }
 0x241   : > { %v3918_v39 = vrot.slane %v3917_v36, 4  ;;  %v3930_v40 = vadd.f32 %v3929_v30, %v3927_v37  ;;  %4990 = vst [vmem:[%s5984_s20 + $0x8] sm:$0xff] %v4988_v38  }
 0x243   : > { %v3919_v41 = vadd.f32 %v3918_v39, %v3917_v36  ;;  %v3931_v42 = vrot.slane %v3930_v40, 4 }
 0x245   : > { %v3920_v44 = vrot.slane %v3919_v41, 2  ;;  %v3932_v45 = vadd.f32 %v3931_v42, %v3930_v40 }
 0x247   : > { %v3921_v46 = vadd.f32 %v3920_v44, %v3919_v41  ;;  %v3933_v47 = vrot.slane %v3932_v45, 2 }
 0x248   : > { %v3992_v58 = vld [vmem:[%s5984_s20 + $0x8] sm:$0xf] (%p5126_p6)  ;;  %v3994_v59 = vld [vmem:[%s5984_s20 + $0xc] sm:$0xf] (%p5126_p6) }
 0x249   : > { %v3934_v49 = vadd.f32 %v3933_v47, %v3932_v45  ;;  %v3922_v50 = vrot.slane %v3921_v46, 1  ;;  %3993 = vst [vmem:[%s3971_s29 + $0x10] sm:$0xf] (%p5126_p6), %v3992_v58 }
 0x24a   : > { %3995 = vst [vmem:[%s3971_s29 + $0x18] sm:$0xf] (%p5126_p6), %v3994_v59 }
 0x24b   : > { %v3935_v51 = vrot.slane %v3934_v49, 1  ;;  %v3923_v53 = vadd.f32 %v3922_v50, %v3921_v46 }
 0x24d   : > { %v3936_v52 = vadd.f32 %v3935_v51, %v3934_v49  ;;  %3966 = sbr.rel (!%p5126_p6) target bundleno = 594 (0x252), region = 92 }
 0x24f   : > { %v3941_v54 = vsel %vm3940_vm0, %v3936_v52, 0.0 }
 0x250   : > { %v3942_v55 = vsel %vm3939_vm1, %v3923_v53, %v3941_v54 }
 0x251   : > { %3943 = vst [vmem:[%s2367_s25] sm:$0xff] %v3942_v55 }
 0x252 PF: > { %s14_s16 = sadd.s32 1, %s5069_s16   ;;  %s6023_s12 = smov %s5057_s13 }
 0x253   : > { %p11_p12 = scmp.ge.s32.totalorder %s14_s16, 4   ;;  %s6024_s13 = smov %s5131_s22 }
 0x254   : > { %s6025_s14 = smov %s5065_s15  ;;  %s6026_s15 = smov %s6028_s17 }
 0x255   :  { %13 = sbr.rel (!%p11_p12) target bundleno = 3 (0x3), region = 183 }

// kernel: discriminator_forward.12
= control target key start
LH: loop header
LB: loop body
LE: loop exit
PB: predicated region body
PF: predicated region fallthrough
CT: control target
= control target key end

     0   :  { %s330_s12 = smov 0   ;;  %s356_s0 = inlined_call_operand.vmem [shape: bf16[32,256], index: 0, kind: input, shape index: {}]   ;;  %s357_s1 = inlined_call_operand.vmem [shape: f32[1,256], index: 1, kind: input, shape index: {}]   ;;  %s358_s2 = inlined_call_operand.vmem [shape: f32[1,256], index: 2, kind: input, shape index: {}]   ;;  %s359_s3 = inlined_call_operand.vmem [shape: bf16[32,256], index: 3, kind: output, shape index: {}]  }
   0x1 LB: > { %s279_s13 = sadd.s32 4294967295, %s308_s12   ;;  %p283_p0 = scmp.ge.s32.totalorder %s308_s12, 1  ;;  %s308_s12 = sphi %s330_s12, %s13_s12  }
   0x2   : > { %p139_p1 = scmp.lt.s32.totalorder %s308_s12, 3 }
   0x4   : > { %p140_p2 = pnand %p283_p0, %p139_p1 }
   0x5   : > { %s284_s14 = sshll.u32 (!%p140_p2), %s279_s13, 1 }
   0x6   : > { %143 = sbr.rel (%p140_p2) target bundleno = 28 (0x1c), region = 32  ;;  %p166_p3 = scmp.lt.s32.totalorder (!%p140_p2), %s284_s14, 3 }
   0xb   : > { %s361_s14 = smov (!%p166_p3, %s284_s14), 3  ;;  %v185_v0 = vld [vmem:[%s357_s1] sm:$0x3] }
   0xc   : > { %v195_v1 = vld [vmem:[%s358_s2] sm:$0x3]  ;;  %s292_s19 = sshll.u32 %s361_s14, 3  ;;  %v187_v2 = vperm.slane %v185_v0, 0  ;;  %v188_v3 = vperm.slane %v185_v0, 1 }
   0xd   : > { %s170_s22 = scalar_lea.vmem %s356_s0, %s292_s19  ;;  %v197_v6 = vperm.slane %v195_v1, 0  ;;  %v198_v7 = vperm.slane %v195_v1, 1  ;;  %s177_s25 = scalar_lea.vmem %s359_s3, %s292_s19 }
   0xe   : > { %v179_v4 = vld [vmem:[%s170_s22] sm:$0xff]  ;;  %v180_v5 = vld [vmem:[%s170_s22 + $0x8] sm:$0xff] }
   0xf   : > { %v181_v8 = vunpack.c.l.bf16 %v179_v4  ;;  %v182_v9 = vunpack.c.h.bf16 %v179_v4  ;;  %v183_v10 = vunpack.c.l.bf16 %v180_v5  ;;  %v184_v11 = vunpack.c.h.bf16 %v180_v5 }
  0x11   : > { %v191_v12 = vmul.f32 %v187_v2, %v181_v8  ;;  %v192_v13 = vmul.f32 %v188_v3, %v182_v9  ;;  %v193_v14 = vmul.f32 %v187_v2, %v183_v10  ;;  %v194_v15 = vmul.f32 %v188_v3, %v184_v11 }
  0x13   : > { %v201_v16 = vadd.f32 %v197_v6, %v191_v12  ;;  %v202_v17 = vadd.f32 %v198_v7, %v192_v13  ;;  %v203_v18 = vadd.f32 %v197_v6, %v193_v14  ;;  %v204_v19 = vadd.f32 %v198_v7, %v194_v15 }
  0x15   : > { %vm205_vm0 = vcmp.gt.f32.partialorder %v201_v16, 0.0  ;;  %vm206_vm1 = vcmp.gt.f32.partialorder %v202_v17, 0.0  ;;  %v209_v20 = vmul.f32 0.2, %v201_v16  ;;  %v210_v21 = vmul.f32 0.2, %v202_v17 }
  0x16   : > { %vm207_vm2 = vcmp.gt.f32.partialorder %v203_v18, 0.0  ;;  %vm208_vm3 = vcmp.gt.f32.partialorder %v204_v19, 0.0  ;;  %v211_v22 = vmul.f32 0.2, %v203_v18  ;;  %v212_v23 = vmul.f32 0.2, %v204_v19 }
  0x17   : > { %v213_v24 = vsel %vm205_vm0, %v201_v16, %v209_v20  ;;  %v214_v25 = vsel %vm206_vm1, %v202_v17, %v210_v21 }
  0x18   : > { %v217_v26 = vpack.c.bf16 %v214_v25, %v213_v24  ;;  %v215_v27 = vsel %vm207_vm2, %v203_v18, %v211_v22  ;;  %v216_v28 = vsel %vm208_vm3, %v204_v19, %v212_v23 }
  0x19   : > { %v218_v29 = vpack.c.bf16 %v216_v28, %v215_v27 }
  0x1a   : > { %219 = vst [vmem:[%s177_s25] sm:$0xff] %v217_v26 }
  0x1b   : > { %220 = vst [vmem:[%s177_s25 + $0x8] sm:$0xff] %v218_v29 }
  0x1c PF: > { %s13_s12 = sadd.s32 1, %s308_s12  }
  0x1d   : > { %p10_p4 = scmp.ge.s32.totalorder %s13_s12, 4  }
  0x1f   :  { %12 = sbr.rel (!%p10_p4) target bundleno = 1 (0x1), region = 62 }

// kernel: discriminator_forward.14
= control target key start
LH: loop header
LB: loop body
LE: loop exit
PB: predicated region body
PF: predicated region fallthrough
CT: control target
= control target key end

     0   :  { %s368_s12 = smov 0   ;;  %s398_s0 = inlined_call_operand.vmem [shape: bf16[32,512], index: 0, kind: input, shape index: {}]   ;;  %s399_s1 = inlined_call_operand.vmem [shape: f32[1,512], index: 1, kind: input, shape index: {}]   ;;  %s400_s2 = inlined_call_operand.vmem [shape: f32[1,512], index: 2, kind: input, shape index: {}]   ;;  %s401_s3 = inlined_call_operand.vmem [shape: bf16[32,512], index: 3, kind: output, shape index: {}]  }
   0x1 LB: > { %s317_s13 = sadd.s32 4294967295, %s346_s12   ;;  %p321_p0 = scmp.ge.s32.totalorder %s346_s12, 1  ;;  %s346_s12 = sphi %s368_s12, %s13_s12  }
   0x2   : > { %p139_p1 = scmp.lt.s32.totalorder %s346_s12, 3 }
   0x4   : > { %p140_p2 = pnand %p321_p0, %p139_p1 }
   0x5   : > { %s322_s14 = sshll.u32 (!%p140_p2), %s317_s13, 1 }
   0x6   : > { %143 = sbr.rel (%p140_p2) target bundleno = 32 (0x20), region = 32  ;;  %p166_p3 = scmp.lt.s32.totalorder (!%p140_p2), %s322_s14, 3 }
   0xb   : > { %v191_v0 = vld [vmem:[%s399_s1] sm:$0xf]  ;;  %s403_s14 = smov (!%p166_p3, %s322_s14), 3 }
   0xc   : > { %v209_v1 = vld [vmem:[%s400_s2] sm:$0xf]  ;;  %s330_s19 = sshll.u32 %s403_s14, 4  ;;  %v193_v2 = vperm.slane %v191_v0, 0  ;;  %v194_v3 = vperm.slane %v191_v0, 1  ;;  %v195_v5 = vperm.slane %v191_v0, 2 }
   0xd   : > { %s170_s22 = scalar_lea.vmem %s398_s0, %s330_s19  ;;  %v211_v4 = vperm.slane %v209_v1, 0  ;;  %v196_v6 = vperm.slane %v191_v0, 3  ;;  %v212_v10 = vperm.slane %v209_v1, 1  ;;  %v213_v11 = vperm.slane %v209_v1, 2  ;;  %s177_s25 = scalar_lea.vmem %s401_s3, %s330_s19 }
   0xe   : > { %v179_v7 = vld [vmem:[%s170_s22] sm:$0xff]  ;;  %v180_v8 = vld [vmem:[%s170_s22 + $0x8] sm:$0xff]  ;;  %v181_v9 = vld [vmem:[%s170_s22 + $0x10] sm:$0xff]  ;;  %v214_v12 = vperm.slane %v209_v1, 3 }
   0xf   : > { %v182_v13 = vld [vmem:[%s170_s22 + $0x18] sm:$0xff]  ;;  %v183_v14 = vunpack.c.l.bf16 %v179_v7  ;;  %v184_v15 = vunpack.c.h.bf16 %v179_v7  ;;  %v185_v16 = vunpack.c.l.bf16 %v180_v8  ;;  %v186_v17 = vunpack.c.h.bf16 %v180_v8 }
  0x10   : > { %v187_v18 = vunpack.c.l.bf16 %v181_v9  ;;  %v188_v19 = vunpack.c.h.bf16 %v181_v9  ;;  %v189_v20 = vunpack.c.l.bf16 %v182_v13  ;;  %v190_v21 = vunpack.c.h.bf16 %v182_v13 }
  0x11   : > { %v201_v22 = vmul.f32 %v193_v2, %v183_v14  ;;  %v202_v23 = vmul.f32 %v194_v3, %v184_v15  ;;  %v203_v24 = vmul.f32 %v195_v5, %v185_v16  ;;  %v204_v25 = vmul.f32 %v196_v6, %v186_v17 }
  0x12   : > { %v205_v26 = vmul.f32 %v193_v2, %v187_v18  ;;  %v206_v27 = vmul.f32 %v194_v3, %v188_v19  ;;  %v207_v28 = vmul.f32 %v195_v5, %v189_v20  ;;  %v208_v29 = vmul.f32 %v196_v6, %v190_v21 }
  0x13   : > { %v219_v30 = vadd.f32 %v211_v4, %v201_v22  ;;  %v220_v31 = vadd.f32 %v212_v10, %v202_v23  ;;  %v221_v32 = vadd.f32 %v213_v11, %v203_v24  ;;  %v222_v33 = vadd.f32 %v214_v12, %v204_v25 }
  0x14   : > { %v223_v34 = vadd.f32 %v211_v4, %v205_v26  ;;  %v224_v35 = vadd.f32 %v212_v10, %v206_v27  ;;  %v225_v36 = vadd.f32 %v213_v11, %v207_v28  ;;  %v226_v37 = vadd.f32 %v214_v12, %v208_v29 }
  0x15   : > { %vm227_vm0 = vcmp.gt.f32.partialorder %v219_v30, 0.0  ;;  %vm228_vm1 = vcmp.gt.f32.partialorder %v220_v31, 0.0  ;;  %v235_v38 = vmul.f32 0.2, %v219_v30  ;;  %v236_v39 = vmul.f32 0.2, %v220_v31 }
  0x16   : > { %vm229_vm2 = vcmp.gt.f32.partialorder %v221_v32, 0.0  ;;  %vm230_vm3 = vcmp.gt.f32.partialorder %v222_v33, 0.0  ;;  %v237_v40 = vmul.f32 0.2, %v221_v32  ;;  %v238_v41 = vmul.f32 0.2, %v222_v33 }
  0x17   : > { %v243_v42 = vsel %vm227_vm0, %v219_v30, %v235_v38  ;;  %v244_v43 = vsel %vm228_vm1, %v220_v31, %v236_v39  ;;  %vm231_vm4 = vcmp.gt.f32.partialorder %v223_v34, 0.0  ;;  %vm232_vm5 = vcmp.gt.f32.partialorder %v224_v35, 0.0 }
  0x18   : > { %v251_v44 = vpack.c.bf16 %v244_v43, %v243_v42  ;;  %v245_v45 = vsel %vm229_vm2, %v221_v32, %v237_v40  ;;  %v246_v46 = vsel %vm230_vm3, %v222_v33, %v238_v41  ;;  %v239_v47 = vmul.f32 0.2, %v223_v34 }
  0x19   : > { %v252_v48 = vpack.c.bf16 %v246_v46, %v245_v45  ;;  %v240_v49 = vmul.f32 0.2, %v224_v35  ;;  %vm233_vm6 = vcmp.gt.f32.partialorder %v225_v36, 0.0  ;;  %vm234_vm7 = vcmp.gt.f32.partialorder %v226_v37, 0.0 }
  0x1a   : > { %255 = vst [vmem:[%s177_s25] sm:$0xff] %v251_v44  ;;  %v247_v50 = vsel %vm231_vm4, %v223_v34, %v239_v47  ;;  %v241_v51 = vmul.f32 0.2, %v225_v36  ;;  %v242_v52 = vmul.f32 0.2, %v226_v37 }
  0x1b   : > { %256 = vst [vmem:[%s177_s25 + $0x8] sm:$0xff] %v252_v48  ;;  %v248_v53 = vsel %vm232_vm5, %v224_v35, %v240_v49 }
  0x1c   : > { %v253_v54 = vpack.c.bf16 %v248_v53, %v247_v50  ;;  %v249_v55 = vsel %vm233_vm6, %v225_v36, %v241_v51  ;;  %v250_v56 = vsel %vm234_vm7, %v226_v37, %v242_v52 }
  0x1d   : > { %v254_v57 = vpack.c.bf16 %v250_v56, %v249_v55 }
  0x1e   : > { %257 = vst [vmem:[%s177_s25 + $0x10] sm:$0xff] %v253_v54 }
  0x1f   : > { %258 = vst [vmem:[%s177_s25 + $0x18] sm:$0xff] %v254_v57 }
  0x20 PF: > { %s13_s12 = sadd.s32 1, %s346_s12  }
  0x21   : > { %p10_p4 = scmp.ge.s32.totalorder %s13_s12, 4  }
  0x23   :  { %12 = sbr.rel (!%p10_p4) target bundleno = 1 (0x1), region = 62 }

// kernel: discriminator_forward.13
= control target key start
LH: loop header
LB: loop body
LE: loop exit
PB: predicated region body
PF: predicated region fallthrough
CT: control target
= control target key end

     0   :  { %s8331_s0 = inlined_call_operand.vmem [shape: bf16[32,4096], index: 0, kind: input, shape index: {}]   ;;  %s8332_s1 = inlined_call_operand.vmem [shape: bf16[4096,512], index: 1, kind: input, shape index: {}]   ;;  %s8333_s2 = inlined_call_operand.vmem [shape: bf16[32,512], index: 2, kind: output, shape index: {0}]   ;;  %s8334_s3 = inlined_call_operand.vmem [shape: f32[8,512], index: 3, kind: output, shape index: {1}]  }
   0x1   :  { %8337 = sst [smem:[#allocation8_spill]] %s8331_s0 }
   0x2   :  { %8338 = sst [smem:[#allocation9_spill]] %s8332_s1 }
   0x3   :  { %s6771_s12 = smov 0   ;;  %s6773_s13 = smov 0  }
   0x4   :  { %s6775_s14 = smov 0   ;;  %s6777_s15 = smov 0  }
   0x5   :  { %s6779_s16 = smov 0   ;;  %s6781_s17 = smov 0  }
   0x6   :  { %s6783_s18 = smov 0   ;;  %s6785_s19 = smov 0  }
   0x7   :  { %s6787_s20 = smov 0   ;;  %s6789_s21 = smov 0  }
   0x8   :  { %s6791_s22 = smov 0  }
   0x9 LB: > { %s5105_s23 = sadd.s32 4294967295, %s6748_s22   ;;  %s26_s24 = sadd.s32 1, %s6740_s20  ;;  %s6748_s22 = sphi %s6791_s22, %s14_s22   ;;  %s6744_s21 = sphi %s6789_s21, %s8357_s21   ;;  %s6740_s20 = sphi %s6787_s20, %s8356_s20   ;;  %s6736_s19 = sphi %s6785_s19, %s8355_s19   ;;  %s6732_s18 = sphi %s6783_s18, %s8354_s18   ;;  %s6728_s17 = sphi %s6781_s17, %s8353_s17   ;;  %s6724_s16 = sphi %s6779_s16, %s8352_s16   ;;  %s6720_s15 = sphi %s6777_s15, %s8351_s15   ;;  %s6716_s14 = sphi %s6775_s14, %s8350_s14   ;;  %s6712_s13 = sphi %s6773_s13, %s8349_s13   ;;  %s6708_s12 = sphi %s6771_s12, %s8348_s12  }
   0xa   : > { %p27_p0 = scmp.ge.s32.totalorder %s26_s24, 2  ;;  %s29_s25 = sadd.s32 1, %s6744_s21 }
   0xb   : > { %s42_s26 = sadd.s32 1, %s6728_s17  ;;  %p49_p1 = scmp.ne.s32.totalorder %s6728_s17, %s6724_s16 }
   0xc   : > { %s8359_s24 = smov (%p27_p0, %s26_s24), 0  ;;  %s8361_s25 = smov (!%p27_p0, %s29_s25), %s6744_s21 }
   0xd   : > { %8339 = sst [smem:[#allocation6_spill]] %s8359_s24  ;;  %s38_s27 = ssub.s32 %s6740_s20, %s8359_s24 }
   0xe   : > { %p50_p2 = scmp.eq.s32.totalorder %s6748_s22, 0  ;;  %p31_p3 = scmp.ge.s32.totalorder %s8361_s25, 2 }
   0xf   : > { %p40_p4 = scmp.eq.s32.totalorder %s38_s27, 0  ;;  %s70_s29 = sadd.s32 1, %s6720_s15 }
  0x10   : > { %p6838_p5 = por %p50_p2, %p49_p1  ;;  %s8363_s25 = smov (%p31_p3, %s8361_s25), 0 }
  0x11   : > { %8341 = sst [smem:[#allocation7_spill]] %s8363_s25  ;;  %s66_s4 = ssub.s32 %s6744_s21, %s8363_s25 }
  0x12   : > { %s6846_s30 = scalar_select %p40_p4, %s6728_s17, %s42_s26  }
  0x13   : > { %p77_p6 = scmp.ne.s32.totalorder %s6720_s15, %s6716_s14  ;;  %s67_s5 = sor.u32 %s66_s4, %s38_s27 }
  0x14   : > { %p96_p7 = scmp.eq.s32.totalorder %s66_s4, 0  ;;  %p68_p8 = scmp.eq.s32.totalorder %s67_s5, 0 }
  0x15   : > { %p6852_p9 = por %p77_p6, %p50_p2  ;;  %s98_s7 = sadd.s32 1, %s6712_s13 }
  0x16   : > { %p108_p10 = scmp.ne.s32.totalorder %s6712_s13, %s6708_s12  ;;  %p109_p11 = scmp.eq.s32.totalorder %s5105_s23, 3 }
  0x17   : > { %s6860_s8 = scalar_select %p68_p8, %s6720_s15, %s70_s29  }
  0x18   : > { %s6863_s9 = scalar_select %p96_p7, %s6712_s13, %s98_s7  }
  0x19   : > { %p6865_p12 = por %p109_p11, %p108_p10  ;;  %p5108_p13 = scmp.ge.s32.totalorder %s6748_s22, 4 }
  0x1b   : > { %159 = sbr.rel (%p5108_p13) target bundleno = 340 (0x154), region = 16 }
  0x20   : > { %162 = sbr.rel (!%p6838_p5) target bundleno = 74 (0x4a), region = 20  ;;  %s164_s11 = sand.u32 (%p6838_p5), 1, %s6728_s17  }
  0x21   : > { %s6282_s26 = sshll.u32 (%p6838_p5), %s6740_s20, 6  ;;  %s5109_s27 = sshll.u32 (%p6838_p5), %s164_s11, 8 }
  0x22   : > { %s8344_s0 = sld [smem:[#allocation8_spill]] (%p6838_p5)  ;;  %s6882_s23 = scalar_lea.vmem (%p6838_p5), [#allocation3], %s5109_s27 }
  0x28   : > { %s6877_s5 = scalar_lea.vmem %s8344_s0, %s6282_s26 }
  0x29   : > { %v185_v0 = vld [vmem:[%s6877_s5] sm:$0xff]  ;;  %v187_v1 = vld [vmem:[%s6877_s5 + $0x8] sm:$0xff]  ;;  %v189_v2 = vld [vmem:[%s6877_s5 + $0x10] sm:$0xff] }
  0x2a   : > { %186 = vst [vmem:[%s6882_s23] sm:$0xff] %v185_v0  ;;  %v191_v3 = vld [vmem:[%s6877_s5 + $0x18] sm:$0xff]  ;;  %v193_v4 = vld [vmem:[%s6877_s5 + $0x20] sm:$0xff]  ;;  %v195_v5 = vld [vmem:[%s6877_s5 + $0x28] sm:$0xff] }
  0x2b   : > { %188 = vst [vmem:[%s6882_s23 + $0x8] sm:$0xff] %v187_v1  ;;  %v197_v6 = vld [vmem:[%s6877_s5 + $0x30] sm:$0xff]  ;;  %v199_v7 = vld [vmem:[%s6877_s5 + $0x38] sm:$0xff]  ;;  %v201_v8 = vld [vmem:[%s6877_s5 + $0x80] sm:$0xff] }
  0x2c   : > { %190 = vst [vmem:[%s6882_s23 + $0x10] sm:$0xff] %v189_v2  ;;  %v203_v9 = vld [vmem:[%s6877_s5 + $0x88] sm:$0xff]  ;;  %v205_v10 = vld [vmem:[%s6877_s5 + $0x90] sm:$0xff]  ;;  %v207_v11 = vld [vmem:[%s6877_s5 + $0x98] sm:$0xff] }
  0x2d   : > { %192 = vst [vmem:[%s6882_s23 + $0x18] sm:$0xff] %v191_v3  ;;  %v209_v12 = vld [vmem:[%s6877_s5 + $0xa0] sm:$0xff]  ;;  %v211_v13 = vld [vmem:[%s6877_s5 + $0xa8] sm:$0xff]  ;;  %v213_v14 = vld [vmem:[%s6877_s5 + $0xb0] sm:$0xff] }
  0x2e   : > { %194 = vst [vmem:[%s6882_s23 + $0x20] sm:$0xff] %v193_v4  ;;  %v215_v15 = vld [vmem:[%s6877_s5 + $0xb8] sm:$0xff]  ;;  %v217_v16 = vld [vmem:[%s6877_s5 + $0x100] sm:$0xff]  ;;  %v219_v17 = vld [vmem:[%s6877_s5 + $0x108] sm:$0xff] }
  0x2f   : > { %196 = vst [vmem:[%s6882_s23 + $0x28] sm:$0xff] %v195_v5  ;;  %v221_v18 = vld [vmem:[%s6877_s5 + $0x110] sm:$0xff]  ;;  %v223_v19 = vld [vmem:[%s6877_s5 + $0x118] sm:$0xff]  ;;  %v225_v20 = vld [vmem:[%s6877_s5 + $0x120] sm:$0xff] }
  0x30   : > { %198 = vst [vmem:[%s6882_s23 + $0x30] sm:$0xff] %v197_v6  ;;  %v227_v21 = vld [vmem:[%s6877_s5 + $0x128] sm:$0xff]  ;;  %v229_v22 = vld [vmem:[%s6877_s5 + $0x130] sm:$0xff]  ;;  %v231_v23 = vld [vmem:[%s6877_s5 + $0x138] sm:$0xff] }
  0x31   : > { %200 = vst [vmem:[%s6882_s23 + $0x38] sm:$0xff] %v199_v7  ;;  %v233_v24 = vld [vmem:[%s6877_s5 + $0x180] sm:$0xff]  ;;  %v235_v25 = vld [vmem:[%s6877_s5 + $0x188] sm:$0xff]  ;;  %v237_v26 = vld [vmem:[%s6877_s5 + $0x190] sm:$0xff] }
  0x32   : > { %202 = vst [vmem:[%s6882_s23 + $0x40] sm:$0xff] %v201_v8  ;;  %v239_v27 = vld [vmem:[%s6877_s5 + $0x198] sm:$0xff]  ;;  %v241_v28 = vld [vmem:[%s6877_s5 + $0x1a0] sm:$0xff]  ;;  %v243_v29 = vld [vmem:[%s6877_s5 + $0x1a8] sm:$0xff] }
  0x33   : > { %204 = vst [vmem:[%s6882_s23 + $0x48] sm:$0xff] %v203_v9  ;;  %v245_v30 = vld [vmem:[%s6877_s5 + $0x1b0] sm:$0xff]  ;;  %v247_v31 = vld [vmem:[%s6877_s5 + $0x1b8] sm:$0xff] }
  0x34   : > { %206 = vst [vmem:[%s6882_s23 + $0x50] sm:$0xff] %v205_v10 }
  0x35   : > { %208 = vst [vmem:[%s6882_s23 + $0x58] sm:$0xff] %v207_v11 }
  0x36   : > { %210 = vst [vmem:[%s6882_s23 + $0x60] sm:$0xff] %v209_v12 }
  0x37   : > { %212 = vst [vmem:[%s6882_s23 + $0x68] sm:$0xff] %v211_v13 }
  0x38   : > { %214 = vst [vmem:[%s6882_s23 + $0x70] sm:$0xff] %v213_v14 }
  0x39   : > { %216 = vst [vmem:[%s6882_s23 + $0x78] sm:$0xff] %v215_v15 }
  0x3a   : > { %218 = vst [vmem:[%s6882_s23 + $0x80] sm:$0xff] %v217_v16 }
  0x3b   : > { %220 = vst [vmem:[%s6882_s23 + $0x88] sm:$0xff] %v219_v17 }
  0x3c   : > { %222 = vst [vmem:[%s6882_s23 + $0x90] sm:$0xff] %v221_v18 }
  0x3d   : > { %224 = vst [vmem:[%s6882_s23 + $0x98] sm:$0xff] %v223_v19 }
  0x3e   : > { %226 = vst [vmem:[%s6882_s23 + $0xa0] sm:$0xff] %v225_v20 }
  0x3f   : > { %228 = vst [vmem:[%s6882_s23 + $0xa8] sm:$0xff] %v227_v21 }
  0x40   : > { %230 = vst [vmem:[%s6882_s23 + $0xb0] sm:$0xff] %v229_v22 }
  0x41   : > { %232 = vst [vmem:[%s6882_s23 + $0xb8] sm:$0xff] %v231_v23 }
  0x42   : > { %234 = vst [vmem:[%s6882_s23 + $0xc0] sm:$0xff] %v233_v24 }
  0x43   : > { %236 = vst [vmem:[%s6882_s23 + $0xc8] sm:$0xff] %v235_v25 }
  0x44   : > { %238 = vst [vmem:[%s6882_s23 + $0xd0] sm:$0xff] %v237_v26 }
  0x45   : > { %240 = vst [vmem:[%s6882_s23 + $0xd8] sm:$0xff] %v239_v27 }
  0x46   : > { %242 = vst [vmem:[%s6882_s23 + $0xe0] sm:$0xff] %v241_v28 }
  0x47   : > { %244 = vst [vmem:[%s6882_s23 + $0xe8] sm:$0xff] %v243_v29 }
  0x48   : > { %246 = vst [vmem:[%s6882_s23 + $0xf0] sm:$0xff] %v245_v30 }
  0x49   : > { %248 = vst [vmem:[%s6882_s23 + $0xf8] sm:$0xff] %v247_v31 }
  0x4a PF: > { %254 = sbr.rel (!%p6852_p9) target bundleno = 340 (0x154), region = 43  ;;  %s256_s28 = sand.u32 (%p6852_p9), 1, %s6720_s15  }
  0x4b   : > { %s5114_s7 = sshll.u32 (%p6852_p9), %s6744_s21, 1  ;;  %s5112_s11 = sshll.u32 (%p6852_p9), %s256_s28, 11 }
  0x4c   : > { %s6283_s26 = sshll.u32 (%p6852_p9), %s6740_s20, 10  ;;  %s8345_s1 = sld [smem:[#allocation9_spill]] (%p6852_p9) }
  0x4d   : > { %s262_s27 = sadd.s32 (%p6852_p9), %s6283_s26, %s5114_s7  ;;  %s6958_s6 = scalar_lea.vmem (%p6852_p9), [#allocation4], %s5112_s11 }
  0x4e   : > { %s5116_s29 = sshll.u32 (%p6852_p9), %s262_s27, 2 }
  0x52   : > { %s6953_s5 = scalar_lea.vmem %s8345_s1, %s5116_s29 }
  0x53   : > { %v804_v32 = vld [vmem:[%s6953_s5] sm:$0xff]  ;;  %v806_v33 = vld [vmem:[%s6953_s5 + $0x10] sm:$0xff] }
  0x54   : > { %v808_v34 = vld [vmem:[%s6953_s5 + $0x20] sm:$0xff]  ;;  %805 = vst [vmem:[%s6958_s6] sm:$0xff] %v804_v32  ;;  %v810_v35 = vld [vmem:[%s6953_s5 + $0x30] sm:$0xff] }
  0x55   : > { %807 = vst [vmem:[%s6958_s6 + $0x8] sm:$0xff] %v806_v33  ;;  %v812_v36 = vld [vmem:[%s6953_s5 + $0x40] sm:$0xff]  ;;  %v814_v37 = vld [vmem:[%s6953_s5 + $0x50] sm:$0xff] }
  0x56   : > { %809 = vst [vmem:[%s6958_s6 + $0x10] sm:$0xff] %v808_v34  ;;  %v816_v38 = vld [vmem:[%s6953_s5 + $0x60] sm:$0xff]  ;;  %v818_v39 = vld [vmem:[%s6953_s5 + $0x70] sm:$0xff] }
  0x57   : > { %811 = vst [vmem:[%s6958_s6 + $0x18] sm:$0xff] %v810_v35  ;;  %v820_v40 = vld [vmem:[%s6953_s5 + $0x80] sm:$0xff]  ;;  %v822_v41 = vld [vmem:[%s6953_s5 + $0x90] sm:$0xff] }
  0x58   : > { %813 = vst [vmem:[%s6958_s6 + $0x20] sm:$0xff] %v812_v36  ;;  %v824_v42 = vld [vmem:[%s6953_s5 + $0xa0] sm:$0xff]  ;;  %v826_v43 = vld [vmem:[%s6953_s5 + $0xb0] sm:$0xff] }
  0x59   : > { %815 = vst [vmem:[%s6958_s6 + $0x28] sm:$0xff] %v814_v37  ;;  %v828_v44 = vld [vmem:[%s6953_s5 + $0xc0] sm:$0xff]  ;;  %v830_v45 = vld [vmem:[%s6953_s5 + $0xd0] sm:$0xff] }
  0x5a   : > { %817 = vst [vmem:[%s6958_s6 + $0x30] sm:$0xff] %v816_v38  ;;  %v832_v46 = vld [vmem:[%s6953_s5 + $0xe0] sm:$0xff]  ;;  %v834_v47 = vld [vmem:[%s6953_s5 + $0xf0] sm:$0xff] }
  0x5b   : > { %819 = vst [vmem:[%s6958_s6 + $0x38] sm:$0xff] %v818_v39  ;;  %v836_v48 = vld [vmem:[%s6953_s5 + $0x100] sm:$0xff]  ;;  %v838_v49 = vld [vmem:[%s6953_s5 + $0x110] sm:$0xff] }
  0x5c   : > { %821 = vst [vmem:[%s6958_s6 + $0x40] sm:$0xff] %v820_v40  ;;  %v840_v50 = vld [vmem:[%s6953_s5 + $0x120] sm:$0xff]  ;;  %v842_v51 = vld [vmem:[%s6953_s5 + $0x130] sm:$0xff] }
  0x5d   : > { %823 = vst [vmem:[%s6958_s6 + $0x48] sm:$0xff] %v822_v41  ;;  %v844_v52 = vld [vmem:[%s6953_s5 + $0x140] sm:$0xff]  ;;  %v846_v53 = vld [vmem:[%s6953_s5 + $0x150] sm:$0xff] }
  0x5e   : > { %825 = vst [vmem:[%s6958_s6 + $0x50] sm:$0xff] %v824_v42  ;;  %v848_v54 = vld [vmem:[%s6953_s5 + $0x160] sm:$0xff]  ;;  %v850_v55 = vld [vmem:[%s6953_s5 + $0x170] sm:$0xff] }
  0x5f   : > { %827 = vst [vmem:[%s6958_s6 + $0x58] sm:$0xff] %v826_v43  ;;  %v852_v56 = vld [vmem:[%s6953_s5 + $0x180] sm:$0xff]  ;;  %v854_v57 = vld [vmem:[%s6953_s5 + $0x190] sm:$0xff] }
  0x60   : > { %829 = vst [vmem:[%s6958_s6 + $0x60] sm:$0xff] %v828_v44  ;;  %v856_v58 = vld [vmem:[%s6953_s5 + $0x1a0] sm:$0xff]  ;;  %v858_v59 = vld [vmem:[%s6953_s5 + $0x1b0] sm:$0xff] }
  0x61   : > { %831 = vst [vmem:[%s6958_s6 + $0x68] sm:$0xff] %v830_v45  ;;  %v860_v60 = vld [vmem:[%s6953_s5 + $0x1c0] sm:$0xff]  ;;  %v862_v61 = vld [vmem:[%s6953_s5 + $0x1d0] sm:$0xff] }
  0x62   : > { %833 = vst [vmem:[%s6958_s6 + $0x70] sm:$0xff] %v832_v46  ;;  %v864_v62 = vld [vmem:[%s6953_s5 + $0x1e0] sm:$0xff]  ;;  %v866_v63 = vld [vmem:[%s6953_s5 + $0x1f0] sm:$0xff] }
  0x63   : > { %835 = vst [vmem:[%s6958_s6 + $0x78] sm:$0xff] %v834_v47  ;;  %v868_v0 = vld [vmem:[%s6953_s5 + $0x200] sm:$0xff]  ;;  %v870_v1 = vld [vmem:[%s6953_s5 + $0x210] sm:$0xff] }
  0x64   : > { %837 = vst [vmem:[%s6958_s6 + $0x80] sm:$0xff] %v836_v48  ;;  %v872_v2 = vld [vmem:[%s6953_s5 + $0x220] sm:$0xff]  ;;  %v874_v3 = vld [vmem:[%s6953_s5 + $0x230] sm:$0xff] }
  0x65   : > { %839 = vst [vmem:[%s6958_s6 + $0x88] sm:$0xff] %v838_v49  ;;  %v876_v4 = vld [vmem:[%s6953_s5 + $0x240] sm:$0xff]  ;;  %v878_v5 = vld [vmem:[%s6953_s5 + $0x250] sm:$0xff] }
  0x66   : > { %841 = vst [vmem:[%s6958_s6 + $0x90] sm:$0xff] %v840_v50  ;;  %v880_v6 = vld [vmem:[%s6953_s5 + $0x260] sm:$0xff]  ;;  %v882_v7 = vld [vmem:[%s6953_s5 + $0x270] sm:$0xff] }
  0x67   : > { %843 = vst [vmem:[%s6958_s6 + $0x98] sm:$0xff] %v842_v51  ;;  %v884_v8 = vld [vmem:[%s6953_s5 + $0x280] sm:$0xff]  ;;  %v886_v9 = vld [vmem:[%s6953_s5 + $0x290] sm:$0xff] }
  0x68   : > { %845 = vst [vmem:[%s6958_s6 + $0xa0] sm:$0xff] %v844_v52  ;;  %v888_v10 = vld [vmem:[%s6953_s5 + $0x2a0] sm:$0xff]  ;;  %v890_v11 = vld [vmem:[%s6953_s5 + $0x2b0] sm:$0xff] }
  0x69   : > { %847 = vst [vmem:[%s6958_s6 + $0xa8] sm:$0xff] %v846_v53  ;;  %v892_v12 = vld [vmem:[%s6953_s5 + $0x2c0] sm:$0xff]  ;;  %v894_v13 = vld [vmem:[%s6953_s5 + $0x2d0] sm:$0xff] }
  0x6a   : > { %849 = vst [vmem:[%s6958_s6 + $0xb0] sm:$0xff] %v848_v54  ;;  %v896_v14 = vld [vmem:[%s6953_s5 + $0x2e0] sm:$0xff]  ;;  %v898_v15 = vld [vmem:[%s6953_s5 + $0x2f0] sm:$0xff] }
  0x6b   : > { %851 = vst [vmem:[%s6958_s6 + $0xb8] sm:$0xff] %v850_v55  ;;  %v900_v16 = vld [vmem:[%s6953_s5 + $0x300] sm:$0xff]  ;;  %v902_v17 = vld [vmem:[%s6953_s5 + $0x310] sm:$0xff] }
  0x6c   : > { %853 = vst [vmem:[%s6958_s6 + $0xc0] sm:$0xff] %v852_v56  ;;  %v904_v18 = vld [vmem:[%s6953_s5 + $0x320] sm:$0xff]  ;;  %v906_v19 = vld [vmem:[%s6953_s5 + $0x330] sm:$0xff] }
  0x6d   : > { %855 = vst [vmem:[%s6958_s6 + $0xc8] sm:$0xff] %v854_v57  ;;  %v908_v20 = vld [vmem:[%s6953_s5 + $0x340] sm:$0xff]  ;;  %v910_v21 = vld [vmem:[%s6953_s5 + $0x350] sm:$0xff] }
  0x6e   : > { %857 = vst [vmem:[%s6958_s6 + $0xd0] sm:$0xff] %v856_v58  ;;  %v912_v22 = vld [vmem:[%s6953_s5 + $0x360] sm:$0xff]  ;;  %v914_v23 = vld [vmem:[%s6953_s5 + $0x370] sm:$0xff] }
  0x6f   : > { %859 = vst [vmem:[%s6958_s6 + $0xd8] sm:$0xff] %v858_v59  ;;  %v916_v24 = vld [vmem:[%s6953_s5 + $0x380] sm:$0xff]  ;;  %v918_v25 = vld [vmem:[%s6953_s5 + $0x390] sm:$0xff] }
  0x70   : > { %861 = vst [vmem:[%s6958_s6 + $0xe0] sm:$0xff] %v860_v60  ;;  %v920_v26 = vld [vmem:[%s6953_s5 + $0x3a0] sm:$0xff]  ;;  %v922_v27 = vld [vmem:[%s6953_s5 + $0x3b0] sm:$0xff] }
  0x71   : > { %863 = vst [vmem:[%s6958_s6 + $0xe8] sm:$0xff] %v862_v61  ;;  %v924_v28 = vld [vmem:[%s6953_s5 + $0x3c0] sm:$0xff]  ;;  %v926_v29 = vld [vmem:[%s6953_s5 + $0x3d0] sm:$0xff] }
  0x72   : > { %865 = vst [vmem:[%s6958_s6 + $0xf0] sm:$0xff] %v864_v62  ;;  %v928_v30 = vld [vmem:[%s6953_s5 + $0x3e0] sm:$0xff]  ;;  %v930_v31 = vld [vmem:[%s6953_s5 + $0x3f0] sm:$0xff] }
  0x73   : > { %867 = vst [vmem:[%s6958_s6 + $0xf8] sm:$0xff] %v866_v63  ;;  %v932_v32 = vld [vmem:[%s6953_s5 + $0x400] sm:$0xff]  ;;  %v934_v33 = vld [vmem:[%s6953_s5 + $0x410] sm:$0xff] }
  0x74   : > { %869 = vst [vmem:[%s6958_s6 + $0x100] sm:$0xff] %v868_v0  ;;  %v936_v34 = vld [vmem:[%s6953_s5 + $0x420] sm:$0xff]  ;;  %v938_v35 = vld [vmem:[%s6953_s5 + $0x430] sm:$0xff] }
  0x75   : > { %871 = vst [vmem:[%s6958_s6 + $0x108] sm:$0xff] %v870_v1  ;;  %v940_v36 = vld [vmem:[%s6953_s5 + $0x440] sm:$0xff]  ;;  %v942_v37 = vld [vmem:[%s6953_s5 + $0x450] sm:$0xff] }
  0x76   : > { %873 = vst [vmem:[%s6958_s6 + $0x110] sm:$0xff] %v872_v2  ;;  %v944_v38 = vld [vmem:[%s6953_s5 + $0x460] sm:$0xff]  ;;  %v946_v39 = vld [vmem:[%s6953_s5 + $0x470] sm:$0xff] }
  0x77   : > { %875 = vst [vmem:[%s6958_s6 + $0x118] sm:$0xff] %v874_v3  ;;  %v948_v40 = vld [vmem:[%s6953_s5 + $0x480] sm:$0xff]  ;;  %v950_v41 = vld [vmem:[%s6953_s5 + $0x490] sm:$0xff] }
  0x78   : > { %877 = vst [vmem:[%s6958_s6 + $0x120] sm:$0xff] %v876_v4  ;;  %v952_v42 = vld [vmem:[%s6953_s5 + $0x4a0] sm:$0xff]  ;;  %v954_v43 = vld [vmem:[%s6953_s5 + $0x4b0] sm:$0xff] }
  0x79   : > { %879 = vst [vmem:[%s6958_s6 + $0x128] sm:$0xff] %v878_v5  ;;  %v956_v44 = vld [vmem:[%s6953_s5 + $0x4c0] sm:$0xff]  ;;  %v958_v45 = vld [vmem:[%s6953_s5 + $0x4d0] sm:$0xff] }
  0x7a   : > { %881 = vst [vmem:[%s6958_s6 + $0x130] sm:$0xff] %v880_v6  ;;  %v960_v46 = vld [vmem:[%s6953_s5 + $0x4e0] sm:$0xff]  ;;  %v962_v47 = vld [vmem:[%s6953_s5 + $0x4f0] sm:$0xff] }
  0x7b   : > { %883 = vst [vmem:[%s6958_s6 + $0x138] sm:$0xff] %v882_v7  ;;  %v964_v48 = vld [vmem:[%s6953_s5 + $0x500] sm:$0xff]  ;;  %v966_v49 = vld [vmem:[%s6953_s5 + $0x510] sm:$0xff] }
  0x7c   : > { %885 = vst [vmem:[%s6958_s6 + $0x140] sm:$0xff] %v884_v8  ;;  %v968_v50 = vld [vmem:[%s6953_s5 + $0x520] sm:$0xff]  ;;  %v970_v51 = vld [vmem:[%s6953_s5 + $0x530] sm:$0xff] }
  0x7d   : > { %887 = vst [vmem:[%s6958_s6 + $0x148] sm:$0xff] %v886_v9  ;;  %v972_v52 = vld [vmem:[%s6953_s5 + $0x540] sm:$0xff]  ;;  %v974_v53 = vld [vmem:[%s6953_s5 + $0x550] sm:$0xff] }
  0x7e   : > { %889 = vst [vmem:[%s6958_s6 + $0x150] sm:$0xff] %v888_v10  ;;  %v976_v54 = vld [vmem:[%s6953_s5 + $0x560] sm:$0xff]  ;;  %v978_v55 = vld [vmem:[%s6953_s5 + $0x570] sm:$0xff] }
  0x7f   : > { %891 = vst [vmem:[%s6958_s6 + $0x158] sm:$0xff] %v890_v11  ;;  %v980_v56 = vld [vmem:[%s6953_s5 + $0x580] sm:$0xff]  ;;  %v982_v57 = vld [vmem:[%s6953_s5 + $0x590] sm:$0xff] }
  0x80   : > { %893 = vst [vmem:[%s6958_s6 + $0x160] sm:$0xff] %v892_v12  ;;  %v984_v58 = vld [vmem:[%s6953_s5 + $0x5a0] sm:$0xff]  ;;  %v986_v59 = vld [vmem:[%s6953_s5 + $0x5b0] sm:$0xff] }
  0x81   : > { %895 = vst [vmem:[%s6958_s6 + $0x168] sm:$0xff] %v894_v13  ;;  %v988_v60 = vld [vmem:[%s6953_s5 + $0x5c0] sm:$0xff]  ;;  %v990_v61 = vld [vmem:[%s6953_s5 + $0x5d0] sm:$0xff] }
  0x82   : > { %897 = vst [vmem:[%s6958_s6 + $0x170] sm:$0xff] %v896_v14  ;;  %v992_v62 = vld [vmem:[%s6953_s5 + $0x5e0] sm:$0xff]  ;;  %v994_v63 = vld [vmem:[%s6953_s5 + $0x5f0] sm:$0xff] }
  0x83   : > { %899 = vst [vmem:[%s6958_s6 + $0x178] sm:$0xff] %v898_v15  ;;  %v996_v0 = vld [vmem:[%s6953_s5 + $0x600] sm:$0xff]  ;;  %v998_v1 = vld [vmem:[%s6953_s5 + $0x610] sm:$0xff] }
  0x84   : > { %901 = vst [vmem:[%s6958_s6 + $0x180] sm:$0xff] %v900_v16  ;;  %v1000_v2 = vld [vmem:[%s6953_s5 + $0x620] sm:$0xff]  ;;  %v1002_v3 = vld [vmem:[%s6953_s5 + $0x630] sm:$0xff] }
  0x85   : > { %903 = vst [vmem:[%s6958_s6 + $0x188] sm:$0xff] %v902_v17  ;;  %v1004_v4 = vld [vmem:[%s6953_s5 + $0x640] sm:$0xff]  ;;  %v1006_v5 = vld [vmem:[%s6953_s5 + $0x650] sm:$0xff] }
  0x86   : > { %905 = vst [vmem:[%s6958_s6 + $0x190] sm:$0xff] %v904_v18  ;;  %v1008_v6 = vld [vmem:[%s6953_s5 + $0x660] sm:$0xff]  ;;  %v1010_v7 = vld [vmem:[%s6953_s5 + $0x670] sm:$0xff] }
  0x87   : > { %907 = vst [vmem:[%s6958_s6 + $0x198] sm:$0xff] %v906_v19  ;;  %v1012_v8 = vld [vmem:[%s6953_s5 + $0x680] sm:$0xff]  ;;  %v1014_v9 = vld [vmem:[%s6953_s5 + $0x690] sm:$0xff] }
  0x88   : > { %909 = vst [vmem:[%s6958_s6 + $0x1a0] sm:$0xff] %v908_v20  ;;  %v1016_v10 = vld [vmem:[%s6953_s5 + $0x6a0] sm:$0xff]  ;;  %v1018_v11 = vld [vmem:[%s6953_s5 + $0x6b0] sm:$0xff] }
  0x89   : > { %911 = vst [vmem:[%s6958_s6 + $0x1a8] sm:$0xff] %v910_v21  ;;  %v1020_v12 = vld [vmem:[%s6953_s5 + $0x6c0] sm:$0xff]  ;;  %v1022_v13 = vld [vmem:[%s6953_s5 + $0x6d0] sm:$0xff] }
  0x8a   : > { %913 = vst [vmem:[%s6958_s6 + $0x1b0] sm:$0xff] %v912_v22  ;;  %v1024_v14 = vld [vmem:[%s6953_s5 + $0x6e0] sm:$0xff]  ;;  %v1026_v15 = vld [vmem:[%s6953_s5 + $0x6f0] sm:$0xff] }
  0x8b   : > { %915 = vst [vmem:[%s6958_s6 + $0x1b8] sm:$0xff] %v914_v23  ;;  %v1028_v16 = vld [vmem:[%s6953_s5 + $0x700] sm:$0xff]  ;;  %v1030_v17 = vld [vmem:[%s6953_s5 + $0x710] sm:$0xff] }
  0x8c   : > { %917 = vst [vmem:[%s6958_s6 + $0x1c0] sm:$0xff] %v916_v24  ;;  %v1032_v18 = vld [vmem:[%s6953_s5 + $0x720] sm:$0xff]  ;;  %v1034_v19 = vld [vmem:[%s6953_s5 + $0x730] sm:$0xff] }
  0x8d   : > { %919 = vst [vmem:[%s6958_s6 + $0x1c8] sm:$0xff] %v918_v25  ;;  %v1036_v20 = vld [vmem:[%s6953_s5 + $0x740] sm:$0xff]  ;;  %v1038_v21 = vld [vmem:[%s6953_s5 + $0x750] sm:$0xff] }
  0x8e   : > { %921 = vst [vmem:[%s6958_s6 + $0x1d0] sm:$0xff] %v920_v26  ;;  %v1040_v22 = vld [vmem:[%s6953_s5 + $0x760] sm:$0xff]  ;;  %v1042_v23 = vld [vmem:[%s6953_s5 + $0x770] sm:$0xff] }
  0x8f   : > { %923 = vst [vmem:[%s6958_s6 + $0x1d8] sm:$0xff] %v922_v27  ;;  %v1044_v24 = vld [vmem:[%s6953_s5 + $0x780] sm:$0xff]  ;;  %v1046_v25 = vld [vmem:[%s6953_s5 + $0x790] sm:$0xff] }
  0x90   : > { %925 = vst [vmem:[%s6958_s6 + $0x1e0] sm:$0xff] %v924_v28  ;;  %v1048_v26 = vld [vmem:[%s6953_s5 + $0x7a0] sm:$0xff]  ;;  %v1050_v27 = vld [vmem:[%s6953_s5 + $0x7b0] sm:$0xff] }
  0x91   : > { %927 = vst [vmem:[%s6958_s6 + $0x1e8] sm:$0xff] %v926_v29  ;;  %v1052_v28 = vld [vmem:[%s6953_s5 + $0x7c0] sm:$0xff]  ;;  %v1054_v29 = vld [vmem:[%s6953_s5 + $0x7d0] sm:$0xff] }
  0x92   : > { %929 = vst [vmem:[%s6958_s6 + $0x1f0] sm:$0xff] %v928_v30  ;;  %v1056_v30 = vld [vmem:[%s6953_s5 + $0x7e0] sm:$0xff] }
  0x93   : > { %931 = vst [vmem:[%s6958_s6 + $0x1f8] sm:$0xff] %v930_v31  ;;  %v1058_v31 = vld [vmem:[%s6953_s5 + $0x7f0] sm:$0xff] }
  0x94   : > { %933 = vst [vmem:[%s6958_s6 + $0x200] sm:$0xff] %v932_v32  ;;  %v1060_v32 = vld [vmem:[%s6953_s5 + $0x800] sm:$0xff] }
  0x95   : > { %935 = vst [vmem:[%s6958_s6 + $0x208] sm:$0xff] %v934_v33  ;;  %v1062_v33 = vld [vmem:[%s6953_s5 + $0x810] sm:$0xff] }
  0x96   : > { %937 = vst [vmem:[%s6958_s6 + $0x210] sm:$0xff] %v936_v34  ;;  %v1064_v34 = vld [vmem:[%s6953_s5 + $0x820] sm:$0xff] }
  0x97   : > { %939 = vst [vmem:[%s6958_s6 + $0x218] sm:$0xff] %v938_v35  ;;  %v1066_v35 = vld [vmem:[%s6953_s5 + $0x830] sm:$0xff] }
  0x98   : > { %941 = vst [vmem:[%s6958_s6 + $0x220] sm:$0xff] %v940_v36  ;;  %v1068_v36 = vld [vmem:[%s6953_s5 + $0x840] sm:$0xff] }
  0x99   : > { %943 = vst [vmem:[%s6958_s6 + $0x228] sm:$0xff] %v942_v37  ;;  %v1070_v37 = vld [vmem:[%s6953_s5 + $0x850] sm:$0xff] }
  0x9a   : > { %945 = vst [vmem:[%s6958_s6 + $0x230] sm:$0xff] %v944_v38  ;;  %v1072_v38 = vld [vmem:[%s6953_s5 + $0x860] sm:$0xff] }
  0x9b   : > { %947 = vst [vmem:[%s6958_s6 + $0x238] sm:$0xff] %v946_v39  ;;  %v1074_v39 = vld [vmem:[%s6953_s5 + $0x870] sm:$0xff] }
  0x9c   : > { %949 = vst [vmem:[%s6958_s6 + $0x240] sm:$0xff] %v948_v40  ;;  %v1076_v40 = vld [vmem:[%s6953_s5 + $0x880] sm:$0xff] }
  0x9d   : > { %951 = vst [vmem:[%s6958_s6 + $0x248] sm:$0xff] %v950_v41  ;;  %v1078_v41 = vld [vmem:[%s6953_s5 + $0x890] sm:$0xff] }
  0x9e   : > { %953 = vst [vmem:[%s6958_s6 + $0x250] sm:$0xff] %v952_v42  ;;  %v1080_v42 = vld [vmem:[%s6953_s5 + $0x8a0] sm:$0xff] }
  0x9f   : > { %955 = vst [vmem:[%s6958_s6 + $0x258] sm:$0xff] %v954_v43  ;;  %v1082_v43 = vld [vmem:[%s6953_s5 + $0x8b0] sm:$0xff] }
  0xa0   : > { %957 = vst [vmem:[%s6958_s6 + $0x260] sm:$0xff] %v956_v44  ;;  %v1084_v44 = vld [vmem:[%s6953_s5 + $0x8c0] sm:$0xff] }
  0xa1   : > { %959 = vst [vmem:[%s6958_s6 + $0x268] sm:$0xff] %v958_v45  ;;  %v1086_v45 = vld [vmem:[%s6953_s5 + $0x8d0] sm:$0xff] }
  0xa2   : > { %961 = vst [vmem:[%s6958_s6 + $0x270] sm:$0xff] %v960_v46  ;;  %v1088_v46 = vld [vmem:[%s6953_s5 + $0x8e0] sm:$0xff] }
  0xa3   : > { %963 = vst [vmem:[%s6958_s6 + $0x278] sm:$0xff] %v962_v47  ;;  %v1090_v47 = vld [vmem:[%s6953_s5 + $0x8f0] sm:$0xff] }
  0xa4   : > { %965 = vst [vmem:[%s6958_s6 + $0x280] sm:$0xff] %v964_v48  ;;  %v1092_v48 = vld [vmem:[%s6953_s5 + $0x900] sm:$0xff] }
  0xa5   : > { %967 = vst [vmem:[%s6958_s6 + $0x288] sm:$0xff] %v966_v49  ;;  %v1094_v49 = vld [vmem:[%s6953_s5 + $0x910] sm:$0xff] }
  0xa6   : > { %969 = vst [vmem:[%s6958_s6 + $0x290] sm:$0xff] %v968_v50  ;;  %v1096_v50 = vld [vmem:[%s6953_s5 + $0x920] sm:$0xff] }
  0xa7   : > { %971 = vst [vmem:[%s6958_s6 + $0x298] sm:$0xff] %v970_v51  ;;  %v1098_v51 = vld [vmem:[%s6953_s5 + $0x930] sm:$0xff] }
  0xa8   : > { %973 = vst [vmem:[%s6958_s6 + $0x2a0] sm:$0xff] %v972_v52  ;;  %v1100_v52 = vld [vmem:[%s6953_s5 + $0x940] sm:$0xff] }
  0xa9   : > { %975 = vst [vmem:[%s6958_s6 + $0x2a8] sm:$0xff] %v974_v53  ;;  %v1102_v53 = vld [vmem:[%s6953_s5 + $0x950] sm:$0xff] }
  0xaa   : > { %977 = vst [vmem:[%s6958_s6 + $0x2b0] sm:$0xff] %v976_v54  ;;  %v1104_v54 = vld [vmem:[%s6953_s5 + $0x960] sm:$0xff] }
  0xab   : > { %979 = vst [vmem:[%s6958_s6 + $0x2b8] sm:$0xff] %v978_v55  ;;  %v1106_v55 = vld [vmem:[%s6953_s5 + $0x970] sm:$0xff] }
  0xac   : > { %981 = vst [vmem:[%s6958_s6 + $0x2c0] sm:$0xff] %v980_v56  ;;  %v1108_v56 = vld [vmem:[%s6953_s5 + $0x980] sm:$0xff] }
  0xad   : > { %983 = vst [vmem:[%s6958_s6 + $0x2c8] sm:$0xff] %v982_v57  ;;  %v1110_v57 = vld [vmem:[%s6953_s5 + $0x990] sm:$0xff] }
  0xae   : > { %985 = vst [vmem:[%s6958_s6 + $0x2d0] sm:$0xff] %v984_v58  ;;  %v1112_v58 = vld [vmem:[%s6953_s5 + $0x9a0] sm:$0xff] }
  0xaf   : > { %987 = vst [vmem:[%s6958_s6 + $0x2d8] sm:$0xff] %v986_v59  ;;  %v1114_v59 = vld [vmem:[%s6953_s5 + $0x9b0] sm:$0xff] }
  0xb0   : > { %989 = vst [vmem:[%s6958_s6 + $0x2e0] sm:$0xff] %v988_v60  ;;  %v1116_v60 = vld [vmem:[%s6953_s5 + $0x9c0] sm:$0xff] }
  0xb1   : > { %991 = vst [vmem:[%s6958_s6 + $0x2e8] sm:$0xff] %v990_v61  ;;  %v1118_v61 = vld [vmem:[%s6953_s5 + $0x9d0] sm:$0xff] }
  0xb2   : > { %993 = vst [vmem:[%s6958_s6 + $0x2f0] sm:$0xff] %v992_v62  ;;  %v1120_v62 = vld [vmem:[%s6953_s5 + $0x9e0] sm:$0xff] }
  0xb3   : > { %995 = vst [vmem:[%s6958_s6 + $0x2f8] sm:$0xff] %v994_v63  ;;  %v1122_v63 = vld [vmem:[%s6953_s5 + $0x9f0] sm:$0xff] }
  0xb4   : > { %997 = vst [vmem:[%s6958_s6 + $0x300] sm:$0xff] %v996_v0  ;;  %v1124_v0 = vld [vmem:[%s6953_s5 + $0xa00] sm:$0xff] }
  0xb5   : > { %999 = vst [vmem:[%s6958_s6 + $0x308] sm:$0xff] %v998_v1  ;;  %v1126_v1 = vld [vmem:[%s6953_s5 + $0xa10] sm:$0xff] }
  0xb6   : > { %1001 = vst [vmem:[%s6958_s6 + $0x310] sm:$0xff] %v1000_v2  ;;  %v1128_v2 = vld [vmem:[%s6953_s5 + $0xa20] sm:$0xff] }
  0xb7   : > { %1003 = vst [vmem:[%s6958_s6 + $0x318] sm:$0xff] %v1002_v3  ;;  %v1130_v3 = vld [vmem:[%s6953_s5 + $0xa30] sm:$0xff] }
  0xb8   : > { %1005 = vst [vmem:[%s6958_s6 + $0x320] sm:$0xff] %v1004_v4  ;;  %v1132_v4 = vld [vmem:[%s6953_s5 + $0xa40] sm:$0xff] }
  0xb9   : > { %1007 = vst [vmem:[%s6958_s6 + $0x328] sm:$0xff] %v1006_v5  ;;  %v1134_v5 = vld [vmem:[%s6953_s5 + $0xa50] sm:$0xff] }
  0xba   : > { %1009 = vst [vmem:[%s6958_s6 + $0x330] sm:$0xff] %v1008_v6  ;;  %v1136_v6 = vld [vmem:[%s6953_s5 + $0xa60] sm:$0xff] }
  0xbb   : > { %1011 = vst [vmem:[%s6958_s6 + $0x338] sm:$0xff] %v1010_v7  ;;  %v1138_v7 = vld [vmem:[%s6953_s5 + $0xa70] sm:$0xff] }
  0xbc   : > { %1013 = vst [vmem:[%s6958_s6 + $0x340] sm:$0xff] %v1012_v8  ;;  %v1140_v8 = vld [vmem:[%s6953_s5 + $0xa80] sm:$0xff] }
  0xbd   : > { %1015 = vst [vmem:[%s6958_s6 + $0x348] sm:$0xff] %v1014_v9  ;;  %v1142_v9 = vld [vmem:[%s6953_s5 + $0xa90] sm:$0xff] }
  0xbe   : > { %1017 = vst [vmem:[%s6958_s6 + $0x350] sm:$0xff] %v1016_v10  ;;  %v1144_v10 = vld [vmem:[%s6953_s5 + $0xaa0] sm:$0xff] }
  0xbf   : > { %1019 = vst [vmem:[%s6958_s6 + $0x358] sm:$0xff] %v1018_v11  ;;  %v1146_v11 = vld [vmem:[%s6953_s5 + $0xab0] sm:$0xff] }
  0xc0   : > { %1021 = vst [vmem:[%s6958_s6 + $0x360] sm:$0xff] %v1020_v12  ;;  %v1148_v12 = vld [vmem:[%s6953_s5 + $0xac0] sm:$0xff] }
  0xc1   : > { %1023 = vst [vmem:[%s6958_s6 + $0x368] sm:$0xff] %v1022_v13  ;;  %v1150_v13 = vld [vmem:[%s6953_s5 + $0xad0] sm:$0xff] }
  0xc2   : > { %1025 = vst [vmem:[%s6958_s6 + $0x370] sm:$0xff] %v1024_v14  ;;  %v1152_v14 = vld [vmem:[%s6953_s5 + $0xae0] sm:$0xff] }
  0xc3   : > { %1027 = vst [vmem:[%s6958_s6 + $0x378] sm:$0xff] %v1026_v15  ;;  %v1154_v15 = vld [vmem:[%s6953_s5 + $0xaf0] sm:$0xff] }
  0xc4   : > { %1029 = vst [vmem:[%s6958_s6 + $0x380] sm:$0xff] %v1028_v16  ;;  %v1156_v16 = vld [vmem:[%s6953_s5 + $0xb00] sm:$0xff] }
  0xc5   : > { %1031 = vst [vmem:[%s6958_s6 + $0x388] sm:$0xff] %v1030_v17  ;;  %v1158_v17 = vld [vmem:[%s6953_s5 + $0xb10] sm:$0xff] }
  0xc6   : > { %1033 = vst [vmem:[%s6958_s6 + $0x390] sm:$0xff] %v1032_v18  ;;  %v1160_v18 = vld [vmem:[%s6953_s5 + $0xb20] sm:$0xff] }
  0xc7   : > { %1035 = vst [vmem:[%s6958_s6 + $0x398] sm:$0xff] %v1034_v19  ;;  %v1162_v19 = vld [vmem:[%s6953_s5 + $0xb30] sm:$0xff] }
  0xc8   : > { %1037 = vst [vmem:[%s6958_s6 + $0x3a0] sm:$0xff] %v1036_v20  ;;  %v1164_v20 = vld [vmem:[%s6953_s5 + $0xb40] sm:$0xff] }
  0xc9   : > { %1039 = vst [vmem:[%s6958_s6 + $0x3a8] sm:$0xff] %v1038_v21  ;;  %v1166_v21 = vld [vmem:[%s6953_s5 + $0xb50] sm:$0xff] }
  0xca   : > { %1041 = vst [vmem:[%s6958_s6 + $0x3b0] sm:$0xff] %v1040_v22  ;;  %v1168_v22 = vld [vmem:[%s6953_s5 + $0xb60] sm:$0xff] }
  0xcb   : > { %1043 = vst [vmem:[%s6958_s6 + $0x3b8] sm:$0xff] %v1042_v23  ;;  %v1170_v23 = vld [vmem:[%s6953_s5 + $0xb70] sm:$0xff] }
  0xcc   : > { %1045 = vst [vmem:[%s6958_s6 + $0x3c0] sm:$0xff] %v1044_v24  ;;  %v1172_v24 = vld [vmem:[%s6953_s5 + $0xb80] sm:$0xff] }
  0xcd   : > { %1047 = vst [vmem:[%s6958_s6 + $0x3c8] sm:$0xff] %v1046_v25  ;;  %v1174_v25 = vld [vmem:[%s6953_s5 + $0xb90] sm:$0xff] }
  0xce   : > { %1049 = vst [vmem:[%s6958_s6 + $0x3d0] sm:$0xff] %v1048_v26  ;;  %v1176_v26 = vld [vmem:[%s6953_s5 + $0xba0] sm:$0xff] }
  0xcf   : > { %1051 = vst [vmem:[%s6958_s6 + $0x3d8] sm:$0xff] %v1050_v27  ;;  %v1178_v27 = vld [vmem:[%s6953_s5 + $0xbb0] sm:$0xff] }
  0xd0   : > { %1053 = vst [vmem:[%s6958_s6 + $0x3e0] sm:$0xff] %v1052_v28  ;;  %v1180_v28 = vld [vmem:[%s6953_s5 + $0xbc0] sm:$0xff] }
  0xd1   : > { %1055 = vst [vmem:[%s6958_s6 + $0x3e8] sm:$0xff] %v1054_v29  ;;  %v1182_v29 = vld [vmem:[%s6953_s5 + $0xbd0] sm:$0xff] }
  0xd2   : > { %1057 = vst [vmem:[%s6958_s6 + $0x3f0] sm:$0xff] %v1056_v30  ;;  %v1184_v30 = vld [vmem:[%s6953_s5 + $0xbe0] sm:$0xff] }
  0xd3   : > { %1059 = vst [vmem:[%s6958_s6 + $0x3f8] sm:$0xff] %v1058_v31  ;;  %v1186_v31 = vld [vmem:[%s6953_s5 + $0xbf0] sm:$0xff] }
  0xd4   : > { %1061 = vst [vmem:[%s6958_s6 + $0x400] sm:$0xff] %v1060_v32  ;;  %v1188_v32 = vld [vmem:[%s6953_s5 + $0xc00] sm:$0xff] }
  0xd5   : > { %1063 = vst [vmem:[%s6958_s6 + $0x408] sm:$0xff] %v1062_v33  ;;  %v1190_v33 = vld [vmem:[%s6953_s5 + $0xc10] sm:$0xff] }
  0xd6   : > { %1065 = vst [vmem:[%s6958_s6 + $0x410] sm:$0xff] %v1064_v34  ;;  %v1192_v34 = vld [vmem:[%s6953_s5 + $0xc20] sm:$0xff] }
  0xd7   : > { %1067 = vst [vmem:[%s6958_s6 + $0x418] sm:$0xff] %v1066_v35  ;;  %v1194_v35 = vld [vmem:[%s6953_s5 + $0xc30] sm:$0xff] }
  0xd8   : > { %1069 = vst [vmem:[%s6958_s6 + $0x420] sm:$0xff] %v1068_v36  ;;  %v1196_v36 = vld [vmem:[%s6953_s5 + $0xc40] sm:$0xff] }
  0xd9   : > { %1071 = vst [vmem:[%s6958_s6 + $0x428] sm:$0xff] %v1070_v37  ;;  %v1198_v37 = vld [vmem:[%s6953_s5 + $0xc50] sm:$0xff] }
  0xda   : > { %1073 = vst [vmem:[%s6958_s6 + $0x430] sm:$0xff] %v1072_v38  ;;  %v1200_v38 = vld [vmem:[%s6953_s5 + $0xc60] sm:$0xff] }
  0xdb   : > { %1075 = vst [vmem:[%s6958_s6 + $0x438] sm:$0xff] %v1074_v39  ;;  %v1202_v39 = vld [vmem:[%s6953_s5 + $0xc70] sm:$0xff] }
  0xdc   : > { %1077 = vst [vmem:[%s6958_s6 + $0x440] sm:$0xff] %v1076_v40  ;;  %v1204_v40 = vld [vmem:[%s6953_s5 + $0xc80] sm:$0xff] }
  0xdd   : > { %1079 = vst [vmem:[%s6958_s6 + $0x448] sm:$0xff] %v1078_v41  ;;  %v1206_v41 = vld [vmem:[%s6953_s5 + $0xc90] sm:$0xff] }
  0xde   : > { %1081 = vst [vmem:[%s6958_s6 + $0x450] sm:$0xff] %v1080_v42  ;;  %v1208_v42 = vld [vmem:[%s6953_s5 + $0xca0] sm:$0xff] }
  0xdf   : > { %1083 = vst [vmem:[%s6958_s6 + $0x458] sm:$0xff] %v1082_v43  ;;  %v1210_v43 = vld [vmem:[%s6953_s5 + $0xcb0] sm:$0xff] }
  0xe0   : > { %1085 = vst [vmem:[%s6958_s6 + $0x460] sm:$0xff] %v1084_v44  ;;  %v1212_v44 = vld [vmem:[%s6953_s5 + $0xcc0] sm:$0xff] }
  0xe1   : > { %1087 = vst [vmem:[%s6958_s6 + $0x468] sm:$0xff] %v1086_v45  ;;  %v1214_v45 = vld [vmem:[%s6953_s5 + $0xcd0] sm:$0xff] }
  0xe2   : > { %1089 = vst [vmem:[%s6958_s6 + $0x470] sm:$0xff] %v1088_v46  ;;  %v1216_v46 = vld [vmem:[%s6953_s5 + $0xce0] sm:$0xff] }
  0xe3   : > { %1091 = vst [vmem:[%s6958_s6 + $0x478] sm:$0xff] %v1090_v47  ;;  %v1218_v47 = vld [vmem:[%s6953_s5 + $0xcf0] sm:$0xff] }
  0xe4   : > { %1093 = vst [vmem:[%s6958_s6 + $0x480] sm:$0xff] %v1092_v48  ;;  %v1220_v48 = vld [vmem:[%s6953_s5 + $0xd00] sm:$0xff] }
  0xe5   : > { %1095 = vst [vmem:[%s6958_s6 + $0x488] sm:$0xff] %v1094_v49  ;;  %v1222_v49 = vld [vmem:[%s6953_s5 + $0xd10] sm:$0xff] }
  0xe6   : > { %1097 = vst [vmem:[%s6958_s6 + $0x490] sm:$0xff] %v1096_v50  ;;  %v1224_v50 = vld [vmem:[%s6953_s5 + $0xd20] sm:$0xff] }
  0xe7   : > { %1099 = vst [vmem:[%s6958_s6 + $0x498] sm:$0xff] %v1098_v51  ;;  %v1226_v51 = vld [vmem:[%s6953_s5 + $0xd30] sm:$0xff] }
  0xe8   : > { %1101 = vst [vmem:[%s6958_s6 + $0x4a0] sm:$0xff] %v1100_v52  ;;  %v1228_v52 = vld [vmem:[%s6953_s5 + $0xd40] sm:$0xff] }
  0xe9   : > { %1103 = vst [vmem:[%s6958_s6 + $0x4a8] sm:$0xff] %v1102_v53  ;;  %v1230_v53 = vld [vmem:[%s6953_s5 + $0xd50] sm:$0xff] }
  0xea   : > { %1105 = vst [vmem:[%s6958_s6 + $0x4b0] sm:$0xff] %v1104_v54  ;;  %v1232_v54 = vld [vmem:[%s6953_s5 + $0xd60] sm:$0xff] }
  0xeb   : > { %1107 = vst [vmem:[%s6958_s6 + $0x4b8] sm:$0xff] %v1106_v55  ;;  %v1234_v55 = vld [vmem:[%s6953_s5 + $0xd70] sm:$0xff] }
  0xec   : > { %1109 = vst [vmem:[%s6958_s6 + $0x4c0] sm:$0xff] %v1108_v56  ;;  %v1236_v56 = vld [vmem:[%s6953_s5 + $0xd80] sm:$0xff] }
  0xed   : > { %1111 = vst [vmem:[%s6958_s6 + $0x4c8] sm:$0xff] %v1110_v57  ;;  %v1238_v57 = vld [vmem:[%s6953_s5 + $0xd90] sm:$0xff] }
  0xee   : > { %1113 = vst [vmem:[%s6958_s6 + $0x4d0] sm:$0xff] %v1112_v58  ;;  %v1240_v58 = vld [vmem:[%s6953_s5 + $0xda0] sm:$0xff] }
  0xef   : > { %1115 = vst [vmem:[%s6958_s6 + $0x4d8] sm:$0xff] %v1114_v59  ;;  %v1242_v59 = vld [vmem:[%s6953_s5 + $0xdb0] sm:$0xff] }
  0xf0   : > { %1117 = vst [vmem:[%s6958_s6 + $0x4e0] sm:$0xff] %v1116_v60  ;;  %v1244_v60 = vld [vmem:[%s6953_s5 + $0xdc0] sm:$0xff] }
  0xf1   : > { %1119 = vst [vmem:[%s6958_s6 + $0x4e8] sm:$0xff] %v1118_v61  ;;  %v1246_v61 = vld [vmem:[%s6953_s5 + $0xdd0] sm:$0xff] }
  0xf2   : > { %1121 = vst [vmem:[%s6958_s6 + $0x4f0] sm:$0xff] %v1120_v62  ;;  %v1248_v62 = vld [vmem:[%s6953_s5 + $0xde0] sm:$0xff] }
  0xf3   : > { %1123 = vst [vmem:[%s6958_s6 + $0x4f8] sm:$0xff] %v1122_v63  ;;  %v1250_v63 = vld [vmem:[%s6953_s5 + $0xdf0] sm:$0xff] }
  0xf4   : > { %1125 = vst [vmem:[%s6958_s6 + $0x500] sm:$0xff] %v1124_v0  ;;  %v1252_v0 = vld [vmem:[%s6953_s5 + $0xe00] sm:$0xff] }
  0xf5   : > { %1127 = vst [vmem:[%s6958_s6 + $0x508] sm:$0xff] %v1126_v1  ;;  %v1254_v1 = vld [vmem:[%s6953_s5 + $0xe10] sm:$0xff] }
  0xf6   : > { %1129 = vst [vmem:[%s6958_s6 + $0x510] sm:$0xff] %v1128_v2  ;;  %v1256_v2 = vld [vmem:[%s6953_s5 + $0xe20] sm:$0xff] }
  0xf7   : > { %1131 = vst [vmem:[%s6958_s6 + $0x518] sm:$0xff] %v1130_v3  ;;  %v1258_v3 = vld [vmem:[%s6953_s5 + $0xe30] sm:$0xff] }
  0xf8   : > { %1133 = vst [vmem:[%s6958_s6 + $0x520] sm:$0xff] %v1132_v4  ;;  %v1260_v4 = vld [vmem:[%s6953_s5 + $0xe40] sm:$0xff] }
  0xf9   : > { %1135 = vst [vmem:[%s6958_s6 + $0x528] sm:$0xff] %v1134_v5  ;;  %v1262_v5 = vld [vmem:[%s6953_s5 + $0xe50] sm:$0xff] }
  0xfa   : > { %1137 = vst [vmem:[%s6958_s6 + $0x530] sm:$0xff] %v1136_v6  ;;  %v1264_v6 = vld [vmem:[%s6953_s5 + $0xe60] sm:$0xff] }
  0xfb   : > { %1139 = vst [vmem:[%s6958_s6 + $0x538] sm:$0xff] %v1138_v7  ;;  %v1266_v7 = vld [vmem:[%s6953_s5 + $0xe70] sm:$0xff] }
  0xfc   : > { %1141 = vst [vmem:[%s6958_s6 + $0x540] sm:$0xff] %v1140_v8  ;;  %v1268_v8 = vld [vmem:[%s6953_s5 + $0xe80] sm:$0xff] }
  0xfd   : > { %1143 = vst [vmem:[%s6958_s6 + $0x548] sm:$0xff] %v1142_v9  ;;  %v1270_v9 = vld [vmem:[%s6953_s5 + $0xe90] sm:$0xff] }
  0xfe   : > { %1145 = vst [vmem:[%s6958_s6 + $0x550] sm:$0xff] %v1144_v10  ;;  %v1272_v10 = vld [vmem:[%s6953_s5 + $0xea0] sm:$0xff] }
  0xff   : > { %1147 = vst [vmem:[%s6958_s6 + $0x558] sm:$0xff] %v1146_v11  ;;  %v1274_v11 = vld [vmem:[%s6953_s5 + $0xeb0] sm:$0xff] }
 0x100   : > { %1149 = vst [vmem:[%s6958_s6 + $0x560] sm:$0xff] %v1148_v12  ;;  %v1276_v12 = vld [vmem:[%s6953_s5 + $0xec0] sm:$0xff] }
 0x101   : > { %1151 = vst [vmem:[%s6958_s6 + $0x568] sm:$0xff] %v1150_v13  ;;  %v1278_v13 = vld [vmem:[%s6953_s5 + $0xed0] sm:$0xff] }
 0x102   : > { %1153 = vst [vmem:[%s6958_s6 + $0x570] sm:$0xff] %v1152_v14  ;;  %v1280_v14 = vld [vmem:[%s6953_s5 + $0xee0] sm:$0xff] }
 0x103   : > { %1155 = vst [vmem:[%s6958_s6 + $0x578] sm:$0xff] %v1154_v15  ;;  %v1282_v15 = vld [vmem:[%s6953_s5 + $0xef0] sm:$0xff] }
 0x104   : > { %1157 = vst [vmem:[%s6958_s6 + $0x580] sm:$0xff] %v1156_v16  ;;  %v1284_v16 = vld [vmem:[%s6953_s5 + $0xf00] sm:$0xff] }
 0x105   : > { %1159 = vst [vmem:[%s6958_s6 + $0x588] sm:$0xff] %v1158_v17  ;;  %v1286_v17 = vld [vmem:[%s6953_s5 + $0xf10] sm:$0xff] }
 0x106   : > { %1161 = vst [vmem:[%s6958_s6 + $0x590] sm:$0xff] %v1160_v18  ;;  %v1288_v18 = vld [vmem:[%s6953_s5 + $0xf20] sm:$0xff] }
 0x107   : > { %1163 = vst [vmem:[%s6958_s6 + $0x598] sm:$0xff] %v1162_v19  ;;  %v1290_v19 = vld [vmem:[%s6953_s5 + $0xf30] sm:$0xff] }
 0x108   : > { %1165 = vst [vmem:[%s6958_s6 + $0x5a0] sm:$0xff] %v1164_v20  ;;  %v1292_v20 = vld [vmem:[%s6953_s5 + $0xf40] sm:$0xff] }
 0x109   : > { %1167 = vst [vmem:[%s6958_s6 + $0x5a8] sm:$0xff] %v1166_v21  ;;  %v1294_v21 = vld [vmem:[%s6953_s5 + $0xf50] sm:$0xff] }
 0x10a   : > { %1169 = vst [vmem:[%s6958_s6 + $0x5b0] sm:$0xff] %v1168_v22  ;;  %v1296_v22 = vld [vmem:[%s6953_s5 + $0xf60] sm:$0xff] }
 0x10b   : > { %1171 = vst [vmem:[%s6958_s6 + $0x5b8] sm:$0xff] %v1170_v23  ;;  %v1298_v23 = vld [vmem:[%s6953_s5 + $0xf70] sm:$0xff] }
 0x10c   : > { %1173 = vst [vmem:[%s6958_s6 + $0x5c0] sm:$0xff] %v1172_v24  ;;  %v1300_v24 = vld [vmem:[%s6953_s5 + $0xf80] sm:$0xff] }
 0x10d   : > { %1175 = vst [vmem:[%s6958_s6 + $0x5c8] sm:$0xff] %v1174_v25  ;;  %v1302_v25 = vld [vmem:[%s6953_s5 + $0xf90] sm:$0xff] }
 0x10e   : > { %1177 = vst [vmem:[%s6958_s6 + $0x5d0] sm:$0xff] %v1176_v26  ;;  %v1304_v26 = vld [vmem:[%s6953_s5 + $0xfa0] sm:$0xff] }
 0x10f   : > { %1179 = vst [vmem:[%s6958_s6 + $0x5d8] sm:$0xff] %v1178_v27  ;;  %v1306_v27 = vld [vmem:[%s6953_s5 + $0xfb0] sm:$0xff] }
 0x110   : > { %1181 = vst [vmem:[%s6958_s6 + $0x5e0] sm:$0xff] %v1180_v28  ;;  %v1308_v28 = vld [vmem:[%s6953_s5 + $0xfc0] sm:$0xff] }
 0x111   : > { %1183 = vst [vmem:[%s6958_s6 + $0x5e8] sm:$0xff] %v1182_v29  ;;  %v1310_v29 = vld [vmem:[%s6953_s5 + $0xfd0] sm:$0xff] }
 0x112   : > { %1185 = vst [vmem:[%s6958_s6 + $0x5f0] sm:$0xff] %v1184_v30  ;;  %v1312_v30 = vld [vmem:[%s6953_s5 + $0xfe0] sm:$0xff] }
 0x113   : > { %1187 = vst [vmem:[%s6958_s6 + $0x5f8] sm:$0xff] %v1186_v31  ;;  %v1314_v31 = vld [vmem:[%s6953_s5 + $0xff0] sm:$0xff] }
 0x114   : > { %1189 = vst [vmem:[%s6958_s6 + $0x600] sm:$0xff] %v1188_v32 }
 0x115   : > { %1191 = vst [vmem:[%s6958_s6 + $0x608] sm:$0xff] %v1190_v33 }
 0x116   : > { %1193 = vst [vmem:[%s6958_s6 + $0x610] sm:$0xff] %v1192_v34 }
 0x117   : > { %1195 = vst [vmem:[%s6958_s6 + $0x618] sm:$0xff] %v1194_v35 }
 0x118   : > { %1197 = vst [vmem:[%s6958_s6 + $0x620] sm:$0xff] %v1196_v36 }
 0x119   : > { %1199 = vst [vmem:[%s6958_s6 + $0x628] sm:$0xff] %v1198_v37 }
 0x11a   : > { %1201 = vst [vmem:[%s6958_s6 + $0x630] sm:$0xff] %v1200_v38 }
 0x11b   : > { %1203 = vst [vmem:[%s6958_s6 + $0x638] sm:$0xff] %v1202_v39 }
 0x11c   : > { %1205 = vst [vmem:[%s6958_s6 + $0x640] sm:$0xff] %v1204_v40 }
 0x11d   : > { %1207 = vst [vmem:[%s6958_s6 + $0x648] sm:$0xff] %v1206_v41 }
 0x11e   : > { %1209 = vst [vmem:[%s6958_s6 + $0x650] sm:$0xff] %v1208_v42 }
 0x11f   : > { %1211 = vst [vmem:[%s6958_s6 + $0x658] sm:$0xff] %v1210_v43 }
 0x120   : > { %1213 = vst [vmem:[%s6958_s6 + $0x660] sm:$0xff] %v1212_v44 }
 0x121   : > { %1215 = vst [vmem:[%s6958_s6 + $0x668] sm:$0xff] %v1214_v45 }
 0x122   : > { %1217 = vst [vmem:[%s6958_s6 + $0x670] sm:$0xff] %v1216_v46 }
 0x123   : > { %1219 = vst [vmem:[%s6958_s6 + $0x678] sm:$0xff] %v1218_v47 }
 0x124   : > { %1221 = vst [vmem:[%s6958_s6 + $0x680] sm:$0xff] %v1220_v48 }
 0x125   : > { %1223 = vst [vmem:[%s6958_s6 + $0x688] sm:$0xff] %v1222_v49 }
 0x126   : > { %1225 = vst [vmem:[%s6958_s6 + $0x690] sm:$0xff] %v1224_v50 }
 0x127   : > { %1227 = vst [vmem:[%s6958_s6 + $0x698] sm:$0xff] %v1226_v51 }
 0x128   : > { %1229 = vst [vmem:[%s6958_s6 + $0x6a0] sm:$0xff] %v1228_v52 }
 0x129   : > { %1231 = vst [vmem:[%s6958_s6 + $0x6a8] sm:$0xff] %v1230_v53 }
 0x12a   : > { %1233 = vst [vmem:[%s6958_s6 + $0x6b0] sm:$0xff] %v1232_v54 }
 0x12b   : > { %1235 = vst [vmem:[%s6958_s6 + $0x6b8] sm:$0xff] %v1234_v55 }
 0x12c   : > { %1237 = vst [vmem:[%s6958_s6 + $0x6c0] sm:$0xff] %v1236_v56 }
 0x12d   : > { %1239 = vst [vmem:[%s6958_s6 + $0x6c8] sm:$0xff] %v1238_v57 }
 0x12e   : > { %1241 = vst [vmem:[%s6958_s6 + $0x6d0] sm:$0xff] %v1240_v58 }
 0x12f   : > { %1243 = vst [vmem:[%s6958_s6 + $0x6d8] sm:$0xff] %v1242_v59 }
 0x130   : > { %1245 = vst [vmem:[%s6958_s6 + $0x6e0] sm:$0xff] %v1244_v60 }
 0x131   : > { %1247 = vst [vmem:[%s6958_s6 + $0x6e8] sm:$0xff] %v1246_v61 }
 0x132   : > { %1249 = vst [vmem:[%s6958_s6 + $0x6f0] sm:$0xff] %v1248_v62 }
 0x133   : > { %1251 = vst [vmem:[%s6958_s6 + $0x6f8] sm:$0xff] %v1250_v63 }
 0x134   : > { %1253 = vst [vmem:[%s6958_s6 + $0x700] sm:$0xff] %v1252_v0 }
 0x135   : > { %1255 = vst [vmem:[%s6958_s6 + $0x708] sm:$0xff] %v1254_v1 }
 0x136   : > { %1257 = vst [vmem:[%s6958_s6 + $0x710] sm:$0xff] %v1256_v2 }
 0x137   : > { %1259 = vst [vmem:[%s6958_s6 + $0x718] sm:$0xff] %v1258_v3 }
 0x138   : > { %1261 = vst [vmem:[%s6958_s6 + $0x720] sm:$0xff] %v1260_v4 }
 0x139   : > { %1263 = vst [vmem:[%s6958_s6 + $0x728] sm:$0xff] %v1262_v5 }
 0x13a   : > { %1265 = vst [vmem:[%s6958_s6 + $0x730] sm:$0xff] %v1264_v6 }
 0x13b   : > { %1267 = vst [vmem:[%s6958_s6 + $0x738] sm:$0xff] %v1266_v7 }
 0x13c   : > { %1269 = vst [vmem:[%s6958_s6 + $0x740] sm:$0xff] %v1268_v8 }
 0x13d   : > { %1271 = vst [vmem:[%s6958_s6 + $0x748] sm:$0xff] %v1270_v9 }
 0x13e   : > { %1273 = vst [vmem:[%s6958_s6 + $0x750] sm:$0xff] %v1272_v10 }
 0x13f   : > { %1275 = vst [vmem:[%s6958_s6 + $0x758] sm:$0xff] %v1274_v11 }
 0x140   : > { %1277 = vst [vmem:[%s6958_s6 + $0x760] sm:$0xff] %v1276_v12 }
 0x141   : > { %1279 = vst [vmem:[%s6958_s6 + $0x768] sm:$0xff] %v1278_v13 }
 0x142   : > { %1281 = vst [vmem:[%s6958_s6 + $0x770] sm:$0xff] %v1280_v14 }
 0x143   : > { %1283 = vst [vmem:[%s6958_s6 + $0x778] sm:$0xff] %v1282_v15 }
 0x144   : > { %1285 = vst [vmem:[%s6958_s6 + $0x780] sm:$0xff] %v1284_v16 }
 0x145   : > { %1287 = vst [vmem:[%s6958_s6 + $0x788] sm:$0xff] %v1286_v17 }
 0x146   : > { %1289 = vst [vmem:[%s6958_s6 + $0x790] sm:$0xff] %v1288_v18 }
 0x147   : > { %1291 = vst [vmem:[%s6958_s6 + $0x798] sm:$0xff] %v1290_v19 }
 0x148   : > { %1293 = vst [vmem:[%s6958_s6 + $0x7a0] sm:$0xff] %v1292_v20 }
 0x149   : > { %1295 = vst [vmem:[%s6958_s6 + $0x7a8] sm:$0xff] %v1294_v21 }
 0x14a   : > { %1297 = vst [vmem:[%s6958_s6 + $0x7b0] sm:$0xff] %v1296_v22 }
 0x14b   : > { %1299 = vst [vmem:[%s6958_s6 + $0x7b8] sm:$0xff] %v1298_v23 }
 0x14c   : > { %1301 = vst [vmem:[%s6958_s6 + $0x7c0] sm:$0xff] %v1300_v24 }
 0x14d   : > { %1303 = vst [vmem:[%s6958_s6 + $0x7c8] sm:$0xff] %v1302_v25 }
 0x14e   : > { %1305 = vst [vmem:[%s6958_s6 + $0x7d0] sm:$0xff] %v1304_v26 }
 0x14f   : > { %1307 = vst [vmem:[%s6958_s6 + $0x7d8] sm:$0xff] %v1306_v27 }
 0x150   : > { %1309 = vst [vmem:[%s6958_s6 + $0x7e0] sm:$0xff] %v1308_v28 }
 0x151   : > { %1311 = vst [vmem:[%s6958_s6 + $0x7e8] sm:$0xff] %v1310_v29 }
 0x152   : > { %1313 = vst [vmem:[%s6958_s6 + $0x7f0] sm:$0xff] %v1312_v30 }
 0x153   : > { %1315 = vst [vmem:[%s6958_s6 + $0x7f8] sm:$0xff] %v1314_v31 }
 0x154 PF: > { %p5117_p0 = scmp.ge.s32.totalorder %s6748_s22, 1  ;;  %p2379_p1 = scmp.lt.s32.totalorder %s6748_s22, 5 }
 0x156   : > { %p2380_p2 = pnand %p5117_p0, %p2379_p1 }
 0x157   : > { %s2386_s0 = sand.u32 (!%p2380_p2), 1, %s6724_s16   ;;  %s2393_s23 = sand.u32 (!%p2380_p2), 1, %s6716_s14  }
 0x158   : > { %2383 = sbr.rel (%p2380_p2) target bundleno = 822 (0x336), region = 95  ;;  %s5118_s28 = sshll.u32 (!%p2380_p2), %s2386_s0, 8 }
 0x159   : > { %s5119_s7 = sshll.u32 (!%p2380_p2), %s2393_s23, 11  ;;  %s2414_s11 = sand.u32 (!%p2380_p2), 1, %s6708_s12  }
 0x15a   : > { %s5121_s26 = sshll.u32 (!%p2380_p2), %s6736_s19, 1  ;;  %s5120_s27 = sshll.u32 (!%p2380_p2), %s2414_s11, 5 }
 0x15b   : > { %p2437_p3 = scmp.lt.s32.totalorder (!%p2380_p2), %s5121_s26, 3  ;;  %s7480_s1 = scalar_lea.vmem (!%p2380_p2), [#allocation3], %s5118_s28 }
 0x15c   : > { %s7482_s25 = scalar_lea.vmem (!%p2380_p2), [#allocation4], %s5119_s7  ;;  %s7484_s24 = scalar_lea.vmem (!%p2380_p2), [#allocation5], %s5120_s27 }
 0x15d   : > { %s8365_s26 = smov (!%p2437_p3, %s5121_s26), 3  ;;  %p5123_p4 = scmp.ne.s32.totalorder %s6732_s18, 0 }
 0x15e   : > { %s5122_s29 = sshll.u32 %s8365_s26, 3 }
 0x15f   : > { %s7478_s6 = scalar_lea.vmem %s8334_s3, %s5122_s29  ;;  %2447 = sbr.rel (%p5123_p4) target bundleno = 365 (0x16d), region = 107 }
 0x164   : > { %v6750_v32 = vmov 0.0  }
 0x165   : > { %2448 = vst [vmem:[#allocation2 + $0x30] sm:$0xff] %v6750_v32 }
 0x166   : > { %2449 = vst [vmem:[#allocation2] sm:$0xff] %v6750_v32 }
 0x167   : > { %2450 = vst [vmem:[#allocation2 + $0x18] sm:$0xff] %v6750_v32 }
 0x168   : > { %2451 = vst [vmem:[#allocation2 + $0x10] sm:$0xff] %v6750_v32 }
 0x169   : > { %2452 = vst [vmem:[#allocation2 + $0x8] sm:$0xff] %v6750_v32 }
 0x16a   : > { %2453 = vst [vmem:[#allocation2 + $0x20] sm:$0xff] %v6750_v32 }
 0x16b   : > { %2454 = vst [vmem:[#allocation2 + $0x28] sm:$0xff] %v6750_v32 }
 0x16c   : > { %2455 = vst [vmem:[#allocation2 + $0x38] sm:$0xff] %v6750_v32 }
 0x16d PF: > { %v5310_v33 = vld [vmem:[%s7482_s25 + $0x70] sm:$0xf]  ;;  %v6331_v34 = vld [vmem:[%s7482_s25 + $0x74] sm:$0xf0]  ;;  %v5302_v44 = vld [vmem:[%s7482_s25 + $0x60] sm:$0xf] }
 0x16e   : > { %v5374_v35 = vld [vmem:[%s7482_s25 + $0xf0] sm:$0xf]  ;;  %v5311_v36 = vor.u32 %v6331_v34, %v5310_v33  ;;  %v6347_v37 = vld [vmem:[%s7482_s25 + $0xf4] sm:$0xf0]  ;;  %v6329_v46 = vld [vmem:[%s7482_s25 + $0x64] sm:$0xf0] }
 0x16f   : > { %v5438_v38 = vld [vmem:[%s7482_s25 + $0x170] sm:$0xf]  ;;  %v6363_v39 = vld [vmem:[%s7482_s25 + $0x174] sm:$0xf0]  ;;  %v5375_v40 = vor.u32 %v6347_v37, %v5374_v35  ;;  %v5366_v47 = vld [vmem:[%s7482_s25 + $0xe0] sm:$0xf]  ;;  %v5303_v49 = vor.u32 %v6329_v46, %v5302_v44 }
 0x170   : > { %v5439_v41 = vor.u32 %v6363_v39, %v5438_v38  ;;  %v5502_v42 = vld [vmem:[%s7482_s25 + $0x1f0] sm:$0xf]  ;;  %v6379_v43 = vld [vmem:[%s7482_s25 + $0x1f4] sm:$0xf0]  ;;  %4192 = vmatpush.bf16.msra.mxu0 %v5311_v36  ;;  %v6345_v48 = vld [vmem:[%s7482_s25 + $0xe4] sm:$0xf0] }
 0x171   : > { %v5503_v45 = vor.u32 %v6379_v43, %v5502_v42  ;;  %4211 = vmatpush.bf16.msra.mxu1 %v5375_v40  ;;  %v5367_v50 = vor.u32 %v6345_v48, %v5366_v47  ;;  %v5430_v51 = vld [vmem:[%s7482_s25 + $0x160] sm:$0xf]  ;;  %v6361_v52 = vld [vmem:[%s7482_s25 + $0x164] sm:$0xf0]  ;;  %v5294_v56 = vld [vmem:[%s7482_s25 + $0x50] sm:$0xf] }
 0x172   : > { %4230 = vmatpush.bf16.msra.mxu2 %v5439_v41  ;;  %v5494_v53 = vld [vmem:[%s7482_s25 + $0x1e0] sm:$0xf]  ;;  %v5431_v54 = vor.u32 %v6361_v52, %v5430_v51  ;;  %v6377_v55 = vld [vmem:[%s7482_s25 + $0x1e4] sm:$0xf0]  ;;  %v6327_v57 = vld [vmem:[%s7482_s25 + $0x54] sm:$0xf0] }
 0x173   : > { %4249 = vmatpush.bf16.msra.mxu3 %v5503_v45  ;;  %v5495_v58 = vor.u32 %v6377_v55, %v5494_v53  ;;  %v5358_v59 = vld [vmem:[%s7482_s25 + $0xd0] sm:$0xf]  ;;  %v6343_v60 = vld [vmem:[%s7482_s25 + $0xd4] sm:$0xf0]  ;;  %v5295_v62 = vor.u32 %v6327_v57, %v5294_v56  ;;  %v5286_v4 = vld [vmem:[%s7482_s25 + $0x40] sm:$0xf] }
 0x174   : > { %v5422_v61 = vld [vmem:[%s7482_s25 + $0x150] sm:$0xf]  ;;  %4193 = vmatpush.bf16.msra.mxu0 %v5303_v49  ;;  %v6359_v63 = vld [vmem:[%s7482_s25 + $0x154] sm:$0xf0]  ;;  %v5359_v2 = vor.u32 %v6343_v60, %v5358_v59  ;;  %v6325_v5 = vld [vmem:[%s7482_s25 + $0x44] sm:$0xf0] }
 0x175   : > { %v5486_v0 = vld [vmem:[%s7482_s25 + $0x1d0] sm:$0xf]  ;;  %v6375_v1 = vld [vmem:[%s7482_s25 + $0x1d4] sm:$0xf0]  ;;  %4212 = vmatpush.bf16.msra.mxu1 %v5367_v50  ;;  %v5423_v3 = vor.u32 %v6359_v63, %v5422_v61  ;;  %v5350_v6 = vld [vmem:[%s7482_s25 + $0xc0] sm:$0xf]  ;;  %v5287_v13 = vor.u32 %v6325_v5, %v5286_v4 }
 0x176   : > { %4231 = vmatpush.bf16.msra.mxu2 %v5431_v54  ;;  %v5487_v7 = vor.u32 %v6375_v1, %v5486_v0  ;;  %v6341_v8 = vld [vmem:[%s7482_s25 + $0xc4] sm:$0xf0]  ;;  %v5414_v9 = vld [vmem:[%s7482_s25 + $0x140] sm:$0xf]  ;;  %v5278_v16 = vld [vmem:[%s7482_s25 + $0x30] sm:$0xf] }
 0x177   : > { %4250 = vmatpush.bf16.msra.mxu3 %v5495_v58  ;;  %v6357_v10 = vld [vmem:[%s7482_s25 + $0x144] sm:$0xf0]  ;;  %v5478_v11 = vld [vmem:[%s7482_s25 + $0x1c0] sm:$0xf]  ;;  %v5351_v14 = vor.u32 %v6341_v8, %v5350_v6  ;;  %v6323_v17 = vld [vmem:[%s7482_s25 + $0x34] sm:$0xf0] }
 0x178   : > { %v6373_v12 = vld [vmem:[%s7482_s25 + $0x1c4] sm:$0xf0]  ;;  %4194 = vmatpush.bf16.msra.mxu0 %v5295_v62  ;;  %v5415_v15 = vor.u32 %v6357_v10, %v5414_v9  ;;  %v5342_v18 = vld [vmem:[%s7482_s25 + $0xb0] sm:$0xf]  ;;  %v6339_v20 = vld [vmem:[%s7482_s25 + $0xb4] sm:$0xf0]  ;;  %v5279_v25 = vor.u32 %v6323_v17, %v5278_v16 }
 0x179   : > { %4213 = vmatpush.bf16.msra.mxu1 %v5359_v2  ;;  %v5479_v19 = vor.u32 %v6373_v12, %v5478_v11  ;;  %v5406_v21 = vld [vmem:[%s7482_s25 + $0x130] sm:$0xf]  ;;  %v6355_v22 = vld [vmem:[%s7482_s25 + $0x134] sm:$0xf0]  ;;  %v5343_v26 = vor.u32 %v6339_v20, %v5342_v18  ;;  %v5270_v28 = vld [vmem:[%s7482_s25 + $0x20] sm:$0xf] }
 0x17a   : > { %4232 = vmatpush.bf16.msra.mxu2 %v5423_v3  ;;  %v5470_v23 = vld [vmem:[%s7482_s25 + $0x1b0] sm:$0xf]  ;;  %v6371_v24 = vld [vmem:[%s7482_s25 + $0x1b4] sm:$0xf0]  ;;  %v5407_v27 = vor.u32 %v6355_v22, %v5406_v21  ;;  %v6321_v29 = vld [vmem:[%s7482_s25 + $0x24] sm:$0xf0] }
 0x17b   : > { %4251 = vmatpush.bf16.msra.mxu3 %v5487_v7  ;;  %v5334_v30 = vld [vmem:[%s7482_s25 + $0xa0] sm:$0xf]  ;;  %v5471_v31 = vor.u32 %v6371_v24, %v5470_v23  ;;  %v6337_v32 = vld [vmem:[%s7482_s25 + $0xa4] sm:$0xf0]  ;;  %v5271_v37 = vor.u32 %v6321_v29, %v5270_v28  ;;  %v5262_v40 = vld [vmem:[%s7482_s25 + $0x10] sm:$0xf] }
 0x17c   : > { %4195 = vmatpush.bf16.msra.mxu0 %v5287_v13  ;;  %v5398_v33 = vld [vmem:[%s7482_s25 + $0x120] sm:$0xf]  ;;  %v6353_v34 = vld [vmem:[%s7482_s25 + $0x124] sm:$0xf0]  ;;  %v5335_v38 = vor.u32 %v6337_v32, %v5334_v30  ;;  %v6319_v41 = vld [vmem:[%s7482_s25 + $0x14] sm:$0xf0] }
 0x17d   : > { %4214 = vmatpush.bf16.msra.mxu1 %v5351_v14  ;;  %v5462_v35 = vld [vmem:[%s7482_s25 + $0x1a0] sm:$0xf]  ;;  %v6369_v36 = vld [vmem:[%s7482_s25 + $0x1a4] sm:$0xf0]  ;;  %v5399_v39 = vor.u32 %v6353_v34, %v5398_v33  ;;  %v5326_v42 = vld [vmem:[%s7482_s25 + $0x90] sm:$0xf]  ;;  %v5263_v50 = vor.u32 %v6319_v41, %v5262_v40 }
 0x17e   : > { %4233 = vmatpush.bf16.msra.mxu2 %v5415_v15  ;;  %v5463_v43 = vor.u32 %v6369_v36, %v5462_v35  ;;  %v6335_v44 = vld [vmem:[%s7482_s25 + $0x94] sm:$0xf0]  ;;  %v5390_v45 = vld [vmem:[%s7482_s25 + $0x110] sm:$0xf]  ;;  %v5254_v49 = vld [vmem:[%s7482_s25] sm:$0xf] }
 0x17f   : > { %4252 = vmatpush.bf16.msra.mxu3 %v5479_v19  ;;  %v6351_v46 = vld [vmem:[%s7482_s25 + $0x114] sm:$0xf0]  ;;  %v5454_v47 = vld [vmem:[%s7482_s25 + $0x190] sm:$0xf]  ;;  %v6317_v51 = vld [vmem:[%s7482_s25 + $0x4] sm:$0xf0]  ;;  %v5327_v54 = vor.u32 %v6335_v44, %v5326_v42 }
 0x180   : > { %4196 = vmatpush.bf16.msra.mxu0 %v5279_v25  ;;  %v6367_v48 = vld [vmem:[%s7482_s25 + $0x194] sm:$0xf0]  ;;  %v5318_v52 = vld [vmem:[%s7482_s25 + $0x80] sm:$0xf]  ;;  %v6333_v53 = vld [vmem:[%s7482_s25 + $0x84] sm:$0xf0]  ;;  %v5391_v55 = vor.u32 %v6351_v46, %v5390_v45  ;;  %v5255_v3 = vor.u32 %v6317_v51, %v5254_v49 }
 0x181   : > { %4215 = vmatpush.bf16.msra.mxu1 %v5343_v26  ;;  %v5382_v56 = vld [vmem:[%s7482_s25 + $0x100] sm:$0xf]  ;;  %v6349_v57 = vld [vmem:[%s7482_s25 + $0x104] sm:$0xf0]  ;;  %v5455_v59 = vor.u32 %v6367_v48, %v5454_v47  ;;  %v6284_v63 = vld [vmem:[%s7480_s1 + $0x4] sm:$0xf]  ;;  %v5319_v7 = vor.u32 %v6333_v53, %v5318_v52 }
 0x182   : > { %4234 = vmatpush.bf16.msra.mxu2 %v5407_v27  ;;  %v5446_v58 = vld [vmem:[%s7482_s25 + $0x180] sm:$0xf]  ;;  %v6365_v60 = vld [vmem:[%s7482_s25 + $0x184] sm:$0xf0]  ;;  %v5128_v0 = vld [vmem:[%s7480_s1 + $0x40] sm:$0xf0]  ;;  %v5383_v8 = vor.u32 %v6349_v57, %v5382_v56 }
 0x183   : > { %4253 = vmatpush.bf16.msra.mxu3 %v5471_v31  ;;  %v5126_v61 = vld [vmem:[%s7480_s1] sm:$0xf]  ;;  %v5694_v1 = vld [vmem:[%s7482_s25 + $0x370] sm:$0xf]  ;;  %v6427_v2 = vld [vmem:[%s7482_s25 + $0x374] sm:$0xf0]  ;;  %v5447_v12 = vor.u32 %v6365_v60, %v5446_v58  ;;  %v7571_v22 = vor.u32 %v6284_v63, %v5128_v0 }
 0x184   : > { %4197 = vmatpush.bf16.msra.mxu0 %v5271_v37  ;;  %v6292_v62 = vld [vmem:[%s7480_s1 + $0x3c] sm:$0xf0]  ;;  %v5134_v4 = vld [vmem:[%s7480_s1 + $0x8] sm:$0xf]  ;;  %v5630_v5 = vld [vmem:[%s7482_s25 + $0x2f0] sm:$0xf]  ;;  %v5695_v13 = vor.u32 %v6427_v2, %v5694_v1 }
 0x185   : > { %4216 = vmatpush.bf16.msra.mxu1 %v5335_v38  ;;  %v6411_v6 = vld [vmem:[%s7482_s25 + $0x2f4] sm:$0xf0]  ;;  %v6293_v9 = vld [vmem:[%s7480_s1 + $0x44] sm:$0xf0]  ;;  %v6285_v10 = vld [vmem:[%s7480_s1 + $0xc] sm:$0xf]  ;;  %v7566_v17 = vor.u32 %v6292_v62, %v5126_v61 }
 0x186   : > { %4235 = vmatpush.bf16.msra.mxu2 %v5399_v39  ;;  %v5136_v11 = vld [vmem:[%s7480_s1 + $0x48] sm:$0xf0]  ;;  %v5566_v14 = vld [vmem:[%s7482_s25 + $0x270] sm:$0xf]  ;;  %v6395_v15 = vld [vmem:[%s7482_s25 + $0x274] sm:$0xf0]  ;;  %v5631_v18 = vor.u32 %v6411_v6, %v5630_v5  ;;  %v7573_v23 = vor.u32 %v6293_v9, %v5134_v4 }
 0x187   : > { %4254 = vmatpush.bf16.msra.mxu3 %v5463_v43  ;;  %v5758_v16 = vld [vmem:[%s7482_s25 + $0x3f0] sm:$0xf]  ;;  %v6443_v19 = vld [vmem:[%s7482_s25 + $0x3f4] sm:$0xf0]  ;;  %v5686_v20 = vld [vmem:[%s7482_s25 + $0x360] sm:$0xf]  ;;  %v7577_v26 = vor.u32 %v6285_v10, %v5136_v11  ;;  %v5567_v27 = vor.u32 %v6395_v15, %v5566_v14 }
 0x188   : > { %4198 = vmatpush.bf16.msra.mxu0 %v5263_v50  ;;  %v6425_v21 = vld [vmem:[%s7482_s25 + $0x364] sm:$0xf0]  ;;  %v5622_v24 = vld [vmem:[%s7482_s25 + $0x2e0] sm:$0xf]  ;;  %v5759_v28 = vor.u32 %v6443_v19, %v5758_v16  ;;  %v5678_v35 = vld [vmem:[%s7482_s25 + $0x350] sm:$0xf] }
 0x189   : > { %4217 = vmatpush.bf16.msra.mxu1 %v5327_v54  ;;  %v6409_v25 = vld [vmem:[%s7482_s25 + $0x2e4] sm:$0xf0]  ;;  %v5687_v29 = vor.u32 %v6425_v21, %v5686_v20  ;;  %v5558_v30 = vld [vmem:[%s7482_s25 + $0x260] sm:$0xf]  ;;  %v6423_v36 = vld [vmem:[%s7482_s25 + $0x354] sm:$0xf0] }
 0x18a   : > { %4236 = vmatpush.bf16.msra.mxu2 %v5391_v55  ;;  %v6393_v31 = vld [vmem:[%s7482_s25 + $0x264] sm:$0xf0]  ;;  %v5750_v32 = vld [vmem:[%s7482_s25 + $0x3e0] sm:$0xf]  ;;  %v5623_v33 = vor.u32 %v6409_v25, %v5622_v24  ;;  %v5614_v37 = vld [vmem:[%s7482_s25 + $0x2d0] sm:$0xf]  ;;  %v5679_v41 = vor.u32 %v6423_v36, %v5678_v35 }
 0x18b   : > { %4255 = vmatpush.bf16.msra.mxu3 %v5455_v59  ;;  %v6441_v34 = vld [vmem:[%s7482_s25 + $0x3e4] sm:$0xf0]  ;;  %v6407_v38 = vld [vmem:[%s7482_s25 + $0x2d4] sm:$0xf0]  ;;  %v5559_v39 = vor.u32 %v6393_v31, %v5558_v30  ;;  %v5550_v42 = vld [vmem:[%s7482_s25 + $0x250] sm:$0xf] }
 0x18c   : > { %4199 = vmatpush.bf16.msra.mxu0 %v5255_v3  ;;  %v5751_v40 = vor.u32 %v6441_v34, %v5750_v32  ;;  %v6391_v43 = vld [vmem:[%s7482_s25 + $0x254] sm:$0xf0]  ;;  %v5742_v44 = vld [vmem:[%s7482_s25 + $0x3d0] sm:$0xf]  ;;  %v5615_v45 = vor.u32 %v6407_v38, %v5614_v37  ;;  %v5670_v47 = vld [vmem:[%s7482_s25 + $0x340] sm:$0xf] }
 0x18d   : > { %4218 = vmatpush.bf16.msra.mxu1 %v5319_v7  ;;  %v6439_v46 = vld [vmem:[%s7482_s25 + $0x3d4] sm:$0xf0]  ;;  %v6421_v48 = vld [vmem:[%s7482_s25 + $0x344] sm:$0xf0]  ;;  %v5606_v49 = vld [vmem:[%s7482_s25 + $0x2c0] sm:$0xf]  ;;  %v5551_v51 = vor.u32 %v6391_v43, %v5550_v42 }
 0x18e   : > { %4237 = vmatpush.bf16.msra.mxu2 %v5383_v8  ;;  %v6405_v50 = vld [vmem:[%s7482_s25 + $0x2c4] sm:$0xf0]  ;;  %v5542_v52 = vld [vmem:[%s7482_s25 + $0x240] sm:$0xf]  ;;  %v5743_v55 = vor.u32 %v6439_v46, %v5742_v44  ;;  %v5671_v56 = vor.u32 %v6421_v48, %v5670_v47  ;;  %v6300_v61 = vld [vmem:[%s7480_s1 + $0x84] sm:$0xf] }
 0x18f   : > { %4256 = vmatpush.bf16.msra.mxu3 %v5447_v12  ;;  %4200 = vmatmul.bf16.vlgmr.msra.gmra.mxu0 %v7566_v17  ;;  %v6389_v53 = vld [vmem:[%s7482_s25 + $0x244] sm:$0xf0]  ;;  %v5734_v54 = vld [vmem:[%s7482_s25 + $0x3c0] sm:$0xf]  ;;  %v5607_v60 = vor.u32 %v6405_v50, %v5606_v49  ;;  %v5192_v62 = vld [vmem:[%s7480_s1 + $0xc0] sm:$0xf0] }
 0x190   : > { %4219 = vmatmul.bf16.vlgmr.msra.gmra.mxu1 %v7571_v22  ;;  %4268 = vmatpush.bf16.msrb.mxu0 %v5567_v27  ;;  %v6437_v57 = vld [vmem:[%s7482_s25 + $0x3c4] sm:$0xf0]  ;;  %v5190_v58 = vld [vmem:[%s7480_s1 + $0x80] sm:$0xf]  ;;  %v5662_v63 = vld [vmem:[%s7482_s25 + $0x330] sm:$0xf]  ;;  %v5543_v4 = vor.u32 %v6389_v53, %v5542_v52  ;;  %v7623_v19 = vor.u32 %v6300_v61, %v5192_v62 }
 0x191   : > { %4287 = vmatpush.bf16.msrb.mxu1 %v5631_v18  ;;  %4238 = vmatmul.bf16.vlgmr.msra.gmra.mxu2 %v7573_v23  ;;  %v6308_v59 = vld [vmem:[%s7480_s1 + $0xbc] sm:$0xf0]  ;;  %v6419_v0 = vld [vmem:[%s7482_s25 + $0x334] sm:$0xf0]  ;;  %v5198_v1 = vld [vmem:[%s7480_s1 + $0x88] sm:$0xf]  ;;  %v5735_v8 = vor.u32 %v6437_v57, %v5734_v54 }
 0x192   : > { %4306 = vmatpush.bf16.msrb.mxu2 %v5695_v13  ;;  %4257 = vmatmul.bf16.vlgmr.msra.gmra.mxu3 %v7577_v26  ;;  %v5598_v2 = vld [vmem:[%s7482_s25 + $0x2b0] sm:$0xf]  ;;  %v6403_v3 = vld [vmem:[%s7482_s25 + $0x2b4] sm:$0xf0]  ;;  %v6309_v5 = vld [vmem:[%s7480_s1 + $0xc4] sm:$0xf0]  ;;  %v5663_v9 = vor.u32 %v6419_v0, %v5662_v63  ;;  %v7618_v13 = vor.u32 %v6308_v59, %v5190_v58 }
 0x193   : > { %4325 = vmatpush.bf16.msrb.mxu3 %v5759_v28  ;;  %v6301_v6 = vld [vmem:[%s7480_s1 + $0x8c] sm:$0xf]  ;;  %v5534_v10 = vld [vmem:[%s7482_s25 + $0x230] sm:$0xf]  ;;  %v6387_v11 = vld [vmem:[%s7482_s25 + $0x234] sm:$0xf0]  ;;  %v5599_v14 = vor.u32 %v6403_v3, %v5598_v2  ;;  %v7625_v20 = vor.u32 %v6309_v5, %v5198_v1 }
 0x194   : > { %4269 = vmatpush.bf16.msrb.mxu0 %v5559_v39  ;;  %v5200_v7 = vld [vmem:[%s7480_s1 + $0xc8] sm:$0xf0]  ;;  %v5726_v12 = vld [vmem:[%s7482_s25 + $0x3b0] sm:$0xf]  ;;  %v6435_v15 = vld [vmem:[%s7482_s25 + $0x3b4] sm:$0xf0]  ;;  %v5535_v27 = vor.u32 %v6387_v11, %v5534_v10 }
 0x195   : > { %4288 = vmatpush.bf16.msrb.mxu1 %v5623_v33  ;;  %v5654_v16 = vld [vmem:[%s7482_s25 + $0x320] sm:$0xf]  ;;  %v6417_v18 = vld [vmem:[%s7482_s25 + $0x324] sm:$0xf0]  ;;  %v7629_v25 = vor.u32 %v6301_v6, %v5200_v7  ;;  %v5727_v28 = vor.u32 %v6435_v15, %v5726_v12  ;;  %v5646_v35 = vld [vmem:[%s7482_s25 + $0x310] sm:$0xf] }
 0x196   : > { %4307 = vmatpush.bf16.msrb.mxu2 %v5687_v29  ;;  %v5590_v21 = vld [vmem:[%s7482_s25 + $0x2a0] sm:$0xf]  ;;  %v6401_v24 = vld [vmem:[%s7482_s25 + $0x2a4] sm:$0xf0]  ;;  %v5655_v29 = vor.u32 %v6417_v18, %v5654_v16  ;;  %v6415_v36 = vld [vmem:[%s7482_s25 + $0x314] sm:$0xf0] }
 0x197   : > { %4326 = vmatpush.bf16.msrb.mxu3 %v5751_v40  ;;  %v5526_v30 = vld [vmem:[%s7482_s25 + $0x220] sm:$0xf]  ;;  %v6385_v31 = vld [vmem:[%s7482_s25 + $0x224] sm:$0xf0]  ;;  %v5591_v33 = vor.u32 %v6401_v24, %v5590_v21  ;;  %v5582_v37 = vld [vmem:[%s7482_s25 + $0x290] sm:$0xf]  ;;  %v5647_v42 = vor.u32 %v6415_v36, %v5646_v35 }
 0x198   : > { %4270 = vmatpush.bf16.msrb.mxu0 %v5551_v51  ;;  %v5718_v32 = vld [vmem:[%s7482_s25 + $0x3a0] sm:$0xf]  ;;  %v6433_v34 = vld [vmem:[%s7482_s25 + $0x3a4] sm:$0xf0]  ;;  %v6399_v38 = vld [vmem:[%s7482_s25 + $0x294] sm:$0xf0]  ;;  %v5527_v39 = vor.u32 %v6385_v31, %v5526_v30 }
 0x199   : > { %4289 = vmatpush.bf16.msrb.mxu1 %v5615_v45  ;;  %v5518_v40 = vld [vmem:[%s7482_s25 + $0x210] sm:$0xf]  ;;  %v6383_v43 = vld [vmem:[%s7482_s25 + $0x214] sm:$0xf0]  ;;  %v5583_v46 = vor.u32 %v6399_v38, %v5582_v37  ;;  %v5638_v47 = vld [vmem:[%s7482_s25 + $0x300] sm:$0xf] }
 0x19a   : > { %4308 = vmatpush.bf16.msrb.mxu2 %v5679_v41  ;;  %v5719_v41 = vor.u32 %v6433_v34, %v5718_v32  ;;  %v5710_v44 = vld [vmem:[%s7482_s25 + $0x390] sm:$0xf]  ;;  %v6431_v45 = vld [vmem:[%s7482_s25 + $0x394] sm:$0xf0]  ;;  %v6413_v48 = vld [vmem:[%s7482_s25 + $0x304] sm:$0xf0]  ;;  %v5519_v53 = vor.u32 %v6383_v43, %v5518_v40 }
 0x19b   : > { %4327 = vmatpush.bf16.msrb.mxu3 %v5743_v55  ;;  %v5574_v49 = vld [vmem:[%s7482_s25 + $0x280] sm:$0xf]  ;;  %v6397_v50 = vld [vmem:[%s7482_s25 + $0x284] sm:$0xf0]  ;;  %v5950_v51 = vld [vmem:[%s7482_s25 + $0x570] sm:$0xf]  ;;  %v5711_v57 = vor.u32 %v6431_v45, %v5710_v44  ;;  %v5639_v58 = vor.u32 %v6413_v48, %v5638_v47 }
 0x19c   : > { %4271 = vmatpush.bf16.msrb.mxu0 %v5543_v4  ;;  %v6491_v52 = vld [vmem:[%s7482_s25 + $0x574] sm:$0xf0]  ;;  %v5510_v54 = vld [vmem:[%s7482_s25 + $0x200] sm:$0xf]  ;;  %v5886_v55 = vld [vmem:[%s7482_s25 + $0x4f0] sm:$0xf]  ;;  %v5575_v62 = vor.u32 %v6397_v50, %v5574_v49 }
 0x19d   : > { %4290 = vmatpush.bf16.msrb.mxu1 %v5607_v60  ;;  %v6381_v59 = vld [vmem:[%s7482_s25 + $0x204] sm:$0xf0]  ;;  %v5702_v60 = vld [vmem:[%s7482_s25 + $0x380] sm:$0xf]  ;;  %v5142_v63 = vld [vmem:[%s7480_s1 + $0x10] sm:$0xf]  ;;  %v5951_v3 = vor.u32 %v6491_v52, %v5950_v51 }
 0x19e   : > { %4309 = vmatpush.bf16.msrb.mxu2 %v5671_v56  ;;  %v6475_v56 = vld [vmem:[%s7482_s25 + $0x4f4] sm:$0xf0]  ;;  %v6429_v61 = vld [vmem:[%s7482_s25 + $0x384] sm:$0xf0]  ;;  %v6294_v0 = vld [vmem:[%s7480_s1 + $0x4c] sm:$0xf0]  ;;  %v5511_v11 = vor.u32 %v6381_v59, %v5510_v54 }
 0x19f   : > { %4328 = vmatpush.bf16.msrb.mxu3 %v5735_v8  ;;  %4205 = vmatmul.bf16.gmra.mxu0 %v7618_v13  ;;  %v6286_v1 = vld [vmem:[%s7480_s1 + $0x14] sm:$0xf]  ;;  %v5822_v4 = vld [vmem:[%s7482_s25 + $0x470] sm:$0xf]  ;;  %v6459_v5 = vld [vmem:[%s7482_s25 + $0x474] sm:$0xf0]  ;;  %v5887_v7 = vor.u32 %v6475_v56, %v5886_v55  ;;  %v5703_v16 = vor.u32 %v6429_v61, %v5702_v60 }
 0x1a0   : > { %4224 = vmatmul.bf16.gmra.mxu1 %v7623_v19  ;;  %4272 = vmatpush.bf16.msrb.mxu0 %v5535_v27  ;;  %v5144_v2 = vld [vmem:[%s7480_s1 + $0x50] sm:$0xf0]  ;;  %v6014_v6 = vld [vmem:[%s7482_s25 + $0x5f0] sm:$0xf]  ;;  %v6507_v8 = vld [vmem:[%s7482_s25 + $0x5f4] sm:$0xf0]  ;;  %v5823_v21 = vor.u32 %v6459_v5, %v5822_v4 }
 0x1a1   : > { %4291 = vmatpush.bf16.msrb.mxu1 %v5599_v14  ;;  %4243 = vmatmul.bf16.gmra.mxu2 %v7625_v20  ;;  %v6489_v10 = vld [vmem:[%s7482_s25 + $0x564] sm:$0xf0]  ;;  %v5150_v12 = vld [vmem:[%s7480_s1 + $0x18] sm:$0xf]  ;;  %v6287_v15 = vld [vmem:[%s7480_s1 + $0x1c] sm:$0xf]  ;;  %v7680_v34 = vor.u32 %v6286_v1, %v5144_v2 }
 0x1a2   : > { %4310 = vmatpush.bf16.msrb.mxu2 %v5663_v9  ;;  %4262 = vmatmul.bf16.gmra.mxu3 %v7629_v25  ;;  %v5942_v9 = vld [vmem:[%s7482_s25 + $0x560] sm:$0xf]  ;;  %v6295_v14 = vld [vmem:[%s7480_s1 + $0x54] sm:$0xf0]  ;;  %v5152_v18 = vld [vmem:[%s7480_s1 + $0x58] sm:$0xf0] }
 0x1a3   : > { %4329 = vmatpush.bf16.msrb.mxu3 %v5727_v28  ;;  %v5814_v24 = vld [vmem:[%s7482_s25 + $0x460] sm:$0xf]  ;;  %v6457_v27 = vld [vmem:[%s7482_s25 + $0x464] sm:$0xf0]  ;;  %v6015_v28 = vor.u32 %v6507_v8, %v6014_v6  ;;  %v5934_v36 = vld [vmem:[%s7482_s25 + $0x550] sm:$0xf]  ;;  %v7685_v38 = vor.u32 %v6295_v14, %v5150_v12 }
 0x1a4   : > { %4273 = vmatpush.bf16.msrb.mxu0 %v5527_v39  ;;  %v5878_v30 = vld [vmem:[%s7482_s25 + $0x4e0] sm:$0xf]  ;;  %v6473_v31 = vld [vmem:[%s7482_s25 + $0x4e4] sm:$0xf0]  ;;  %v6487_v37 = vld [vmem:[%s7482_s25 + $0x554] sm:$0xf0]  ;;  %v7687_v39 = vor.u32 %v6287_v15, %v5152_v18  ;;  %v5815_v40 = vor.u32 %v6457_v27, %v5814_v24 }
 0x1a5   : > { %4292 = vmatpush.bf16.msrb.mxu1 %v5591_v33  ;;  %v6006_v32 = vld [vmem:[%s7482_s25 + $0x5e0] sm:$0xf]  ;;  %v7678_v33 = vor.u32 %v6294_v0, %v5142_v63  ;;  %v6505_v35 = vld [vmem:[%s7482_s25 + $0x5e4] sm:$0xf0]  ;;  %v6455_v43 = vld [vmem:[%s7482_s25 + $0x454] sm:$0xf0]  ;;  %v5935_v45 = vor.u32 %v6487_v37, %v5934_v36 }
 0x1a6   : > { %4311 = vmatpush.bf16.msrb.mxu2 %v5655_v29  ;;  %v5943_v29 = vor.u32 %v6489_v10, %v5942_v9  ;;  %v6007_v44 = vor.u32 %v6505_v35, %v6006_v32  ;;  %v6471_v47 = vld [vmem:[%s7482_s25 + $0x4d4] sm:$0xf0]  ;;  %v5998_v48 = vld [vmem:[%s7482_s25 + $0x5d0] sm:$0xf]  ;;  %v5926_v50 = vld [vmem:[%s7482_s25 + $0x540] sm:$0xf] }
 0x1a7   : > { %4330 = vmatpush.bf16.msrb.mxu3 %v5719_v41  ;;  %v5879_v41 = vor.u32 %v6473_v31, %v5878_v30  ;;  %v6503_v49 = vld [vmem:[%s7482_s25 + $0x5d4] sm:$0xf0]  ;;  %v6485_v51 = vld [vmem:[%s7482_s25 + $0x544] sm:$0xf0]  ;;  %v5798_v54 = vld [vmem:[%s7482_s25 + $0x440] sm:$0xf] }
 0x1a8   : > { %4274 = vmatpush.bf16.msrb.mxu0 %v5519_v53  ;;  %v6453_v55 = vld [vmem:[%s7482_s25 + $0x444] sm:$0xf0]  ;;  %v5999_v56 = vor.u32 %v6503_v49, %v5998_v48  ;;  %v5990_v60 = vld [vmem:[%s7482_s25 + $0x5c0] sm:$0xf]  ;;  %v6483_v63 = vld [vmem:[%s7482_s25 + $0x534] sm:$0xf0] }
 0x1a9   : > { %4293 = vmatpush.bf16.msrb.mxu1 %v5583_v46  ;;  %v5870_v46 = vld [vmem:[%s7482_s25 + $0x4d0] sm:$0xf]  ;;  %v6469_v59 = vld [vmem:[%s7482_s25 + $0x4c4] sm:$0xf0]  ;;  %v5799_v0 = vor.u32 %v6453_v55, %v5798_v54  ;;  %v5208_v8 = vld [vmem:[%s7480_s1 + $0xd0] sm:$0xf0] }
 0x1aa   : > { %4312 = vmatpush.bf16.msrb.mxu2 %v5647_v42  ;;  %v5806_v42 = vld [vmem:[%s7482_s25 + $0x450] sm:$0xf]  ;;  %v5871_v53 = vor.u32 %v6471_v47, %v5870_v46  ;;  %v6501_v61 = vld [vmem:[%s7482_s25 + $0x5c4] sm:$0xf0]  ;;  %v6499_v14 = vld [vmem:[%s7482_s25 + $0x5b4] sm:$0xf0] }
 0x1ab   : > { %4331 = vmatpush.bf16.msrb.mxu3 %v5711_v57  ;;  %v5807_v52 = vor.u32 %v6455_v43, %v5806_v42  ;;  %v5927_v57 = vor.u32 %v6485_v51, %v5926_v50  ;;  %v5790_v2 = vld [vmem:[%s7482_s25 + $0x430] sm:$0xf]  ;;  %v5991_v4 = vor.u32 %v6501_v61, %v5990_v60  ;;  %v5910_v15 = vld [vmem:[%s7482_s25 + $0x520] sm:$0xf]  ;;  %v5214_v18 = vld [vmem:[%s7480_s1 + $0x98] sm:$0xf] }
 0x1ac   : > { %4275 = vmatpush.bf16.msrb.mxu0 %v5511_v11  ;;  %v5206_v5 = vld [vmem:[%s7480_s1 + $0x90] sm:$0xf]  ;;  %v6467_v11 = vld [vmem:[%s7482_s25 + $0x4b4] sm:$0xf0]  ;;  %v6303_v24 = vld [vmem:[%s7480_s1 + $0x9c] sm:$0xf] }
 0x1ad   : > { %4294 = vmatpush.bf16.msrb.mxu1 %v5575_v62  ;;  %v5918_v62 = vld [vmem:[%s7482_s25 + $0x530] sm:$0xf]  ;;  %v5216_v27 = vld [vmem:[%s7480_s1 + $0xd8] sm:$0xf0]  ;;  %v5782_v30 = vld [vmem:[%s7482_s25 + $0x420] sm:$0xf] }
 0x1ae   : > { %4313 = vmatpush.bf16.msrb.mxu2 %v5639_v58  ;;  %v5862_v58 = vld [vmem:[%s7482_s25 + $0x4c0] sm:$0xf]  ;;  %v6310_v6 = vld [vmem:[%s7480_s1 + $0xcc] sm:$0xf0]  ;;  %v5919_v9 = vor.u32 %v6483_v63, %v5918_v62  ;;  %v6449_v31 = vld [vmem:[%s7482_s25 + $0x424] sm:$0xf0]  ;;  %v7739_v47 = vor.u32 %v6303_v24, %v5216_v27 }
 0x1af   : > { %4332 = vmatpush.bf16.msrb.mxu3 %v5703_v16  ;;  %4276 = vmatmul.bf16.vlgmr.msrb.gmra.mxu0 %v7678_v33  ;;  %v5863_v1 = vor.u32 %v6469_v59, %v5862_v58  ;;  %v5854_v10 = vld [vmem:[%s7482_s25 + $0x4b0] sm:$0xf]  ;;  %v6481_v16 = vld [vmem:[%s7482_s25 + $0x524] sm:$0xf0]  ;;  %v5846_v36 = vld [vmem:[%s7482_s25 + $0x4a0] sm:$0xf]  ;;  %v5783_v48 = vor.u32 %v6449_v31, %v5782_v30 }
 0x1b0   : > { %4344 = vmatpush.bf16.msra.mxu0 %v5823_v21  ;;  %4295 = vmatmul.bf16.vlgmr.msrb.gmra.mxu1 %v7680_v34  ;;  %v5982_v12 = vld [vmem:[%s7482_s25 + $0x5b0] sm:$0xf]  ;;  %v6311_v21 = vld [vmem:[%s7480_s1 + $0xd4] sm:$0xf0]  ;;  %v5911_v35 = vor.u32 %v6481_v16, %v5910_v15  ;;  %v6465_v37 = vld [vmem:[%s7482_s25 + $0x4a4] sm:$0xf0] }
 0x1b1   : > { %4363 = vmatpush.bf16.msra.mxu1 %v5887_v7  ;;  %4314 = vmatmul.bf16.vlgmr.msrb.gmra.mxu2 %v7685_v38  ;;  %v6302_v7 = vld [vmem:[%s7480_s1 + $0x94] sm:$0xf]  ;;  %v5983_v32 = vor.u32 %v6499_v14, %v5982_v12  ;;  %v6497_v43 = vld [vmem:[%s7482_s25 + $0x5a4] sm:$0xf0]  ;;  %v7737_v46 = vor.u32 %v6311_v21, %v5214_v18  ;;  %v5847_v49 = vor.u32 %v6465_v37, %v5846_v36  ;;  %v5774_v50 = vld [vmem:[%s7482_s25 + $0x410] sm:$0xf] }
 0x1b2   : > { %4382 = vmatpush.bf16.msra.mxu2 %v5951_v3  ;;  %4333 = vmatmul.bf16.vlgmr.msrb.gmra.mxu3 %v7687_v39  ;;  %v6451_v3 = vld [vmem:[%s7482_s25 + $0x434] sm:$0xf0]  ;;  %v7732_v42 = vor.u32 %v6302_v7, %v5208_v8  ;;  %v5838_v54 = vld [vmem:[%s7482_s25 + $0x490] sm:$0xf]  ;;  %v5894_v58 = vld [vmem:[%s7482_s25 + $0x500] sm:$0xf] }
 0x1b3   : > { %4401 = vmatpush.bf16.msra.mxu3 %v6015_v28  ;;  %v5791_v28 = vor.u32 %v6451_v3, %v5790_v2  ;;  %v6447_v51 = vld [vmem:[%s7482_s25 + $0x414] sm:$0xf0]  ;;  %v6477_v59 = vld [vmem:[%s7482_s25 + $0x504] sm:$0xf0]  ;;  %v6206_v60 = vld [vmem:[%s7482_s25 + $0x770] sm:$0xf] }
 0x1b4   : > { %4345 = vmatpush.bf16.msra.mxu0 %v5815_v40  ;;  %v5974_v40 = vld [vmem:[%s7482_s25 + $0x5a0] sm:$0xf]  ;;  %v6463_v55 = vld [vmem:[%s7482_s25 + $0x494] sm:$0xf0]  ;;  %v5775_v62 = vor.u32 %v6447_v51, %v5774_v50  ;;  %v6493_v7 = vld [vmem:[%s7482_s25 + $0x584] sm:$0xf0] }
 0x1b5   : > { %4364 = vmatpush.bf16.msra.mxu1 %v5879_v41  ;;  %v7730_v41 = vor.u32 %v6310_v6, %v5206_v5  ;;  %v6555_v61 = vld [vmem:[%s7482_s25 + $0x774] sm:$0xf0]  ;;  %v5839_v63 = vor.u32 %v6463_v55, %v5838_v54  ;;  %v5830_v2 = vld [vmem:[%s7482_s25 + $0x480] sm:$0xf]  ;;  %v6461_v5 = vld [vmem:[%s7482_s25 + $0x484] sm:$0xf0] }
 0x1b6   : > { %4383 = vmatpush.bf16.msra.mxu2 %v5943_v29  ;;  %v5855_v29 = vor.u32 %v6467_v11, %v5854_v10  ;;  %v5958_v6 = vld [vmem:[%s7482_s25 + $0x580] sm:$0xf]  ;;  %v6207_v8 = vor.u32 %v6555_v61, %v6206_v60  ;;  %v6523_v10 = vld [vmem:[%s7482_s25 + $0x674] sm:$0xf0]  ;;  %v6142_v11 = vld [vmem:[%s7482_s25 + $0x6f0] sm:$0xf]  ;;  %v5831_v18 = vor.u32 %v6461_v5, %v5830_v2 }
 0x1b7   : > { %4402 = vmatpush.bf16.msra.mxu3 %v6007_v44  ;;  %v5902_v44 = vld [vmem:[%s7482_s25 + $0x510] sm:$0xf]  ;;  %v6539_v12 = vld [vmem:[%s7482_s25 + $0x6f4] sm:$0xf0]  ;;  %v6198_v21 = vld [vmem:[%s7482_s25 + $0x760] sm:$0xf]  ;;  %v5959_v27 = vor.u32 %v6493_v7, %v5958_v6 }
 0x1b8   : > { %4346 = vmatpush.bf16.msra.mxu0 %v5807_v52  ;;  %v5975_v52 = vor.u32 %v6497_v43, %v5974_v40  ;;  %v6270_v14 = vld [vmem:[%s7482_s25 + $0x7f0] sm:$0xf]  ;;  %v6571_v15 = vld [vmem:[%s7482_s25 + $0x7f4] sm:$0xf0]  ;;  %v6553_v24 = vld [vmem:[%s7482_s25 + $0x764] sm:$0xf0] }
 0x1b9   : > { %4365 = vmatpush.bf16.msra.mxu1 %v5871_v53  ;;  %v6288_v30 = vld [vmem:[%s7480_s1 + $0x24] sm:$0xf]  ;;  %v6271_v36 = vor.u32 %v6571_v15, %v6270_v14  ;;  %v6070_v37 = vld [vmem:[%s7482_s25 + $0x660] sm:$0xf]  ;;  %v6521_v40 = vld [vmem:[%s7482_s25 + $0x664] sm:$0xf0] }
 0x1ba   : > { %4384 = vmatpush.bf16.msra.mxu2 %v5935_v45  ;;  %v6479_v45 = vld [vmem:[%s7482_s25 + $0x514] sm:$0xf0]  ;;  %v5166_v43 = vld [vmem:[%s7480_s1 + $0x28] sm:$0xf]  ;;  %v6134_v50 = vld [vmem:[%s7482_s25 + $0x6e0] sm:$0xf] }
 0x1bb   : > { %4403 = vmatpush.bf16.msra.mxu3 %v5999_v56  ;;  %v5903_v53 = vor.u32 %v6479_v45, %v5902_v44  ;;  %v5966_v56 = vld [vmem:[%s7482_s25 + $0x590] sm:$0xf]  ;;  %v6297_v44 = vld [vmem:[%s7480_s1 + $0x64] sm:$0xf0]  ;;  %v6289_v45 = vld [vmem:[%s7480_s1 + $0x2c] sm:$0xf] }
 0x1bc   : > { %4347 = vmatpush.bf16.msra.mxu0 %v5799_v0  ;;  %v5766_v0 = vld [vmem:[%s7482_s25 + $0x400] sm:$0xf]  ;;  %v6537_v51 = vld [vmem:[%s7482_s25 + $0x6e4] sm:$0xf0]  ;;  %v6190_v55 = vld [vmem:[%s7482_s25 + $0x750] sm:$0xf]  ;;  %v7791_v61 = vor.u32 %v6297_v44, %v5166_v43 }
 0x1bd   : > { %4366 = vmatpush.bf16.msra.mxu1 %v5863_v1  ;;  %v6445_v1 = vld [vmem:[%s7482_s25 + $0x404] sm:$0xf0]  ;;  %v6519_v60 = vld [vmem:[%s7482_s25 + $0x654] sm:$0xf0]  ;;  %v6254_v5 = vld [vmem:[%s7482_s25 + $0x7d0] sm:$0xf] }
 0x1be   : > { %4385 = vmatpush.bf16.msra.mxu2 %v5927_v57  ;;  %v6495_v57 = vld [vmem:[%s7482_s25 + $0x594] sm:$0xf0]  ;;  %v5767_v16 = vor.u32 %v6445_v1, %v5766_v0  ;;  %v6569_v54 = vld [vmem:[%s7482_s25 + $0x7e4] sm:$0xf0]  ;;  %v6126_v1 = vld [vmem:[%s7482_s25 + $0x6d0] sm:$0xf] }
 0x1bf   : > { %4404 = vmatpush.bf16.msra.mxu3 %v5991_v4  ;;  %4281 = vmatmul.bf16.gmra.mxu0 %v7730_v41  ;;  %v5967_v3 = vor.u32 %v6495_v57, %v5966_v56  ;;  %v5895_v4 = vor.u32 %v6477_v59, %v5894_v58  ;;  %v6551_v58 = vld [vmem:[%s7482_s25 + $0x754] sm:$0xf0]  ;;  %v6062_v59 = vld [vmem:[%s7482_s25 + $0x650] sm:$0xf]  ;;  %v6182_v7 = vld [vmem:[%s7482_s25 + $0x740] sm:$0xf] }
 0x1c0   : > { %4348 = vmatpush.bf16.msra.mxu0 %v5791_v28  ;;  %4300 = vmatmul.bf16.gmra.mxu1 %v7732_v42  ;;  %v5158_v28 = vld [vmem:[%s7480_s1 + $0x20] sm:$0xf]  ;;  %v6535_v2 = vld [vmem:[%s7482_s25 + $0x6d4] sm:$0xf0]  ;;  %v6533_v15 = vld [vmem:[%s7482_s25 + $0x6c4] sm:$0xf0] }
 0x1c1   : > { %4367 = vmatpush.bf16.msra.mxu1 %v5855_v29  ;;  %4319 = vmatmul.bf16.gmra.mxu2 %v7737_v46  ;;  %v6296_v29 = vld [vmem:[%s7480_s1 + $0x5c] sm:$0xf0]  ;;  %v6567_v6 = vld [vmem:[%s7482_s25 + $0x7d4] sm:$0xf0]  ;;  %v6304_v43 = vld [vmem:[%s7480_s1 + $0xa4] sm:$0xf] }
 0x1c2   : > { %4386 = vmatpush.bf16.msra.mxu2 %v5919_v9  ;;  %4338 = vmatmul.bf16.gmra.mxu3 %v7739_v47  ;;  %v6078_v9 = vld [vmem:[%s7482_s25 + $0x670] sm:$0xf]  ;;  %v7784_v56 = vor.u32 %v6296_v29, %v5158_v28  ;;  %v6118_v14 = vld [vmem:[%s7482_s25 + $0x6c0] sm:$0xf]  ;;  %v6547_v28 = vld [vmem:[%s7482_s25 + $0x734] sm:$0xf0] }
 0x1c3   : > { %4405 = vmatpush.bf16.msra.mxu3 %v5983_v32  ;;  %v6079_v31 = vor.u32 %v6523_v10, %v6078_v9  ;;  %v5160_v32 = vld [vmem:[%s7480_s1 + $0x60] sm:$0xf0]  ;;  %v6054_v9 = vld [vmem:[%s7482_s25 + $0x640] sm:$0xf]  ;;  %v6517_v10 = vld [vmem:[%s7482_s25 + $0x644] sm:$0xf0] }
 0x1c4   : > { %4349 = vmatpush.bf16.msra.mxu0 %v5783_v48  ;;  %v6199_v48 = vor.u32 %v6553_v24, %v6198_v21  ;;  %v7786_v57 = vor.u32 %v6288_v30, %v5160_v32  ;;  %v6246_v21 = vld [vmem:[%s7482_s25 + $0x7c0] sm:$0xf]  ;;  %v6565_v24 = vld [vmem:[%s7482_s25 + $0x7c4] sm:$0xf0]  ;;  %v6046_v29 = vld [vmem:[%s7482_s25 + $0x630] sm:$0xf] }
 0x1c5   : > { %4368 = vmatpush.bf16.msra.mxu1 %v5847_v49  ;;  %v5168_v49 = vld [vmem:[%s7480_s1 + $0x68] sm:$0xf0]  ;;  %v6515_v30 = vld [vmem:[%s7482_s25 + $0x634] sm:$0xf0]  ;;  %v6247_v32 = vor.u32 %v6565_v24, %v6246_v21  ;;  %v5224_v44 = vld [vmem:[%s7480_s1 + $0xe0] sm:$0xf0] }
 0x1c6   : > { %4387 = vmatpush.bf16.msra.mxu2 %v5911_v35  ;;  %v6143_v35 = vor.u32 %v6539_v12, %v6142_v11  ;;  %v6127_v11 = vor.u32 %v6535_v2, %v6126_v1  ;;  %v6255_v12 = vor.u32 %v6567_v6, %v6254_v5  ;;  %v6102_v1 = vld [vmem:[%s7482_s25 + $0x6a0] sm:$0xf]  ;;  %v6529_v2 = vld [vmem:[%s7482_s25 + $0x6a4] sm:$0xf0]  ;;  %v6094_v21 = vld [vmem:[%s7482_s25 + $0x690] sm:$0xf] }
 0x1c7   : > { %4406 = vmatpush.bf16.msra.mxu3 %v5975_v52  ;;  %v6071_v52 = vor.u32 %v6521_v40, %v6070_v37  ;;  %v5222_v37 = vld [vmem:[%s7480_s1 + $0xa0] sm:$0xf]  ;;  %v6561_v6 = vld [vmem:[%s7482_s25 + $0x7a4] sm:$0xf0]  ;;  %v6527_v24 = vld [vmem:[%s7482_s25 + $0x694] sm:$0xf0] }
 0x1c8   : > { %4350 = vmatpush.bf16.msra.mxu0 %v5775_v62  ;;  %v7793_v62 = vor.u32 %v6289_v45, %v5168_v49  ;;  %v6312_v40 = vld [vmem:[%s7480_s1 + $0xdc] sm:$0xf0]  ;;  %v6238_v49 = vld [vmem:[%s7482_s25 + $0x7b0] sm:$0xf]  ;;  %p6276_p5 = scmp.ne.s32.totalorder %s6732_s18, 1 }
 0x1c9   : > { %4369 = vmatpush.bf16.msra.mxu1 %v5839_v63  ;;  %v6135_v63 = vor.u32 %v6537_v51, %v6134_v50  ;;  %v6563_v50 = vld [vmem:[%s7482_s25 + $0x7b4] sm:$0xf0]  ;;  %v6166_v51 = vld [vmem:[%s7482_s25 + $0x720] sm:$0xf] }
 0x1ca   : > { %4388 = vmatpush.bf16.msra.mxu2 %v5903_v53  ;;  %v6262_v53 = vld [vmem:[%s7482_s25 + $0x7e0] sm:$0xf] }
 0x1cb   : > { %4407 = vmatpush.bf16.msra.mxu3 %v5967_v3  ;;  %v6263_v0 = vor.u32 %v6569_v54, %v6262_v53  ;;  %v6191_v3 = vor.u32 %v6551_v58, %v6190_v55  ;;  %v6038_v53 = vld [vmem:[%s7482_s25 + $0x620] sm:$0xf]  ;;  %v6513_v54 = vld [vmem:[%s7482_s25 + $0x624] sm:$0xf0] }
 0x1cc   : > { %4351 = vmatpush.bf16.msra.mxu0 %v5767_v16  ;;  %v5230_v55 = vld [vmem:[%s7480_s1 + $0xa8] sm:$0xf]  ;;  %v6230_v5 = vld [vmem:[%s7482_s25 + $0x7a0] sm:$0xf] }
 0x1cd   : > { %4370 = vmatpush.bf16.msra.mxu1 %v5831_v18  ;;  %v6055_v18 = vor.u32 %v6517_v10, %v6054_v9  ;;  %v6313_v58 = vld [vmem:[%s7480_s1 + $0xe4] sm:$0xf0]  ;;  %v7838_v9 = vor.u32 %v6304_v43, %v5224_v44  ;;  %v6543_v10 = vld [vmem:[%s7482_s25 + $0x714] sm:$0xf0]  ;;  %v6330_v43 = vld [vmem:[%s7482_s25 + $0x74] sm:$0xf] }
 0x1ce   : > { %4389 = vmatpush.bf16.msra.mxu2 %v5895_v4  ;;  %v6063_v4 = vor.u32 %v6519_v60, %v6062_v59  ;;  %v6305_v59 = vld [vmem:[%s7480_s1 + $0xac] sm:$0xf]  ;;  %v5312_v44 = vld [vmem:[%s7482_s25 + $0x78] sm:$0xf0] }
 0x1cf   : > { %4408 = vmatpush.bf16.msra.mxu3 %v5959_v27  ;;  %4352 = vmatmul.bf16.vlgmr.msra.gmra.mxu0 %v7784_v56  ;;  %v6174_v27 = vld [vmem:[%s7482_s25 + $0x730] sm:$0xf]  ;;  %v5232_v60 = vld [vmem:[%s7480_s1 + $0xe8] sm:$0xf0] }
 0x1d0   : > { %4420 = vmatpush.bf16.msrb.mxu0 %v6079_v31  ;;  %4371 = vmatmul.bf16.vlgmr.msra.gmra.mxu1 %v7786_v57  ;;  %v6119_v31 = vor.u32 %v6533_v15, %v6118_v14  ;;  %v6175_v45 = vor.u32 %v6547_v28, %v6174_v27  ;;  %v7843_v14 = vor.u32 %v6313_v58, %v5230_v55  ;;  %v6222_v27 = vld [vmem:[%s7482_s25 + $0x790] sm:$0xf]  ;;  %v6346_v55 = vld [vmem:[%s7482_s25 + $0xf4] sm:$0xf]  ;;  %v5376_v58 = vld [vmem:[%s7482_s25 + $0xf8] sm:$0xf0] }
 0x1d1   : > { %4439 = vmatpush.bf16.msrb.mxu1 %v6143_v35  ;;  %4390 = vmatmul.bf16.vlgmr.msra.gmra.mxu2 %v7791_v61  ;;  %v6110_v35 = vld [vmem:[%s7482_s25 + $0x6b0] sm:$0xf]  ;;  %v7845_v15 = vor.u32 %v6305_v59, %v5232_v60  ;;  %v5315_v60 = vor.u32 %v6330_v43, %v5312_v44 }
 0x1d2   : > { %4458 = vmatpush.bf16.msrb.mxu2 %v6207_v8  ;;  %v6549_v8 = vld [vmem:[%s7482_s25 + $0x744] sm:$0xf0]  ;;  %4409 = vmatmul.bf16.vlgmr.msra.gmra.mxu3 %v7793_v62 }
 0x1d3   : > { %4477 = vmatpush.bf16.msrb.mxu3 %v6271_v36  ;;  %v6183_v16 = vor.u32 %v6549_v8, %v6182_v7  ;;  %v6531_v36 = vld [vmem:[%s7482_s25 + $0x6b4] sm:$0xf0]  ;;  %v6158_v7 = vld [vmem:[%s7482_s25 + $0x710] sm:$0xf]  ;;  %v7836_v8 = vor.u32 %v6312_v40, %v5222_v37  ;;  %v6362_v37 = vld [vmem:[%s7482_s25 + $0x174] sm:$0xf] }
 0x1d4   : > { %4421 = vmatpush.bf16.msrb.mxu0 %v6071_v52  ;;  %v6545_v52 = vld [vmem:[%s7482_s25 + $0x724] sm:$0xf0]  ;;  %v6159_v28 = vor.u32 %v6543_v10, %v6158_v7  ;;  %v5440_v40 = vld [vmem:[%s7482_s25 + $0x178] sm:$0xf0]  ;;  %v5174_v7 = vld [vmem:[%s7480_s1 + $0x30] sm:$0xf] }
 0x1d5   : > { %4440 = vmatpush.bf16.msrb.mxu1 %v6135_v63  ;;  %v6111_v63 = vor.u32 %v6531_v36, %v6110_v35  ;;  %v6022_v35 = vld [vmem:[%s7482_s25 + $0x600] sm:$0xf]  ;;  %v6509_v36 = vld [vmem:[%s7482_s25 + $0x604] sm:$0xf0]  ;;  %v5443_v59 = vor.u32 %v6362_v37, %v5440_v40  ;;  %v6298_v10 = vld [vmem:[%s7480_s1 + $0x6c] sm:$0xf0] }
 0x1d6   : > { %4459 = vmatpush.bf16.msrb.mxu2 %v6199_v48  ;;  %v6047_v48 = vor.u32 %v6515_v30, %v6046_v29  ;;  %v6559_v30 = vld [vmem:[%s7482_s25 + $0x794] sm:$0xf0]  ;;  %v6358_v37 = vld [vmem:[%s7482_s25 + $0x154] sm:$0xf]  ;;  %v5424_v40 = vld [vmem:[%s7482_s25 + $0x158] sm:$0xf0] }
 0x1d7   : > { %4478 = vmatpush.bf16.msrb.mxu3 %v6263_v0  ;;  %v6239_v0 = vor.u32 %v6563_v50, %v6238_v49  ;;  %v6086_v49 = vld [vmem:[%s7482_s25 + $0x680] sm:$0xf]  ;;  %v6525_v50 = vld [vmem:[%s7482_s25 + $0x684] sm:$0xf0] }
 0x1d8   : > { %4422 = vmatpush.bf16.msrb.mxu0 %v6063_v4  ;;  %v6039_v4 = vor.u32 %v6513_v54, %v6038_v53  ;;  %v6023_v53 = vor.u32 %v6509_v36, %v6022_v35  ;;  %v6557_v54 = vld [vmem:[%s7482_s25 + $0x784] sm:$0xf0]  ;;  %v6291_v35 = vld [vmem:[%s7480_s1 + $0x3c] sm:$0xf] }
 0x1d9   : > { %4441 = vmatpush.bf16.msrb.mxu1 %v6127_v11  ;;  %v6030_v11 = vld [vmem:[%s7482_s25 + $0x610] sm:$0xf]  ;;  %v5184_v36 = vld [vmem:[%s7480_s1 + $0x78] sm:$0xf0] }
 0x1da   : > { %4460 = vmatpush.bf16.msrb.mxu2 %v6191_v3  ;;  %v6167_v3 = vor.u32 %v6545_v52, %v6166_v51  ;;  %v6214_v51 = vld [vmem:[%s7482_s25 + $0x780] sm:$0xf] }
 0x1db   : > { %4479 = vmatpush.bf16.msrb.mxu3 %v6255_v12  ;;  %v6511_v12 = vld [vmem:[%s7482_s25 + $0x614] sm:$0xf0] }
 0x1dc   : > { %4423 = vmatpush.bf16.msrb.mxu0 %v6055_v18  ;;  %v6231_v18 = vor.u32 %v6561_v6, %v6230_v5  ;;  %v6031_v29 = vor.u32 %v6511_v12, %v6030_v11  ;;  %v6087_v5 = vor.u32 %v6525_v50, %v6086_v49  ;;  %v6215_v6 = vor.u32 %v6557_v54, %v6214_v51  ;;  %v6290_v11 = vld [vmem:[%s7480_s1 + $0x34] sm:$0xf]  ;;  %v5488_v54 = vld [vmem:[%s7482_s25 + $0x1d8] sm:$0xf0] }
 0x1dd   : > { %4442 = vmatpush.bf16.msrb.mxu1 %v6119_v31  ;;  %v6150_v31 = vld [vmem:[%s7482_s25 + $0x700] sm:$0xf]  ;;  %v5176_v12 = vld [vmem:[%s7480_s1 + $0x70] sm:$0xf0]  ;;  %v7892_v50 = vor.u32 %v6298_v10, %v5174_v7  ;;  %v6372_v7 = vld [vmem:[%s7482_s25 + $0x1c4] sm:$0xf] }
 0x1de   : > { %4461 = vmatpush.bf16.msrb.mxu2 %v6183_v16  ;;  %v6103_v16 = vor.u32 %v6529_v2, %v6102_v1  ;;  %v6360_v1 = vld [vmem:[%s7482_s25 + $0x164] sm:$0xf]  ;;  %v5432_v2 = vld [vmem:[%s7482_s25 + $0x168] sm:$0xf0]  ;;  %v6342_v49 = vld [vmem:[%s7482_s25 + $0xd4] sm:$0xf]  ;;  %v7894_v51 = vor.u32 %v6290_v11, %v5176_v12 }
 0x1df   : > { %4480 = vmatpush.bf16.msrb.mxu3 %v6247_v32  ;;  %v6541_v32 = vld [vmem:[%s7482_s25 + $0x704] sm:$0xf0]  ;;  %4357 = vmatmul.bf16.gmra.mxu0 %v7836_v8  ;;  %v5480_v10 = vld [vmem:[%s7482_s25 + $0x1c8] sm:$0xf0] }
 0x1e0   : > { %4424 = vmatpush.bf16.msrb.mxu0 %v6047_v48  ;;  %4376 = vmatmul.bf16.gmra.mxu1 %v7838_v9  ;;  %v6223_v48 = vor.u32 %v6559_v30, %v6222_v27  ;;  %v6151_v52 = vor.u32 %v6541_v32, %v6150_v31  ;;  %v5496_v30 = vld [vmem:[%s7482_s25 + $0x1e8] sm:$0xf0]  ;;  %v5182_v31 = vld [vmem:[%s7480_s1 + $0x38] sm:$0xf] }
 0x1e1   : > { %4443 = vmatpush.bf16.msrb.mxu1 %v6111_v63  ;;  %4395 = vmatmul.bf16.gmra.mxu2 %v7843_v14  ;;  %v6378_v63 = vld [vmem:[%s7482_s25 + $0x1f4] sm:$0xf]  ;;  %v6299_v32 = vld [vmem:[%s7480_s1 + $0x74] sm:$0xf0] }
 0x1e2   : > { %4462 = vmatpush.bf16.msrb.mxu2 %v6175_v45  ;;  %4414 = vmatmul.bf16.gmra.mxu3 %v7845_v15  ;;  %v6095_v45 = vor.u32 %v6527_v24, %v6094_v21  ;;  %v6344_v21 = vld [vmem:[%s7482_s25 + $0xe4] sm:$0xf]  ;;  %v5435_v24 = vor.u32 %v6360_v1, %v5432_v2 }
 0x1e3   : > { %4481 = vmatpush.bf16.msrb.mxu3 %v6239_v0  ;;  %v5504_v0 = vld [vmem:[%s7482_s25 + $0x1f8] sm:$0xf0] }
 0x1e4   : > { %4425 = vmatpush.bf16.msrb.mxu0 %v6039_v4  ;;  %v5304_v4 = vld [vmem:[%s7482_s25 + $0x68] sm:$0xf0] }
 0x1e5   : > { %4444 = vmatpush.bf16.msrb.mxu1 %v6103_v16  ;;  %v5379_v16 = vor.u32 %v6346_v55, %v5376_v58  ;;  %v7899_v55 = vor.u32 %v6299_v32, %v5182_v31  ;;  %v7901_v58 = vor.u32 %v6291_v35, %v5184_v36  ;;  %v6370_v31 = vld [vmem:[%s7482_s25 + $0x1b4] sm:$0xf]  ;;  %v5472_v32 = vld [vmem:[%s7482_s25 + $0x1b8] sm:$0xf0] }
 0x1e6   : > { %4463 = vmatpush.bf16.msrb.mxu2 %v6167_v3  ;;  %v6328_v3 = vld [vmem:[%s7482_s25 + $0x64] sm:$0xf] }
 0x1e7   : > { %4482 = vmatpush.bf16.msrb.mxu3 %v6231_v18  ;;  %v5507_v18 = vor.u32 %v6378_v63, %v5504_v0  ;;  %v5307_v27 = vor.u32 %v6328_v3, %v5304_v4  ;;  %v6356_v63 = vld [vmem:[%s7482_s25 + $0x144] sm:$0xf]  ;;  %v5416_v0 = vld [vmem:[%s7482_s25 + $0x148] sm:$0xf0] }
 0x1e8   : > { %4426 = vmatpush.bf16.msrb.mxu0 %v6031_v29  ;;  %v6376_v29 = vld [vmem:[%s7482_s25 + $0x1e4] sm:$0xf]  ;;  %v5288_v4 = vld [vmem:[%s7482_s25 + $0x48] sm:$0xf0]  ;;  %v5419_v11 = vor.u32 %v6356_v63, %v5416_v0 }
 0x1e9   : > { %4445 = vmatpush.bf16.msrb.mxu1 %v6095_v45  ;;  %v5499_v44 = vor.u32 %v6376_v29, %v5496_v30  ;;  %v6326_v45 = vld [vmem:[%s7482_s25 + $0x54] sm:$0xf]  ;;  %v6324_v3 = vld [vmem:[%s7482_s25 + $0x44] sm:$0xf]  ;;  %v5344_v30 = vld [vmem:[%s7482_s25 + $0xb8] sm:$0xf0] }
 0x1ea   : > { %4464 = vmatpush.bf16.msrb.mxu2 %v6159_v28  ;;  %v5368_v28 = vld [vmem:[%s7482_s25 + $0xe8] sm:$0xf0]  ;;  %v5291_v12 = vor.u32 %v6324_v3, %v5288_v4  ;;  %v6338_v29 = vld [vmem:[%s7482_s25 + $0xb4] sm:$0xf]  ;;  %v6368_v63 = vld [vmem:[%s7482_s25 + $0x1a4] sm:$0xf] }
 0x1eb   : > { %4483 = vmatpush.bf16.msrb.mxu3 %v6223_v48  ;;  %v5371_v43 = vor.u32 %v6344_v21, %v5368_v28  ;;  %v5296_v48 = vld [vmem:[%s7482_s25 + $0x58] sm:$0xf0]  ;;  %v5464_v0 = vld [vmem:[%s7482_s25 + $0x1a8] sm:$0xf0] }
 0x1ec   : > { %4427 = vmatpush.bf16.msrb.mxu0 %v6023_v53  ;;  %v6374_v53 = vld [vmem:[%s7482_s25 + $0x1d4] sm:$0xf]  ;;  %v5280_v28 = vld [vmem:[%s7482_s25 + $0x38] sm:$0xf0] }
 0x1ed   : > { %4446 = vmatpush.bf16.msrb.mxu1 %v6087_v5  ;;  %v5491_v2 = vor.u32 %v6374_v53, %v5488_v54  ;;  %v6340_v5 = vld [vmem:[%s7482_s25 + $0xc4] sm:$0xf]  ;;  %v5272_v54 = vld [vmem:[%s7482_s25 + $0x28] sm:$0xf0]  ;;  %v6307_v3 = vld [vmem:[%s7480_s1 + $0xbc] sm:$0xf] }
 0x1ee   : > { %4465 = vmatpush.bf16.msrb.mxu2 %v6151_v52  ;;  %v5360_v52 = vld [vmem:[%s7482_s25 + $0xd8] sm:$0xf0]  ;;  %v6320_v53 = vld [vmem:[%s7482_s25 + $0x24] sm:$0xf] }
 0x1ef   : > { %4484 = vmatpush.bf16.msrb.mxu3 %v6215_v6  ;;  %v5363_v1 = vor.u32 %v6342_v49, %v5360_v52  ;;  %4428 = vmatmul.bf16.vlgmr.msrb.gmra.mxu0 %v7892_v50  ;;  %v5352_v6 = vld [vmem:[%s7482_s25 + $0xc8] sm:$0xf0]  ;;  %v5347_v49 = vor.u32 %v6338_v29, %v5344_v30  ;;  %v5475_v52 = vor.u32 %v6370_v31, %v5472_v32  ;;  %v5248_v4 = vld [vmem:[%s7480_s1 + $0xf8] sm:$0xf0]  ;;  %v6366_v29 = vld [vmem:[%s7482_s25 + $0x194] sm:$0xf] }
 0x1f0   : > { %4496 = vmatpush.bf16.msra.mxu0 %v5315_v60  ;;  %v5299_v60 = vor.u32 %v6326_v45, %v5296_v48  ;;  %4447 = vmatmul.bf16.vlgmr.msrb.gmra.mxu1 %v7894_v51  ;;  %v5355_v21 = vor.u32 %v6340_v5, %v5352_v6  ;;  %v6306_v45 = vld [vmem:[%s7480_s1 + $0xb4] sm:$0xf]  ;;  %v5275_v6 = vor.u32 %v6320_v53, %v5272_v54  ;;  %v5456_v30 = vld [vmem:[%s7482_s25 + $0x198] sm:$0xf0]  ;;  %v6364_v53 = vld [vmem:[%s7482_s25 + $0x184] sm:$0xf] }
 0x1f1   : > { %4515 = vmatpush.bf16.msra.mxu1 %v5379_v16  ;;  %4466 = vmatmul.bf16.vlgmr.msrb.gmra.mxu2 %v7899_v55  ;;  %v6354_v16 = vld [vmem:[%s7482_s25 + $0x134] sm:$0xf]  ;;  %v7953_v32 = vor.u32 %v6307_v3, %v5248_v4  ;;  %v5448_v54 = vld [vmem:[%s7482_s25 + $0x188] sm:$0xf0]  ;;  %v5632_v4 = vld [vmem:[%s7482_s25 + $0x2f8] sm:$0xf0] }
 0x1f2   : > { %4534 = vmatpush.bf16.msra.mxu2 %v5443_v59  ;;  %v5427_v59 = vor.u32 %v6358_v37, %v5424_v40  ;;  %4485 = vmatmul.bf16.vlgmr.msrb.gmra.mxu3 %v7901_v58  ;;  %v6352_v37 = vld [vmem:[%s7482_s25 + $0x124] sm:$0xf]  ;;  %v5400_v40 = vld [vmem:[%s7482_s25 + $0x128] sm:$0xf0]  ;;  %v5240_v48 = vld [vmem:[%s7480_s1 + $0xf0] sm:$0xf0] }
 0x1f3   : > { %4553 = vmatpush.bf16.msra.mxu3 %v5507_v18  ;;  %v5408_v18 = vld [vmem:[%s7482_s25 + $0x138] sm:$0xf0]  ;;  %v5403_v5 = vor.u32 %v6352_v37, %v5400_v40  ;;  %v5384_v40 = vld [vmem:[%s7482_s25 + $0x108] sm:$0xf0] }
 0x1f4   : > { %4497 = vmatpush.bf16.msra.mxu0 %v5307_v27  ;;  %v6322_v27 = vld [vmem:[%s7482_s25 + $0x34] sm:$0xf]  ;;  %v5411_v35 = vor.u32 %v6354_v16, %v5408_v18  ;;  %v5264_v18 = vld [vmem:[%s7482_s25 + $0x18] sm:$0xf0] }
 0x1f5   : > { %4516 = vmatpush.bf16.msra.mxu1 %v5371_v43  ;;  %v5283_v36 = vor.u32 %v6322_v27, %v5280_v28  ;;  %v5238_v43 = vld [vmem:[%s7480_s1 + $0xb0] sm:$0xf]  ;;  %v6318_v16 = vld [vmem:[%s7482_s25 + $0x14] sm:$0xf]  ;;  %v7946_v27 = vor.u32 %v6306_v45, %v5240_v48  ;;  %v5328_v28 = vld [vmem:[%s7482_s25 + $0x98] sm:$0xf0]  ;;  %v5459_v48 = vor.u32 %v6366_v29, %v5456_v30 }
 0x1f6   : > { %4535 = vmatpush.bf16.msra.mxu2 %v5435_v24  ;;  %v5483_v24 = vor.u32 %v6372_v7, %v5480_v10  ;;  %v6350_v7 = vld [vmem:[%s7482_s25 + $0x114] sm:$0xf]  ;;  %v5392_v10 = vld [vmem:[%s7482_s25 + $0x118] sm:$0xf0]  ;;  %v5267_v37 = vor.u32 %v6318_v16, %v5264_v18  ;;  %v6424_v16 = vld [vmem:[%s7482_s25 + $0x364] sm:$0xf] }
 0x1f7   : > { %4554 = vmatpush.bf16.msra.mxu3 %v5499_v44  ;;  %v6314_v44 = vld [vmem:[%s7480_s1 + $0xec] sm:$0xf0]  ;;  %v5688_v18 = vld [vmem:[%s7482_s25 + $0x368] sm:$0xf0]  ;;  %v6392_v29 = vld [vmem:[%s7482_s25 + $0x264] sm:$0xf] }
 0x1f8   : > { %4498 = vmatpush.bf16.msra.mxu0 %v5299_v60  ;;  %v5336_v60 = vld [vmem:[%s7482_s25 + $0xa8] sm:$0xf0] }
 0x1f9   : > { %4517 = vmatpush.bf16.msra.mxu1 %v5363_v1  ;;  %v5246_v1 = vld [vmem:[%s7480_s1 + $0xb8] sm:$0xf]  ;;  %v5560_v30 = vld [vmem:[%s7482_s25 + $0x268] sm:$0xf0] }
 0x1fa   : > { %4536 = vmatpush.bf16.msra.mxu2 %v5427_v59  ;;  %v6336_v59 = vld [vmem:[%s7482_s25 + $0xa4] sm:$0xf] }
 0x1fb   : > { %4555 = vmatpush.bf16.msra.mxu3 %v5491_v2  ;;  %v6315_v2 = vld [vmem:[%s7480_s1 + $0xf4] sm:$0xf0] }
 0x1fc   : > { %4499 = vmatpush.bf16.msra.mxu0 %v5291_v12  ;;  %v5467_v12 = vor.u32 %v6368_v63, %v5464_v0  ;;  %v7951_v31 = vor.u32 %v6315_v2, %v5246_v1  ;;  %v6394_v63 = vld [vmem:[%s7482_s25 + $0x274] sm:$0xf]  ;;  %v5568_v0 = vld [vmem:[%s7482_s25 + $0x278] sm:$0xf0] }
 0x1fd   : > { %4518 = vmatpush.bf16.msra.mxu1 %v5355_v21  ;;  %v6334_v21 = vld [vmem:[%s7482_s25 + $0x94] sm:$0xf] }
 0x1fe   : > { %4537 = vmatpush.bf16.msra.mxu2 %v5419_v11  ;;  %v5339_v11 = vor.u32 %v6336_v59, %v5336_v60  ;;  %v5331_v45 = vor.u32 %v6334_v21, %v5328_v28  ;;  %v6426_v59 = vld [vmem:[%s7482_s25 + $0x374] sm:$0xf]  ;;  %v5696_v60 = vld [vmem:[%s7482_s25 + $0x378] sm:$0xf0] }
 0x1ff   : > { %4556 = vmatpush.bf16.msra.mxu3 %v5483_v24  ;;  %v7944_v24 = vor.u32 %v6314_v44, %v5238_v43  ;;  %v6316_v43 = vld [vmem:[%s7482_s25 + $0x4] sm:$0xf]  ;;  %v5256_v44 = vld [vmem:[%s7482_s25 + $0x8] sm:$0xf0]  ;;  %v6410_v1 = vld [vmem:[%s7482_s25 + $0x2f4] sm:$0xf] }
 0x200   : > { %4500 = vmatpush.bf16.msra.mxu0 %v5283_v36  ;;  %v5395_v36 = vor.u32 %v6350_v7, %v5392_v10  ;;  %4452 = vmatmul.bf16.gmra.mxu1 %v7946_v27  ;;  %v5259_v3 = vor.u32 %v6316_v43, %v5256_v44  ;;  %v5451_v10 = vor.u32 %v6364_v53, %v5448_v54  ;;  %v6390_v53 = vld [vmem:[%s7482_s25 + $0x254] sm:$0xf]  ;;  %v5552_v54 = vld [vmem:[%s7482_s25 + $0x258] sm:$0xf0] }
 0x201   : > { %4519 = vmatpush.bf16.msra.mxu1 %v5347_v49  ;;  %v6332_v49 = vld [vmem:[%s7482_s25 + $0x84] sm:$0xf]  ;;  %4433 = vmatmul.bf16.gmra.mxu0 %v7944_v24  ;;  %v5635_v21 = vor.u32 %v6410_v1, %v5632_v4  ;;  %v5691_v43 = vor.u32 %v6424_v16, %v5688_v18  ;;  %v5563_v44 = vor.u32 %v6392_v29, %v5560_v30  ;;  %v5744_v1 = vld [vmem:[%s7482_s25 + $0x3d8] sm:$0xf0]  ;;  %v5544_v16 = vld [vmem:[%s7482_s25 + $0x248] sm:$0xf0] }
 0x202   : > { %4538 = vmatpush.bf16.msra.mxu2 %v5411_v35  ;;  %v6348_v35 = vld [vmem:[%s7482_s25 + $0x104] sm:$0xf]  ;;  %4490 = vmatmul.bf16.gmra.mxu3 %v7953_v32  ;;  %v5736_v29 = vld [vmem:[%s7482_s25 + $0x3c8] sm:$0xf0] }
 0x203   : > { %4557 = vmatpush.bf16.msra.mxu3 %v5475_v52  ;;  %v5320_v52 = vld [vmem:[%s7482_s25 + $0x88] sm:$0xf0]  ;;  %4471 = vmatmul.bf16.gmra.mxu2 %v7951_v31  ;;  %v5387_v2 = vor.u32 %v6348_v35, %v5384_v40  ;;  %v6408_v35 = vld [vmem:[%s7482_s25 + $0x2e4] sm:$0xf] }
 0x204   : > { %4501 = vmatpush.bf16.msra.mxu0 %v5275_v6  ;;  %v5760_v6 = vld [vmem:[%s7482_s25 + $0x3f8] sm:$0xf0]  ;;  %v5323_v7 = vor.u32 %v6332_v49, %v5320_v52  ;;  %v5752_v40 = vld [vmem:[%s7482_s25 + $0x3e8] sm:$0xf0]  ;;  %v6422_v49 = vld [vmem:[%s7482_s25 + $0x354] sm:$0xf] }
 0x205   : > { %4520 = vmatpush.bf16.msra.mxu1 %v5339_v11  ;;  %v5699_v11 = vor.u32 %v6426_v59, %v5696_v60  ;;  %v5680_v52 = vld [vmem:[%s7482_s25 + $0x358] sm:$0xf0]  ;;  %v6406_v59 = vld [vmem:[%s7482_s25 + $0x2d4] sm:$0xf]  ;;  %v6404_v18 = vld [vmem:[%s7482_s25 + $0x2c4] sm:$0xf] }
 0x206   : > { %4539 = vmatpush.bf16.msra.mxu2 %v5403_v5  ;;  %v6442_v5 = vld [vmem:[%s7482_s25 + $0x3f4] sm:$0xf]  ;;  %v5683_v4 = vor.u32 %v6422_v49, %v5680_v52  ;;  %v5600_v49 = vld [vmem:[%s7482_s25 + $0x2b8] sm:$0xf0] }
 0x207   : > { %4558 = vmatpush.bf16.msra.mxu3 %v5467_v12  ;;  %v5571_v12 = vor.u32 %v6394_v63, %v5568_v0  ;;  %v5763_v28 = vor.u32 %v6442_v5, %v5760_v6  ;;  %v5616_v63 = vld [vmem:[%s7482_s25 + $0x2d8] sm:$0xf0]  ;;  %v6438_v0 = vld [vmem:[%s7482_s25 + $0x3d4] sm:$0xf]  ;;  %v5555_v5 = vor.u32 %v6390_v53, %v5552_v54  ;;  %v6420_v6 = vld [vmem:[%s7482_s25 + $0x344] sm:$0xf] }
 0x208   : > { %4502 = vmatpush.bf16.msra.mxu0 %v5267_v37  ;;  %v6440_v37 = vld [vmem:[%s7482_s25 + $0x3e4] sm:$0xf]  ;;  %v6434_v52 = vld [vmem:[%s7482_s25 + $0x3b4] sm:$0xf]  ;;  %v5728_v53 = vld [vmem:[%s7482_s25 + $0x3b8] sm:$0xf0] }
 0x209   : > { %4521 = vmatpush.bf16.msra.mxu1 %v5331_v45 }
 0x20a   : > { %4540 = vmatpush.bf16.msra.mxu2 %v5395_v36  ;;  %v5624_v36 = vld [vmem:[%s7482_s25 + $0x2e8] sm:$0xf0] }
 0x20b   : > { %4559 = vmatpush.bf16.msra.mxu3 %v5459_v48  ;;  %v5627_v45 = vor.u32 %v6408_v35, %v5624_v36  ;;  %v5755_v48 = vor.u32 %v6440_v37, %v5752_v40  ;;  %v5664_v36 = vld [vmem:[%s7482_s25 + $0x338] sm:$0xf0] }
 0x20c   : > { %4503 = vmatpush.bf16.msra.mxu0 %v5259_v3  ;;  %v4201_v60 = vpop.f32.mrf.mxu0 }
 0x20d   : > { %4522 = vmatpush.bf16.msra.mxu1 %v5323_v7  ;;  %v5672_v7 = vld [vmem:[%s7482_s25 + $0x348] sm:$0xf0] }
 0x20e   : > { %4541 = vmatpush.bf16.msra.mxu2 %v5387_v2  ;;  %v4220_v2 = vpop.f32.mrf.mxu1  ;;  %v5675_v30 = vor.u32 %v6420_v6, %v5672_v7  ;;  %v5528_v6 = vld [vmem:[%s7482_s25 + $0x228] sm:$0xf0]  ;;  %v6400_v7 = vld [vmem:[%s7482_s25 + $0x2a4] sm:$0xf] }
 0x20f   : > { %4560 = vmatpush.bf16.msra.mxu3 %v5451_v10  ;;  %v4221_v3 = vadd.f32 %v4220_v2, %v4201_v60  ;;  %v5619_v10 = vor.u32 %v6406_v59, %v5616_v63  ;;  %v5656_v2 = vld [vmem:[%s7482_s25 + $0x328] sm:$0xf0] }
 0x210   : > { %4572 = vmatpush.bf16.msrb.mxu0 %v5571_v12  ;;  %v6388_v12 = vld [vmem:[%s7482_s25 + $0x244] sm:$0xf]  ;;  %4523 = vmatmul.bf16.vlgmr.msra.gmra.mxu1 %v7571_v22 }
 0x211   : > { %4591 = vmatpush.bf16.msrb.mxu1 %v5635_v21  ;;  %4504 = vmatmul.bf16.vlgmr.msra.gmra.mxu0 %v7566_v17  ;;  %v5608_v21 = vld [vmem:[%s7482_s25 + $0x2c8] sm:$0xf0]  ;;  %v5547_v35 = vor.u32 %v6388_v12, %v5544_v16  ;;  %v6418_v17 = vld [vmem:[%s7482_s25 + $0x334] sm:$0xf] }
 0x212   : > { %4610 = vmatpush.bf16.msrb.mxu2 %v5699_v11  ;;  %v5747_v11 = vor.u32 %v6438_v0, %v5744_v1  ;;  %4561 = vmatmul.bf16.vlgmr.msra.gmra.mxu3 %v7577_v26  ;;  %v5611_v37 = vor.u32 %v6404_v18, %v5608_v21  ;;  %v5667_v59 = vor.u32 %v6418_v17, %v5664_v36  ;;  %v6416_v1 = vld [vmem:[%s7482_s25 + $0x324] sm:$0xf]  ;;  %v5720_v12 = vld [vmem:[%s7482_s25 + $0x3a8] sm:$0xf0]  ;;  %v6414_v21 = vld [vmem:[%s7482_s25 + $0x314] sm:$0xf] }
 0x213   : > { %4629 = vmatpush.bf16.msrb.mxu3 %v5763_v28  ;;  %v6436_v28 = vld [vmem:[%s7482_s25 + $0x3c4] sm:$0xf]  ;;  %4542 = vmatmul.bf16.vlgmr.msra.gmra.mxu2 %v7573_v23  ;;  %v6402_v23 = vld [vmem:[%s7482_s25 + $0x2b4] sm:$0xf]  ;;  %v5659_v16 = vor.u32 %v6416_v1, %v5656_v2  ;;  %v5520_v36 = vld [vmem:[%s7482_s25 + $0x218] sm:$0xf0] }
 0x214   : > { %4573 = vmatpush.bf16.msrb.mxu0 %v5563_v44  ;;  %v4239_v22 = vpop.f32.mrf.mxu2  ;;  %v5739_v40 = vor.u32 %v6436_v28, %v5736_v29  ;;  %v5536_v44 = vld [vmem:[%s7482_s25 + $0x238] sm:$0xf0]  ;;  %v6382_v17 = vld [vmem:[%s7482_s25 + $0x214] sm:$0xf] }
 0x215   : > { %4592 = vmatpush.bf16.msrb.mxu1 %v5627_v45  ;;  %v4240_v26 = vadd.f32 %v4239_v22, %v4221_v3  ;;  %v4258_v45 = vpop.f32.mrf.mxu3  ;;  %v5603_v3 = vor.u32 %v6402_v23, %v5600_v49  ;;  %v5648_v28 = vld [vmem:[%s7482_s25 + $0x318] sm:$0xf0]  ;;  %v6398_v22 = vld [vmem:[%s7482_s25 + $0x294] sm:$0xf]  ;;  %v6412_v49 = vld [vmem:[%s7482_s25 + $0x304] sm:$0xf] }
 0x216   : > { %4611 = vmatpush.bf16.msrb.mxu2 %v5691_v43  ;;  %v6386_v43 = vld [vmem:[%s7482_s25 + $0x234] sm:$0xf]  ;;  %v4222_v54 = vpop.f32.mrf.mxu1 }
 0x217   : > { %4630 = vmatpush.bf16.msrb.mxu3 %v5755_v48  ;;  %v4203_v48 = vpop.f32.mrf.mxu0  ;;  %v8011_v60 = vadd.f32 %v4258_v45, %v4240_v26  ;;  %v5539_v0 = vor.u32 %v6386_v43, %v5536_v44  ;;  %v5584_v44 = vld [vmem:[%s7482_s25 + $0x298] sm:$0xf0]  ;;  %v6430_v23 = vld [vmem:[%s7482_s25 + $0x394] sm:$0xf] }
 0x218   : > { %4574 = vmatpush.bf16.msrb.mxu0 %v5555_v5  ;;  %v4223_v63 = vadd.f32 %v4222_v54, %v4203_v48  ;;  %v6384_v5 = vld [vmem:[%s7482_s25 + $0x224] sm:$0xf]  ;;  %v5712_v26 = vld [vmem:[%s7482_s25 + $0x398] sm:$0xf0]  ;;  %v5651_v48 = vor.u32 %v6414_v21, %v5648_v28  ;;  %v5523_v54 = vor.u32 %v6382_v17, %v5520_v36  ;;  %v5587_v1 = vor.u32 %v6398_v22, %v5584_v44  ;;  %v6506_v28 = vld [vmem:[%s7482_s25 + $0x5f4] sm:$0xf] }
 0x219   : > { %4593 = vmatpush.bf16.msrb.mxu1 %v5619_v10  ;;  %v5592_v10 = vld [vmem:[%s7482_s25 + $0x2a8] sm:$0xf0]  ;;  %v5531_v18 = vor.u32 %v6384_v5, %v5528_v6  ;;  %v5715_v2 = vor.u32 %v6430_v23, %v5712_v26  ;;  %v6428_v5 = vld [vmem:[%s7482_s25 + $0x384] sm:$0xf] }
 0x21a   : > { %4612 = vmatpush.bf16.msrb.mxu2 %v5683_v4  ;;  %v5731_v4 = vor.u32 %v6434_v52, %v5728_v53  ;;  %v5704_v6 = vld [vmem:[%s7482_s25 + $0x388] sm:$0xf0]  ;;  %v6456_v26 = vld [vmem:[%s7482_s25 + $0x464] sm:$0xf] }
 0x21b   : > { %4631 = vmatpush.bf16.msrb.mxu3 %v5747_v11  ;;  %v6432_v11 = vld [vmem:[%s7482_s25 + $0x3a4] sm:$0xf] }
 0x21c   : > { %4575 = vmatpush.bf16.msrb.mxu0 %v5547_v35  ;;  %v4241_v29 = vpop.f32.mrf.mxu2  ;;  %v5723_v35 = vor.u32 %v6432_v11, %v5720_v12  ;;  %v6458_v11 = vld [vmem:[%s7482_s25 + $0x474] sm:$0xf]  ;;  %v5824_v12 = vld [vmem:[%s7482_s25 + $0x478] sm:$0xf0] }
 0x21d   : > { %4594 = vmatpush.bf16.msrb.mxu1 %v5611_v37  ;;  %v4242_v37 = vadd.f32 %v4241_v29, %v4223_v63  ;;  %v6380_v63 = vld [vmem:[%s7482_s25 + $0x204] sm:$0xf]  ;;  %v6016_v29 = vld [vmem:[%s7482_s25 + $0x5f8] sm:$0xf0]  ;;  %v5827_v22 = vor.u32 %v6458_v11, %v5824_v12  ;;  %v6470_v11 = vld [vmem:[%s7482_s25 + $0x4d4] sm:$0xf] }
 0x21e   : > { %4613 = vmatpush.bf16.msrb.mxu2 %v5675_v30  ;;  %v5595_v30 = vor.u32 %v6400_v7, %v5592_v10  ;;  %v4225_v45 = vpop.f32.mrf.mxu1  ;;  %v6490_v7 = vld [vmem:[%s7482_s25 + $0x574] sm:$0xf]  ;;  %v5952_v10 = vld [vmem:[%s7482_s25 + $0x578] sm:$0xf0]  ;;  %v6019_v23 = vor.u32 %v6506_v28, %v6016_v29 }
 0x21f   : > { %4632 = vmatpush.bf16.msrb.mxu3 %v5739_v40  ;;  %v4260_v40 = vpop.f32.mrf.mxu3  ;;  %v4206_v43 = vpop.f32.mrf.mxu0  ;;  %v5955_v36 = vor.u32 %v6490_v7, %v5952_v10  ;;  %v6454_v7 = vld [vmem:[%s7482_s25 + $0x454] sm:$0xf]  ;;  %v5808_v10 = vld [vmem:[%s7482_s25 + $0x458] sm:$0xf0] }
 0x220   : > { %4576 = vmatpush.bf16.msrb.mxu0 %v5539_v0  ;;  %v8030_v52 = vadd.f32 %v4260_v40, %v4242_v37  ;;  %v4226_v53 = vadd.f32 %v4225_v45, %v4206_v43  ;;  %v5512_v0 = vld [vmem:[%s7482_s25 + $0x208] sm:$0xf0]  ;;  %4528 = vmatmul.bf16.gmra.mxu1 %v7623_v19  ;;  %v6488_v37 = vld [vmem:[%s7482_s25 + $0x564] sm:$0xf] }
 0x221   : > { %4595 = vmatpush.bf16.msrb.mxu1 %v5603_v3  ;;  %v6396_v3 = vld [vmem:[%s7482_s25 + $0x284] sm:$0xf]  ;;  %4509 = vmatmul.bf16.gmra.mxu0 %v7618_v13  ;;  %v5515_v21 = vor.u32 %v6380_v63, %v5512_v0  ;;  %v5888_v13 = vld [vmem:[%s7482_s25 + $0x4f8] sm:$0xf0]  ;;  %v5944_v40 = vld [vmem:[%s7482_s25 + $0x568] sm:$0xf0] }
 0x222   : > { %4614 = vmatpush.bf16.msrb.mxu2 %v5667_v59  ;;  %v5640_v59 = vld [vmem:[%s7482_s25 + $0x308] sm:$0xf0]  ;;  %4566 = vmatmul.bf16.gmra.mxu3 %v7629_v25  ;;  %v5707_v25 = vor.u32 %v6428_v5, %v5704_v6  ;;  %v5947_v0 = vor.u32 %v6488_v37, %v5944_v40  ;;  %v5936_v5 = vld [vmem:[%s7482_s25 + $0x558] sm:$0xf0]  ;;  %v6468_v40 = vld [vmem:[%s7482_s25 + $0x4c4] sm:$0xf] }
 0x223   : > { %4633 = vmatpush.bf16.msrb.mxu3 %v5731_v4  ;;  %v5576_v4 = vld [vmem:[%s7482_s25 + $0x288] sm:$0xf0]  ;;  %4547 = vmatmul.bf16.gmra.mxu2 %v7625_v20 }
 0x224   : > { %4577 = vmatpush.bf16.msrb.mxu0 %v5531_v18  ;;  %v5643_v18 = vor.u32 %v6412_v49, %v5640_v59  ;;  %v4244_v19 = vpop.f32.mrf.mxu2  ;;  %v5579_v20 = vor.u32 %v6396_v3, %v5576_v4  ;;  %v5816_v45 = vld [vmem:[%s7482_s25 + $0x468] sm:$0xf0]  ;;  %v6504_v59 = vld [vmem:[%s7482_s25 + $0x5e4] sm:$0xf]  ;;  %v6486_v4 = vld [vmem:[%s7482_s25 + $0x554] sm:$0xf] }
 0x225   : > { %4596 = vmatpush.bf16.msrb.mxu1 %v5595_v30  ;;  %v4245_v30 = vadd.f32 %v4244_v19, %v4226_v53  ;;  %v5880_v53 = vld [vmem:[%s7482_s25 + $0x4e8] sm:$0xf0] }
 0x226   : > { %4615 = vmatpush.bf16.msrb.mxu2 %v5659_v16  ;;  %v6474_v16 = vld [vmem:[%s7482_s25 + $0x4f4] sm:$0xf]  ;;  %v4227_v43 = vpop.f32.mrf.mxu1  ;;  %v6008_v63 = vld [vmem:[%s7482_s25 + $0x5e8] sm:$0xf0] }
 0x227   : > { %4634 = vmatpush.bf16.msrb.mxu3 %v5723_v35  ;;  %v4263_v35 = vpop.f32.mrf.mxu3  ;;  %v4208_v17 = vpop.f32.mrf.mxu0  ;;  %v5891_v44 = vor.u32 %v6474_v16, %v5888_v13  ;;  %v6011_v3 = vor.u32 %v6504_v59, %v6008_v63  ;;  %v6000_v13 = vld [vmem:[%s7482_s25 + $0x5d8] sm:$0xf0]  ;;  %v5800_v37 = vld [vmem:[%s7482_s25 + $0x448] sm:$0xf0] }
 0x228   : > { %4578 = vmatpush.bf16.msrb.mxu0 %v5523_v54  ;;  %v8056_v49 = vadd.f32 %v4263_v35, %v4245_v30  ;;  %v4228_v54 = vadd.f32 %v4227_v43, %v4208_v17  ;;  %v6484_v30 = vld [vmem:[%s7482_s25 + $0x544] sm:$0xf]  ;;  %v5928_v35 = vld [vmem:[%s7482_s25 + $0x548] sm:$0xf0]  ;;  %v5792_v59 = vld [vmem:[%s7482_s25 + $0x438] sm:$0xf0] }
 0x229   : > { %4597 = vmatpush.bf16.msrb.mxu1 %v5587_v1  ;;  %v5819_v1 = vor.u32 %v6456_v26, %v5816_v45  ;;  %v5864_v43 = vld [vmem:[%s7482_s25 + $0x4c8] sm:$0xf0]  ;;  %v5931_v26 = vor.u32 %v6484_v30, %v5928_v35 }
 0x22a   : > { %4616 = vmatpush.bf16.msrb.mxu2 %v5651_v48  ;;  %v6472_v48 = vld [vmem:[%s7482_s25 + $0x4e4] sm:$0xf] }
 0x22b   : > { %4635 = vmatpush.bf16.msrb.mxu3 %v5715_v2  ;;  %v5883_v2 = vor.u32 %v6472_v48, %v5880_v53  ;;  %v5920_v48 = vld [vmem:[%s7482_s25 + $0x538] sm:$0xf0]  ;;  %v6450_v53 = vld [vmem:[%s7482_s25 + $0x434] sm:$0xf] }
 0x22c   : > { %4579 = vmatpush.bf16.msrb.mxu0 %v5515_v21  ;;  %v4246_v6 = vpop.f32.mrf.mxu2  ;;  %v6502_v21 = vld [vmem:[%s7482_s25 + $0x5d4] sm:$0xf] }
 0x22d   : > { %4598 = vmatpush.bf16.msrb.mxu1 %v5579_v20  ;;  %v4247_v12 = vadd.f32 %v4246_v6, %v4228_v54  ;;  %v5939_v20 = vor.u32 %v6486_v4, %v5936_v5  ;;  %v5795_v6 = vor.u32 %v6450_v53, %v5792_v59  ;;  %v6476_v53 = vld [vmem:[%s7482_s25 + $0x504] sm:$0xf] }
 0x22e   : > { %4617 = vmatpush.bf16.msrb.mxu2 %v5643_v18  ;;  %v5872_v18 = vld [vmem:[%s7482_s25 + $0x4d8] sm:$0xf0]  ;;  %v8071_v29 = vpop.f32.mrf.mxu1 }
 0x22f   : > { %4636 = vmatpush.bf16.msrb.mxu3 %v5707_v25  ;;  %v4265_v16 = vpop.f32.mrf.mxu3  ;;  %v8069_v28 = vpop.f32.mrf.mxu0  ;;  %v5811_v25 = vor.u32 %v6454_v7, %v5808_v10  ;;  %v5875_v17 = vor.u32 %v6470_v11, %v5872_v18  ;;  %v6480_v7 = vld [vmem:[%s7482_s25 + $0x524] sm:$0xf]  ;;  %v5912_v10 = vld [vmem:[%s7482_s25 + $0x528] sm:$0xf0] }
 0x230   : > { %4648 = vmatpush.bf16.msra.mxu0 %v5827_v22  ;;  %v8073_v19 = vadd.f32 %v4265_v16, %v4247_v12  ;;  %v6452_v22 = vld [vmem:[%s7482_s25 + $0x444] sm:$0xf]  ;;  %4599 = vmatmul.bf16.vlgmr.msrb.gmra.mxu1 %v7680_v34  ;;  %v5867_v34 = vor.u32 %v6468_v40, %v5864_v43  ;;  %v5784_v18 = vld [vmem:[%s7482_s25 + $0x428] sm:$0xf0]  ;;  %v5915_v30 = vor.u32 %v6480_v7, %v5912_v10  ;;  %v6446_v40 = vld [vmem:[%s7482_s25 + $0x414] sm:$0xf] }
 0x231   : > { %4667 = vmatpush.bf16.msra.mxu1 %v5891_v44  ;;  %4580 = vmatmul.bf16.vlgmr.msrb.gmra.mxu0 %v7678_v33  ;;  %v6500_v44 = vld [vmem:[%s7482_s25 + $0x5c4] sm:$0xf]  ;;  %v5803_v45 = vor.u32 %v6452_v22, %v5800_v37  ;;  %v6482_v33 = vld [vmem:[%s7482_s25 + $0x534] sm:$0xf]  ;;  %v5776_v43 = vld [vmem:[%s7482_s25 + $0x418] sm:$0xf0] }
 0x232   : > { %4686 = vmatpush.bf16.msra.mxu2 %v5955_v36  ;;  %v6003_v36 = vor.u32 %v6502_v21, %v6000_v13  ;;  %4637 = vmatmul.bf16.vlgmr.msrb.gmra.mxu3 %v7687_v39  ;;  %v5923_v5 = vor.u32 %v6482_v33, %v5920_v48  ;;  %v6448_v16 = vld [vmem:[%s7482_s25 + $0x424] sm:$0xf]  ;;  %v5848_v13 = vld [vmem:[%s7482_s25 + $0x4a8] sm:$0xf0]  ;;  %v6494_v33 = vld [vmem:[%s7482_s25 + $0x594] sm:$0xf] }
 0x233   : > { %4705 = vmatpush.bf16.msra.mxu3 %v6019_v23  ;;  %v5992_v23 = vld [vmem:[%s7482_s25 + $0x5c8] sm:$0xf0]  ;;  %4618 = vmatmul.bf16.vlgmr.msrb.gmra.mxu2 %v7685_v38  ;;  %v6466_v38 = vld [vmem:[%s7482_s25 + $0x4b4] sm:$0xf]  ;;  %v6464_v21 = vld [vmem:[%s7482_s25 + $0x4a4] sm:$0xf]  ;;  %v5787_v35 = vor.u32 %v6448_v16, %v5784_v18 }
 0x234   : > { %4649 = vmatpush.bf16.msra.mxu0 %v5819_v1  ;;  %v5995_v54 = vor.u32 %v6500_v44, %v5992_v23  ;;  %v8092_v63 = vpop.f32.mrf.mxu2  ;;  %v6498_v1 = vld [vmem:[%s7482_s25 + $0x5b4] sm:$0xf]  ;;  %v5851_v22 = vor.u32 %v6464_v21, %v5848_v13  ;;  %v5968_v48 = vld [vmem:[%s7482_s25 + $0x598] sm:$0xf0]  ;;  %v6460_v7 = vld [vmem:[%s7482_s25 + $0x484] sm:$0xf] }
 0x235   : > { %4668 = vmatpush.bf16.msra.mxu1 %v5883_v2  ;;  %v5984_v2 = vld [vmem:[%s7482_s25 + $0x5b8] sm:$0xf0]  ;;  %v6462_v44 = vld [vmem:[%s7482_s25 + $0x494] sm:$0xf]  ;;  %v5832_v10 = vld [vmem:[%s7482_s25 + $0x488] sm:$0xf0] }
 0x236   : > { %4687 = vmatpush.bf16.msra.mxu2 %v5947_v0  ;;  %v5856_v0 = vld [vmem:[%s7482_s25 + $0x4b8] sm:$0xf0]  ;;  %v8101_v4 = vpop.f32.mrf.mxu1  ;;  %v5987_v12 = vor.u32 %v6498_v1, %v5984_v2  ;;  %v6444_v1 = vld [vmem:[%s7482_s25 + $0x404] sm:$0xf]  ;;  %v5768_v2 = vld [vmem:[%s7482_s25 + $0x408] sm:$0xf0] }
 0x237   : > { %4706 = vmatpush.bf16.msra.mxu3 %v6011_v3  ;;  %v8094_v39 = vpop.f32.mrf.mxu3  ;;  %v8099_v3 = vpop.f32.mrf.mxu0  ;;  %v5859_v11 = vor.u32 %v6466_v38, %v5856_v0  ;;  %v5779_v38 = vor.u32 %v6446_v40, %v5776_v43  ;;  %v5896_v0 = vld [vmem:[%s7482_s25 + $0x508] sm:$0xf0]  ;;  %v6554_v16 = vld [vmem:[%s7482_s25 + $0x774] sm:$0xf]  ;;  %v6208_v18 = vld [vmem:[%s7482_s25 + $0x778] sm:$0xf0] }
 0x238   : > { %4650 = vmatpush.bf16.msra.mxu0 %v5811_v25  ;;  %v5976_v25 = vld [vmem:[%s7482_s25 + $0x5a8] sm:$0xf0]  ;;  %v6522_v21 = vld [vmem:[%s7482_s25 + $0x674] sm:$0xf]  ;;  %v6080_v13 = vld [vmem:[%s7482_s25 + $0x678] sm:$0xf0] }
 0x239   : > { %4669 = vmatpush.bf16.msra.mxu1 %v5875_v17  ;;  %v6478_v17 = vld [vmem:[%s7482_s25 + $0x514] sm:$0xf]  ;;  %v6552_v40 = vld [vmem:[%s7482_s25 + $0x764] sm:$0xf]  ;;  %v6200_v43 = vld [vmem:[%s7482_s25 + $0x768] sm:$0xf0] }
 0x23a   : > { %4688 = vmatpush.bf16.msra.mxu2 %v5939_v20  ;;  %v6496_v20 = vld [vmem:[%s7482_s25 + $0x5a4] sm:$0xf] }
 0x23b   : > { %4707 = vmatpush.bf16.msra.mxu3 %v6003_v36  ;;  %v5904_v36 = vld [vmem:[%s7482_s25 + $0x518] sm:$0xf0]  ;;  %v5979_v37 = vor.u32 %v6496_v20, %v5976_v25  ;;  %v6538_v20 = vld [vmem:[%s7482_s25 + $0x6f4] sm:$0xf]  ;;  %v5899_v25 = vor.u32 %v6476_v53, %v5896_v0  ;;  %v6520_v53 = vld [vmem:[%s7482_s25 + $0x664] sm:$0xf] }
 0x23c   : > { %4651 = vmatpush.bf16.msra.mxu0 %v5803_v45  ;;  %v8116_v23 = vpop.f32.mrf.mxu2  ;;  %v5840_v45 = vld [vmem:[%s7482_s25 + $0x498] sm:$0xf0]  ;;  %v5907_v59 = vor.u32 %v6478_v17, %v5904_v36  ;;  %v6136_v0 = vld [vmem:[%s7482_s25 + $0x6e8] sm:$0xf0] }
 0x23d   : > { %4670 = vmatpush.bf16.msra.mxu1 %v5867_v34 }
 0x23e   : > { %4689 = vmatpush.bf16.msra.mxu2 %v5931_v26 }
 0x23f   : > { %4708 = vmatpush.bf16.msra.mxu3 %v5995_v54  ;;  %v8118_v26 = vpop.f32.mrf.mxu3  ;;  %v8123_v34 = vpop.f32.mrf.mxu0 }
 0x240   : > { %4652 = vmatpush.bf16.msra.mxu0 %v5795_v6  ;;  %v8125_v54 = vpop.f32.mrf.mxu1  ;;  %v5971_v6 = vor.u32 %v6494_v33, %v5968_v48  ;;  %4604 = vmatmul.bf16.gmra.mxu1 %v7732_v42  ;;  %v6272_v42 = vld [vmem:[%s7482_s25 + $0x7f8] sm:$0xf0] }
 0x241   : > { %4671 = vmatpush.bf16.msra.mxu1 %v5859_v11  ;;  %v6492_v11 = vld [vmem:[%s7482_s25 + $0x584] sm:$0xf]  ;;  %4585 = vmatmul.bf16.gmra.mxu0 %v7730_v41  ;;  %v6144_v41 = vld [vmem:[%s7482_s25 + $0x6f8] sm:$0xf0] }
 0x242   : > { %4690 = vmatpush.bf16.msra.mxu2 %v5923_v5  ;;  %v5843_v5 = vor.u32 %v6462_v44, %v5840_v45  ;;  %4642 = vmatmul.bf16.gmra.mxu3 %v7739_v47  ;;  %v6147_v33 = vor.u32 %v6538_v20, %v6144_v41  ;;  %v6256_v41 = vld [vmem:[%s7482_s25 + $0x7d8] sm:$0xf0] }
 0x243   : > { %4709 = vmatpush.bf16.msra.mxu3 %v5987_v12  ;;  %v5960_v12 = vld [vmem:[%s7482_s25 + $0x588] sm:$0xf0]  ;;  %4623 = vmatmul.bf16.gmra.mxu2 %v7737_v46  ;;  %v5835_v46 = vor.u32 %v6460_v7, %v5832_v10 }
 0x244   : > { %4653 = vmatpush.bf16.msra.mxu0 %v5787_v35  ;;  %v6570_v35 = vld [vmem:[%s7482_s25 + $0x7f4] sm:$0xf]  ;;  %v5963_v17 = vor.u32 %v6492_v11, %v5960_v12  ;;  %v8147_v47 = vpop.f32.mrf.mxu2  ;;  %v6192_v12 = vld [vmem:[%s7482_s25 + $0x758] sm:$0xf0] }
 0x245   : > { %4672 = vmatpush.bf16.msra.mxu1 %v5851_v22  ;;  %v6211_v22 = vor.u32 %v6554_v16, %v6208_v18  ;;  %v6275_v48 = vor.u32 %v6570_v35, %v6272_v42  ;;  %v6550_v11 = vld [vmem:[%s7482_s25 + $0x754] sm:$0xf]  ;;  %v6064_v18 = vld [vmem:[%s7482_s25 + $0x658] sm:$0xf0] }
 0x246   : > { %4691 = vmatpush.bf16.msra.mxu2 %v5915_v30  ;;  %v5771_v30 = vor.u32 %v6444_v1, %v5768_v2  ;;  %v6568_v1 = vld [vmem:[%s7482_s25 + $0x7e4] sm:$0xf]  ;;  %v6264_v2 = vld [vmem:[%s7482_s25 + $0x7e8] sm:$0xf0]  ;;  %v6518_v16 = vld [vmem:[%s7482_s25 + $0x654] sm:$0xf] }
 0x247   : > { %4710 = vmatpush.bf16.msra.mxu3 %v5979_v37  ;;  %v8149_v36 = vpop.f32.mrf.mxu3  ;;  %v6083_v37 = vor.u32 %v6522_v21, %v6080_v13  ;;  %v8153_v44 = vpop.f32.mrf.mxu0  ;;  %v6267_v10 = vor.u32 %v6568_v1, %v6264_v2  ;;  %v6534_v21 = vld [vmem:[%s7482_s25 + $0x6d4] sm:$0xf] }
 0x248   : > { %4654 = vmatpush.bf16.msra.mxu0 %v5779_v38  ;;  %v8155_v45 = vpop.f32.mrf.mxu1  ;;  %v6536_v38 = vld [vmem:[%s7482_s25 + $0x6e4] sm:$0xf] }
 0x249   : > { %4673 = vmatpush.bf16.msra.mxu1 %v5843_v5  ;;  %v6203_v5 = vor.u32 %v6552_v40, %v6200_v43  ;;  %v6139_v7 = vor.u32 %v6536_v38, %v6136_v0  ;;  %v6564_v38 = vld [vmem:[%s7482_s25 + $0x7c4] sm:$0xf]  ;;  %v6248_v0 = vld [vmem:[%s7482_s25 + $0x7c8] sm:$0xf0] }
 0x24a   : > { %4692 = vmatpush.bf16.msra.mxu2 %v5907_v59  ;;  %v6072_v59 = vld [vmem:[%s7482_s25 + $0x668] sm:$0xf0] }
 0x24b   : > { %4711 = vmatpush.bf16.msra.mxu3 %v5971_v6  ;;  %v6075_v6 = vor.u32 %v6520_v53, %v6072_v59  ;;  %v6532_v53 = vld [vmem:[%s7482_s25 + $0x6c4] sm:$0xf]  ;;  %v6120_v59 = vld [vmem:[%s7482_s25 + $0x6c8] sm:$0xf0] }
 0x24c   : > { %4655 = vmatpush.bf16.msra.mxu0 %v5771_v30  ;;  %v8168_v13 = vpop.f32.mrf.mxu2  ;;  %v6566_v30 = vld [vmem:[%s7482_s25 + $0x7d4] sm:$0xf] }
 0x24d   : > { %4674 = vmatpush.bf16.msra.mxu1 %v5835_v46  ;;  %v6195_v46 = vor.u32 %v6550_v11, %v6192_v12  ;;  %v6259_v43 = vor.u32 %v6566_v30, %v6256_v41  ;;  %v6112_v12 = vld [vmem:[%s7482_s25 + $0x6b8] sm:$0xf0] }
 0x24e   : > { %4693 = vmatpush.bf16.msra.mxu2 %v5899_v25  ;;  %v6128_v25 = vld [vmem:[%s7482_s25 + $0x6d8] sm:$0xf0] }
 0x24f   : > { %4712 = vmatpush.bf16.msra.mxu3 %v5963_v17  ;;  %v8170_v20 = vpop.f32.mrf.mxu3  ;;  %v8175_v35 = vpop.f32.mrf.mxu0  ;;  %v6067_v17 = vor.u32 %v6518_v16, %v6064_v18  ;;  %v6131_v40 = vor.u32 %v6534_v21, %v6128_v25  ;;  %v6562_v16 = vld [vmem:[%s7482_s25 + $0x7b4] sm:$0xf]  ;;  %v6240_v18 = vld [vmem:[%s7482_s25 + $0x7b8] sm:$0xf0] }
 0x250   : > { %4724 = vmatpush.bf16.msrb.mxu0 %v6083_v37  ;;  %v8177_v42 = vpop.f32.mrf.mxu1  ;;  %v6184_v37 = vld [vmem:[%s7482_s25 + $0x748] sm:$0xf0]  ;;  %4675 = vmatmul.bf16.vlgmr.msra.gmra.mxu1 %v7786_v57  ;;  %v6123_v57 = vor.u32 %v6532_v53, %v6120_v59  ;;  %v6560_v59 = vld [vmem:[%s7482_s25 + $0x7a4] sm:$0xf] }
 0x251   : > { %4743 = vmatpush.bf16.msrb.mxu1 %v6147_v33  ;;  %v6516_v33 = vld [vmem:[%s7482_s25 + $0x644] sm:$0xf]  ;;  %4656 = vmatmul.bf16.vlgmr.msra.gmra.mxu0 %v7784_v56  ;;  %v6546_v56 = vld [vmem:[%s7482_s25 + $0x734] sm:$0xf]  ;;  %v6104_v53 = vld [vmem:[%s7482_s25 + $0x6a8] sm:$0xf0] }
 0x252   : > { %4762 = vmatpush.bf16.msrb.mxu2 %v6211_v22  ;;  %v6548_v22 = vld [vmem:[%s7482_s25 + $0x744] sm:$0xf]  ;;  %4713 = vmatmul.bf16.vlgmr.msra.gmra.mxu3 %v7793_v62 }
 0x253   : > { %4781 = vmatpush.bf16.msrb.mxu3 %v6275_v48  ;;  %v6056_v48 = vld [vmem:[%s7482_s25 + $0x648] sm:$0xf0]  ;;  %4694 = vmatmul.bf16.vlgmr.msra.gmra.mxu2 %v7791_v61  ;;  %v6187_v1 = vor.u32 %v6548_v22, %v6184_v37  ;;  %v6530_v61 = vld [vmem:[%s7482_s25 + $0x6b4] sm:$0xf]  ;;  %v4278_v22 = vadd.f32 %v8069_v28, %v8011_v60 }
 0x254   : > { %4725 = vmatpush.bf16.msrb.mxu0 %v6075_v6  ;;  %v6059_v2 = vor.u32 %v6516_v33, %v6056_v48  ;;  %v6251_v6 = vor.u32 %v6564_v38, %v6248_v0  ;;  %v8196_v11 = vpop.f32.mrf.mxu2  ;;  %v6115_v37 = vor.u32 %v6530_v61, %v6112_v12  ;;  %v6040_v33 = vld [vmem:[%s7482_s25 + $0x628] sm:$0xf0]  ;;  %v6528_v48 = vld [vmem:[%s7482_s25 + $0x6a4] sm:$0xf]  ;;  %v6542_v28 = vld [vmem:[%s7482_s25 + $0x714] sm:$0xf] }
 0x255   : > { %4744 = vmatpush.bf16.msrb.mxu1 %v6139_v7  ;;  %v6514_v7 = vld [vmem:[%s7482_s25 + $0x634] sm:$0xf]  ;;  %v6232_v38 = vld [vmem:[%s7482_s25 + $0x7a8] sm:$0xf0]  ;;  %v6096_v12 = vld [vmem:[%s7482_s25 + $0x698] sm:$0xf0] }
 0x256   : > { %4763 = vmatpush.bf16.msrb.mxu2 %v6203_v5  ;;  %v6176_v5 = vld [vmem:[%s7482_s25 + $0x738] sm:$0xf0] }
 0x257   : > { %4782 = vmatpush.bf16.msrb.mxu3 %v6267_v10  ;;  %v6048_v10 = vld [vmem:[%s7482_s25 + $0x638] sm:$0xf0]  ;;  %v8198_v62 = vpop.f32.mrf.mxu3  ;;  %v8203_v21 = vpop.f32.mrf.mxu0  ;;  %v6179_v30 = vor.u32 %v6546_v56, %v6176_v5  ;;  %v6107_v56 = vor.u32 %v6528_v48, %v6104_v53  ;;  %v6235_v5 = vor.u32 %v6560_v59, %v6232_v38  ;;  %v6024_v48 = vld [vmem:[%s7482_s25 + $0x608] sm:$0xf0]  ;;  %v6524_v53 = vld [vmem:[%s7482_s25 + $0x684] sm:$0xf] }
 0x258   : > { %4726 = vmatpush.bf16.msrb.mxu0 %v6067_v17  ;;  %v8205_v25 = vpop.f32.mrf.mxu1  ;;  %v6051_v41 = vor.u32 %v6514_v7, %v6048_v10  ;;  %v6168_v17 = vld [vmem:[%s7482_s25 + $0x728] sm:$0xf0]  ;;  %v6526_v7 = vld [vmem:[%s7482_s25 + $0x694] sm:$0xf] }
 0x259   : > { %4745 = vmatpush.bf16.msrb.mxu1 %v6131_v40  ;;  %v6243_v40 = vor.u32 %v6562_v16, %v6240_v18  ;;  %v6558_v16 = vld [vmem:[%s7482_s25 + $0x794] sm:$0xf]  ;;  %v6224_v18 = vld [vmem:[%s7482_s25 + $0x798] sm:$0xf0]  ;;  %v6216_v59 = vld [vmem:[%s7482_s25 + $0x788] sm:$0xf0] }
 0x25a   : > { %4764 = vmatpush.bf16.msrb.mxu2 %v6195_v46  ;;  %v6544_v46 = vld [vmem:[%s7482_s25 + $0x724] sm:$0xf] }
 0x25b   : > { %4783 = vmatpush.bf16.msrb.mxu3 %v6259_v43  ;;  %v6512_v43 = vld [vmem:[%s7482_s25 + $0x624] sm:$0xf]  ;;  %v6171_v0 = vor.u32 %v6544_v46, %v6168_v17  ;;  %v4280_v46 = vadd.f32 %v8099_v3, %v8030_v52  ;;  %v6088_v52 = vld [vmem:[%s7482_s25 + $0x688] sm:$0xf0] }
 0x25c   : > { %4727 = vmatpush.bf16.msrb.mxu0 %v6059_v2  ;;  %v6043_v60 = vor.u32 %v6512_v43, %v6040_v33  ;;  %v4297_v2 = vadd.f32 %v8071_v29, %v4278_v22  ;;  %v8223_v10 = vpop.f32.mrf.mxu2  ;;  %v6227_v43 = vor.u32 %v6558_v16, %v6224_v18  ;;  %v6508_v33 = vld [vmem:[%s7482_s25 + $0x604] sm:$0xf] }
 0x25d   : > { %4746 = vmatpush.bf16.msrb.mxu1 %v6123_v57  ;;  %v6510_v57 = vld [vmem:[%s7482_s25 + $0x614] sm:$0xf]  ;;  %v6556_v3 = vld [vmem:[%s7482_s25 + $0x784] sm:$0xf] }
 0x25e   : > { %4765 = vmatpush.bf16.msrb.mxu2 %v6187_v1  ;;  %v6160_v1 = vld [vmem:[%s7482_s25 + $0x718] sm:$0xf0]  ;;  %v4316_v29 = vadd.f32 %v8092_v63, %v4297_v2  ;;  %v6099_v63 = vor.u32 %v6526_v7, %v6096_v12 }
 0x25f   : > { %4784 = vmatpush.bf16.msrb.mxu3 %v6251_v6  ;;  %v6032_v6 = vld [vmem:[%s7482_s25 + $0x618] sm:$0xf0]  ;;  %v8225_v61 = vpop.f32.mrf.mxu3  ;;  %v6163_v17 = vor.u32 %v6542_v28, %v6160_v1  ;;  %v6027_v28 = vor.u32 %v6508_v33, %v6024_v48 }
 0x260   : > { %4728 = vmatpush.bf16.msrb.mxu0 %v6051_v41  ;;  %v8233_v41 = vpop.f32.mrf.mxu1  ;;  %v6035_v22 = vor.u32 %v6510_v57, %v6032_v6  ;;  %4680 = vmatmul.bf16.gmra.mxu1 %v7838_v9  ;;  %v4335_v38 = vadd.f32 %v8094_v39, %v4316_v29  ;;  %v6219_v9 = vor.u32 %v6556_v3, %v6216_v59 }
 0x261   : > { %4747 = vmatpush.bf16.msrb.mxu1 %v6115_v37  ;;  %v6540_v37 = vld [vmem:[%s7482_s25 + $0x704] sm:$0xf]  ;;  %4661 = vmatmul.bf16.gmra.mxu0 %v7836_v8  ;;  %v6091_v8 = vor.u32 %v6524_v53, %v6088_v52  ;;  %v2458_v53 = vld [vmem:[#allocation2 + $0x18] sm:$0xff] }
 0x262   : > { %4766 = vmatpush.bf16.msrb.mxu2 %v6179_v30  ;;  %v8231_v30 = vpop.f32.mrf.mxu0  ;;  %4718 = vmatmul.bf16.gmra.mxu3 %v7845_v15  ;;  %v4354_v1 = vadd.f32 %v8175_v35, %v4335_v38  ;;  %v4283_v15 = vadd.f32 %v8123_v34, %v8056_v49  ;;  %v4285_v34 = vadd.f32 %v8153_v44, %v8073_v19 }
 0x263   : > { %4785 = vmatpush.bf16.msrb.mxu3 %v6243_v40  ;;  %v6152_v40 = vld [vmem:[%s7482_s25 + $0x708] sm:$0xf0]  ;;  %4699 = vmatmul.bf16.gmra.mxu2 %v7843_v14 }
 0x264   : > { %4729 = vmatpush.bf16.msrb.mxu0 %v6043_v60  ;;  %v6155_v60 = vor.u32 %v6540_v37, %v6152_v40  ;;  %v4396_v2 = vpop.f32.mrf.mxu2  ;;  %v4302_v6 = vadd.f32 %v8125_v54, %v4283_v15 }
 0x265   : > { %4748 = vmatpush.bf16.msrb.mxu1 %v6107_v56 }
 0x266   : > { %4767 = vmatpush.bf16.msrb.mxu2 %v6171_v0  ;;  %v4299_v0 = vadd.f32 %v8101_v4, %v4280_v46  ;;  %v4373_v4 = vadd.f32 %v8177_v42, %v4354_v1  ;;  %v4321_v16 = vadd.f32 %v8147_v47, %v4302_v6  ;;  %v4304_v47 = vadd.f32 %v8155_v45, %v4285_v34 }
 0x267   : > { %4786 = vmatpush.bf16.msrb.mxu3 %v6235_v5  ;;  %v4415_v56 = vpop.f32.mrf.mxu3 }
 0x268   : > { %4730 = vmatpush.bf16.msrb.mxu0 %v6035_v22  ;;  %v4318_v39 = vadd.f32 %v8116_v23, %v4299_v0  ;;  %v4379_v14 = vpop.f32.mrf.mxu1  ;;  %v4392_v57 = vadd.f32 %v8196_v11, %v4373_v4  ;;  %v4340_v54 = vadd.f32 %v8149_v36, %v4321_v16 }
 0x269   : > { %4749 = vmatpush.bf16.msrb.mxu1 %v6099_v63 }
 0x26a   : > { %4768 = vmatpush.bf16.msrb.mxu2 %v6163_v17  ;;  %v4360_v5 = vpop.f32.mrf.mxu0  ;;  %v4337_v35 = vadd.f32 %v8118_v26, %v4318_v39  ;;  %v4411_v18 = vadd.f32 %v8198_v62, %v4392_v57  ;;  %v4359_v62 = vadd.f32 %v8231_v30, %v4340_v54  ;;  %v2456_v17 = vld [vmem:[#allocation2 + $0x30] sm:$0xff] }
 0x26b   : > { %4787 = vmatpush.bf16.msrb.mxu3 %v6227_v43 }
 0x26c   : > { %4731 = vmatpush.bf16.msrb.mxu0 %v6027_v28  ;;  %v4356_v7 = vadd.f32 %v8203_v21, %v4337_v35  ;;  %v4398_v23 = vpop.f32.mrf.mxu2 }
 0x26d   : > { %4750 = vmatpush.bf16.msrb.mxu1 %v6091_v8 }
 0x26e   : > { %4769 = vmatpush.bf16.msrb.mxu2 %v6155_v60  ;;  %v4375_v42 = vadd.f32 %v8205_v25, %v4356_v7  ;;  %v4323_v25 = vadd.f32 %v8168_v13, %v4304_v47 }
 0x26f   : > { %4788 = vmatpush.bf16.msrb.mxu3 %v6219_v9  ;;  %v4417_v12 = vpop.f32.mrf.mxu3 }
 0x270   : > { %v4448_v49 = vpop.f32.mrf.mxu1  ;;  %4751 = vmatmul.bf16.vlgmr.msrb.gmra.mxu1 %v7894_v51  ;;  %v4394_v11 = vadd.f32 %v8223_v10, %v4375_v42  ;;  %v4378_v10 = vadd.f32 %v8233_v41, %v4359_v62 }
 0x271   : > { %4732 = vmatmul.bf16.vlgmr.msrb.gmra.mxu0 %v7892_v50 }
 0x272   : > { %v4429_v29 = vpop.f32.mrf.mxu0  ;;  %4789 = vmatmul.bf16.vlgmr.msrb.gmra.mxu3 %v7901_v58  ;;  %v4413_v50 = vadd.f32 %v8225_v61, %v4394_v11  ;;  %v4342_v58 = vadd.f32 %v8170_v20, %v4323_v25  ;;  %v4397_v45 = vadd.f32 %v4396_v2, %v4378_v10  ;;  %v2460_v2 = vld [vmem:[#allocation2 + $0x8] sm:$0xff] }
 0x273   : > { %v4430_v26 = vadd.f32 %v4429_v29, %v4411_v18  ;;  %4770 = vmatmul.bf16.vlgmr.msrb.gmra.mxu2 %v7899_v55 }
 0x274   : > { %v4467_v44 = vpop.f32.mrf.mxu2  ;;  %v4361_v30 = vadd.f32 %v4360_v5, %v4342_v58  ;;  %v4416_v13 = vadd.f32 %v4415_v56, %v4397_v45 }
 0x275   : > { %v4449_v19 = vadd.f32 %v4448_v49, %v4430_v26 }
 0x276   : > { %v4380_v52 = vadd.f32 %v4379_v14, %v4361_v30 }
 0x277   : > { %v4486_v21 = vpop.f32.mrf.mxu3  ;;  %v4468_v51 = vadd.f32 %v4467_v44, %v4449_v19 }
 0x278   : > { %v4450_v36 = vpop.f32.mrf.mxu1  ;;  %v4399_v20 = vadd.f32 %v4398_v23, %v4380_v52 }
 0x279   : > { %v4487_v55 = vadd.f32 %v4486_v21, %v4468_v51 }
 0x27a   : > { %v4431_v46 = vpop.f32.mrf.mxu0  ;;  %v4418_v28 = vadd.f32 %v4417_v12, %v4399_v20 }
 0x27b   : > { %v4432_v22 = vadd.f32 %v4431_v46, %v4413_v50  ;;  %v4800_v37 = vadd.f32 %v4487_v55, %v2456_v17 }
 0x27c   : > { %v4469_v63 = vpop.f32.mrf.mxu2 }
 0x27d   : > { %4808 = vst [vmem:[#allocation2 + $0x30] sm:$0xff] %v4800_v37  ;;  %v4451_v40 = vadd.f32 %v4450_v36, %v4432_v22 }
 0x27f   : > { %v4488_v43 = vpop.f32.mrf.mxu3  ;;  %v4470_v33 = vadd.f32 %v4469_v63, %v4451_v40 }
 0x280   : > { %v4453_v48 = vpop.f32.mrf.mxu1  ;;  %4756 = vmatmul.bf16.gmra.mxu1 %v7946_v27 }
 0x281   : > { %v4489_v3 = vadd.f32 %v4488_v43, %v4470_v33  ;;  %4737 = vmatmul.bf16.gmra.mxu0 %v7944_v24 }
 0x282   : > { %v4434_v61 = vpop.f32.mrf.mxu0  ;;  %4794 = vmatmul.bf16.gmra.mxu3 %v7953_v32  ;;  %v2462_v32 = vld [vmem:[#allocation2 + $0x28] sm:$0xff] }
 0x283   : > { %v4435_v59 = vadd.f32 %v4434_v61, %v4416_v13  ;;  %v4802_v41 = vadd.f32 %v4489_v3, %v2458_v53  ;;  %4775 = vmatmul.bf16.gmra.mxu2 %v7951_v31 }
 0x285   : > { %4810 = vst [vmem:[#allocation2 + $0x18] sm:$0xff] %v4802_v41  ;;  %v4454_v38 = vadd.f32 %v4453_v48, %v4435_v59 }
 0x286   : > { %v4472_v0 = vpop.f32.mrf.mxu2 }
 0x287   : > { %v4491_v60 = vpop.f32.mrf.mxu3  ;;  %v4473_v1 = vadd.f32 %v4472_v0, %v4454_v38 }
 0x288   : > { %v4455_v9 = vpop.f32.mrf.mxu1 }
 0x289   : > { %v4492_v56 = vadd.f32 %v4491_v60, %v4473_v1 }
 0x28a   : > { %v4436_v8 = vpop.f32.mrf.mxu0 }
 0x28b   : > { %v4437_v39 = vadd.f32 %v4436_v8, %v4418_v28  ;;  %v4804_v24 = vadd.f32 %v4492_v56, %v2460_v2 }
 0x28d   : > { %4812 = vst [vmem:[#allocation2 + $0x8] sm:$0xff] %v4804_v24  ;;  %v4456_v27 = vadd.f32 %v4455_v9, %v4437_v39 }
 0x28e   : > { %v4474_v5 = vpop.f32.mrf.mxu2 }
 0x28f   : > { %v4493_v14 = vpop.f32.mrf.mxu3  ;;  %v4475_v15 = vadd.f32 %v4474_v5, %v4456_v27 }
 0x290   : > { %v4524_v4 = vpop.f32.mrf.mxu1 }
 0x291   : > { %v4494_v57 = vadd.f32 %v4493_v14, %v4475_v15 }
 0x292   : > { %v4505_v31 = vpop.f32.mrf.mxu0 }
 0x293   : > { %v4525_v35 = vadd.f32 %v4524_v4, %v4505_v31  ;;  %v4806_v6 = vadd.f32 %v4494_v57, %v2462_v32 }
 0x295   : > { %4814 = vst [vmem:[#allocation2 + $0x28] sm:$0xff] %v4806_v6 }
 0x296   : > { %v4543_v7 = vpop.f32.mrf.mxu2 }
 0x297   : > { %v4562_v23 = vpop.f32.mrf.mxu3  ;;  %v4544_v12 = vadd.f32 %v4543_v7, %v4525_v35 }
 0x298   : > { %v4526_v18 = vpop.f32.mrf.mxu1 }
 0x299   : > { %v4563_v49 = vadd.f32 %v4562_v23, %v4544_v12 }
 0x29a   : > { %v4507_v16 = vpop.f32.mrf.mxu0 }
 0x29b   : > { %v4527_v29 = vadd.f32 %v4526_v18, %v4507_v16 }
 0x29e   : > { %v4545_v34 = vpop.f32.mrf.mxu2 }
 0x29f   : > { %v4564_v42 = vpop.f32.mrf.mxu3  ;;  %v4546_v26 = vadd.f32 %v4545_v34, %v4527_v29 }
 0x2a0   : > { %v4529_v11 = vpop.f32.mrf.mxu1 }
 0x2a1   : > { %v4565_v62 = vadd.f32 %v4564_v42, %v4546_v26 }
 0x2a2   : > { %v4510_v54 = vpop.f32.mrf.mxu0 }
 0x2a3   : > { %v4530_v47 = vadd.f32 %v4529_v11, %v4510_v54 }
 0x2a6   : > { %v4548_v19 = vpop.f32.mrf.mxu2 }
 0x2a7   : > { %v4567_v44 = vpop.f32.mrf.mxu3  ;;  %v4549_v21 = vadd.f32 %v4548_v19, %v4530_v47 }
 0x2a8   : > { %v4531_v50 = vpop.f32.mrf.mxu1 }
 0x2a9   : > { %v4568_v46 = vadd.f32 %v4567_v44, %v4549_v21 }
 0x2aa   : > { %v4512_v25 = vpop.f32.mrf.mxu0 }
 0x2ab   : > { %v4532_v51 = vadd.f32 %v4531_v50, %v4512_v25 }
 0x2ae   : > { %v4550_v36 = vpop.f32.mrf.mxu2 }
 0x2af   : > { %v4569_v17 = vpop.f32.mrf.mxu3  ;;  %v4551_v10 = vadd.f32 %v4550_v36, %v4532_v51 }
 0x2b0   : > { %v4600_v22 = vpop.f32.mrf.mxu1 }
 0x2b1   : > { %v4570_v58 = vadd.f32 %v4569_v17, %v4551_v10 }
 0x2b2   : > { %v4581_v55 = vpop.f32.mrf.mxu0 }
 0x2b3   : > { %v4582_v1 = vadd.f32 %v4581_v55, %v4563_v49 }
 0x2b5   : > { %v4601_v8 = vadd.f32 %v4600_v22, %v4582_v1  ;;  %v2457_v22 = vld [vmem:[#allocation2] sm:$0xff] }
 0x2b6   : > { %v4619_v45 = vpop.f32.mrf.mxu2 }
 0x2b7   : > { %v4638_v37 = vpop.f32.mrf.mxu3  ;;  %v4620_v56 = vadd.f32 %v4619_v45, %v4601_v8 }
 0x2b8   : > { %v4602_v40 = vpop.f32.mrf.mxu1 }
 0x2b9   : > { %v4639_v5 = vadd.f32 %v4638_v37, %v4620_v56 }
 0x2ba   : > { %v4583_v30 = vpop.f32.mrf.mxu0 }
 0x2bb   : > { %v4584_v27 = vadd.f32 %v4583_v30, %v4565_v62 }
 0x2bd   : > { %v4603_v14 = vadd.f32 %v4602_v40, %v4584_v27 }
 0x2be   : > { %v4621_v63 = vpop.f32.mrf.mxu2 }
 0x2bf   : > { %v4640_v43 = vpop.f32.mrf.mxu3  ;;  %v4622_v32 = vadd.f32 %v4621_v63, %v4603_v14 }
 0x2c0   : > { %v4605_v33 = vpop.f32.mrf.mxu1 }
 0x2c1   : > { %v4641_v23 = vadd.f32 %v4640_v43, %v4622_v32 }
 0x2c2   : > { %v4586_v13 = vpop.f32.mrf.mxu0 }
 0x2c3   : > { %v4587_v6 = vadd.f32 %v4586_v13, %v4568_v46 }
 0x2c5   : > { %v4606_v16 = vadd.f32 %v4605_v33, %v4587_v6 }
 0x2c6   : > { %v4624_v61 = vpop.f32.mrf.mxu2 }
 0x2c7   : > { %v4643_v48 = vpop.f32.mrf.mxu3  ;;  %v4625_v34 = vadd.f32 %v4624_v61, %v4606_v16 }
 0x2c8   : > { %v4607_v52 = vpop.f32.mrf.mxu1 }
 0x2c9   : > { %v4644_v19 = vadd.f32 %v4643_v48, %v4625_v34 }
 0x2ca   : > { %v4588_v53 = vpop.f32.mrf.mxu0 }
 0x2cb   : > { %v4589_v11 = vadd.f32 %v4588_v53, %v4570_v58 }
 0x2cd   : > { %v4608_v21 = vadd.f32 %v4607_v52, %v4589_v11 }
 0x2ce   : > { %v4626_v3 = vpop.f32.mrf.mxu2 }
 0x2cf   : > { %v4645_v59 = vpop.f32.mrf.mxu3  ;;  %v4627_v36 = vadd.f32 %v4626_v3, %v4608_v21  ;;  %v2459_v3 = vld [vmem:[#allocation2 + $0x10] sm:$0xff] }
 0x2d0   : > { %v4676_v41 = vpop.f32.mrf.mxu1 }
 0x2d1   : > { %v4646_v63 = vadd.f32 %v4645_v59, %v4627_v36 }
 0x2d2   : > { %v4657_v20 = vpop.f32.mrf.mxu0 }
 0x2d3   : > { %v4658_v15 = vadd.f32 %v4657_v20, %v4639_v5 }
 0x2d5   : > { %v4677_v7 = vadd.f32 %v4676_v41, %v4658_v15 }
 0x2d6   : > { %v4695_v38 = vpop.f32.mrf.mxu2 }
 0x2d7   : > { %v4714_v0 = vpop.f32.mrf.mxu3  ;;  %v4696_v12 = vadd.f32 %v4695_v38, %v4677_v7 }
 0x2d8   : > { %v4678_v28 = vpop.f32.mrf.mxu1 }
 0x2d9   : > { %v4715_v42 = vadd.f32 %v4714_v0, %v4696_v12 }
 0x2da   : > { %v4659_v60 = vpop.f32.mrf.mxu0 }
 0x2db   : > { %v4660_v18 = vadd.f32 %v4659_v60, %v4641_v23 }
 0x2dd   : > { %v4679_v47 = vadd.f32 %v4678_v28, %v4660_v18 }
 0x2de   : > { %v4697_v9 = vpop.f32.mrf.mxu2 }
 0x2df   : > { %v4716_v2 = vpop.f32.mrf.mxu3  ;;  %v4698_v44 = vadd.f32 %v4697_v9, %v4679_v47 }
 0x2e0   : > { %v4681_v24 = vpop.f32.mrf.mxu1 }
 0x2e1   : > { %v4717_v17 = vadd.f32 %v4716_v2, %v4698_v44 }
 0x2e2   : > { %v4662_v39 = vpop.f32.mrf.mxu0 }
 0x2e3   : > { %v4663_v25 = vadd.f32 %v4662_v39, %v4644_v19 }
 0x2e5   : > { %v4682_v37 = vadd.f32 %v4681_v24, %v4663_v25  ;;  %v2461_v24 = vld [vmem:[#allocation2 + $0x20] sm:$0xff] }
 0x2e6   : > { %v4700_v31 = vpop.f32.mrf.mxu2 }
 0x2e7   : > { %v4719_v4 = vpop.f32.mrf.mxu3  ;;  %v4701_v58 = vadd.f32 %v4700_v31, %v4682_v37 }
 0x2e8   : > { %v4683_v57 = vpop.f32.mrf.mxu1 }
 0x2e9   : > { %v4720_v53 = vadd.f32 %v4719_v4, %v4701_v58 }
 0x2ea   : > { %v4664_v35 = vpop.f32.mrf.mxu0 }
 0x2eb   : > { %v4665_v13 = vadd.f32 %v4664_v35, %v4646_v63  ;;  %v2463_v35 = vld [vmem:[#allocation2 + $0x38] sm:$0xff] }
 0x2ed   : > { %v4684_v41 = vadd.f32 %v4683_v57, %v4665_v13 }
 0x2ee   : > { %v4702_v29 = vpop.f32.mrf.mxu2 }
 0x2ef   : > { %v4721_v49 = vpop.f32.mrf.mxu3  ;;  %v4703_v28 = vadd.f32 %v4702_v29, %v4684_v41 }
 0x2f0   : > { %v4752_v54 = vpop.f32.mrf.mxu1 }
 0x2f1   : > { %v4722_v2 = vadd.f32 %v4721_v49, %v4703_v28 }
 0x2f2   : > { %v4733_v26 = vpop.f32.mrf.mxu0 }
 0x2f3   : > { %v4734_v62 = vadd.f32 %v4733_v26, %v4715_v42 }
 0x2f5   : > { %v4753_v50 = vadd.f32 %v4752_v54, %v4734_v62 }
 0x2f6   : > { %v4771_v51 = vpop.f32.mrf.mxu2 }
 0x2f7   : > { %v4790_v46 = vpop.f32.mrf.mxu3  ;;  %v4772_v10 = vadd.f32 %v4771_v51, %v4753_v50 }
 0x2f8   : > { %v4754_v45 = vpop.f32.mrf.mxu1 }
 0x2f9   : > { %v4791_v30 = vadd.f32 %v4790_v46, %v4772_v10 }
 0x2fa   : > { %v4735_v55 = vpop.f32.mrf.mxu0 }
 0x2fb   : > { %v4736_v40 = vadd.f32 %v4735_v55, %v4717_v17  ;;  %v4801_v43 = vadd.f32 %v4791_v30, %v2457_v22 }
 0x2fd   : > { %4809 = vst [vmem:[#allocation2] sm:$0xff] %v4801_v43  ;;  %v4755_v33 = vadd.f32 %v4754_v45, %v4736_v40 }
 0x2fe   : > { %v4773_v61 = vpop.f32.mrf.mxu2 }
 0x2ff   : > { %v4792_v48 = vpop.f32.mrf.mxu3  ;;  %v4774_v52 = vadd.f32 %v4773_v61, %v4755_v33 }
 0x300   : > { %v4757_v60 = vpop.f32.mrf.mxu1 }
 0x301   : > { %v4793_v38 = vadd.f32 %v4792_v48, %v4774_v52 }
 0x302   : > { %v4738_v20 = vpop.f32.mrf.mxu0 }
 0x303   : > { %v4739_v0 = vadd.f32 %v4738_v20, %v4720_v53  ;;  %v4803_v1 = vadd.f32 %v4793_v38, %v2459_v3 }
 0x305   : > { %4811 = vst [vmem:[#allocation2 + $0x10] sm:$0xff] %v4803_v1  ;;  %v4758_v8 = vadd.f32 %v4757_v60, %v4739_v0 }
 0x306   : > { %v4776_v59 = vpop.f32.mrf.mxu2 }
 0x307   : > { %v4795_v9 = vpop.f32.mrf.mxu3  ;;  %v4777_v56 = vadd.f32 %v4776_v59, %v4758_v8 }
 0x308   : > { %v4759_v15 = vpop.f32.mrf.mxu1 }
 0x309   : > { %v4796_v27 = vadd.f32 %v4795_v9, %v4777_v56 }
 0x30a   : > { %v4740_v39 = vpop.f32.mrf.mxu0 }
 0x30b   : > { %v4741_v5 = vadd.f32 %v4740_v39, %v4722_v2  ;;  %v4805_v14 = vadd.f32 %v4796_v27, %v2461_v24 }
 0x30d   : > { %4813 = vst [vmem:[#allocation2 + $0x20] sm:$0xff] %v4805_v14  ;;  %v4760_v31 = vadd.f32 %v4759_v15, %v4741_v5 }
 0x30e   : > { %v4778_v4 = vpop.f32.mrf.mxu2 }
 0x30f   : > { %v4779_v32 = vadd.f32 %v4778_v4, %v4760_v31  ;;  %v4797_v57 = vpop.f32.mrf.mxu3 }
 0x311   : > { %v4798_v6 = vadd.f32 %v4797_v57, %v4779_v32  ;;  %4819 = sbr.rel (%p6276_p5) target bundleno = 816 (0x330), region = 111 }
 0x313   : > { %v4807_v7 = vadd.f32 %v4798_v6, %v2463_v35 }
 0x315   : > { %4815 = vst [vmem:[#allocation2 + $0x38] sm:$0xff] %v4807_v7 }
 0x316   : > { %v4820_v23 = vld [vmem:[#allocation2 + $0x30] sm:$0xff]  ;;  %v4822_v12 = vld [vmem:[#allocation2 + $0x18] sm:$0xff]  ;;  %v4824_v16 = vld [vmem:[#allocation2 + $0x8] sm:$0xff]  ;;  %v4872_v53 = vlaneseq }
 0x317   : > { %v4826_v18 = vld [vmem:[#allocation2 + $0x28] sm:$0xff]  ;;  %v4828_v29 = vadd.f32 %v4822_v12, %v4820_v23  ;;  %v4846_v49 = vmul.f32 %v4820_v23, %v4820_v23  ;;  %v4848_v34 = vmul.f32 %v4822_v12, %v4822_v12  ;;  %v4850_v42 = vmul.f32 %v4824_v16, %v4824_v16  ;;  %v4821_v26 = vld [vmem:[#allocation2] sm:$0xff]  ;;  %v4823_v54 = vld [vmem:[#allocation2 + $0x10] sm:$0xff] }
 0x318   : > { %v4852_v11 = vmul.f32 %v4826_v18, %v4826_v18  ;;  %v4825_v47 = vld [vmem:[#allocation2 + $0x20] sm:$0xff]  ;;  %v4837_v19 = vadd.f32 %v4823_v54, %v4821_v26  ;;  %v4847_v44 = vmul.f32 %v4821_v26, %v4821_v26  ;;  %v4849_v50 = vmul.f32 %v4823_v54, %v4823_v54 }
 0x319   : > { %v4829_v21 = vadd.f32 %v4828_v29, %v4824_v16  ;;  %v4854_v25 = vadd.f32 %v4848_v34, %v4846_v49  ;;  %v4851_v51 = vmul.f32 %v4825_v47, %v4825_v47  ;;  %v4882_v22 = vpack.c.bf16 %v4821_v26, %v4820_v23 }
 0x31a   : > { %v4838_v46 = vadd.f32 %v4837_v19, %v4825_v47  ;;  %v4863_v55 = vadd.f32 %v4849_v50, %v4847_v44  ;;  %v4883_v37 = vpack.c.bf16 %v4823_v54, %v4822_v12  ;;  %v4884_v30 = vpack.c.bf16 %v4825_v47, %v4824_v16 }
 0x31b   : > { %v4830_v17 = vadd.f32 %v4829_v21, %v4826_v18  ;;  %v4855_v10 = vadd.f32 %v4854_v25, %v4850_v42  ;;  %4886 = vst [vmem:[%s7484_s24] sm:$0xff] %v4882_v22  ;;  %v4873_v1 = vshrl.u32 %v4872_v53, 7 }
 0x31c   : > { %v4827_v62 = vld [vmem:[#allocation2 + $0x38] sm:$0xff]  ;;  %v4864_v43 = vadd.f32 %v4863_v55, %v4851_v51  ;;  %4887 = vst [vmem:[%s7484_s24 + $0x8] sm:$0xff] %v4883_v37 }
 0x31d   : > { %v4853_v36 = vmul.f32 %v4827_v62, %v4827_v62  ;;  %v4839_v45 = vadd.f32 %v4838_v46, %v4827_v62  ;;  %v4885_v40 = vpack.c.bf16 %v4827_v62, %v4826_v18  ;;  %v4831_v63 = vrot.slane %v4830_v17, 4  ;;  %4888 = vst [vmem:[%s7484_s24 + $0x10] sm:$0xff] %v4884_v30 }
 0x31e   : > { %v4856_v58 = vadd.f32 %v4855_v10, %v4852_v11  ;;  %vm4875_vm0 = vcmp.eq.s32.totalorder %v4873_v1, 1  ;;  %vm4874_vm1 = vcmp.eq.s32.totalorder %v4873_v1, 0 }
 0x31f   : > { %v4840_v13 = vrot.slane %v4839_v45, 4  ;;  %v4832_v33 = vadd.f32 %v4831_v63, %v4830_v17  ;;  %v4865_v48 = vadd.f32 %v4864_v43, %v4853_v36  ;;  %4889 = vst [vmem:[%s7484_s24 + $0x18] sm:$0xff] %v4885_v40 }
 0x320   : > { %v4857_v61 = vrot.slane %v4856_v58, 4 }
 0x321   : > { %v4841_v52 = vadd.f32 %v4840_v13, %v4839_v45  ;;  %v4833_v20 = vrot.slane %v4832_v33, 2  ;;  %v4866_v41 = vrot.slane %v4865_v48, 4 }
 0x322   : > { %v4858_v3 = vadd.f32 %v4857_v61, %v4856_v58 }
 0x323   : > { %v4842_v38 = vrot.slane %v4841_v52, 2  ;;  %v4834_v0 = vadd.f32 %v4833_v20, %v4832_v33  ;;  %v4867_v28 = vadd.f32 %v4866_v41, %v4865_v48 }
 0x324   : > { %v4859_v60 = vrot.slane %v4858_v3, 2 }
 0x325   : > { %v4843_v8 = vadd.f32 %v4842_v38, %v4841_v52  ;;  %v4835_v59 = vrot.slane %v4834_v0, 1  ;;  %v4868_v2 = vrot.slane %v4867_v28, 2 }
 0x326   : > { %v4860_v9 = vadd.f32 %v4859_v60, %v4858_v3 }
 0x327   : > { %v4844_v56 = vrot.slane %v4843_v8, 1  ;;  %v4869_v24 = vadd.f32 %v4868_v2, %v4867_v28  ;;  %v4836_v27 = vadd.f32 %v4835_v59, %v4834_v0 }
 0x328   : > { %v4861_v39 = vrot.slane %v4860_v9, 1 }
 0x329   : > { %v4870_v14 = vrot.slane %v4869_v24, 1  ;;  %v4845_v15 = vadd.f32 %v4844_v56, %v4843_v8 }
 0x32a   : > { %v4862_v5 = vadd.f32 %v4861_v39, %v4860_v9 }
 0x32b   : > { %v4871_v4 = vadd.f32 %v4870_v14, %v4869_v24 }
 0x32c   : > { %v4876_v31 = vsel %vm4875_vm0, %v4862_v5, 0.0 }
 0x32d   : > { %v4878_v32 = vsel %vm4874_vm1, %v4836_v27, %v4876_v31  ;;  %v4877_v35 = vsel %vm4875_vm0, %v4871_v4, 0.0 }
 0x32e   : > { %4880 = vst [vmem:[%s7478_s6] sm:$0xff] %v4878_v32  ;;  %v4879_v57 = vsel %vm4874_vm1, %v4845_v15, %v4877_v35 }
 0x32f   : > { %4881 = vst [vmem:[%s7478_s6 + $0x8] sm:$0xff] %v4879_v57 }
 0x330 PF: > { %4905 = sbr.rel (!%p6865_p12) target bundleno = 822 (0x336), region = 115  ;;  %s6572_s1 = sshll.u32 (%p6865_p12), %s6736_s19, 3  ;;  %v4946_v6 = vld [vmem:[%s7484_s24] sm:$0xff] (%p6865_p12)  ;;  %v4948_v7 = vld [vmem:[%s7484_s24 + $0x8] sm:$0xff] (%p6865_p12)  ;;  %v4950_v23 = vld [vmem:[%s7484_s24 + $0x10] sm:$0xff] (%p6865_p12) }
 0x331   : > { %s4911_s16 = scalar_lea.vmem (%p6865_p12), %s8333_s2, %s6572_s1  ;;  %v4952_v12 = vld [vmem:[%s7484_s24 + $0x18] sm:$0xff] (%p6865_p12) }
 0x332   : > { %4947 = vst [vmem:[%s4911_s16] sm:$0xff] (%p6865_p12), %v4946_v6 }
 0x333   : > { %4949 = vst [vmem:[%s4911_s16 + $0x10] sm:$0xff] (%p6865_p12), %v4948_v7 }
 0x334   : > { %4951 = vst [vmem:[%s4911_s16 + $0x20] sm:$0xff] (%p6865_p12), %v4950_v23 }
 0x335   : > { %4953 = vst [vmem:[%s4911_s16 + $0x30] sm:$0xff] %v4952_v12 }
 0x336 PF: > { %s14_s22 = sadd.s32 1, %s6748_s22   ;;  %s8346_s25 = sld [smem:[#allocation6_spill]] }
 0x337   : > { %p11_p6 = scmp.ge.s32.totalorder %s14_s22, 6   ;;  %s8347_s10 = sld [smem:[#allocation7_spill]] }
 0x338   : > { %s8348_s12 = smov %s6712_s13  ;;  %s8349_s13 = smov %s6863_s9 }
 0x339   : > { %s8350_s14 = smov %s6720_s15  ;;  %s8351_s15 = smov %s6860_s8 }
 0x33a   : > { %s8352_s16 = smov %s6728_s17  ;;  %s8353_s17 = smov %s6846_s30 }
 0x33b   : > { %s8354_s18 = smov %s6740_s20  ;;  %s8355_s19 = smov %s6744_s21 }
 0x33c   : > { %s8356_s20 = smov %s8346_s25  ;;  %13 = sbr.rel (!%p11_p6) target bundleno = 9 (0x9), region = 210 }
 0x33d   : > { %s8357_s21 = smov %s8347_s10 }

// kernel: discriminator_forward.15
= control target key start
LH: loop header
LB: loop body
LE: loop exit
PB: predicated region body
PF: predicated region fallthrough
CT: control target
= control target key end

     0   :  { %s2625_s12 = smov 0   ;;  %s2627_s13 = smov 0   ;;  %s2883_s0 = inlined_call_operand.vmem [shape: bf16[16,8192], index: 0, kind: input, shape index: {}]   ;;  %s2884_s1 = inlined_call_operand.vmem [shape: bf16[8192,128], index: 1, kind: input, shape index: {}]   ;;  %s2885_s2 = inlined_call_operand.vmem [shape: f32[1,128], index: 2, kind: input, shape index: {}]   ;;  %s2886_s3 = inlined_call_operand.vmem [shape: f32[16,128], index: 3, kind: output, shape index: {}]  }
   0x1   :  { %s2629_s14 = smov 0   ;;  %s2631_s15 = smov 0  }
   0x2   :  { %s2633_s16 = smov 0  }
   0x3 LB: > { %s25_s17 = sadd.s32 1, %s2598_s15  ;;  %p48_p1 = scmp.ne.s32.totalorder %s2590_s13, %s2586_s12  ;;  %s2602_s16 = sphi %s2633_s16, %s13_s16   ;;  %s2598_s15 = sphi %s2631_s15, %s2890_s15   ;;  %s2594_s14 = sphi %s2629_s14, %s2889_s14   ;;  %s2590_s13 = sphi %s2627_s13, %s2888_s13   ;;  %s2586_s12 = sphi %s2625_s12, %s2887_s12  }
   0x4   : > { %p26_p0 = scmp.ge.s32.totalorder %s25_s17, 4  ;;  %p49_p2 = scmp.eq.s32.totalorder %s2602_s16, 0 }
   0x5   : > { %s41_s19 = sadd.s32 1, %s2590_s13  ;;  %p1787_p5 = scmp.ge.s32.totalorder %s2602_s16, 4 }
   0x6   : > { %s2892_s17 = smov (%p26_p0, %s25_s17), 0  ;;  %p50_p3 = por %p49_p2, %p48_p1 }
   0x7   : > { %s37_s18 = ssub.s32 %s2598_s15, %s2892_s17  ;;  %162 = sbr.rel (%p1787_p5) target bundleno = 32 (0x20), region = 20 }
   0x8   : > { %p39_p4 = scmp.eq.s32.totalorder %s37_s18, 0 }
   0xa   : > { %s2660_s20 = scalar_select %p39_p4, %s2590_s13, %s41_s19  }
   0xc   : > { %165 = sbr.rel (!%p50_p3) target bundleno = 32 (0x20), region = 24  ;;  %s167_s21 = sand.u32 (%p50_p3), 1, %s2590_s13  }
   0xd   : > { %s2377_s22 = sshll.u32 (%p50_p3), %s2598_s15, 6  ;;  %s1788_s23 = sshll.u32 (%p50_p3), %s167_s21, 7 }
   0xe   : > { %s2668_s26 = scalar_lea.vmem (%p50_p3), %s2883_s0, %s2377_s22  ;;  %s169_s27 = scalar_lea.vmem (%p50_p3), [#allocation3], %s1788_s23 }
   0xf   : > { %v188_v0 = vld [vmem:[%s2668_s26] sm:$0xff] (%p50_p3)  ;;  %v190_v1 = vld [vmem:[%s2668_s26 + $0x8] sm:$0xff] (%p50_p3)  ;;  %v192_v2 = vld [vmem:[%s2668_s26 + $0x10] sm:$0xff] (%p50_p3) }
  0x10   : > { %189 = vst [vmem:[%s169_s27] sm:$0xff] (%p50_p3), %v188_v0  ;;  %v194_v3 = vld [vmem:[%s2668_s26 + $0x18] sm:$0xff] (%p50_p3)  ;;  %v196_v4 = vld [vmem:[%s2668_s26 + $0x20] sm:$0xff] (%p50_p3)  ;;  %v198_v5 = vld [vmem:[%s2668_s26 + $0x28] sm:$0xff] (%p50_p3) }
  0x11   : > { %191 = vst [vmem:[%s169_s27 + $0x8] sm:$0xff] %v190_v1  ;;  %v200_v6 = vld [vmem:[%s2668_s26 + $0x30] sm:$0xff]  ;;  %v202_v7 = vld [vmem:[%s2668_s26 + $0x38] sm:$0xff]  ;;  %v204_v8 = vld [vmem:[%s2668_s26 + $0x100] sm:$0xff] }
  0x12   : > { %193 = vst [vmem:[%s169_s27 + $0x10] sm:$0xff] %v192_v2  ;;  %v206_v9 = vld [vmem:[%s2668_s26 + $0x108] sm:$0xff]  ;;  %v208_v10 = vld [vmem:[%s2668_s26 + $0x110] sm:$0xff]  ;;  %v210_v11 = vld [vmem:[%s2668_s26 + $0x118] sm:$0xff] }
  0x13   : > { %195 = vst [vmem:[%s169_s27 + $0x18] sm:$0xff] %v194_v3  ;;  %v212_v12 = vld [vmem:[%s2668_s26 + $0x120] sm:$0xff]  ;;  %v214_v13 = vld [vmem:[%s2668_s26 + $0x128] sm:$0xff]  ;;  %v216_v14 = vld [vmem:[%s2668_s26 + $0x130] sm:$0xff] }
  0x14   : > { %197 = vst [vmem:[%s169_s27 + $0x20] sm:$0xff] %v196_v4  ;;  %v218_v15 = vld [vmem:[%s2668_s26 + $0x138] sm:$0xff] }
  0x15   : > { %199 = vst [vmem:[%s169_s27 + $0x28] sm:$0xff] %v198_v5 }
  0x16   : > { %201 = vst [vmem:[%s169_s27 + $0x30] sm:$0xff] %v200_v6 }
  0x17   : > { %203 = vst [vmem:[%s169_s27 + $0x38] sm:$0xff] %v202_v7 }
  0x18   : > { %205 = vst [vmem:[%s169_s27 + $0x40] sm:$0xff] %v204_v8 }
  0x19   : > { %207 = vst [vmem:[%s169_s27 + $0x48] sm:$0xff] %v206_v9 }
  0x1a   : > { %209 = vst [vmem:[%s169_s27 + $0x50] sm:$0xff] %v208_v10 }
  0x1b   : > { %211 = vst [vmem:[%s169_s27 + $0x58] sm:$0xff] %v210_v11 }
  0x1c   : > { %213 = vst [vmem:[%s169_s27 + $0x60] sm:$0xff] %v212_v12 }
  0x1d   : > { %215 = vst [vmem:[%s169_s27 + $0x68] sm:$0xff] %v214_v13 }
  0x1e   : > { %217 = vst [vmem:[%s169_s27 + $0x70] sm:$0xff] %v216_v14 }
  0x1f   : > { %219 = vst [vmem:[%s169_s27 + $0x78] sm:$0xff] %v218_v15 }
  0x20 PF: > { %p1791_p6 = scmp.ge.s32.totalorder %s2602_s16, 1  ;;  %p236_p7 = scmp.lt.s32.totalorder %s2602_s16, 5 }
  0x22   : > { %p237_p8 = pnand %p1791_p6, %p236_p7 }
  0x23   : > { %s243_s28 = sand.u32 (!%p237_p8), 1, %s2586_s12   ;;  %s1793_s29 = sshll.u32 (!%p237_p8), %s2594_s14, 8 }
  0x24   : > { %240 = sbr.rel (%p237_p8) target bundleno = 336 (0x150), region = 51  ;;  %s1792_s30 = sshll.u32 (!%p237_p8), %s243_s28, 7 }
  0x25   : > { %p283_p9 = scmp.lt.s32.totalorder (!%p237_p8), %s1793_s29, 1023  ;;  %s2695_s8 = scalar_lea.vmem (!%p237_p8), [#allocation3], %s1792_s30 }
  0x26   : > { %p1795_p10 = scmp.ne.s32.totalorder (!%p237_p8), %s2594_s14, 0 }
  0x29   : > { %s2894_s29 = smov (!%p283_p9, %s1793_s29), 1023  ;;  %306 = sbr.rel (%p1795_p10) target bundleno = 49 (0x31), region = 59 }
  0x2a   : > { %s1794_s4 = sshll.u32 %s2894_s29, 2 }
  0x2b   : > { %s2693_s7 = scalar_lea.vmem %s2884_s1, %s1794_s4 }
  0x2e   : > { %v2604_v16 = vmov 0.0  }
  0x2f   : > { %307 = vst [vmem:[#allocation2] sm:$0xff] %v2604_v16 }
  0x30   : > { %308 = vst [vmem:[#allocation2 + $0x8] sm:$0xff] %v2604_v16 }
  0x31 PF: > { %v2401_v17 = vld [vmem:[%s2693_s7 + $0x38] sm:$0xff]  ;;  %v2400_v21 = vld [vmem:[%s2693_s7 + $0x30] sm:$0xff]  ;;  %v2399_v25 = vld [vmem:[%s2693_s7 + $0x28] sm:$0xff]  ;;  %p2372_p11 = scmp.ne.s32.totalorder %s2594_s14, 3 }
  0x32   : > { %v2409_v18 = vld [vmem:[%s2693_s7 + $0x78] sm:$0xff]  ;;  %1431 = vmatpush.bf16.msra.mxu0 %v2401_v17  ;;  %v2408_v22 = vld [vmem:[%s2693_s7 + $0x70] sm:$0xff]  ;;  %v2407_v26 = vld [vmem:[%s2693_s7 + $0x68] sm:$0xff] }
  0x33   : > { %v2417_v19 = vld [vmem:[%s2693_s7 + $0xb8] sm:$0xff]  ;;  %1445 = vmatpush.bf16.msra.mxu1 %v2409_v18  ;;  %v2416_v23 = vld [vmem:[%s2693_s7 + $0xb0] sm:$0xff]  ;;  %v2415_v27 = vld [vmem:[%s2693_s7 + $0xa8] sm:$0xff] }
  0x34   : > { %v2425_v20 = vld [vmem:[%s2693_s7 + $0xf8] sm:$0xff]  ;;  %1459 = vmatpush.bf16.msra.mxu2 %v2417_v19  ;;  %v2424_v24 = vld [vmem:[%s2693_s7 + $0xf0] sm:$0xff]  ;;  %v2423_v28 = vld [vmem:[%s2693_s7 + $0xe8] sm:$0xff] }
  0x35   : > { %1473 = vmatpush.bf16.msra.mxu3 %v2425_v20  ;;  %v2398_v29 = vld [vmem:[%s2693_s7 + $0x20] sm:$0xff]  ;;  %v2397_v33 = vld [vmem:[%s2693_s7 + $0x18] sm:$0xff]  ;;  %v2396_v37 = vld [vmem:[%s2693_s7 + $0x10] sm:$0xff] }
  0x36   : > { %1432 = vmatpush.bf16.msra.mxu0 %v2400_v21  ;;  %v2406_v30 = vld [vmem:[%s2693_s7 + $0x60] sm:$0xff]  ;;  %v2405_v34 = vld [vmem:[%s2693_s7 + $0x58] sm:$0xff]  ;;  %v2404_v38 = vld [vmem:[%s2693_s7 + $0x50] sm:$0xff] }
  0x37   : > { %1446 = vmatpush.bf16.msra.mxu1 %v2408_v22  ;;  %v2414_v31 = vld [vmem:[%s2693_s7 + $0xa0] sm:$0xff]  ;;  %v2413_v35 = vld [vmem:[%s2693_s7 + $0x98] sm:$0xff]  ;;  %v2412_v39 = vld [vmem:[%s2693_s7 + $0x90] sm:$0xff] }
  0x38   : > { %1460 = vmatpush.bf16.msra.mxu2 %v2416_v23  ;;  %v2422_v32 = vld [vmem:[%s2693_s7 + $0xe0] sm:$0xff]  ;;  %v2421_v36 = vld [vmem:[%s2693_s7 + $0xd8] sm:$0xff]  ;;  %v2420_v40 = vld [vmem:[%s2693_s7 + $0xd0] sm:$0xff] }
  0x39   : > { %1474 = vmatpush.bf16.msra.mxu3 %v2424_v24  ;;  %v2395_v41 = vld [vmem:[%s2693_s7 + $0x8] sm:$0xff]  ;;  %v2394_v45 = vld [vmem:[%s2693_s7] sm:$0xff]  ;;  %v2433_v49 = vld [vmem:[%s2693_s7 + $0x138] sm:$0xff] }
  0x3a   : > { %1433 = vmatpush.bf16.msra.mxu0 %v2399_v25  ;;  %v2403_v42 = vld [vmem:[%s2693_s7 + $0x48] sm:$0xff]  ;;  %v2402_v46 = vld [vmem:[%s2693_s7 + $0x40] sm:$0xff]  ;;  %v2441_v50 = vld [vmem:[%s2693_s7 + $0x178] sm:$0xff] }
  0x3b   : > { %1447 = vmatpush.bf16.msra.mxu1 %v2407_v26  ;;  %v2411_v43 = vld [vmem:[%s2693_s7 + $0x88] sm:$0xff]  ;;  %v2410_v47 = vld [vmem:[%s2693_s7 + $0x80] sm:$0xff]  ;;  %v1798_v51 = vld [vmem:[%s2695_s8] sm:$0xf] }
  0x3c   : > { %1461 = vmatpush.bf16.msra.mxu2 %v2415_v27  ;;  %v2419_v44 = vld [vmem:[%s2693_s7 + $0xc8] sm:$0xff]  ;;  %v2418_v48 = vld [vmem:[%s2693_s7 + $0xc0] sm:$0xff]  ;;  %v2386_v52 = vld [vmem:[%s2695_s8 + $0x3c] sm:$0xf0] }
  0x3d   : > { %1475 = vmatpush.bf16.msra.mxu3 %v2423_v28  ;;  %v1806_v53 = vld [vmem:[%s2695_s8 + $0x8] sm:$0xf]  ;;  %v2378_v55 = vld [vmem:[%s2695_s8 + $0x4] sm:$0xf]  ;;  %v2379_v57 = vld [vmem:[%s2695_s8 + $0xc] sm:$0xf]  ;;  %v1799_v61 = vor.u32 %v2386_v52, %v1798_v51 }
  0x3e   : > { %1434 = vmatpush.bf16.msra.mxu0 %v2398_v29  ;;  %v2387_v54 = vld [vmem:[%s2695_s8 + $0x44] sm:$0xf0]  ;;  %v1800_v56 = vld [vmem:[%s2695_s8 + $0x40] sm:$0xf0]  ;;  %v1808_v58 = vld [vmem:[%s2695_s8 + $0x48] sm:$0xf0] }
  0x3f   : > { %1448 = vmatpush.bf16.msra.mxu1 %v2406_v30  ;;  %v2449_v59 = vld [vmem:[%s2693_s7 + $0x1b8] sm:$0xff]  ;;  %v1807_v62 = vor.u32 %v2387_v54, %v1806_v53  ;;  %v1803_v63 = vor.u32 %v2378_v55, %v1800_v56  ;;  %v1811_v0 = vor.u32 %v2379_v57, %v1808_v58  ;;  %v2432_v1 = vld [vmem:[%s2693_s7 + $0x130] sm:$0xff]  ;;  %v2431_v5 = vld [vmem:[%s2693_s7 + $0x128] sm:$0xff] }
  0x40   : > { %1462 = vmatpush.bf16.msra.mxu2 %v2414_v31  ;;  %v2457_v60 = vld [vmem:[%s2693_s7 + $0x1f8] sm:$0xff]  ;;  %v2440_v2 = vld [vmem:[%s2693_s7 + $0x170] sm:$0xff]  ;;  %v2439_v6 = vld [vmem:[%s2693_s7 + $0x168] sm:$0xff] }
  0x41   : > { %1476 = vmatpush.bf16.msra.mxu3 %v2422_v32  ;;  %v2448_v3 = vld [vmem:[%s2693_s7 + $0x1b0] sm:$0xff]  ;;  %v2447_v7 = vld [vmem:[%s2693_s7 + $0x1a8] sm:$0xff]  ;;  %v2430_v9 = vld [vmem:[%s2693_s7 + $0x120] sm:$0xff] }
  0x42   : > { %1435 = vmatpush.bf16.msra.mxu0 %v2397_v33  ;;  %v2456_v4 = vld [vmem:[%s2693_s7 + $0x1f0] sm:$0xff]  ;;  %v2455_v8 = vld [vmem:[%s2693_s7 + $0x1e8] sm:$0xff]  ;;  %v2438_v10 = vld [vmem:[%s2693_s7 + $0x160] sm:$0xff] }
  0x43   : > { %1449 = vmatpush.bf16.msra.mxu1 %v2405_v34  ;;  %v2446_v11 = vld [vmem:[%s2693_s7 + $0x1a0] sm:$0xff]  ;;  %v2429_v13 = vld [vmem:[%s2693_s7 + $0x118] sm:$0xff]  ;;  %v2428_v17 = vld [vmem:[%s2693_s7 + $0x110] sm:$0xff] }
  0x44   : > { %1463 = vmatpush.bf16.msra.mxu2 %v2413_v35  ;;  %v2454_v12 = vld [vmem:[%s2693_s7 + $0x1e0] sm:$0xff]  ;;  %v2437_v14 = vld [vmem:[%s2693_s7 + $0x158] sm:$0xff]  ;;  %v2436_v18 = vld [vmem:[%s2693_s7 + $0x150] sm:$0xff] }
  0x45   : > { %1477 = vmatpush.bf16.msra.mxu3 %v2421_v36  ;;  %v2445_v15 = vld [vmem:[%s2693_s7 + $0x198] sm:$0xff]  ;;  %v2444_v19 = vld [vmem:[%s2693_s7 + $0x190] sm:$0xff]  ;;  %v2427_v21 = vld [vmem:[%s2693_s7 + $0x108] sm:$0xff] }
  0x46   : > { %1436 = vmatpush.bf16.msra.mxu0 %v2396_v37  ;;  %v2453_v16 = vld [vmem:[%s2693_s7 + $0x1d8] sm:$0xff]  ;;  %v2452_v20 = vld [vmem:[%s2693_s7 + $0x1d0] sm:$0xff]  ;;  %v2435_v22 = vld [vmem:[%s2693_s7 + $0x148] sm:$0xff] }
  0x47   : > { %1450 = vmatpush.bf16.msra.mxu1 %v2404_v38  ;;  %v2443_v23 = vld [vmem:[%s2693_s7 + $0x188] sm:$0xff]  ;;  %v2426_v25 = vld [vmem:[%s2693_s7 + $0x100] sm:$0xff]  ;;  %v2465_v29 = vld [vmem:[%s2693_s7 + $0x238] sm:$0xff] }
  0x48   : > { %1464 = vmatpush.bf16.msra.mxu2 %v2412_v39  ;;  %v2451_v24 = vld [vmem:[%s2693_s7 + $0x1c8] sm:$0xff]  ;;  %v2434_v26 = vld [vmem:[%s2693_s7 + $0x140] sm:$0xff]  ;;  %v2473_v30 = vld [vmem:[%s2693_s7 + $0x278] sm:$0xff] }
  0x49   : > { %1478 = vmatpush.bf16.msra.mxu3 %v2420_v40  ;;  %v2442_v27 = vld [vmem:[%s2693_s7 + $0x180] sm:$0xff]  ;;  %v1822_v33 = vld [vmem:[%s2695_s8 + $0x18] sm:$0xf]  ;;  %v2381_v37 = vld [vmem:[%s2695_s8 + $0x1c] sm:$0xf] }
  0x4a   : > { %1437 = vmatpush.bf16.msra.mxu0 %v2395_v41  ;;  %v2450_v28 = vld [vmem:[%s2693_s7 + $0x1c0] sm:$0xff]  ;;  %v2389_v34 = vld [vmem:[%s2695_s8 + $0x54] sm:$0xf0]  ;;  %v1824_v38 = vld [vmem:[%s2695_s8 + $0x58] sm:$0xf0] }
  0x4b   : > { %1451 = vmatpush.bf16.msra.mxu1 %v2403_v42  ;;  %v1814_v31 = vld [vmem:[%s2695_s8 + $0x10] sm:$0xf]  ;;  %v2380_v35 = vld [vmem:[%s2695_s8 + $0x14] sm:$0xf]  ;;  %v2481_v39 = vld [vmem:[%s2693_s7 + $0x2b8] sm:$0xff]  ;;  %v1823_v42 = vor.u32 %v2389_v34, %v1822_v33 }
  0x4c   : > { %1465 = vmatpush.bf16.msra.mxu2 %v2411_v43  ;;  %v2388_v32 = vld [vmem:[%s2695_s8 + $0x4c] sm:$0xf0]  ;;  %v1816_v36 = vld [vmem:[%s2695_s8 + $0x50] sm:$0xf0]  ;;  %v2489_v40 = vld [vmem:[%s2693_s7 + $0x2f8] sm:$0xff] }
  0x4d   : > { %1479 = vmatpush.bf16.msra.mxu3 %v2419_v44  ;;  %v1815_v41 = vor.u32 %v2388_v32, %v1814_v31  ;;  %v1819_v43 = vor.u32 %v2380_v35, %v1816_v36  ;;  %v1827_v44 = vor.u32 %v2381_v37, %v1824_v38  ;;  %v2479_v51 = vld [vmem:[%s2693_s7 + $0x2a8] sm:$0xff]  ;;  %v2462_v53 = vld [vmem:[%s2693_s7 + $0x220] sm:$0xff]  ;;  %v2461_v57 = vld [vmem:[%s2693_s7 + $0x218] sm:$0xff] }
  0x4e   : > { %1438 = vmatpush.bf16.msra.mxu0 %v2394_v45  ;;  %v2464_v45 = vld [vmem:[%s2693_s7 + $0x230] sm:$0xff]  ;;  %v2487_v52 = vld [vmem:[%s2693_s7 + $0x2e8] sm:$0xff]  ;;  %v2470_v54 = vld [vmem:[%s2693_s7 + $0x260] sm:$0xff] }
  0x4f   : > { %1452 = vmatpush.bf16.msra.mxu1 %v2402_v46  ;;  %v2472_v46 = vld [vmem:[%s2693_s7 + $0x270] sm:$0xff]  ;;  %v2478_v55 = vld [vmem:[%s2693_s7 + $0x2a0] sm:$0xff]  ;;  %v2469_v58 = vld [vmem:[%s2693_s7 + $0x258] sm:$0xff] }
  0x50   : > { %1466 = vmatpush.bf16.msra.mxu2 %v2410_v47  ;;  %v2480_v47 = vld [vmem:[%s2693_s7 + $0x2b0] sm:$0xff]  ;;  %v2486_v56 = vld [vmem:[%s2693_s7 + $0x2e0] sm:$0xff]  ;;  %v2511_v31 = vld [vmem:[%s2693_s7 + $0x3a8] sm:$0xff] }
  0x51   : > { %1480 = vmatpush.bf16.msra.mxu3 %v2418_v48  ;;  %1439 = vmatmul.bf16.vlgmr.msra.gmra.mxu0 %v1799_v61  ;;  %v2488_v48 = vld [vmem:[%s2693_s7 + $0x2f0] sm:$0xff]  ;;  %v2519_v32 = vld [vmem:[%s2693_s7 + $0x3e8] sm:$0xff]  ;;  %v2494_v33 = vld [vmem:[%s2693_s7 + $0x320] sm:$0xff] }
  0x52   : > { %1487 = vmatpush.bf16.msrb.mxu0 %v2433_v49  ;;  %1453 = vmatmul.bf16.vlgmr.msra.gmra.mxu1 %v1803_v63  ;;  %v2463_v49 = vld [vmem:[%s2693_s7 + $0x228] sm:$0xff]  ;;  %v2460_v61 = vld [vmem:[%s2693_s7 + $0x210] sm:$0xff]  ;;  %v2502_v34 = vld [vmem:[%s2693_s7 + $0x360] sm:$0xff] }
  0x53   : > { %1501 = vmatpush.bf16.msrb.mxu1 %v2441_v50  ;;  %1467 = vmatmul.bf16.vlgmr.msra.gmra.mxu2 %v1807_v62  ;;  %v2471_v50 = vld [vmem:[%s2693_s7 + $0x268] sm:$0xff]  ;;  %v2468_v62 = vld [vmem:[%s2693_s7 + $0x250] sm:$0xff]  ;;  %v2510_v35 = vld [vmem:[%s2693_s7 + $0x3a0] sm:$0xff] }
  0x54   : > { %1515 = vmatpush.bf16.msrb.mxu2 %v2449_v59  ;;  %1481 = vmatmul.bf16.vlgmr.msra.gmra.mxu3 %v1811_v0  ;;  %v2477_v59 = vld [vmem:[%s2693_s7 + $0x298] sm:$0xff]  ;;  %v2476_v63 = vld [vmem:[%s2693_s7 + $0x290] sm:$0xff]  ;;  %v2518_v36 = vld [vmem:[%s2693_s7 + $0x3e0] sm:$0xff] }
  0x55   : > { %1529 = vmatpush.bf16.msrb.mxu3 %v2457_v60  ;;  %v2485_v60 = vld [vmem:[%s2693_s7 + $0x2d8] sm:$0xff]  ;;  %v2484_v0 = vld [vmem:[%s2693_s7 + $0x2d0] sm:$0xff] }
  0x56   : > { %1488 = vmatpush.bf16.msrb.mxu0 %v2432_v1  ;;  %v2459_v1 = vld [vmem:[%s2693_s7 + $0x208] sm:$0xff]  ;;  %v2493_v37 = vld [vmem:[%s2693_s7 + $0x318] sm:$0xff] }
  0x57   : > { %1502 = vmatpush.bf16.msrb.mxu1 %v2440_v2  ;;  %v2467_v2 = vld [vmem:[%s2693_s7 + $0x248] sm:$0xff]  ;;  %v2501_v38 = vld [vmem:[%s2693_s7 + $0x358] sm:$0xff] }
  0x58   : > { %1516 = vmatpush.bf16.msrb.mxu2 %v2448_v3  ;;  %v2475_v3 = vld [vmem:[%s2693_s7 + $0x288] sm:$0xff] }
  0x59   : > { %1530 = vmatpush.bf16.msrb.mxu3 %v2456_v4  ;;  %v2483_v4 = vld [vmem:[%s2693_s7 + $0x2c8] sm:$0xff] }
  0x5a   : > { %1489 = vmatpush.bf16.msrb.mxu0 %v2431_v5  ;;  %v2458_v5 = vld [vmem:[%s2693_s7 + $0x200] sm:$0xff] }
  0x5b   : > { %1503 = vmatpush.bf16.msrb.mxu1 %v2439_v6  ;;  %v2466_v6 = vld [vmem:[%s2693_s7 + $0x240] sm:$0xff] }
  0x5c   : > { %1517 = vmatpush.bf16.msrb.mxu2 %v2447_v7  ;;  %v2474_v7 = vld [vmem:[%s2693_s7 + $0x280] sm:$0xff] }
  0x5d   : > { %1531 = vmatpush.bf16.msrb.mxu3 %v2455_v8  ;;  %v2482_v8 = vld [vmem:[%s2693_s7 + $0x2c0] sm:$0xff] }
  0x5e   : > { %1490 = vmatpush.bf16.msrb.mxu0 %v2430_v9  ;;  %v2497_v9 = vld [vmem:[%s2693_s7 + $0x338] sm:$0xff] }
  0x5f   : > { %1504 = vmatpush.bf16.msrb.mxu1 %v2438_v10  ;;  %v2505_v10 = vld [vmem:[%s2693_s7 + $0x378] sm:$0xff] }
  0x60   : > { %1518 = vmatpush.bf16.msrb.mxu2 %v2446_v11  ;;  %v1830_v11 = vld [vmem:[%s2695_s8 + $0x20] sm:$0xf] }
  0x61   : > { %1532 = vmatpush.bf16.msrb.mxu3 %v2454_v12  ;;  %v2390_v12 = vld [vmem:[%s2695_s8 + $0x5c] sm:$0xf0] }
  0x62   : > { %1491 = vmatpush.bf16.msrb.mxu0 %v2429_v13  ;;  %v1838_v13 = vld [vmem:[%s2695_s8 + $0x28] sm:$0xf] }
  0x63   : > { %1505 = vmatpush.bf16.msrb.mxu1 %v2437_v14  ;;  %v2391_v14 = vld [vmem:[%s2695_s8 + $0x64] sm:$0xf0] }
  0x64   : > { %1519 = vmatpush.bf16.msrb.mxu2 %v2445_v15  ;;  %v2382_v15 = vld [vmem:[%s2695_s8 + $0x24] sm:$0xf] }
  0x65   : > { %1533 = vmatpush.bf16.msrb.mxu3 %v2453_v16  ;;  %v1832_v16 = vld [vmem:[%s2695_s8 + $0x60] sm:$0xf0] }
  0x66   : > { %1492 = vmatpush.bf16.msrb.mxu0 %v2428_v17  ;;  %v2383_v17 = vld [vmem:[%s2695_s8 + $0x2c] sm:$0xf] }
  0x67   : > { %1506 = vmatpush.bf16.msrb.mxu1 %v2436_v18  ;;  %v1840_v18 = vld [vmem:[%s2695_s8 + $0x68] sm:$0xf0] }
  0x68   : > { %1520 = vmatpush.bf16.msrb.mxu2 %v2444_v19  ;;  %v2513_v19 = vld [vmem:[%s2693_s7 + $0x3b8] sm:$0xff] }
  0x69   : > { %1534 = vmatpush.bf16.msrb.mxu3 %v2452_v20  ;;  %v2521_v20 = vld [vmem:[%s2693_s7 + $0x3f8] sm:$0xff] }
  0x6a   : > { %1493 = vmatpush.bf16.msrb.mxu0 %v2427_v21  ;;  %v1831_v21 = vor.u32 %v2390_v12, %v1830_v11 }
  0x6b   : > { %1507 = vmatpush.bf16.msrb.mxu1 %v2435_v22  ;;  %v1839_v22 = vor.u32 %v2391_v14, %v1838_v13 }
  0x6c   : > { %1521 = vmatpush.bf16.msrb.mxu2 %v2443_v23  ;;  %v1835_v23 = vor.u32 %v2382_v15, %v1832_v16 }
  0x6d   : > { %1535 = vmatpush.bf16.msrb.mxu3 %v2451_v24  ;;  %v1843_v24 = vor.u32 %v2383_v17, %v1840_v18 }
  0x6e   : > { %1494 = vmatpush.bf16.msrb.mxu0 %v2426_v25  ;;  %v2496_v25 = vld [vmem:[%s2693_s7 + $0x330] sm:$0xff] }
  0x6f   : > { %1508 = vmatpush.bf16.msrb.mxu1 %v2434_v26  ;;  %v2504_v26 = vld [vmem:[%s2693_s7 + $0x370] sm:$0xff] }
  0x70   : > { %1522 = vmatpush.bf16.msrb.mxu2 %v2442_v27  ;;  %v2512_v27 = vld [vmem:[%s2693_s7 + $0x3b0] sm:$0xff] }
  0x71   : > { %1536 = vmatpush.bf16.msrb.mxu3 %v2450_v28  ;;  %1495 = vmatmul.bf16.vlgmr.msrb.gmra.mxu0 %v1815_v41  ;;  %v2520_v28 = vld [vmem:[%s2693_s7 + $0x3f0] sm:$0xff] }
  0x72   : > { %1543 = vmatpush.bf16.msra.mxu0 %v2465_v29  ;;  %1509 = vmatmul.bf16.vlgmr.msrb.gmra.mxu1 %v1819_v43  ;;  %v2495_v29 = vld [vmem:[%s2693_s7 + $0x328] sm:$0xff]  ;;  %v2492_v41 = vld [vmem:[%s2693_s7 + $0x310] sm:$0xff] }
  0x73   : > { %1557 = vmatpush.bf16.msra.mxu1 %v2473_v30  ;;  %1523 = vmatmul.bf16.vlgmr.msrb.gmra.mxu2 %v1823_v42  ;;  %v2503_v30 = vld [vmem:[%s2693_s7 + $0x368] sm:$0xff]  ;;  %v2500_v42 = vld [vmem:[%s2693_s7 + $0x350] sm:$0xff] }
  0x74   : > { %1571 = vmatpush.bf16.msra.mxu2 %v2481_v39  ;;  %1537 = vmatmul.bf16.vlgmr.msrb.gmra.mxu3 %v1827_v44  ;;  %v2509_v39 = vld [vmem:[%s2693_s7 + $0x398] sm:$0xff]  ;;  %v2508_v43 = vld [vmem:[%s2693_s7 + $0x390] sm:$0xff] }
  0x75   : > { %1585 = vmatpush.bf16.msra.mxu3 %v2489_v40  ;;  %v2517_v40 = vld [vmem:[%s2693_s7 + $0x3d8] sm:$0xff]  ;;  %v2516_v44 = vld [vmem:[%s2693_s7 + $0x3d0] sm:$0xff] }
  0x76   : > { %1544 = vmatpush.bf16.msra.mxu0 %v2464_v45  ;;  %v2491_v45 = vld [vmem:[%s2693_s7 + $0x308] sm:$0xff] }
  0x77   : > { %1558 = vmatpush.bf16.msra.mxu1 %v2472_v46  ;;  %v2499_v46 = vld [vmem:[%s2693_s7 + $0x348] sm:$0xff] }
  0x78   : > { %1572 = vmatpush.bf16.msra.mxu2 %v2480_v47  ;;  %v2507_v47 = vld [vmem:[%s2693_s7 + $0x388] sm:$0xff] }
  0x79   : > { %1586 = vmatpush.bf16.msra.mxu3 %v2488_v48  ;;  %v2515_v48 = vld [vmem:[%s2693_s7 + $0x3c8] sm:$0xff] }
  0x7a   : > { %1545 = vmatpush.bf16.msra.mxu0 %v2463_v49  ;;  %v2490_v49 = vld [vmem:[%s2693_s7 + $0x300] sm:$0xff] }
  0x7b   : > { %1559 = vmatpush.bf16.msra.mxu1 %v2471_v50  ;;  %v2498_v50 = vld [vmem:[%s2693_s7 + $0x340] sm:$0xff] }
  0x7c   : > { %1573 = vmatpush.bf16.msra.mxu2 %v2479_v51  ;;  %v2506_v51 = vld [vmem:[%s2693_s7 + $0x380] sm:$0xff] }
  0x7d   : > { %1587 = vmatpush.bf16.msra.mxu3 %v2487_v52  ;;  %v2514_v52 = vld [vmem:[%s2693_s7 + $0x3c0] sm:$0xff] }
  0x7e   : > { %1546 = vmatpush.bf16.msra.mxu0 %v2462_v53  ;;  %v1846_v53 = vld [vmem:[%s2695_s8 + $0x30] sm:$0xf] }
  0x7f   : > { %1560 = vmatpush.bf16.msra.mxu1 %v2470_v54  ;;  %v2392_v54 = vld [vmem:[%s2695_s8 + $0x6c] sm:$0xf0] }
  0x80   : > { %1574 = vmatpush.bf16.msra.mxu2 %v2478_v55  ;;  %v2384_v55 = vld [vmem:[%s2695_s8 + $0x34] sm:$0xf] }
  0x81   : > { %1588 = vmatpush.bf16.msra.mxu3 %v2486_v56  ;;  %v1848_v56 = vld [vmem:[%s2695_s8 + $0x70] sm:$0xf0] }
  0x82   : > { %1547 = vmatpush.bf16.msra.mxu0 %v2461_v57  ;;  %v1854_v57 = vld [vmem:[%s2695_s8 + $0x38] sm:$0xf] }
  0x83   : > { %1561 = vmatpush.bf16.msra.mxu1 %v2469_v58  ;;  %v2393_v58 = vld [vmem:[%s2695_s8 + $0x74] sm:$0xf0] }
  0x84   : > { %1575 = vmatpush.bf16.msra.mxu2 %v2477_v59  ;;  %v2385_v59 = vld [vmem:[%s2695_s8 + $0x3c] sm:$0xf] }
  0x85   : > { %1589 = vmatpush.bf16.msra.mxu3 %v2485_v60  ;;  %v1856_v60 = vld [vmem:[%s2695_s8 + $0x78] sm:$0xf0] }
  0x86   : > { %1548 = vmatpush.bf16.msra.mxu0 %v2460_v61  ;;  %v1847_v61 = vor.u32 %v2392_v54, %v1846_v53 }
  0x87   : > { %1562 = vmatpush.bf16.msra.mxu1 %v2468_v62  ;;  %v1851_v62 = vor.u32 %v2384_v55, %v1848_v56  ;;  %v309_v55 = vld [vmem:[#allocation2] sm:$0xff] }
  0x88   : > { %1576 = vmatpush.bf16.msra.mxu2 %v2476_v63  ;;  %v1855_v63 = vor.u32 %v2393_v58, %v1854_v57 }
  0x89   : > { %1590 = vmatpush.bf16.msra.mxu3 %v2484_v0  ;;  %v1859_v0 = vor.u32 %v2385_v59, %v1856_v60 }
  0x8a   : > { %1549 = vmatpush.bf16.msra.mxu0 %v2459_v1 }
  0x8b   : > { %1563 = vmatpush.bf16.msra.mxu1 %v2467_v2 }
  0x8c   : > { %1577 = vmatpush.bf16.msra.mxu2 %v2475_v3 }
  0x8d   : > { %1591 = vmatpush.bf16.msra.mxu3 %v2483_v4 }
  0x8e   : > { %1550 = vmatpush.bf16.msra.mxu0 %v2458_v5 }
  0x8f   : > { %1564 = vmatpush.bf16.msra.mxu1 %v2466_v6 }
  0x90   : > { %1578 = vmatpush.bf16.msra.mxu2 %v2474_v7 }
  0x91   : > { %1592 = vmatpush.bf16.msra.mxu3 %v2482_v8  ;;  %1551 = vmatmul.bf16.vlgmr.msra.gmra.mxu0 %v1831_v21 }
  0x92   : > { %1599 = vmatpush.bf16.msrb.mxu0 %v2497_v9  ;;  %1565 = vmatmul.bf16.vlgmr.msra.gmra.mxu1 %v1835_v23 }
  0x93   : > { %1613 = vmatpush.bf16.msrb.mxu1 %v2505_v10  ;;  %1579 = vmatmul.bf16.vlgmr.msra.gmra.mxu2 %v1839_v22 }
  0x94   : > { %1627 = vmatpush.bf16.msrb.mxu2 %v2513_v19  ;;  %1593 = vmatmul.bf16.vlgmr.msra.gmra.mxu3 %v1843_v24 }
  0x95   : > { %1641 = vmatpush.bf16.msrb.mxu3 %v2521_v20 }
  0x96   : > { %1600 = vmatpush.bf16.msrb.mxu0 %v2496_v25 }
  0x97   : > { %1614 = vmatpush.bf16.msrb.mxu1 %v2504_v26 }
  0x98   : > { %1628 = vmatpush.bf16.msrb.mxu2 %v2512_v27 }
  0x99   : > { %1642 = vmatpush.bf16.msrb.mxu3 %v2520_v28 }
  0x9a   : > { %1601 = vmatpush.bf16.msrb.mxu0 %v2495_v29 }
  0x9b   : > { %1615 = vmatpush.bf16.msrb.mxu1 %v2503_v30 }
  0x9c   : > { %1629 = vmatpush.bf16.msrb.mxu2 %v2511_v31 }
  0x9d   : > { %1643 = vmatpush.bf16.msrb.mxu3 %v2519_v32 }
  0x9e   : > { %1602 = vmatpush.bf16.msrb.mxu0 %v2494_v33 }
  0x9f   : > { %1616 = vmatpush.bf16.msrb.mxu1 %v2502_v34 }
  0xa0   : > { %1630 = vmatpush.bf16.msrb.mxu2 %v2510_v35 }
  0xa1   : > { %1644 = vmatpush.bf16.msrb.mxu3 %v2518_v36 }
  0xa2   : > { %1603 = vmatpush.bf16.msrb.mxu0 %v2493_v37 }
  0xa3   : > { %1617 = vmatpush.bf16.msrb.mxu1 %v2501_v38 }
  0xa4   : > { %1631 = vmatpush.bf16.msrb.mxu2 %v2509_v39 }
  0xa5   : > { %1645 = vmatpush.bf16.msrb.mxu3 %v2517_v40 }
  0xa6   : > { %1604 = vmatpush.bf16.msrb.mxu0 %v2492_v41 }
  0xa7   : > { %1618 = vmatpush.bf16.msrb.mxu1 %v2500_v42 }
  0xa8   : > { %1632 = vmatpush.bf16.msrb.mxu2 %v2508_v43 }
  0xa9   : > { %1646 = vmatpush.bf16.msrb.mxu3 %v2516_v44 }
  0xaa   : > { %1605 = vmatpush.bf16.msrb.mxu0 %v2491_v45 }
  0xab   : > { %1619 = vmatpush.bf16.msrb.mxu1 %v2499_v46 }
  0xac   : > { %1633 = vmatpush.bf16.msrb.mxu2 %v2507_v47 }
  0xad   : > { %1647 = vmatpush.bf16.msrb.mxu3 %v2515_v48 }
  0xae   : > { %1606 = vmatpush.bf16.msrb.mxu0 %v2490_v49 }
  0xaf   : > { %1620 = vmatpush.bf16.msrb.mxu1 %v2498_v50 }
  0xb0   : > { %1634 = vmatpush.bf16.msrb.mxu2 %v2506_v51 }
  0xb1   : > { %1648 = vmatpush.bf16.msrb.mxu3 %v2514_v52  ;;  %1607 = vmatmul.bf16.vlgmr.msrb.gmra.mxu0 %v1847_v61 }
  0xb2   : > { %1621 = vmatmul.bf16.vlgmr.msrb.gmra.mxu1 %v1851_v62 }
  0xb3   : > { %1635 = vmatmul.bf16.vlgmr.msrb.gmra.mxu2 %v1855_v63  ;;  %v310_v63 = vld [vmem:[#allocation2 + $0x8] sm:$0xff] }
  0xb4   : > { %1649 = vmatmul.bf16.vlgmr.msrb.gmra.mxu3 %v1859_v0 }
  0xce   : > { %v1440_v1 = vpop.f32.mrf.mxu0 }
  0xcf   : > { %v1454_v2 = vpop.f32.mrf.mxu1 }
  0xd0   : > { %v1455_v9 = vadd.f32 %v1454_v2, %v1440_v1 }
  0xd6   : > { %v1468_v3 = vpop.f32.mrf.mxu2  ;;  %v1442_v5 = vpop.f32.mrf.mxu0 }
  0xd7   : > { %v1482_v4 = vpop.f32.mrf.mxu3  ;;  %v1456_v6 = vpop.f32.mrf.mxu1  ;;  %v1469_v12 = vadd.f32 %v1468_v3, %v1455_v9 }
  0xd8   : > { %v1457_v17 = vadd.f32 %v1456_v6, %v1442_v5 }
  0xd9   : > { %v1483_v15 = vadd.f32 %v1482_v4, %v1469_v12 }
  0xde   : > { %v1470_v7 = vpop.f32.mrf.mxu2 }
  0xdf   : > { %v1484_v8 = vpop.f32.mrf.mxu3  ;;  %v1471_v20 = vadd.f32 %v1470_v7, %v1457_v17 }
  0xe1   : > { %v1485_v25 = vadd.f32 %v1484_v8, %v1471_v20 }
  0xee   : > { %v1496_v10 = vpop.f32.mrf.mxu0 }
  0xef   : > { %v1510_v11 = vpop.f32.mrf.mxu1  ;;  %v1497_v18 = vadd.f32 %v1496_v10, %v1483_v15 }
  0xf1   : > { %v1511_v21 = vadd.f32 %v1510_v11, %v1497_v18 }
  0xf6   : > { %v1524_v13 = vpop.f32.mrf.mxu2  ;;  %v1498_v16 = vpop.f32.mrf.mxu0 }
  0xf7   : > { %v1538_v14 = vpop.f32.mrf.mxu3  ;;  %v1512_v19 = vpop.f32.mrf.mxu1  ;;  %v1525_v26 = vadd.f32 %v1524_v13, %v1511_v21  ;;  %v1499_v28 = vadd.f32 %v1498_v16, %v1485_v25 }
  0xf9   : > { %v1539_v29 = vadd.f32 %v1538_v14, %v1525_v26  ;;  %v1513_v32 = vadd.f32 %v1512_v19, %v1499_v28 }
  0xfe   : > { %v1526_v22 = vpop.f32.mrf.mxu2 }
  0xff   : > { %v1540_v23 = vpop.f32.mrf.mxu3  ;;  %v1527_v34 = vadd.f32 %v1526_v22, %v1513_v32 }
 0x101   : > { %v1541_v38 = vadd.f32 %v1540_v23, %v1527_v34 }
 0x10e   : > { %v1552_v24 = vpop.f32.mrf.mxu0 }
 0x10f   : > { %v1566_v27 = vpop.f32.mrf.mxu1  ;;  %v1553_v33 = vadd.f32 %v1552_v24, %v1539_v29 }
 0x111   : > { %v1567_v36 = vadd.f32 %v1566_v27, %v1553_v33 }
 0x116   : > { %v1580_v30 = vpop.f32.mrf.mxu2  ;;  %v1554_v35 = vpop.f32.mrf.mxu0 }
 0x117   : > { %v1594_v31 = vpop.f32.mrf.mxu3  ;;  %v1568_v37 = vpop.f32.mrf.mxu1  ;;  %v1581_v39 = vadd.f32 %v1580_v30, %v1567_v36  ;;  %v1555_v40 = vadd.f32 %v1554_v35, %v1541_v38 }
 0x119   : > { %v1595_v43 = vadd.f32 %v1594_v31, %v1581_v39  ;;  %v1569_v45 = vadd.f32 %v1568_v37, %v1555_v40 }
 0x11e   : > { %v1582_v41 = vpop.f32.mrf.mxu2 }
 0x11f   : > { %v1596_v42 = vpop.f32.mrf.mxu3  ;;  %v1583_v48 = vadd.f32 %v1582_v41, %v1569_v45 }
 0x121   : > { %v1597_v52 = vadd.f32 %v1596_v42, %v1583_v48 }
 0x12e   : > { %v1608_v44 = vpop.f32.mrf.mxu0 }
 0x12f   : > { %v1609_v46 = vadd.f32 %v1608_v44, %v1595_v43  ;;  %v1622_v47 = vpop.f32.mrf.mxu1 }
 0x131   : > { %v1623_v49 = vadd.f32 %v1622_v47, %v1609_v46 }
 0x136   : > { %v1636_v50 = vpop.f32.mrf.mxu2  ;;  %v1610_v54 = vpop.f32.mrf.mxu0 }
 0x137   : > { %v1650_v51 = vpop.f32.mrf.mxu3  ;;  %v1637_v53 = vadd.f32 %v1636_v50, %v1623_v49  ;;  %v1611_v57 = vadd.f32 %v1610_v54, %v1597_v52  ;;  %v1624_v59 = vpop.f32.mrf.mxu1 }
 0x139   : > { %v1651_v56 = vadd.f32 %v1650_v51, %v1637_v53  ;;  %v1625_v60 = vadd.f32 %v1624_v59, %v1611_v57 }
 0x13b   : > { %v1655_v58 = vadd.f32 %v1651_v56, %v309_v55 }
 0x13d   : > { %1657 = vst [vmem:[#allocation2] sm:$0xff] %v1655_v58 }
 0x13e   : > { %v1638_v61 = vpop.f32.mrf.mxu2 }
 0x13f   : > { %v1639_v62 = vadd.f32 %v1638_v61, %v1625_v60  ;;  %v1652_v0 = vpop.f32.mrf.mxu3 }
 0x141   : > { %v1653_v1 = vadd.f32 %v1652_v0, %v1639_v62  ;;  %1662 = sbr.rel (%p2372_p11) target bundleno = 336 (0x150), region = 63 }
 0x143   : > { %v1656_v2 = vadd.f32 %v1653_v1, %v310_v63 }
 0x145   : > { %1658 = vst [vmem:[#allocation2 + $0x8] sm:$0xff] %v1656_v2 }
 0x146   : > { %v1663_v3 = vld [vmem:[#allocation2] sm:$0xff] }
 0x147   : > { %v2563_v4 = vld [vmem:[%s2885_s2] ss:$0 sm:$0xff] }
 0x148   : > { %v1669_v6 = vadd.f32 %v2563_v4, %v1663_v3 }
 0x14a   : > { %1671 = vst [vmem:[%s2886_s3] sm:$0xff] %v1669_v6 }
 0x14c   : > { %v1664_v5 = vld [vmem:[#allocation2 + $0x8] sm:$0xff] }
 0x14d   : > { %v1670_v7 = vadd.f32 %v2563_v4, %v1664_v5 }
 0x14f   : > { %1672 = vst [vmem:[%s2886_s3 + $0x8] sm:$0xff] %v1670_v7 }
 0x150 PF: > { %s13_s16 = sadd.s32 1, %s2602_s16   ;;  %s2887_s12 = smov %s2590_s13 }
 0x151   : > { %p10_p12 = scmp.ge.s32.totalorder %s13_s16, 6   ;;  %s2888_s13 = smov %s2660_s20 }
 0x152   : > { %s2889_s14 = smov %s2598_s15  ;;  %s2890_s15 = smov %s2892_s17 }
 0x153   :  { %12 = sbr.rel (!%p10_p12) target bundleno = 3 (0x3), region = 104 }

</bundles_post_ra>
